<compile_context>
chip_gen: v7x
topology: tpu7x:2x2x1
jax: 0.10.0
libtpu: 0.0.40
codegen_flags: <defaults>
</compile_context>

<pallas_src>
import functools

import jax
import jax.numpy as jnp
from jax.experimental import pallas as pl
from jax.experimental.pallas import tpu as pltpu


# ----------------------------------------------------------------------------
# Weight packing: PyTorch layout -> fused-kernel layout
# ----------------------------------------------------------------------------
def _reorder_gates(w):
    """w: (rows, 4H) in PyTorch gate order [i, f, g, o] -> [i, f, o, g]."""
    H = w.shape[1] // 4
    i, f, g, o = (w[:, 0:H], w[:, H:2 * H], w[:, 2 * H:3 * H], w[:, 3 * H:4 * H])
    return jnp.concatenate([i, f, o, g], axis=1)


def _pack_bidir_layer(fwd, bwd, H):
    """Pack one bidirectional LSTM layer (PyTorch-layout params) for the kernel.

    fwd/bwd: dicts with w_ih (4H, D), w_hh (4H, H), b_ih (4H,), b_hh (4H,).
    Returns:
      w_ih (D, 8H)  bf16  cols 0:4H fwd gates, 4H:8H bwd gates (each [i,f,o,g])
      w_hh (2H, 4H) bf16  rows 0:H map h_fwd -> gates, rows H:2H map h_bwd -> gates
      b    (1, 8H)  f32   b_ih + b_hh per direction
    """
    wih = jnp.concatenate([_reorder_gates(fwd["w_ih"].T),
                           _reorder_gates(bwd["w_ih"].T)], axis=1)
    whh = jnp.concatenate([_reorder_gates(fwd["w_hh"].T),
                           _reorder_gates(bwd["w_hh"].T)], axis=0)      # (2H, 4H)
    b_f = _reorder_gates((fwd["b_ih"] + fwd["b_hh"]).reshape(1, 4 * H))
    b_b = _reorder_gates((bwd["b_ih"] + bwd["b_hh"]).reshape(1, 4 * H))
    b = jnp.concatenate([b_f, b_b], axis=1)                             # (1, 8H)
    return (wih.astype(jnp.bfloat16), whh.astype(jnp.bfloat16),
            b.astype(jnp.float32))


# ----------------------------------------------------------------------------
# Fused kernel: 2 bidirectional LSTM layers + attention + FC head
# ----------------------------------------------------------------------------
def _fused_lstm_kernel(T, B, H,
                       x_ref, wih0_ref, whh0_ref, b0_ref,
                       wih1_hbm, whh1_hbm, b1_ref,
                       attw_ref, fc1w_ref, fc1b_ref, fc2w_ref, fc2b_ref,
                       out_ref,
                       gin_scr, seq0_scr, seq1_scr,
                       wih1_vmem, whh1_vmem, dma_sem):
    f32, bf16 = jnp.float32, jnp.bfloat16
    H2, H3, H4, H8 = 2 * H, 3 * H, 4 * H, 8 * H
    R = 8                                     # sublane-padded rows per timestep

    # Kick off layer-1 weight DMA immediately; hidden behind layer-0 compute.
    cp_wih1 = pltpu.make_async_copy(wih1_hbm, wih1_vmem, dma_sem.at[0])
    cp_whh1 = pltpu.make_async_copy(whh1_hbm, whh1_vmem, dma_sem.at[1])
    cp_wih1.start()
    cp_whh1.start()

    # Hoisted row masks: rows 0:4 of every 8-row block are forward-direction
    # slots, rows 4:8 are backward-direction slots (batch in rows 0:B / 4:4+B;
    # the rest are pad rows that carry finite garbage only).
    is_fwd_4h = jax.lax.broadcasted_iota(jnp.int32, (R, H4), 0) < 4
    is_fwd_h = jax.lax.broadcasted_iota(jnp.int32, (R, H), 0) < 4
    zeros_h = jnp.zeros((R, H), f32)

    def run_layer(x_bf16, wih, whh, bias, out_scr):
        # Hoisted input projection for all timesteps and both directions:
        # (T*8, D) @ (D, 8H) + (1, 8H).  Cols 0:4H fwd gates, 4H:8H bwd gates.
        gin_scr[...] = (jnp.dot(x_bf16, wih, preferred_element_type=f32) + bias)
        h_wide = jnp.zeros((R, H2), bf16)     # rows 0:4: [h_fwd|0], rows 4:8: [0|h_bwd]
        c = jnp.zeros((R, H), f32)            # fwd cell rows 0:4, bwd cell rows 4:8
        for s in range(T):                    # static unroll (T is small)
            # One recurrent matmul per step feeds both directions (K=2H).
            rec = jnp.dot(h_wide, whh, preferred_element_type=f32)         # (8, 4H)
            blk_f = gin_scr[s * R:(s + 1) * R, 0:H4]
            blk_b = gin_scr[(T - 1 - s) * R:(T - s) * R, H4:H8]
            g = jnp.where(is_fwd_4h, blk_f,
                          pltpu.roll(blk_b, shift=4, axis=0)) + rec
            # gate column order per direction: [i, f, o, g]
            s3 = jax.nn.sigmoid(g[:, 0:H3])                                 # i, f, o
            gg = jnp.tanh(g[:, H3:H4])                                      # g
            c = s3[:, H:H2] * c + s3[:, 0:H] * gg
            h_new = s3[:, H2:H3] * jnp.tanh(c)                              # (8, H)
            # forward rows belong to time s, backward rows to time T-1-s.
            out_scr[s * R:(s + 1) * R, 0:H] = h_new
            out_scr[(T - 1 - s) * R:(T - s) * R, H:H2] = pltpu.roll(
                h_new, shift=4, axis=0)
            # Rebuild the block-diagonal wide state for the next recurrent dot.
            h_wide = jnp.concatenate(
                [jnp.where(is_fwd_h, h_new, zeros_h),
                 jnp.where(is_fwd_h, zeros_h, h_new)], axis=1).astype(bf16)

    run_layer(x_ref[...], wih0_ref[...], whh0_ref[...], b0_ref[...], seq0_scr)
    cp_wih1.wait()
    cp_whh1.wait()
    run_layer(seq0_scr[...].astype(bf16), wih1_vmem[...], whh1_vmem[...],
              b1_ref[...], seq1_scr)

    # ---- attention over time + FC head (vectorized, all in VMEM) -----------
    feat = seq1_scr[...]                                                    # (T*8, 2H)
    scores = jnp.dot(feat, attw_ref[...], preferred_element_type=f32)       # (T*8, 1)
    slot = jax.lax.broadcasted_iota(jnp.int32, (T * R, 1), 0) % R
    valid = slot < B
    # A single global max is constant within every batch group -> exact softmax.
    m = jnp.max(jnp.where(valid, scores, jnp.full_like(scores, -1e30)),
                axis=0, keepdims=True)                                      # (1, 1)
    e = jnp.where(valid, jnp.exp(scores - m), 0.0)                          # (T*8, 1)
    # Per-batch pooling via a selection matrix: sel[p, r] = 1 iff r % 8 == p.
    sel = jnp.where(
        jax.lax.broadcasted_iota(jnp.int32, (R, T * R), 1) % R
        == jax.lax.broadcasted_iota(jnp.int32, (R, T * R), 0), 1.0, 0.0)
    num = jnp.dot(sel, feat * e, preferred_element_type=f32)                # (8, 2H)
    den = jnp.dot(sel, e, preferred_element_type=f32)                       # (8, 1)
    pooled = num / jnp.maximum(den, 1e-30)                                  # (8, 2H)
    h1 = (jnp.dot(pooled, fc1w_ref[...], preferred_element_type=f32)
          + fc1b_ref[...])
    h1 = jnp.where(h1 >= 0, h1, 0.01 * h1)                                  # LeakyReLU(0.01)
    out_ref[...] = (jnp.dot(h1, fc2w_ref[...], preferred_element_type=f32)
                    + fc2b_ref[...])


def _full_spec(shape):
    nd = len(shape)
    return pl.BlockSpec(tuple(shape), lambda i, _nd=nd: (0,) * _nd)


# ----------------------------------------------------------------------------
# Parameter init (PyTorch-equivalent layout, packed for the kernel)
# ----------------------------------------------------------------------------
def init_params(key, vocab_size=21, embedding_dim=32, hidden_size=128,
                num_layers=2, bilstm=True, n_cls=2):
    assert bilstm and num_layers == 2, "kernel is specialized for the module defaults"
    H = hidden_size
    num_dirs = 2
    keys = iter(jax.random.split(key, 64))
    u = lambda k, shape, s: jax.random.uniform(k, shape, jnp.float32, -s, s)

    params = {}
    params["embedding"] = jax.random.normal(
        next(keys), (vocab_size, embedding_dim), jnp.float32)

    scale = hidden_size ** -0.5
    lstm_layers = []
    for layer in range(num_layers):
        in_dim = embedding_dim if layer == 0 else H * num_dirs
        dirs = []
        for _ in range(num_dirs):
            dirs.append(dict(
                w_ih=u(next(keys), (4 * H, in_dim), scale),   # PyTorch layout
                w_hh=u(next(keys), (4 * H, H), scale),
                b_ih=u(next(keys), (4 * H,), scale),
                b_hh=u(next(keys), (4 * H,), scale)))
        w_ih, w_hh, b = _pack_bidir_layer(dirs[0], dirs[1], H)
        lstm_layers.append(dict(w_ih=w_ih, w_hh=w_hh, b=b))
    params["lstm"] = lstm_layers

    feat_dim = H * num_dirs
    params["att_w"] = u(next(keys), (feat_dim, 1), 0.1)
    fc1_s = feat_dim ** -0.5
    params["fc1_w"] = u(next(keys), (feat_dim, H), fc1_s)
    params["fc1_b"] = u(next(keys), (1, H), fc1_s)
    fc2_s = H ** -0.5
    params["fc2_w"] = u(next(keys), (H, n_cls), fc2_s)
    params["fc2_b"] = u(next(keys), (1, n_cls), fc2_s)
    return params


# ----------------------------------------------------------------------------
# Full model forward
# ----------------------------------------------------------------------------
@jax.jit
def lstm_model_forward(params, tokens):
    B, T = tokens.shape
    assert B <= 4, "direction-stacked layout packs fwd/bwd batches into one 8-row block"
    E = params["embedding"].shape[1]
    H = params["fc1_w"].shape[1]
    NC = params["fc2_w"].shape[1]
    R = 8

    # Embedding lookup (glue, data-dependent gather) stays in the wrapper.
    emb = jnp.take(params["embedding"], tokens, axis=0)                 # (B, T, E)
    # time-major, sublane-padded rows: row r = t*8 + b  (b < B valid, rest pad)
    x = jnp.pad(jnp.transpose(emb, (1, 0, 2)), ((0, 0), (0, R - B), (0, 0)))
    x = x.reshape(T * R, E).astype(jnp.bfloat16)

    l0, l1 = params["lstm"]
    kernel = functools.partial(_fused_lstm_kernel, T, B, H)

    in_specs = [
        _full_spec((T * R, E)),
        _full_spec(l0["w_ih"].shape), _full_spec(l0["w_hh"].shape), _full_spec(l0["b"].shape),
        pl.BlockSpec(memory_space=pl.ANY),     # layer-1 W_ih stays in HBM (manual DMA)
        pl.BlockSpec(memory_space=pl.ANY),     # layer-1 W_hh stays in HBM (manual DMA)
        _full_spec(l1["b"].shape),
        _full_spec(params["att_w"].shape),
        _full_spec(params["fc1_w"].shape), _full_spec(params["fc1_b"].shape),
        _full_spec(params["fc2_w"].shape), _full_spec(params["fc2_b"].shape),
    ]

    out = pl.pallas_call(
        kernel,
        out_shape=jax.ShapeDtypeStruct((R, NC), jnp.float32),
        grid_spec=pltpu.PrefetchScalarGridSpec(
            num_scalar_prefetch=0,
            grid=(1,),
            in_specs=in_specs,
            out_specs=_full_spec((R, NC)),
            scratch_shapes=[
                pltpu.VMEM((T * R, 8 * H), jnp.float32),     # hoisted gate pre-activations
                pltpu.VMEM((T * R, 2 * H), jnp.float32),     # layer-0 sequence output [fwd|bwd]
                pltpu.VMEM((T * R, 2 * H), jnp.float32),     # layer-1 sequence output [fwd|bwd]
                pltpu.VMEM(l1["w_ih"].shape, jnp.bfloat16),  # layer-1 W_ih landing buffer
                pltpu.VMEM(l1["w_hh"].shape, jnp.bfloat16),  # layer-1 W_hh landing buffer
                pltpu.SemaphoreType.DMA((2,)),
            ]),
        compiler_params=pltpu.CompilerParams(
            dimension_semantics=("arbitrary",)),
    )(x,
      l0["w_ih"], l0["w_hh"], l0["b"],
      l1["w_ih"], l1["w_hh"], l1["b"],
      params["att_w"], params["fc1_w"], params["fc1_b"],
      params["fc2_w"], params["fc2_b"])
    return out[:B]


if __name__ == "__main__":
    key = jax.random.PRNGKey(0)
    k_params, k_tokens = jax.random.split(key)

    VOCAB, EMB, HID, LAYERS, NCLS = 21, 32, 128, 2, 2
    B, T = 2, 8

    params = init_params(k_params, vocab_size=VOCAB, embedding_dim=EMB,
                         hidden_size=HID, num_layers=LAYERS, bilstm=True,
                         n_cls=NCLS)
    tokens = jax.random.randint(k_tokens, (B, T), 0, VOCAB, dtype=jnp.int32)

    logits = lstm_model_forward(params, tokens)
    logits = jax.block_until_ready(logits)
    assert logits.shape == (B, NCLS) and logits.dtype == jnp.float32
    assert bool(jnp.all(jnp.isfinite(logits)))
    print("KERNEL_OK")
</pallas_src>

<mosaic_0001>
module attributes {stable_mosaic.version = 11 : i64} {
  func.func @_fused_lstm_kernel(%arg0: i32, %arg1: memref<64x32xbf16, #tpu.memory_space<vmem>>, %arg2: memref<32x1024xbf16, #tpu.memory_space<vmem>>, %arg3: memref<256x512xbf16, #tpu.memory_space<vmem>>, %arg4: memref<1x1024xf32, #tpu.memory_space<vmem>>, %arg5: memref<256x1024xbf16, #tpu.memory_space<any>>, %arg6: memref<256x512xbf16, #tpu.memory_space<any>>, %arg7: memref<1x1024xf32, #tpu.memory_space<vmem>>, %arg8: memref<256x1xf32, #tpu.memory_space<vmem>>, %arg9: memref<256x128xf32, #tpu.memory_space<vmem>>, %arg10: memref<1x128xf32, #tpu.memory_space<vmem>>, %arg11: memref<128x2xf32, #tpu.memory_space<vmem>>, %arg12: memref<1x2xf32, #tpu.memory_space<vmem>>, %arg13: memref<8x2xf32, #tpu.memory_space<vmem>>, %arg14: memref<64x1024xf32, #tpu.memory_space<vmem>>, %arg15: memref<64x256xf32, #tpu.memory_space<vmem>>, %arg16: memref<64x256xf32, #tpu.memory_space<vmem>>, %arg17: memref<256x1024xbf16, #tpu.memory_space<vmem>>, %arg18: memref<256x512xbf16, #tpu.memory_space<vmem>>, %arg19: memref<2x!tpu.dma_semaphore, #tpu.memory_space<semaphore_mem>>) attributes {dimension_semantics = [#tpu.dimension_semantics<arbitrary>], iteration_bounds = array<i64: 1>, scalar_prefetch = 0 : i64, scratch_operands = 6 : i64, tpu.core_type = #tpu.core_type<tc>, window_params = [{pipeline_mode = #tpu.pipeline_mode<synchronous>, transform_indices = @transform_0, window_bounds = array<i64: 64, 32>}, {pipeline_mode = #tpu.pipeline_mode<synchronous>, transform_indices = @transform_1, window_bounds = array<i64: 32, 1024>}, {pipeline_mode = #tpu.pipeline_mode<synchronous>, transform_indices = @transform_2, window_bounds = array<i64: 256, 512>}, {pipeline_mode = #tpu.pipeline_mode<synchronous>, transform_indices = @transform_3, window_bounds = array<i64: 1, 1024>}, {}, {}, {pipeline_mode = #tpu.pipeline_mode<synchronous>, transform_indices = @transform_6, window_bounds = array<i64: 1, 1024>}, {pipeline_mode = #tpu.pipeline_mode<synchronous>, transform_indices = @transform_7, window_bounds = array<i64: 256, 1>}, {pipeline_mode = #tpu.pipeline_mode<synchronous>, transform_indices = @transform_8, window_bounds = array<i64: 256, 128>}, {pipeline_mode = #tpu.pipeline_mode<synchronous>, transform_indices = @transform_9, window_bounds = array<i64: 1, 128>}, {pipeline_mode = #tpu.pipeline_mode<synchronous>, transform_indices = @transform_10, window_bounds = array<i64: 128, 2>}, {pipeline_mode = #tpu.pipeline_mode<synchronous>, transform_indices = @transform_11, window_bounds = array<i64: 1, 2>}, {pipeline_mode = #tpu.pipeline_mode<synchronous>, transform_indices = @transform_12, window_bounds = array<i64: 8, 2>}]} {
    %c0_i32 = arith.constant 0 : i32
    %0 = tpu.memref_slice %arg19[%c0_i32] : memref<2x!tpu.dma_semaphore, #tpu.memory_space<semaphore_mem>> -> memref<1x!tpu.dma_semaphore, #tpu.memory_space<semaphore_mem>>
    %1 = tpu.memref_squeeze %0 : memref<1x!tpu.dma_semaphore, #tpu.memory_space<semaphore_mem>> -> memref<!tpu.dma_semaphore, #tpu.memory_space<semaphore_mem>>
    tpu.enqueue_dma source(%arg5 : memref<256x1024xbf16, #tpu.memory_space<any>>) target(%arg17 : memref<256x1024xbf16, #tpu.memory_space<vmem>>) target_semaphore(%1 : memref<!tpu.dma_semaphore, #tpu.memory_space<semaphore_mem>>)
    %c1_i32 = arith.constant 1 : i32
    %2 = tpu.memref_slice %arg19[%c1_i32] : memref<2x!tpu.dma_semaphore, #tpu.memory_space<semaphore_mem>> -> memref<1x!tpu.dma_semaphore, #tpu.memory_space<semaphore_mem>>
    %3 = tpu.memref_squeeze %2 : memref<1x!tpu.dma_semaphore, #tpu.memory_space<semaphore_mem>> -> memref<!tpu.dma_semaphore, #tpu.memory_space<semaphore_mem>>
    tpu.enqueue_dma source(%arg6 : memref<256x512xbf16, #tpu.memory_space<any>>) target(%arg18 : memref<256x512xbf16, #tpu.memory_space<vmem>>) target_semaphore(%3 : memref<!tpu.dma_semaphore, #tpu.memory_space<semaphore_mem>>)
    %4 = tpu.iota {dimensions = array<i32: 0>} : vector<8x512xi32>
    %c4_i32 = arith.constant 4 : i32
    %5 = vector.broadcast %c4_i32 : i32 to vector<8x512xi32>
    %6 = arith.cmpi slt, %4, %5 : vector<8x512xi32>
    %7 = tpu.iota {dimensions = array<i32: 0>} : vector<8x128xi32>
    %c4_i32_0 = arith.constant 4 : i32
    %8 = vector.broadcast %c4_i32_0 : i32 to vector<8x128xi32>
    %9 = arith.cmpi slt, %7, %8 : vector<8x128xi32>
    %cst = arith.constant 0.000000e+00 : f32
    %10 = vector.broadcast %cst : f32 to vector<8x128xf32>
    %c0 = arith.constant 0 : index
    %c0_1 = arith.constant 0 : index
    %11 = vector.load %arg1[%c0, %c0_1] : memref<64x32xbf16, #tpu.memory_space<vmem>>, vector<64x32xbf16>
    %c0_2 = arith.constant 0 : index
    %c0_3 = arith.constant 0 : index
    %12 = vector.load %arg2[%c0_2, %c0_3] : memref<32x1024xbf16, #tpu.memory_space<vmem>>, vector<32x1024xbf16>
    %c0_4 = arith.constant 0 : index
    %c0_5 = arith.constant 0 : index
    %13 = vector.load %arg3[%c0_4, %c0_5] : memref<256x512xbf16, #tpu.memory_space<vmem>>, vector<256x512xbf16>
    %c0_6 = arith.constant 0 : index
    %c0_7 = arith.constant 0 : index
    %14 = vector.load %arg4[%c0_6, %c0_7] : memref<1x1024xf32, #tpu.memory_space<vmem>>, vector<1x1024xf32>
    %cst_8 = arith.constant dense<0.000000e+00> : vector<64x1024xf32>
    %15 = tpu.matmul %11, %12, %cst_8 {dimension_numbers = #tpu.dot_dimension_numbers<[1], [0], [0], [1], [0, 0, 1, 1], [], []>} : vector<64x32xbf16>, vector<32x1024xbf16>, vector<64x1024xf32> -> vector<64x1024xf32>
    %16 = vector.broadcast %14 : vector<1x1024xf32> to vector<64x1024xf32>
    %17 = arith.addf %15, %16 : vector<64x1024xf32>
    %c0_9 = arith.constant 0 : index
    %c0_10 = arith.constant 0 : index
    %18 = vector.load %arg14[%c0_9, %c0_10] : memref<64x1024xf32, #tpu.memory_space<vmem>>, vector<64x1024xf32>
    tpu.vector_store %arg14[%c0_9, %c0_10], %17 {strides = array<i32>} : memref<64x1024xf32, #tpu.memory_space<vmem>>, vector<64x1024xf32>,
    %cst_11 = arith.constant 0.000000e+00 : bf16
    %19 = vector.broadcast %cst_11 : bf16 to vector<8x256xbf16>
    %cst_12 = arith.constant 0.000000e+00 : f32
    %20 = vector.broadcast %cst_12 : f32 to vector<8x128xf32>
    %cst_13 = arith.constant dense<0.000000e+00> : vector<8x512xf32>
    %21 = tpu.matmul %19, %13, %cst_13 {dimension_numbers = #tpu.dot_dimension_numbers<[1], [0], [0], [1], [0, 0, 1, 1], [], []>} : vector<8x256xbf16>, vector<256x512xbf16>, vector<8x512xf32> -> vector<8x512xf32>
    %c0_14 = arith.constant 0 : index
    %c0_15 = arith.constant 0 : index
    %22 = vector.load %arg14[%c0_14, %c0_15] : memref<64x1024xf32, #tpu.memory_space<vmem>>, vector<8x512xf32>
    %c56 = arith.constant 56 : index
    %c512 = arith.constant 512 : index
    %23 = vector.load %arg14[%c56, %c512] : memref<64x1024xf32, #tpu.memory_space<vmem>>, vector<8x512xf32>
    %c4_i32_16 = arith.constant 4 : i32
    %24 = tpu.dynamic_rotate %23 by %c4_i32_16 dim 0 : vector<8x512xf32>, i32 -> vector<8x512xf32>
    %25 = arith.select %6, %22, %24 : vector<8x512xi1>, vector<8x512xf32>
    %26 = arith.addf %25, %21 : vector<8x512xf32>
    %27 = vector.extract_strided_slice %26 {offsets = [0, 0], sizes = [8, 384], strides = [1, 1]} : vector<8x512xf32> to vector<8x384xf32>
    %28 = arith.negf %27 : vector<8x384xf32>
    %29 = math.exp %28 : vector<8x384xf32>
    %cst_17 = arith.constant 1.000000e+00 : f32
    %30 = vector.broadcast %cst_17 : f32 to vector<8x384xf32>
    %31 = arith.addf %30, %29 : vector<8x384xf32>
    %32 = arith.divf %30, %31 : vector<8x384xf32>
    %33 = vector.extract_strided_slice %26 {offsets = [0, 384], sizes = [8, 128], strides = [1, 1]} : vector<8x512xf32> to vector<8x128xf32>
    %34 = math.tanh %33 : vector<8x128xf32>
    %35 = vector.extract_strided_slice %32 {offsets = [0, 128], sizes = [8, 128], strides = [1, 1]} : vector<8x384xf32> to vector<8x128xf32>
    %36 = arith.mulf %35, %20 : vector<8x128xf32>
    %37 = vector.extract_strided_slice %32 {offsets = [0, 0], sizes = [8, 128], strides = [1, 1]} : vector<8x384xf32> to vector<8x128xf32>
    %38 = arith.mulf %37, %34 : vector<8x128xf32>
    %39 = arith.addf %36, %38 : vector<8x128xf32>
    %40 = vector.extract_strided_slice %32 {offsets = [0, 256], sizes = [8, 128], strides = [1, 1]} : vector<8x384xf32> to vector<8x128xf32>
    %41 = math.tanh %39 : vector<8x128xf32>
    %42 = arith.mulf %40, %41 : vector<8x128xf32>
    %c0_18 = arith.constant 0 : index
    %c0_19 = arith.constant 0 : index
    %43 = vector.load %arg15[%c0_18, %c0_19] : memref<64x256xf32, #tpu.memory_space<vmem>>, vector<8x128xf32>
    tpu.vector_store %arg15[%c0_18, %c0_19], %42 {strides = array<i32>} : memref<64x256xf32, #tpu.memory_space<vmem>>, vector<8x128xf32>,
    %c4_i32_20 = arith.constant 4 : i32
    %44 = tpu.dynamic_rotate %42 by %c4_i32_20 dim 0 : vector<8x128xf32>, i32 -> vector<8x128xf32>
    %c56_21 = arith.constant 56 : index
    %c128 = arith.constant 128 : index
    %45 = vector.load %arg15[%c56_21, %c128] : memref<64x256xf32, #tpu.memory_space<vmem>>, vector<8x128xf32>
    tpu.vector_store %arg15[%c56_21, %c128], %44 {strides = array<i32>} : memref<64x256xf32, #tpu.memory_space<vmem>>, vector<8x128xf32>,
    %46 = arith.select %9, %42, %10 : vector<8x128xi1>, vector<8x128xf32>
    %47 = arith.select %9, %10, %42 : vector<8x128xi1>, vector<8x128xf32>
    %48 = tpu.concatenate %46, %47 in 1 : vector<8x128xf32>, vector<8x128xf32> -> vector<8x256xf32>
    %49 = arith.truncf %48 : vector<8x256xf32> to vector<8x256xbf16>
    %cst_22 = arith.constant dense<0.000000e+00> : vector<8x512xf32>
    %50 = tpu.matmul %49, %13, %cst_22 {dimension_numbers = #tpu.dot_dimension_numbers<[1], [0], [0], [1], [0, 0, 1, 1], [], []>} : vector<8x256xbf16>, vector<256x512xbf16>, vector<8x512xf32> -> vector<8x512xf32>
    %c8 = arith.constant 8 : index
    %c0_23 = arith.constant 0 : index
    %51 = vector.load %arg14[%c8, %c0_23] : memref<64x1024xf32, #tpu.memory_space<vmem>>, vector<8x512xf32>
    %c48 = arith.constant 48 : index
    %c512_24 = arith.constant 512 : index
    %52 = vector.load %arg14[%c48, %c512_24] : memref<64x1024xf32, #tpu.memory_space<vmem>>, vector<8x512xf32>
    %c4_i32_25 = arith.constant 4 : i32
    %53 = tpu.dynamic_rotate %52 by %c4_i32_25 dim 0 : vector<8x512xf32>, i32 -> vector<8x512xf32>
    %54 = arith.select %6, %51, %53 : vector<8x512xi1>, vector<8x512xf32>
    %55 = arith.addf %54, %50 : vector<8x512xf32>
    %56 = vector.extract_strided_slice %55 {offsets = [0, 0], sizes = [8, 384], strides = [1, 1]} : vector<8x512xf32> to vector<8x384xf32>
    %57 = arith.negf %56 : vector<8x384xf32>
    %58 = math.exp %57 : vector<8x384xf32>
    %cst_26 = arith.constant 1.000000e+00 : f32
    %59 = vector.broadcast %cst_26 : f32 to vector<8x384xf32>
    %60 = arith.addf %59, %58 : vector<8x384xf32>
    %61 = arith.divf %59, %60 : vector<8x384xf32>
    %62 = vector.extract_strided_slice %55 {offsets = [0, 384], sizes = [8, 128], strides = [1, 1]} : vector<8x512xf32> to vector<8x128xf32>
    %63 = math.tanh %62 : vector<8x128xf32>
    %64 = vector.extract_strided_slice %61 {offsets = [0, 128], sizes = [8, 128], strides = [1, 1]} : vector<8x384xf32> to vector<8x128xf32>
    %65 = arith.mulf %64, %39 : vector<8x128xf32>
    %66 = vector.extract_strided_slice %61 {offsets = [0, 0], sizes = [8, 128], strides = [1, 1]} : vector<8x384xf32> to vector<8x128xf32>
    %67 = arith.mulf %66, %63 : vector<8x128xf32>
    %68 = arith.addf %65, %67 : vector<8x128xf32>
    %69 = vector.extract_strided_slice %61 {offsets = [0, 256], sizes = [8, 128], strides = [1, 1]} : vector<8x384xf32> to vector<8x128xf32>
    %70 = math.tanh %68 : vector<8x128xf32>
    %71 = arith.mulf %69, %70 : vector<8x128xf32>
    %c8_27 = arith.constant 8 : index
    %c0_28 = arith.constant 0 : index
    %72 = vector.load %arg15[%c8_27, %c0_28] : memref<64x256xf32, #tpu.memory_space<vmem>>, vector<8x128xf32>
    tpu.vector_store %arg15[%c8_27, %c0_28], %71 {strides = array<i32>} : memref<64x256xf32, #tpu.memory_space<vmem>>, vector<8x128xf32>,
    %c4_i32_29 = arith.constant 4 : i32
    %73 = tpu.dynamic_rotate %71 by %c4_i32_29 dim 0 : vector<8x128xf32>, i32 -> vector<8x128xf32>
    %c48_30 = arith.constant 48 : index
    %c128_31 = arith.constant 128 : index
    %74 = vector.load %arg15[%c48_30, %c128_31] : memref<64x256xf32, #tpu.memory_space<vmem>>, vector<8x128xf32>
    tpu.vector_store %arg15[%c48_30, %c128_31], %73 {strides = array<i32>} : memref<64x256xf32, #tpu.memory_space<vmem>>, vector<8x128xf32>,
    %75 = arith.select %9, %71, %10 : vector<8x128xi1>, vector<8x128xf32>
    %76 = arith.select %9, %10, %71 : vector<8x128xi1>, vector<8x128xf32>
    %77 = tpu.concatenate %75, %76 in 1 : vector<8x128xf32>, vector<8x128xf32> -> vector<8x256xf32>
    %78 = arith.truncf %77 : vector<8x256xf32> to vector<8x256xbf16>
    %cst_32 = arith.constant dense<0.000000e+00> : vector<8x512xf32>
    %79 = tpu.matmul %78, %13, %cst_32 {dimension_numbers = #tpu.dot_dimension_numbers<[1], [0], [0], [1], [0, 0, 1, 1], [], []>} : vector<8x256xbf16>, vector<256x512xbf16>, vector<8x512xf32> -> vector<8x512xf32>
    %c16 = arith.constant 16 : index
    %c0_33 = arith.constant 0 : index
    %80 = vector.load %arg14[%c16, %c0_33] : memref<64x1024xf32, #tpu.memory_space<vmem>>, vector<8x512xf32>
    %c40 = arith.constant 40 : index
    %c512_34 = arith.constant 512 : index
    %81 = vector.load %arg14[%c40, %c512_34] : memref<64x1024xf32, #tpu.memory_space<vmem>>, vector<8x512xf32>
    %c4_i32_35 = arith.constant 4 : i32
    %82 = tpu.dynamic_rotate %81 by %c4_i32_35 dim 0 : vector<8x512xf32>, i32 -> vector<8x512xf32>
    %83 = arith.select %6, %80, %82 : vector<8x512xi1>, vector<8x512xf32>
    %84 = arith.addf %83, %79 : vector<8x512xf32>
    %85 = vector.extract_strided_slice %84 {offsets = [0, 0], sizes = [8, 384], strides = [1, 1]} : vector<8x512xf32> to vector<8x384xf32>
    %86 = arith.negf %85 : vector<8x384xf32>
    %87 = math.exp %86 : vector<8x384xf32>
    %cst_36 = arith.constant 1.000000e+00 : f32
    %88 = vector.broadcast %cst_36 : f32 to vector<8x384xf32>
    %89 = arith.addf %88, %87 : vector<8x384xf32>
    %90 = arith.divf %88, %89 : vector<8x384xf32>
    %91 = vector.extract_strided_slice %84 {offsets = [0, 384], sizes = [8, 128], strides = [1, 1]} : vector<8x512xf32> to vector<8x128xf32>
    %92 = math.tanh %91 : vector<8x128xf32>
    %93 = vector.extract_strided_slice %90 {offsets = [0, 128], sizes = [8, 128], strides = [1, 1]} : vector<8x384xf32> to vector<8x128xf32>
    %94 = arith.mulf %93, %68 : vector<8x128xf32>
    %95 = vector.extract_strided_slice %90 {offsets = [0, 0], sizes = [8, 128], strides = [1, 1]} : vector<8x384xf32> to vector<8x128xf32>
    %96 = arith.mulf %95, %92 : vector<8x128xf32>
    %97 = arith.addf %94, %96 : vector<8x128xf32>
    %98 = vector.extract_strided_slice %90 {offsets = [0, 256], sizes = [8, 128], strides = [1, 1]} : vector<8x384xf32> to vector<8x128xf32>
    %99 = math.tanh %97 : vector<8x128xf32>
    %100 = arith.mulf %98, %99 : vector<8x128xf32>
    %c16_37 = arith.constant 16 : index
    %c0_38 = arith.constant 0 : index
    %101 = vector.load %arg15[%c16_37, %c0_38] : memref<64x256xf32, #tpu.memory_space<vmem>>, vector<8x128xf32>
    tpu.vector_store %arg15[%c16_37, %c0_38], %100 {strides = array<i32>} : memref<64x256xf32, #tpu.memory_space<vmem>>, vector<8x128xf32>,
    %c4_i32_39 = arith.constant 4 : i32
    %102 = tpu.dynamic_rotate %100 by %c4_i32_39 dim 0 : vector<8x128xf32>, i32 -> vector<8x128xf32>
    %c40_40 = arith.constant 40 : index
    %c128_41 = arith.constant 128 : index
    %103 = vector.load %arg15[%c40_40, %c128_41] : memref<64x256xf32, #tpu.memory_space<vmem>>, vector<8x128xf32>
    tpu.vector_store %arg15[%c40_40, %c128_41], %102 {strides = array<i32>} : memref<64x256xf32, #tpu.memory_space<vmem>>, vector<8x128xf32>,
    %104 = arith.select %9, %100, %10 : vector<8x128xi1>, vector<8x128xf32>
    %105 = arith.select %9, %10, %100 : vector<8x128xi1>, vector<8x128xf32>
    %106 = tpu.concatenate %104, %105 in 1 : vector<8x128xf32>, vector<8x128xf32> -> vector<8x256xf32>
    %107 = arith.truncf %106 : vector<8x256xf32> to vector<8x256xbf16>
    %cst_42 = arith.constant dense<0.000000e+00> : vector<8x512xf32>
    %108 = tpu.matmul %107, %13, %cst_42 {dimension_numbers = #tpu.dot_dimension_numbers<[1], [0], [0], [1], [0, 0, 1, 1], [], []>} : vector<8x256xbf16>, vector<256x512xbf16>, vector<8x512xf32> -> vector<8x512xf32>
    %c24 = arith.constant 24 : index
    %c0_43 = arith.constant 0 : index
    %109 = vector.load %arg14[%c24, %c0_43] : memref<64x1024xf32, #tpu.memory_space<vmem>>, vector<8x512xf32>
    %c32 = arith.constant 32 : index
    %c512_44 = arith.constant 512 : index
    %110 = vector.load %arg14[%c32, %c512_44] : memref<64x1024xf32, #tpu.memory_space<vmem>>, vector<8x512xf32>
    %c4_i32_45 = arith.constant 4 : i32
    %111 = tpu.dynamic_rotate %110 by %c4_i32_45 dim 0 : vector<8x512xf32>, i32 -> vector<8x512xf32>
    %112 = arith.select %6, %109, %111 : vector<8x512xi1>, vector<8x512xf32>
    %113 = arith.addf %112, %108 : vector<8x512xf32>
    %114 = vector.extract_strided_slice %113 {offsets = [0, 0], sizes = [8, 384], strides = [1, 1]} : vector<8x512xf32> to vector<8x384xf32>
    %115 = arith.negf %114 : vector<8x384xf32>
    %116 = math.exp %115 : vector<8x384xf32>
    %cst_46 = arith.constant 1.000000e+00 : f32
    %117 = vector.broadcast %cst_46 : f32 to vector<8x384xf32>
    %118 = arith.addf %117, %116 : vector<8x384xf32>
    %119 = arith.divf %117, %118 : vector<8x384xf32>
    %120 = vector.extract_strided_slice %113 {offsets = [0, 384], sizes = [8, 128], strides = [1, 1]} : vector<8x512xf32> to vector<8x128xf32>
    %121 = math.tanh %120 : vector<8x128xf32>
    %122 = vector.extract_strided_slice %119 {offsets = [0, 128], sizes = [8, 128], strides = [1, 1]} : vector<8x384xf32> to vector<8x128xf32>
    %123 = arith.mulf %122, %97 : vector<8x128xf32>
    %124 = vector.extract_strided_slice %119 {offsets = [0, 0], sizes = [8, 128], strides = [1, 1]} : vector<8x384xf32> to vector<8x128xf32>
    %125 = arith.mulf %124, %121 : vector<8x128xf32>
    %126 = arith.addf %123, %125 : vector<8x128xf32>
    %127 = vector.extract_strided_slice %119 {offsets = [0, 256], sizes = [8, 128], strides = [1, 1]} : vector<8x384xf32> to vector<8x128xf32>
    %128 = math.tanh %126 : vector<8x128xf32>
    %129 = arith.mulf %127, %128 : vector<8x128xf32>
    %c24_47 = arith.constant 24 : index
    %c0_48 = arith.constant 0 : index
    %130 = vector.load %arg15[%c24_47, %c0_48] : memref<64x256xf32, #tpu.memory_space<vmem>>, vector<8x128xf32>
    tpu.vector_store %arg15[%c24_47, %c0_48], %129 {strides = array<i32>} : memref<64x256xf32, #tpu.memory_space<vmem>>, vector<8x128xf32>,
    %c4_i32_49 = arith.constant 4 : i32
    %131 = tpu.dynamic_rotate %129 by %c4_i32_49 dim 0 : vector<8x128xf32>, i32 -> vector<8x128xf32>
    %c32_50 = arith.constant 32 : index
    %c128_51 = arith.constant 128 : index
    %132 = vector.load %arg15[%c32_50, %c128_51] : memref<64x256xf32, #tpu.memory_space<vmem>>, vector<8x128xf32>
    tpu.vector_store %arg15[%c32_50, %c128_51], %131 {strides = array<i32>} : memref<64x256xf32, #tpu.memory_space<vmem>>, vector<8x128xf32>,
    %133 = arith.select %9, %129, %10 : vector<8x128xi1>, vector<8x128xf32>
    %134 = arith.select %9, %10, %129 : vector<8x128xi1>, vector<8x128xf32>
    %135 = tpu.concatenate %133, %134 in 1 : vector<8x128xf32>, vector<8x128xf32> -> vector<8x256xf32>
    %136 = arith.truncf %135 : vector<8x256xf32> to vector<8x256xbf16>
    %cst_52 = arith.constant dense<0.000000e+00> : vector<8x512xf32>
    %137 = tpu.matmul %136, %13, %cst_52 {dimension_numbers = #tpu.dot_dimension_numbers<[1], [0], [0], [1], [0, 0, 1, 1], [], []>} : vector<8x256xbf16>, vector<256x512xbf16>, vector<8x512xf32> -> vector<8x512xf32>
    %c32_53 = arith.constant 32 : index
    %c0_54 = arith.constant 0 : index
    %138 = vector.load %arg14[%c32_53, %c0_54] : memref<64x1024xf32, #tpu.memory_space<vmem>>, vector<8x512xf32>
    %c24_55 = arith.constant 24 : index
    %c512_56 = arith.constant 512 : index
    %139 = vector.load %arg14[%c24_55, %c512_56] : memref<64x1024xf32, #tpu.memory_space<vmem>>, vector<8x512xf32>
    %c4_i32_57 = arith.constant 4 : i32
    %140 = tpu.dynamic_rotate %139 by %c4_i32_57 dim 0 : vector<8x512xf32>, i32 -> vector<8x512xf32>
    %141 = arith.select %6, %138, %140 : vector<8x512xi1>, vector<8x512xf32>
    %142 = arith.addf %141, %137 : vector<8x512xf32>
    %143 = vector.extract_strided_slice %142 {offsets = [0, 0], sizes = [8, 384], strides = [1, 1]} : vector<8x512xf32> to vector<8x384xf32>
    %144 = arith.negf %143 : vector<8x384xf32>
    %145 = math.exp %144 : vector<8x384xf32>
    %cst_58 = arith.constant 1.000000e+00 : f32
    %146 = vector.broadcast %cst_58 : f32 to vector<8x384xf32>
    %147 = arith.addf %146, %145 : vector<8x384xf32>
    %148 = arith.divf %146, %147 : vector<8x384xf32>
    %149 = vector.extract_strided_slice %142 {offsets = [0, 384], sizes = [8, 128], strides = [1, 1]} : vector<8x512xf32> to vector<8x128xf32>
    %150 = math.tanh %149 : vector<8x128xf32>
    %151 = vector.extract_strided_slice %148 {offsets = [0, 128], sizes = [8, 128], strides = [1, 1]} : vector<8x384xf32> to vector<8x128xf32>
    %152 = arith.mulf %151, %126 : vector<8x128xf32>
    %153 = vector.extract_strided_slice %148 {offsets = [0, 0], sizes = [8, 128], strides = [1, 1]} : vector<8x384xf32> to vector<8x128xf32>
    %154 = arith.mulf %153, %150 : vector<8x128xf32>
    %155 = arith.addf %152, %154 : vector<8x128xf32>
    %156 = vector.extract_strided_slice %148 {offsets = [0, 256], sizes = [8, 128], strides = [1, 1]} : vector<8x384xf32> to vector<8x128xf32>
    %157 = math.tanh %155 : vector<8x128xf32>
    %158 = arith.mulf %156, %157 : vector<8x128xf32>
    %c32_59 = arith.constant 32 : index
    %c0_60 = arith.constant 0 : index
    %159 = vector.load %arg15[%c32_59, %c0_60] : memref<64x256xf32, #tpu.memory_space<vmem>>, vector<8x128xf32>
    tpu.vector_store %arg15[%c32_59, %c0_60], %158 {strides = array<i32>} : memref<64x256xf32, #tpu.memory_space<vmem>>, vector<8x128xf32>,
    %c4_i32_61 = arith.constant 4 : i32
    %160 = tpu.dynamic_rotate %158 by %c4_i32_61 dim 0 : vector<8x128xf32>, i32 -> vector<8x128xf32>
    %c24_62 = arith.constant 24 : index
    %c128_63 = arith.constant 128 : index
    %161 = vector.load %arg15[%c24_62, %c128_63] : memref<64x256xf32, #tpu.memory_space<vmem>>, vector<8x128xf32>
    tpu.vector_store %arg15[%c24_62, %c128_63], %160 {strides = array<i32>} : memref<64x256xf32, #tpu.memory_space<vmem>>, vector<8x128xf32>,
    %162 = arith.select %9, %158, %10 : vector<8x128xi1>, vector<8x128xf32>
    %163 = arith.select %9, %10, %158 : vector<8x128xi1>, vector<8x128xf32>
    %164 = tpu.concatenate %162, %163 in 1 : vector<8x128xf32>, vector<8x128xf32> -> vector<8x256xf32>
    %165 = arith.truncf %164 : vector<8x256xf32> to vector<8x256xbf16>
    %cst_64 = arith.constant dense<0.000000e+00> : vector<8x512xf32>
    %166 = tpu.matmul %165, %13, %cst_64 {dimension_numbers = #tpu.dot_dimension_numbers<[1], [0], [0], [1], [0, 0, 1, 1], [], []>} : vector<8x256xbf16>, vector<256x512xbf16>, vector<8x512xf32> -> vector<8x512xf32>
    %c40_65 = arith.constant 40 : index
    %c0_66 = arith.constant 0 : index
    %167 = vector.load %arg14[%c40_65, %c0_66] : memref<64x1024xf32, #tpu.memory_space<vmem>>, vector<8x512xf32>
    %c16_67 = arith.constant 16 : index
    %c512_68 = arith.constant 512 : index
    %168 = vector.load %arg14[%c16_67, %c512_68] : memref<64x1024xf32, #tpu.memory_space<vmem>>, vector<8x512xf32>
    %c4_i32_69 = arith.constant 4 : i32
    %169 = tpu.dynamic_rotate %168 by %c4_i32_69 dim 0 : vector<8x512xf32>, i32 -> vector<8x512xf32>
    %170 = arith.select %6, %167, %169 : vector<8x512xi1>, vector<8x512xf32>
    %171 = arith.addf %170, %166 : vector<8x512xf32>
    %172 = vector.extract_strided_slice %171 {offsets = [0, 0], sizes = [8, 384], strides = [1, 1]} : vector<8x512xf32> to vector<8x384xf32>
    %173 = arith.negf %172 : vector<8x384xf32>
    %174 = math.exp %173 : vector<8x384xf32>
    %cst_70 = arith.constant 1.000000e+00 : f32
    %175 = vector.broadcast %cst_70 : f32 to vector<8x384xf32>
    %176 = arith.addf %175, %174 : vector<8x384xf32>
    %177 = arith.divf %175, %176 : vector<8x384xf32>
    %178 = vector.extract_strided_slice %171 {offsets = [0, 384], sizes = [8, 128], strides = [1, 1]} : vector<8x512xf32> to vector<8x128xf32>
    %179 = math.tanh %178 : vector<8x128xf32>
    %180 = vector.extract_strided_slice %177 {offsets = [0, 128], sizes = [8, 128], strides = [1, 1]} : vector<8x384xf32> to vector<8x128xf32>
    %181 = arith.mulf %180, %155 : vector<8x128xf32>
    %182 = vector.extract_strided_slice %177 {offsets = [0, 0], sizes = [8, 128], strides = [1, 1]} : vector<8x384xf32> to vector<8x128xf32>
    %183 = arith.mulf %182, %179 : vector<8x128xf32>
    %184 = arith.addf %181, %183 : vector<8x128xf32>
    %185 = vector.extract_strided_slice %177 {offsets = [0, 256], sizes = [8, 128], strides = [1, 1]} : vector<8x384xf32> to vector<8x128xf32>
    %186 = math.tanh %184 : vector<8x128xf32>
    %187 = arith.mulf %185, %186 : vector<8x128xf32>
    %c40_71 = arith.constant 40 : index
    %c0_72 = arith.constant 0 : index
    %188 = vector.load %arg15[%c40_71, %c0_72] : memref<64x256xf32, #tpu.memory_space<vmem>>, vector<8x128xf32>
    tpu.vector_store %arg15[%c40_71, %c0_72], %187 {strides = array<i32>} : memref<64x256xf32, #tpu.memory_space<vmem>>, vector<8x128xf32>,
    %c4_i32_73 = arith.constant 4 : i32
    %189 = tpu.dynamic_rotate %187 by %c4_i32_73 dim 0 : vector<8x128xf32>, i32 -> vector<8x128xf32>
    %c16_74 = arith.constant 16 : index
    %c128_75 = arith.constant 128 : index
    %190 = vector.load %arg15[%c16_74, %c128_75] : memref<64x256xf32, #tpu.memory_space<vmem>>, vector<8x128xf32>
    tpu.vector_store %arg15[%c16_74, %c128_75], %189 {strides = array<i32>} : memref<64x256xf32, #tpu.memory_space<vmem>>, vector<8x128xf32>,
    %191 = arith.select %9, %187, %10 : vector<8x128xi1>, vector<8x128xf32>
    %192 = arith.select %9, %10, %187 : vector<8x128xi1>, vector<8x128xf32>
    %193 = tpu.concatenate %191, %192 in 1 : vector<8x128xf32>, vector<8x128xf32> -> vector<8x256xf32>
    %194 = arith.truncf %193 : vector<8x256xf32> to vector<8x256xbf16>
    %cst_76 = arith.constant dense<0.000000e+00> : vector<8x512xf32>
    %195 = tpu.matmul %194, %13, %cst_76 {dimension_numbers = #tpu.dot_dimension_numbers<[1], [0], [0], [1], [0, 0, 1, 1], [], []>} : vector<8x256xbf16>, vector<256x512xbf16>, vector<8x512xf32> -> vector<8x512xf32>
    %c48_77 = arith.constant 48 : index
    %c0_78 = arith.constant 0 : index
    %196 = vector.load %arg14[%c48_77, %c0_78] : memref<64x1024xf32, #tpu.memory_space<vmem>>, vector<8x512xf32>
    %c8_79 = arith.constant 8 : index
    %c512_80 = arith.constant 512 : index
    %197 = vector.load %arg14[%c8_79, %c512_80] : memref<64x1024xf32, #tpu.memory_space<vmem>>, vector<8x512xf32>
    %c4_i32_81 = arith.constant 4 : i32
    %198 = tpu.dynamic_rotate %197 by %c4_i32_81 dim 0 : vector<8x512xf32>, i32 -> vector<8x512xf32>
    %199 = arith.select %6, %196, %198 : vector<8x512xi1>, vector<8x512xf32>
    %200 = arith.addf %199, %195 : vector<8x512xf32>
    %201 = vector.extract_strided_slice %200 {offsets = [0, 0], sizes = [8, 384], strides = [1, 1]} : vector<8x512xf32> to vector<8x384xf32>
    %202 = arith.negf %201 : vector<8x384xf32>
    %203 = math.exp %202 : vector<8x384xf32>
    %cst_82 = arith.constant 1.000000e+00 : f32
    %204 = vector.broadcast %cst_82 : f32 to vector<8x384xf32>
    %205 = arith.addf %204, %203 : vector<8x384xf32>
    %206 = arith.divf %204, %205 : vector<8x384xf32>
    %207 = vector.extract_strided_slice %200 {offsets = [0, 384], sizes = [8, 128], strides = [1, 1]} : vector<8x512xf32> to vector<8x128xf32>
    %208 = math.tanh %207 : vector<8x128xf32>
    %209 = vector.extract_strided_slice %206 {offsets = [0, 128], sizes = [8, 128], strides = [1, 1]} : vector<8x384xf32> to vector<8x128xf32>
    %210 = arith.mulf %209, %184 : vector<8x128xf32>
    %211 = vector.extract_strided_slice %206 {offsets = [0, 0], sizes = [8, 128], strides = [1, 1]} : vector<8x384xf32> to vector<8x128xf32>
    %212 = arith.mulf %211, %208 : vector<8x128xf32>
    %213 = arith.addf %210, %212 : vector<8x128xf32>
    %214 = vector.extract_strided_slice %206 {offsets = [0, 256], sizes = [8, 128], strides = [1, 1]} : vector<8x384xf32> to vector<8x128xf32>
    %215 = math.tanh %213 : vector<8x128xf32>
    %216 = arith.mulf %214, %215 : vector<8x128xf32>
    %c48_83 = arith.constant 48 : index
    %c0_84 = arith.constant 0 : index
    %217 = vector.load %arg15[%c48_83, %c0_84] : memref<64x256xf32, #tpu.memory_space<vmem>>, vector<8x128xf32>
    tpu.vector_store %arg15[%c48_83, %c0_84], %216 {strides = array<i32>} : memref<64x256xf32, #tpu.memory_space<vmem>>, vector<8x128xf32>,
    %c4_i32_85 = arith.constant 4 : i32
    %218 = tpu.dynamic_rotate %216 by %c4_i32_85 dim 0 : vector<8x128xf32>, i32 -> vector<8x128xf32>
    %c8_86 = arith.constant 8 : index
    %c128_87 = arith.constant 128 : index
    %219 = vector.load %arg15[%c8_86, %c128_87] : memref<64x256xf32, #tpu.memory_space<vmem>>, vector<8x128xf32>
    tpu.vector_store %arg15[%c8_86, %c128_87], %218 {strides = array<i32>} : memref<64x256xf32, #tpu.memory_space<vmem>>, vector<8x128xf32>,
    %220 = arith.select %9, %216, %10 : vector<8x128xi1>, vector<8x128xf32>
    %221 = arith.select %9, %10, %216 : vector<8x128xi1>, vector<8x128xf32>
    %222 = tpu.concatenate %220, %221 in 1 : vector<8x128xf32>, vector<8x128xf32> -> vector<8x256xf32>
    %223 = arith.truncf %222 : vector<8x256xf32> to vector<8x256xbf16>
    %cst_88 = arith.constant dense<0.000000e+00> : vector<8x512xf32>
    %224 = tpu.matmul %223, %13, %cst_88 {dimension_numbers = #tpu.dot_dimension_numbers<[1], [0], [0], [1], [0, 0, 1, 1], [], []>} : vector<8x256xbf16>, vector<256x512xbf16>, vector<8x512xf32> -> vector<8x512xf32>
    %c56_89 = arith.constant 56 : index
    %c0_90 = arith.constant 0 : index
    %225 = vector.load %arg14[%c56_89, %c0_90] : memref<64x1024xf32, #tpu.memory_space<vmem>>, vector<8x512xf32>
    %c0_91 = arith.constant 0 : index
    %c512_92 = arith.constant 512 : index
    %226 = vector.load %arg14[%c0_91, %c512_92] : memref<64x1024xf32, #tpu.memory_space<vmem>>, vector<8x512xf32>
    %c4_i32_93 = arith.constant 4 : i32
    %227 = tpu.dynamic_rotate %226 by %c4_i32_93 dim 0 : vector<8x512xf32>, i32 -> vector<8x512xf32>
    %228 = arith.select %6, %225, %227 : vector<8x512xi1>, vector<8x512xf32>
    %229 = arith.addf %228, %224 : vector<8x512xf32>
    %230 = vector.extract_strided_slice %229 {offsets = [0, 0], sizes = [8, 384], strides = [1, 1]} : vector<8x512xf32> to vector<8x384xf32>
    %231 = arith.negf %230 : vector<8x384xf32>
    %232 = math.exp %231 : vector<8x384xf32>
    %cst_94 = arith.constant 1.000000e+00 : f32
    %233 = vector.broadcast %cst_94 : f32 to vector<8x384xf32>
    %234 = arith.addf %233, %232 : vector<8x384xf32>
    %235 = arith.divf %233, %234 : vector<8x384xf32>
    %236 = vector.extract_strided_slice %229 {offsets = [0, 384], sizes = [8, 128], strides = [1, 1]} : vector<8x512xf32> to vector<8x128xf32>
    %237 = math.tanh %236 : vector<8x128xf32>
    %238 = vector.extract_strided_slice %235 {offsets = [0, 128], sizes = [8, 128], strides = [1, 1]} : vector<8x384xf32> to vector<8x128xf32>
    %239 = arith.mulf %238, %213 : vector<8x128xf32>
    %240 = vector.extract_strided_slice %235 {offsets = [0, 0], sizes = [8, 128], strides = [1, 1]} : vector<8x384xf32> to vector<8x128xf32>
    %241 = arith.mulf %240, %237 : vector<8x128xf32>
    %242 = arith.addf %239, %241 : vector<8x128xf32>
    %243 = vector.extract_strided_slice %235 {offsets = [0, 256], sizes = [8, 128], strides = [1, 1]} : vector<8x384xf32> to vector<8x128xf32>
    %244 = math.tanh %242 : vector<8x128xf32>
    %245 = arith.mulf %243, %244 : vector<8x128xf32>
    %c56_95 = arith.constant 56 : index
    %c0_96 = arith.constant 0 : index
    %246 = vector.load %arg15[%c56_95, %c0_96] : memref<64x256xf32, #tpu.memory_space<vmem>>, vector<8x128xf32>
    tpu.vector_store %arg15[%c56_95, %c0_96], %245 {strides = array<i32>} : memref<64x256xf32, #tpu.memory_space<vmem>>, vector<8x128xf32>,
    %c4_i32_97 = arith.constant 4 : i32
    %247 = tpu.dynamic_rotate %245 by %c4_i32_97 dim 0 : vector<8x128xf32>, i32 -> vector<8x128xf32>
    %c0_98 = arith.constant 0 : index
    %c128_99 = arith.constant 128 : index
    %248 = vector.load %arg15[%c0_98, %c128_99] : memref<64x256xf32, #tpu.memory_space<vmem>>, vector<8x128xf32>
    tpu.vector_store %arg15[%c0_98, %c128_99], %247 {strides = array<i32>} : memref<64x256xf32, #tpu.memory_space<vmem>>, vector<8x128xf32>,
    %c0_i32_100 = arith.constant 0 : i32
    %249 = tpu.memref_slice %arg19[%c0_i32_100] : memref<2x!tpu.dma_semaphore, #tpu.memory_space<semaphore_mem>> -> memref<1x!tpu.dma_semaphore, #tpu.memory_space<semaphore_mem>>
    %250 = tpu.memref_squeeze %249 : memref<1x!tpu.dma_semaphore, #tpu.memory_space<semaphore_mem>> -> memref<!tpu.dma_semaphore, #tpu.memory_space<semaphore_mem>>
    tpu.wait_dma2 semaphore(%250 : memref<!tpu.dma_semaphore, #tpu.memory_space<semaphore_mem>>) src(%arg5 : memref<256x1024xbf16, #tpu.memory_space<any>>) dst(%arg17 : memref<256x1024xbf16, #tpu.memory_space<vmem>>)
    %c1_i32_101 = arith.constant 1 : i32
    %251 = tpu.memref_slice %arg19[%c1_i32_101] : memref<2x!tpu.dma_semaphore, #tpu.memory_space<semaphore_mem>> -> memref<1x!tpu.dma_semaphore, #tpu.memory_space<semaphore_mem>>
    %252 = tpu.memref_squeeze %251 : memref<1x!tpu.dma_semaphore, #tpu.memory_space<semaphore_mem>> -> memref<!tpu.dma_semaphore, #tpu.memory_space<semaphore_mem>>
    tpu.wait_dma2 semaphore(%252 : memref<!tpu.dma_semaphore, #tpu.memory_space<semaphore_mem>>) src(%arg6 : memref<256x512xbf16, #tpu.memory_space<any>>) dst(%arg18 : memref<256x512xbf16, #tpu.memory_space<vmem>>)
    %c0_102 = arith.constant 0 : index
    %c0_103 = arith.constant 0 : index
    %253 = vector.load %arg15[%c0_102, %c0_103] : memref<64x256xf32, #tpu.memory_space<vmem>>, vector<64x256xf32>
    %254 = arith.truncf %253 : vector<64x256xf32> to vector<64x256xbf16>
    %c0_104 = arith.constant 0 : index
    %c0_105 = arith.constant 0 : index
    %255 = vector.load %arg17[%c0_104, %c0_105] : memref<256x1024xbf16, #tpu.memory_space<vmem>>, vector<256x1024xbf16>
    %c0_106 = arith.constant 0 : index
    %c0_107 = arith.constant 0 : index
    %256 = vector.load %arg18[%c0_106, %c0_107] : memref<256x512xbf16, #tpu.memory_space<vmem>>, vector<256x512xbf16>
    %c0_108 = arith.constant 0 : index
    %c0_109 = arith.constant 0 : index
    %257 = vector.load %arg7[%c0_108, %c0_109] : memref<1x1024xf32, #tpu.memory_space<vmem>>, vector<1x1024xf32>
    %cst_110 = arith.constant dense<0.000000e+00> : vector<64x1024xf32>
    %258 = tpu.matmul %254, %255, %cst_110 {dimension_numbers = #tpu.dot_dimension_numbers<[1], [0], [0], [1], [0, 0, 1, 1], [], []>} : vector<64x256xbf16>, vector<256x1024xbf16>, vector<64x1024xf32> -> vector<64x1024xf32>
    %259 = vector.broadcast %257 : vector<1x1024xf32> to vector<64x1024xf32>
    %260 = arith.addf %258, %259 : vector<64x1024xf32>
    %c0_111 = arith.constant 0 : index
    %c0_112 = arith.constant 0 : index
    %261 = vector.load %arg14[%c0_111, %c0_112] : memref<64x1024xf32, #tpu.memory_space<vmem>>, vector<64x1024xf32>
    tpu.vector_store %arg14[%c0_111, %c0_112], %260 {strides = array<i32>} : memref<64x1024xf32, #tpu.memory_space<vmem>>, vector<64x1024xf32>,
    %cst_113 = arith.constant 0.000000e+00 : bf16
    %262 = vector.broadcast %cst_113 : bf16 to vector<8x256xbf16>
    %cst_114 = arith.constant 0.000000e+00 : f32
    %263 = vector.broadcast %cst_114 : f32 to vector<8x128xf32>
    %cst_115 = arith.constant dense<0.000000e+00> : vector<8x512xf32>
    %264 = tpu.matmul %262, %256, %cst_115 {dimension_numbers = #tpu.dot_dimension_numbers<[1], [0], [0], [1], [0, 0, 1, 1], [], []>} : vector<8x256xbf16>, vector<256x512xbf16>, vector<8x512xf32> -> vector<8x512xf32>
    %c0_116 = arith.constant 0 : index
    %c0_117 = arith.constant 0 : index
    %265 = vector.load %arg14[%c0_116, %c0_117] : memref<64x1024xf32, #tpu.memory_space<vmem>>, vector<8x512xf32>
    %c56_118 = arith.constant 56 : index
    %c512_119 = arith.constant 512 : index
    %266 = vector.load %arg14[%c56_118, %c512_119] : memref<64x1024xf32, #tpu.memory_space<vmem>>, vector<8x512xf32>
    %c4_i32_120 = arith.constant 4 : i32
    %267 = tpu.dynamic_rotate %266 by %c4_i32_120 dim 0 : vector<8x512xf32>, i32 -> vector<8x512xf32>
    %268 = arith.select %6, %265, %267 : vector<8x512xi1>, vector<8x512xf32>
    %269 = arith.addf %268, %264 : vector<8x512xf32>
    %270 = vector.extract_strided_slice %269 {offsets = [0, 0], sizes = [8, 384], strides = [1, 1]} : vector<8x512xf32> to vector<8x384xf32>
    %271 = arith.negf %270 : vector<8x384xf32>
    %272 = math.exp %271 : vector<8x384xf32>
    %cst_121 = arith.constant 1.000000e+00 : f32
    %273 = vector.broadcast %cst_121 : f32 to vector<8x384xf32>
    %274 = arith.addf %273, %272 : vector<8x384xf32>
    %275 = arith.divf %273, %274 : vector<8x384xf32>
    %276 = vector.extract_strided_slice %269 {offsets = [0, 384], sizes = [8, 128], strides = [1, 1]} : vector<8x512xf32> to vector<8x128xf32>
    %277 = math.tanh %276 : vector<8x128xf32>
    %278 = vector.extract_strided_slice %275 {offsets = [0, 128], sizes = [8, 128], strides = [1, 1]} : vector<8x384xf32> to vector<8x128xf32>
    %279 = arith.mulf %278, %263 : vector<8x128xf32>
    %280 = vector.extract_strided_slice %275 {offsets = [0, 0], sizes = [8, 128], strides = [1, 1]} : vector<8x384xf32> to vector<8x128xf32>
    %281 = arith.mulf %280, %277 : vector<8x128xf32>
    %282 = arith.addf %279, %281 : vector<8x128xf32>
    %283 = vector.extract_strided_slice %275 {offsets = [0, 256], sizes = [8, 128], strides = [1, 1]} : vector<8x384xf32> to vector<8x128xf32>
    %284 = math.tanh %282 : vector<8x128xf32>
    %285 = arith.mulf %283, %284 : vector<8x128xf32>
    %c0_122 = arith.constant 0 : index
    %c0_123 = arith.constant 0 : index
    %286 = vector.load %arg16[%c0_122, %c0_123] : memref<64x256xf32, #tpu.memory_space<vmem>>, vector<8x128xf32>
    tpu.vector_store %arg16[%c0_122, %c0_123], %285 {strides = array<i32>} : memref<64x256xf32, #tpu.memory_space<vmem>>, vector<8x128xf32>,
    %c4_i32_124 = arith.constant 4 : i32
    %287 = tpu.dynamic_rotate %285 by %c4_i32_124 dim 0 : vector<8x128xf32>, i32 -> vector<8x128xf32>
    %c56_125 = arith.constant 56 : index
    %c128_126 = arith.constant 128 : index
    %288 = vector.load %arg16[%c56_125, %c128_126] : memref<64x256xf32, #tpu.memory_space<vmem>>, vector<8x128xf32>
    tpu.vector_store %arg16[%c56_125, %c128_126], %287 {strides = array<i32>} : memref<64x256xf32, #tpu.memory_space<vmem>>, vector<8x128xf32>,
    %289 = arith.select %9, %285, %10 : vector<8x128xi1>, vector<8x128xf32>
    %290 = arith.select %9, %10, %285 : vector<8x128xi1>, vector<8x128xf32>
    %291 = tpu.concatenate %289, %290 in 1 : vector<8x128xf32>, vector<8x128xf32> -> vector<8x256xf32>
    %292 = arith.truncf %291 : vector<8x256xf32> to vector<8x256xbf16>
    %cst_127 = arith.constant dense<0.000000e+00> : vector<8x512xf32>
    %293 = tpu.matmul %292, %256, %cst_127 {dimension_numbers = #tpu.dot_dimension_numbers<[1], [0], [0], [1], [0, 0, 1, 1], [], []>} : vector<8x256xbf16>, vector<256x512xbf16>, vector<8x512xf32> -> vector<8x512xf32>
    %c8_128 = arith.constant 8 : index
    %c0_129 = arith.constant 0 : index
    %294 = vector.load %arg14[%c8_128, %c0_129] : memref<64x1024xf32, #tpu.memory_space<vmem>>, vector<8x512xf32>
    %c48_130 = arith.constant 48 : index
    %c512_131 = arith.constant 512 : index
    %295 = vector.load %arg14[%c48_130, %c512_131] : memref<64x1024xf32, #tpu.memory_space<vmem>>, vector<8x512xf32>
    %c4_i32_132 = arith.constant 4 : i32
    %296 = tpu.dynamic_rotate %295 by %c4_i32_132 dim 0 : vector<8x512xf32>, i32 -> vector<8x512xf32>
    %297 = arith.select %6, %294, %296 : vector<8x512xi1>, vector<8x512xf32>
    %298 = arith.addf %297, %293 : vector<8x512xf32>
    %299 = vector.extract_strided_slice %298 {offsets = [0, 0], sizes = [8, 384], strides = [1, 1]} : vector<8x512xf32> to vector<8x384xf32>
    %300 = arith.negf %299 : vector<8x384xf32>
    %301 = math.exp %300 : vector<8x384xf32>
    %cst_133 = arith.constant 1.000000e+00 : f32
    %302 = vector.broadcast %cst_133 : f32 to vector<8x384xf32>
    %303 = arith.addf %302, %301 : vector<8x384xf32>
    %304 = arith.divf %302, %303 : vector<8x384xf32>
    %305 = vector.extract_strided_slice %298 {offsets = [0, 384], sizes = [8, 128], strides = [1, 1]} : vector<8x512xf32> to vector<8x128xf32>
    %306 = math.tanh %305 : vector<8x128xf32>
    %307 = vector.extract_strided_slice %304 {offsets = [0, 128], sizes = [8, 128], strides = [1, 1]} : vector<8x384xf32> to vector<8x128xf32>
    %308 = arith.mulf %307, %282 : vector<8x128xf32>
    %309 = vector.extract_strided_slice %304 {offsets = [0, 0], sizes = [8, 128], strides = [1, 1]} : vector<8x384xf32> to vector<8x128xf32>
    %310 = arith.mulf %309, %306 : vector<8x128xf32>
    %311 = arith.addf %308, %310 : vector<8x128xf32>
    %312 = vector.extract_strided_slice %304 {offsets = [0, 256], sizes = [8, 128], strides = [1, 1]} : vector<8x384xf32> to vector<8x128xf32>
    %313 = math.tanh %311 : vector<8x128xf32>
    %314 = arith.mulf %312, %313 : vector<8x128xf32>
    %c8_134 = arith.constant 8 : index
    %c0_135 = arith.constant 0 : index
    %315 = vector.load %arg16[%c8_134, %c0_135] : memref<64x256xf32, #tpu.memory_space<vmem>>, vector<8x128xf32>
    tpu.vector_store %arg16[%c8_134, %c0_135], %314 {strides = array<i32>} : memref<64x256xf32, #tpu.memory_space<vmem>>, vector<8x128xf32>,
    %c4_i32_136 = arith.constant 4 : i32
    %316 = tpu.dynamic_rotate %314 by %c4_i32_136 dim 0 : vector<8x128xf32>, i32 -> vector<8x128xf32>
    %c48_137 = arith.constant 48 : index
    %c128_138 = arith.constant 128 : index
    %317 = vector.load %arg16[%c48_137, %c128_138] : memref<64x256xf32, #tpu.memory_space<vmem>>, vector<8x128xf32>
    tpu.vector_store %arg16[%c48_137, %c128_138], %316 {strides = array<i32>} : memref<64x256xf32, #tpu.memory_space<vmem>>, vector<8x128xf32>,
    %318 = arith.select %9, %314, %10 : vector<8x128xi1>, vector<8x128xf32>
    %319 = arith.select %9, %10, %314 : vector<8x128xi1>, vector<8x128xf32>
    %320 = tpu.concatenate %318, %319 in 1 : vector<8x128xf32>, vector<8x128xf32> -> vector<8x256xf32>
    %321 = arith.truncf %320 : vector<8x256xf32> to vector<8x256xbf16>
    %cst_139 = arith.constant dense<0.000000e+00> : vector<8x512xf32>
    %322 = tpu.matmul %321, %256, %cst_139 {dimension_numbers = #tpu.dot_dimension_numbers<[1], [0], [0], [1], [0, 0, 1, 1], [], []>} : vector<8x256xbf16>, vector<256x512xbf16>, vector<8x512xf32> -> vector<8x512xf32>
    %c16_140 = arith.constant 16 : index
    %c0_141 = arith.constant 0 : index
    %323 = vector.load %arg14[%c16_140, %c0_141] : memref<64x1024xf32, #tpu.memory_space<vmem>>, vector<8x512xf32>
    %c40_142 = arith.constant 40 : index
    %c512_143 = arith.constant 512 : index
    %324 = vector.load %arg14[%c40_142, %c512_143] : memref<64x1024xf32, #tpu.memory_space<vmem>>, vector<8x512xf32>
    %c4_i32_144 = arith.constant 4 : i32
    %325 = tpu.dynamic_rotate %324 by %c4_i32_144 dim 0 : vector<8x512xf32>, i32 -> vector<8x512xf32>
    %326 = arith.select %6, %323, %325 : vector<8x512xi1>, vector<8x512xf32>
    %327 = arith.addf %326, %322 : vector<8x512xf32>
    %328 = vector.extract_strided_slice %327 {offsets = [0, 0], sizes = [8, 384], strides = [1, 1]} : vector<8x512xf32> to vector<8x384xf32>
    %329 = arith.negf %328 : vector<8x384xf32>
    %330 = math.exp %329 : vector<8x384xf32>
    %cst_145 = arith.constant 1.000000e+00 : f32
    %331 = vector.broadcast %cst_145 : f32 to vector<8x384xf32>
    %332 = arith.addf %331, %330 : vector<8x384xf32>
    %333 = arith.divf %331, %332 : vector<8x384xf32>
    %334 = vector.extract_strided_slice %327 {offsets = [0, 384], sizes = [8, 128], strides = [1, 1]} : vector<8x512xf32> to vector<8x128xf32>
    %335 = math.tanh %334 : vector<8x128xf32>
    %336 = vector.extract_strided_slice %333 {offsets = [0, 128], sizes = [8, 128], strides = [1, 1]} : vector<8x384xf32> to vector<8x128xf32>
    %337 = arith.mulf %336, %311 : vector<8x128xf32>
    %338 = vector.extract_strided_slice %333 {offsets = [0, 0], sizes = [8, 128], strides = [1, 1]} : vector<8x384xf32> to vector<8x128xf32>
    %339 = arith.mulf %338, %335 : vector<8x128xf32>
    %340 = arith.addf %337, %339 : vector<8x128xf32>
    %341 = vector.extract_strided_slice %333 {offsets = [0, 256], sizes = [8, 128], strides = [1, 1]} : vector<8x384xf32> to vector<8x128xf32>
    %342 = math.tanh %340 : vector<8x128xf32>
    %343 = arith.mulf %341, %342 : vector<8x128xf32>
    %c16_146 = arith.constant 16 : index
    %c0_147 = arith.constant 0 : index
    %344 = vector.load %arg16[%c16_146, %c0_147] : memref<64x256xf32, #tpu.memory_space<vmem>>, vector<8x128xf32>
    tpu.vector_store %arg16[%c16_146, %c0_147], %343 {strides = array<i32>} : memref<64x256xf32, #tpu.memory_space<vmem>>, vector<8x128xf32>,
    %c4_i32_148 = arith.constant 4 : i32
    %345 = tpu.dynamic_rotate %343 by %c4_i32_148 dim 0 : vector<8x128xf32>, i32 -> vector<8x128xf32>
    %c40_149 = arith.constant 40 : index
    %c128_150 = arith.constant 128 : index
    %346 = vector.load %arg16[%c40_149, %c128_150] : memref<64x256xf32, #tpu.memory_space<vmem>>, vector<8x128xf32>
    tpu.vector_store %arg16[%c40_149, %c128_150], %345 {strides = array<i32>} : memref<64x256xf32, #tpu.memory_space<vmem>>, vector<8x128xf32>,
    %347 = arith.select %9, %343, %10 : vector<8x128xi1>, vector<8x128xf32>
    %348 = arith.select %9, %10, %343 : vector<8x128xi1>, vector<8x128xf32>
    %349 = tpu.concatenate %347, %348 in 1 : vector<8x128xf32>, vector<8x128xf32> -> vector<8x256xf32>
    %350 = arith.truncf %349 : vector<8x256xf32> to vector<8x256xbf16>
    %cst_151 = arith.constant dense<0.000000e+00> : vector<8x512xf32>
    %351 = tpu.matmul %350, %256, %cst_151 {dimension_numbers = #tpu.dot_dimension_numbers<[1], [0], [0], [1], [0, 0, 1, 1], [], []>} : vector<8x256xbf16>, vector<256x512xbf16>, vector<8x512xf32> -> vector<8x512xf32>
    %c24_152 = arith.constant 24 : index
    %c0_153 = arith.constant 0 : index
    %352 = vector.load %arg14[%c24_152, %c0_153] : memref<64x1024xf32, #tpu.memory_space<vmem>>, vector<8x512xf32>
    %c32_154 = arith.constant 32 : index
    %c512_155 = arith.constant 512 : index
    %353 = vector.load %arg14[%c32_154, %c512_155] : memref<64x1024xf32, #tpu.memory_space<vmem>>, vector<8x512xf32>
    %c4_i32_156 = arith.constant 4 : i32
    %354 = tpu.dynamic_rotate %353 by %c4_i32_156 dim 0 : vector<8x512xf32>, i32 -> vector<8x512xf32>
    %355 = arith.select %6, %352, %354 : vector<8x512xi1>, vector<8x512xf32>
    %356 = arith.addf %355, %351 : vector<8x512xf32>
    %357 = vector.extract_strided_slice %356 {offsets = [0, 0], sizes = [8, 384], strides = [1, 1]} : vector<8x512xf32> to vector<8x384xf32>
    %358 = arith.negf %357 : vector<8x384xf32>
    %359 = math.exp %358 : vector<8x384xf32>
    %cst_157 = arith.constant 1.000000e+00 : f32
    %360 = vector.broadcast %cst_157 : f32 to vector<8x384xf32>
    %361 = arith.addf %360, %359 : vector<8x384xf32>
    %362 = arith.divf %360, %361 : vector<8x384xf32>
    %363 = vector.extract_strided_slice %356 {offsets = [0, 384], sizes = [8, 128], strides = [1, 1]} : vector<8x512xf32> to vector<8x128xf32>
    %364 = math.tanh %363 : vector<8x128xf32>
    %365 = vector.extract_strided_slice %362 {offsets = [0, 128], sizes = [8, 128], strides = [1, 1]} : vector<8x384xf32> to vector<8x128xf32>
    %366 = arith.mulf %365, %340 : vector<8x128xf32>
    %367 = vector.extract_strided_slice %362 {offsets = [0, 0], sizes = [8, 128], strides = [1, 1]} : vector<8x384xf32> to vector<8x128xf32>
    %368 = arith.mulf %367, %364 : vector<8x128xf32>
    %369 = arith.addf %366, %368 : vector<8x128xf32>
    %370 = vector.extract_strided_slice %362 {offsets = [0, 256], sizes = [8, 128], strides = [1, 1]} : vector<8x384xf32> to vector<8x128xf32>
    %371 = math.tanh %369 : vector<8x128xf32>
    %372 = arith.mulf %370, %371 : vector<8x128xf32>
    %c24_158 = arith.constant 24 : index
    %c0_159 = arith.constant 0 : index
    %373 = vector.load %arg16[%c24_158, %c0_159] : memref<64x256xf32, #tpu.memory_space<vmem>>, vector<8x128xf32>
    tpu.vector_store %arg16[%c24_158, %c0_159], %372 {strides = array<i32>} : memref<64x256xf32, #tpu.memory_space<vmem>>, vector<8x128xf32>,
    %c4_i32_160 = arith.constant 4 : i32
    %374 = tpu.dynamic_rotate %372 by %c4_i32_160 dim 0 : vector<8x128xf32>, i32 -> vector<8x128xf32>
    %c32_161 = arith.constant 32 : index
    %c128_162 = arith.constant 128 : index
    %375 = vector.load %arg16[%c32_161, %c128_162] : memref<64x256xf32, #tpu.memory_space<vmem>>, vector<8x128xf32>
    tpu.vector_store %arg16[%c32_161, %c128_162], %374 {strides = array<i32>} : memref<64x256xf32, #tpu.memory_space<vmem>>, vector<8x128xf32>,
    %376 = arith.select %9, %372, %10 : vector<8x128xi1>, vector<8x128xf32>
    %377 = arith.select %9, %10, %372 : vector<8x128xi1>, vector<8x128xf32>
    %378 = tpu.concatenate %376, %377 in 1 : vector<8x128xf32>, vector<8x128xf32> -> vector<8x256xf32>
    %379 = arith.truncf %378 : vector<8x256xf32> to vector<8x256xbf16>
    %cst_163 = arith.constant dense<0.000000e+00> : vector<8x512xf32>
    %380 = tpu.matmul %379, %256, %cst_163 {dimension_numbers = #tpu.dot_dimension_numbers<[1], [0], [0], [1], [0, 0, 1, 1], [], []>} : vector<8x256xbf16>, vector<256x512xbf16>, vector<8x512xf32> -> vector<8x512xf32>
    %c32_164 = arith.constant 32 : index
    %c0_165 = arith.constant 0 : index
    %381 = vector.load %arg14[%c32_164, %c0_165] : memref<64x1024xf32, #tpu.memory_space<vmem>>, vector<8x512xf32>
    %c24_166 = arith.constant 24 : index
    %c512_167 = arith.constant 512 : index
    %382 = vector.load %arg14[%c24_166, %c512_167] : memref<64x1024xf32, #tpu.memory_space<vmem>>, vector<8x512xf32>
    %c4_i32_168 = arith.constant 4 : i32
    %383 = tpu.dynamic_rotate %382 by %c4_i32_168 dim 0 : vector<8x512xf32>, i32 -> vector<8x512xf32>
    %384 = arith.select %6, %381, %383 : vector<8x512xi1>, vector<8x512xf32>
    %385 = arith.addf %384, %380 : vector<8x512xf32>
    %386 = vector.extract_strided_slice %385 {offsets = [0, 0], sizes = [8, 384], strides = [1, 1]} : vector<8x512xf32> to vector<8x384xf32>
    %387 = arith.negf %386 : vector<8x384xf32>
    %388 = math.exp %387 : vector<8x384xf32>
    %cst_169 = arith.constant 1.000000e+00 : f32
    %389 = vector.broadcast %cst_169 : f32 to vector<8x384xf32>
    %390 = arith.addf %389, %388 : vector<8x384xf32>
    %391 = arith.divf %389, %390 : vector<8x384xf32>
    %392 = vector.extract_strided_slice %385 {offsets = [0, 384], sizes = [8, 128], strides = [1, 1]} : vector<8x512xf32> to vector<8x128xf32>
    %393 = math.tanh %392 : vector<8x128xf32>
    %394 = vector.extract_strided_slice %391 {offsets = [0, 128], sizes = [8, 128], strides = [1, 1]} : vector<8x384xf32> to vector<8x128xf32>
    %395 = arith.mulf %394, %369 : vector<8x128xf32>
    %396 = vector.extract_strided_slice %391 {offsets = [0, 0], sizes = [8, 128], strides = [1, 1]} : vector<8x384xf32> to vector<8x128xf32>
    %397 = arith.mulf %396, %393 : vector<8x128xf32>
    %398 = arith.addf %395, %397 : vector<8x128xf32>
    %399 = vector.extract_strided_slice %391 {offsets = [0, 256], sizes = [8, 128], strides = [1, 1]} : vector<8x384xf32> to vector<8x128xf32>
    %400 = math.tanh %398 : vector<8x128xf32>
    %401 = arith.mulf %399, %400 : vector<8x128xf32>
    %c32_170 = arith.constant 32 : index
    %c0_171 = arith.constant 0 : index
    %402 = vector.load %arg16[%c32_170, %c0_171] : memref<64x256xf32, #tpu.memory_space<vmem>>, vector<8x128xf32>
    tpu.vector_store %arg16[%c32_170, %c0_171], %401 {strides = array<i32>} : memref<64x256xf32, #tpu.memory_space<vmem>>, vector<8x128xf32>,
    %c4_i32_172 = arith.constant 4 : i32
    %403 = tpu.dynamic_rotate %401 by %c4_i32_172 dim 0 : vector<8x128xf32>, i32 -> vector<8x128xf32>
    %c24_173 = arith.constant 24 : index
    %c128_174 = arith.constant 128 : index
    %404 = vector.load %arg16[%c24_173, %c128_174] : memref<64x256xf32, #tpu.memory_space<vmem>>, vector<8x128xf32>
    tpu.vector_store %arg16[%c24_173, %c128_174], %403 {strides = array<i32>} : memref<64x256xf32, #tpu.memory_space<vmem>>, vector<8x128xf32>,
    %405 = arith.select %9, %401, %10 : vector<8x128xi1>, vector<8x128xf32>
    %406 = arith.select %9, %10, %401 : vector<8x128xi1>, vector<8x128xf32>
    %407 = tpu.concatenate %405, %406 in 1 : vector<8x128xf32>, vector<8x128xf32> -> vector<8x256xf32>
    %408 = arith.truncf %407 : vector<8x256xf32> to vector<8x256xbf16>
    %cst_175 = arith.constant dense<0.000000e+00> : vector<8x512xf32>
    %409 = tpu.matmul %408, %256, %cst_175 {dimension_numbers = #tpu.dot_dimension_numbers<[1], [0], [0], [1], [0, 0, 1, 1], [], []>} : vector<8x256xbf16>, vector<256x512xbf16>, vector<8x512xf32> -> vector<8x512xf32>
    %c40_176 = arith.constant 40 : index
    %c0_177 = arith.constant 0 : index
    %410 = vector.load %arg14[%c40_176, %c0_177] : memref<64x1024xf32, #tpu.memory_space<vmem>>, vector<8x512xf32>
    %c16_178 = arith.constant 16 : index
    %c512_179 = arith.constant 512 : index
    %411 = vector.load %arg14[%c16_178, %c512_179] : memref<64x1024xf32, #tpu.memory_space<vmem>>, vector<8x512xf32>
    %c4_i32_180 = arith.constant 4 : i32
    %412 = tpu.dynamic_rotate %411 by %c4_i32_180 dim 0 : vector<8x512xf32>, i32 -> vector<8x512xf32>
    %413 = arith.select %6, %410, %412 : vector<8x512xi1>, vector<8x512xf32>
    %414 = arith.addf %413, %409 : vector<8x512xf32>
    %415 = vector.extract_strided_slice %414 {offsets = [0, 0], sizes = [8, 384], strides = [1, 1]} : vector<8x512xf32> to vector<8x384xf32>
    %416 = arith.negf %415 : vector<8x384xf32>
    %417 = math.exp %416 : vector<8x384xf32>
    %cst_181 = arith.constant 1.000000e+00 : f32
    %418 = vector.broadcast %cst_181 : f32 to vector<8x384xf32>
    %419 = arith.addf %418, %417 : vector<8x384xf32>
    %420 = arith.divf %418, %419 : vector<8x384xf32>
    %421 = vector.extract_strided_slice %414 {offsets = [0, 384], sizes = [8, 128], strides = [1, 1]} : vector<8x512xf32> to vector<8x128xf32>
    %422 = math.tanh %421 : vector<8x128xf32>
    %423 = vector.extract_strided_slice %420 {offsets = [0, 128], sizes = [8, 128], strides = [1, 1]} : vector<8x384xf32> to vector<8x128xf32>
    %424 = arith.mulf %423, %398 : vector<8x128xf32>
    %425 = vector.extract_strided_slice %420 {offsets = [0, 0], sizes = [8, 128], strides = [1, 1]} : vector<8x384xf32> to vector<8x128xf32>
    %426 = arith.mulf %425, %422 : vector<8x128xf32>
    %427 = arith.addf %424, %426 : vector<8x128xf32>
    %428 = vector.extract_strided_slice %420 {offsets = [0, 256], sizes = [8, 128], strides = [1, 1]} : vector<8x384xf32> to vector<8x128xf32>
    %429 = math.tanh %427 : vector<8x128xf32>
    %430 = arith.mulf %428, %429 : vector<8x128xf32>
    %c40_182 = arith.constant 40 : index
    %c0_183 = arith.constant 0 : index
    %431 = vector.load %arg16[%c40_182, %c0_183] : memref<64x256xf32, #tpu.memory_space<vmem>>, vector<8x128xf32>
    tpu.vector_store %arg16[%c40_182, %c0_183], %430 {strides = array<i32>} : memref<64x256xf32, #tpu.memory_space<vmem>>, vector<8x128xf32>,
    %c4_i32_184 = arith.constant 4 : i32
    %432 = tpu.dynamic_rotate %430 by %c4_i32_184 dim 0 : vector<8x128xf32>, i32 -> vector<8x128xf32>
    %c16_185 = arith.constant 16 : index
    %c128_186 = arith.constant 128 : index
    %433 = vector.load %arg16[%c16_185, %c128_186] : memref<64x256xf32, #tpu.memory_space<vmem>>, vector<8x128xf32>
    tpu.vector_store %arg16[%c16_185, %c128_186], %432 {strides = array<i32>} : memref<64x256xf32, #tpu.memory_space<vmem>>, vector<8x128xf32>,
    %434 = arith.select %9, %430, %10 : vector<8x128xi1>, vector<8x128xf32>
    %435 = arith.select %9, %10, %430 : vector<8x128xi1>, vector<8x128xf32>
    %436 = tpu.concatenate %434, %435 in 1 : vector<8x128xf32>, vector<8x128xf32> -> vector<8x256xf32>
    %437 = arith.truncf %436 : vector<8x256xf32> to vector<8x256xbf16>
    %cst_187 = arith.constant dense<0.000000e+00> : vector<8x512xf32>
    %438 = tpu.matmul %437, %256, %cst_187 {dimension_numbers = #tpu.dot_dimension_numbers<[1], [0], [0], [1], [0, 0, 1, 1], [], []>} : vector<8x256xbf16>, vector<256x512xbf16>, vector<8x512xf32> -> vector<8x512xf32>
    %c48_188 = arith.constant 48 : index
    %c0_189 = arith.constant 0 : index
    %439 = vector.load %arg14[%c48_188, %c0_189] : memref<64x1024xf32, #tpu.memory_space<vmem>>, vector<8x512xf32>
    %c8_190 = arith.constant 8 : index
    %c512_191 = arith.constant 512 : index
    %440 = vector.load %arg14[%c8_190, %c512_191] : memref<64x1024xf32, #tpu.memory_space<vmem>>, vector<8x512xf32>
    %c4_i32_192 = arith.constant 4 : i32
    %441 = tpu.dynamic_rotate %440 by %c4_i32_192 dim 0 : vector<8x512xf32>, i32 -> vector<8x512xf32>
    %442 = arith.select %6, %439, %441 : vector<8x512xi1>, vector<8x512xf32>
    %443 = arith.addf %442, %438 : vector<8x512xf32>
    %444 = vector.extract_strided_slice %443 {offsets = [0, 0], sizes = [8, 384], strides = [1, 1]} : vector<8x512xf32> to vector<8x384xf32>
    %445 = arith.negf %444 : vector<8x384xf32>
    %446 = math.exp %445 : vector<8x384xf32>
    %cst_193 = arith.constant 1.000000e+00 : f32
    %447 = vector.broadcast %cst_193 : f32 to vector<8x384xf32>
    %448 = arith.addf %447, %446 : vector<8x384xf32>
    %449 = arith.divf %447, %448 : vector<8x384xf32>
    %450 = vector.extract_strided_slice %443 {offsets = [0, 384], sizes = [8, 128], strides = [1, 1]} : vector<8x512xf32> to vector<8x128xf32>
    %451 = math.tanh %450 : vector<8x128xf32>
    %452 = vector.extract_strided_slice %449 {offsets = [0, 128], sizes = [8, 128], strides = [1, 1]} : vector<8x384xf32> to vector<8x128xf32>
    %453 = arith.mulf %452, %427 : vector<8x128xf32>
    %454 = vector.extract_strided_slice %449 {offsets = [0, 0], sizes = [8, 128], strides = [1, 1]} : vector<8x384xf32> to vector<8x128xf32>
    %455 = arith.mulf %454, %451 : vector<8x128xf32>
    %456 = arith.addf %453, %455 : vector<8x128xf32>
    %457 = vector.extract_strided_slice %449 {offsets = [0, 256], sizes = [8, 128], strides = [1, 1]} : vector<8x384xf32> to vector<8x128xf32>
    %458 = math.tanh %456 : vector<8x128xf32>
    %459 = arith.mulf %457, %458 : vector<8x128xf32>
    %c48_194 = arith.constant 48 : index
    %c0_195 = arith.constant 0 : index
    %460 = vector.load %arg16[%c48_194, %c0_195] : memref<64x256xf32, #tpu.memory_space<vmem>>, vector<8x128xf32>
    tpu.vector_store %arg16[%c48_194, %c0_195], %459 {strides = array<i32>} : memref<64x256xf32, #tpu.memory_space<vmem>>, vector<8x128xf32>,
    %c4_i32_196 = arith.constant 4 : i32
    %461 = tpu.dynamic_rotate %459 by %c4_i32_196 dim 0 : vector<8x128xf32>, i32 -> vector<8x128xf32>
    %c8_197 = arith.constant 8 : index
    %c128_198 = arith.constant 128 : index
    %462 = vector.load %arg16[%c8_197, %c128_198] : memref<64x256xf32, #tpu.memory_space<vmem>>, vector<8x128xf32>
    tpu.vector_store %arg16[%c8_197, %c128_198], %461 {strides = array<i32>} : memref<64x256xf32, #tpu.memory_space<vmem>>, vector<8x128xf32>,
    %463 = arith.select %9, %459, %10 : vector<8x128xi1>, vector<8x128xf32>
    %464 = arith.select %9, %10, %459 : vector<8x128xi1>, vector<8x128xf32>
    %465 = tpu.concatenate %463, %464 in 1 : vector<8x128xf32>, vector<8x128xf32> -> vector<8x256xf32>
    %466 = arith.truncf %465 : vector<8x256xf32> to vector<8x256xbf16>
    %cst_199 = arith.constant dense<0.000000e+00> : vector<8x512xf32>
    %467 = tpu.matmul %466, %256, %cst_199 {dimension_numbers = #tpu.dot_dimension_numbers<[1], [0], [0], [1], [0, 0, 1, 1], [], []>} : vector<8x256xbf16>, vector<256x512xbf16>, vector<8x512xf32> -> vector<8x512xf32>
    %c56_200 = arith.constant 56 : index
    %c0_201 = arith.constant 0 : index
    %468 = vector.load %arg14[%c56_200, %c0_201] : memref<64x1024xf32, #tpu.memory_space<vmem>>, vector<8x512xf32>
    %c0_202 = arith.constant 0 : index
    %c512_203 = arith.constant 512 : index
    %469 = vector.load %arg14[%c0_202, %c512_203] : memref<64x1024xf32, #tpu.memory_space<vmem>>, vector<8x512xf32>
    %c4_i32_204 = arith.constant 4 : i32
    %470 = tpu.dynamic_rotate %469 by %c4_i32_204 dim 0 : vector<8x512xf32>, i32 -> vector<8x512xf32>
    %471 = arith.select %6, %468, %470 : vector<8x512xi1>, vector<8x512xf32>
    %472 = arith.addf %471, %467 : vector<8x512xf32>
    %473 = vector.extract_strided_slice %472 {offsets = [0, 0], sizes = [8, 384], strides = [1, 1]} : vector<8x512xf32> to vector<8x384xf32>
    %474 = arith.negf %473 : vector<8x384xf32>
    %475 = math.exp %474 : vector<8x384xf32>
    %cst_205 = arith.constant 1.000000e+00 : f32
    %476 = vector.broadcast %cst_205 : f32 to vector<8x384xf32>
    %477 = arith.addf %476, %475 : vector<8x384xf32>
    %478 = arith.divf %476, %477 : vector<8x384xf32>
    %479 = vector.extract_strided_slice %472 {offsets = [0, 384], sizes = [8, 128], strides = [1, 1]} : vector<8x512xf32> to vector<8x128xf32>
    %480 = math.tanh %479 : vector<8x128xf32>
    %481 = vector.extract_strided_slice %478 {offsets = [0, 128], sizes = [8, 128], strides = [1, 1]} : vector<8x384xf32> to vector<8x128xf32>
    %482 = arith.mulf %481, %456 : vector<8x128xf32>
    %483 = vector.extract_strided_slice %478 {offsets = [0, 0], sizes = [8, 128], strides = [1, 1]} : vector<8x384xf32> to vector<8x128xf32>
    %484 = arith.mulf %483, %480 : vector<8x128xf32>
    %485 = arith.addf %482, %484 : vector<8x128xf32>
    %486 = vector.extract_strided_slice %478 {offsets = [0, 256], sizes = [8, 128], strides = [1, 1]} : vector<8x384xf32> to vector<8x128xf32>
    %487 = math.tanh %485 : vector<8x128xf32>
    %488 = arith.mulf %486, %487 : vector<8x128xf32>
    %c56_206 = arith.constant 56 : index
    %c0_207 = arith.constant 0 : index
    %489 = vector.load %arg16[%c56_206, %c0_207] : memref<64x256xf32, #tpu.memory_space<vmem>>, vector<8x128xf32>
    tpu.vector_store %arg16[%c56_206, %c0_207], %488 {strides = array<i32>} : memref<64x256xf32, #tpu.memory_space<vmem>>, vector<8x128xf32>,
    %c4_i32_208 = arith.constant 4 : i32
    %490 = tpu.dynamic_rotate %488 by %c4_i32_208 dim 0 : vector<8x128xf32>, i32 -> vector<8x128xf32>
    %c0_209 = arith.constant 0 : index
    %c128_210 = arith.constant 128 : index
    %491 = vector.load %arg16[%c0_209, %c128_210] : memref<64x256xf32, #tpu.memory_space<vmem>>, vector<8x128xf32>
    tpu.vector_store %arg16[%c0_209, %c128_210], %490 {strides = array<i32>} : memref<64x256xf32, #tpu.memory_space<vmem>>, vector<8x128xf32>,
    %c0_211 = arith.constant 0 : index
    %c0_212 = arith.constant 0 : index
    %492 = vector.load %arg16[%c0_211, %c0_212] : memref<64x256xf32, #tpu.memory_space<vmem>>, vector<64x256xf32>
    %c0_213 = arith.constant 0 : index
    %c0_214 = arith.constant 0 : index
    %493 = vector.load %arg8[%c0_213, %c0_214] : memref<256x1xf32, #tpu.memory_space<vmem>>, vector<256x1xf32>
    %cst_215 = arith.constant dense<0.000000e+00> : vector<64x1xf32>
    %494 = tpu.matmul %492, %493, %cst_215 {dimension_numbers = #tpu.dot_dimension_numbers<[1], [0], [0], [1], [0, 0, 1, 1], [], []>} : vector<64x256xf32>, vector<256x1xf32>, vector<64x1xf32> -> vector<64x1xf32>
    %495 = tpu.iota {dimensions = array<i32: 0>} : vector<64x1xi32>
    %c8_i32 = arith.constant 8 : i32
    %c0_i32_216 = arith.constant 0 : i32
    %496 = arith.cmpi eq, %c8_i32, %c0_i32_216 : i32
    %c1_i32_217 = arith.constant 1 : i32
    %497 = arith.select %496, %c1_i32_217, %c8_i32 : i32
    %498 = vector.broadcast %497 : i32 to vector<64x1xi32>
    %499 = arith.remsi %495, %498 : vector<64x1xi32>
    %c0_i32_218 = arith.constant 0 : i32
    %500 = vector.broadcast %c0_i32_218 : i32 to vector<64x1xi32>
    %501 = arith.cmpi ne, %499, %500 : vector<64x1xi32>
    %c0_i32_219 = arith.constant 0 : i32
    %502 = vector.broadcast %c0_i32_219 : i32 to vector<64x1xi32>
    %503 = arith.cmpi slt, %499, %502 : vector<64x1xi32>
    %c0_i32_220 = arith.constant 0 : i32
    %504 = arith.cmpi slt, %497, %c0_i32_220 : i32
    %505 = vector.broadcast %504 : i1 to vector<64x1xi1>
    %506 = vector.broadcast %505 : vector<64x1xi1> to vector<64x1xi1>
    %507 = arith.xori %503, %506 : vector<64x1xi1>
    %508 = arith.andi %507, %501 : vector<64x1xi1>
    %509 = vector.broadcast %497 : i32 to vector<64x1xi32>
    %510 = arith.addi %499, %509 : vector<64x1xi32>
    %511 = arith.select %508, %510, %499 : vector<64x1xi1>, vector<64x1xi32>
    %c2_i32 = arith.constant 2 : i32
    %512 = vector.broadcast %c2_i32 : i32 to vector<64x1xi32>
    %513 = arith.cmpi slt, %511, %512 : vector<64x1xi32>
    %cst_221 = arith.constant -1.000000e+30 : f32
    %514 = vector.broadcast %cst_221 : f32 to vector<64x1xf32>
    %515 = arith.select %513, %494, %514 : vector<64x1xi1>, vector<64x1xf32>
    %cst_222 = arith.constant dense<0xFF800000> : vector<1xf32>
    %516 = vector.multi_reduction <maximumf>, %515, %cst_222 [0] : vector<64x1xf32> to vector<1xf32>
    %517 = vector.shape_cast %516 : vector<1xf32> to vector<1x1xf32>
    %518 = vector.broadcast %517 : vector<1x1xf32> to vector<64x1xf32>
    %519 = arith.subf %494, %518 : vector<64x1xf32>
    %520 = math.exp %519 : vector<64x1xf32>
    %cst_223 = arith.constant 0.000000e+00 : f32
    %521 = vector.broadcast %cst_223 : f32 to vector<64x1xf32>
    %522 = arith.select %513, %520, %521 : vector<64x1xi1>, vector<64x1xf32>
    %523 = tpu.iota {dimensions = array<i32: 1>} : vector<8x64xi32>
    %c8_i32_224 = arith.constant 8 : i32
    %c0_i32_225 = arith.constant 0 : i32
    %524 = arith.cmpi eq, %c8_i32_224, %c0_i32_225 : i32
    %c1_i32_226 = arith.constant 1 : i32
    %525 = arith.select %524, %c1_i32_226, %c8_i32_224 : i32
    %526 = vector.broadcast %525 : i32 to vector<8x64xi32>
    %527 = arith.remsi %523, %526 : vector<8x64xi32>
    %c0_i32_227 = arith.constant 0 : i32
    %528 = vector.broadcast %c0_i32_227 : i32 to vector<8x64xi32>
    %529 = arith.cmpi ne, %527, %528 : vector<8x64xi32>
    %c0_i32_228 = arith.constant 0 : i32
    %530 = vector.broadcast %c0_i32_228 : i32 to vector<8x64xi32>
    %531 = arith.cmpi slt, %527, %530 : vector<8x64xi32>
    %c0_i32_229 = arith.constant 0 : i32
    %532 = arith.cmpi slt, %525, %c0_i32_229 : i32
    %533 = vector.broadcast %532 : i1 to vector<8x64xi1>
    %534 = vector.broadcast %533 : vector<8x64xi1> to vector<8x64xi1>
    %535 = arith.xori %531, %534 : vector<8x64xi1>
    %536 = arith.andi %535, %529 : vector<8x64xi1>
    %537 = vector.broadcast %525 : i32 to vector<8x64xi32>
    %538 = arith.addi %527, %537 : vector<8x64xi32>
    %539 = arith.select %536, %538, %527 : vector<8x64xi1>, vector<8x64xi32>
    %540 = tpu.iota {dimensions = array<i32: 0>} : vector<8x64xi32>
    %541 = arith.cmpi eq, %539, %540 : vector<8x64xi32>
    %cst_230 = arith.constant 1.000000e+00 : f32
    %cst_231 = arith.constant 0.000000e+00 : f32
    %542 = vector.broadcast %cst_230 : f32 to vector<8x64xf32>
    %543 = vector.broadcast %cst_231 : f32 to vector<8x64xf32>
    %544 = arith.select %541, %542, %543 : vector<8x64xi1>, vector<8x64xf32>
    %545 = vector.broadcast %522 : vector<64x1xf32> to vector<64x256xf32>
    %546 = arith.mulf %492, %545 : vector<64x256xf32>
    %cst_232 = arith.constant dense<0.000000e+00> : vector<8x256xf32>
    %547 = tpu.matmul %544, %546, %cst_232 {dimension_numbers = #tpu.dot_dimension_numbers<[1], [0], [0], [1], [0, 0, 1, 1], [], []>} : vector<8x64xf32>, vector<64x256xf32>, vector<8x256xf32> -> vector<8x256xf32>
    %cst_233 = arith.constant dense<0.000000e+00> : vector<8x1xf32>
    %548 = tpu.matmul %544, %522, %cst_233 {dimension_numbers = #tpu.dot_dimension_numbers<[1], [0], [0], [1], [0, 0, 1, 1], [], []>} : vector<8x64xf32>, vector<64x1xf32>, vector<8x1xf32> -> vector<8x1xf32>
    %cst_234 = arith.constant 1.000000e-30 : f32
    %549 = vector.broadcast %cst_234 : f32 to vector<8x1xf32>
    %550 = arith.maximumf %548, %549 : vector<8x1xf32>
    %551 = vector.broadcast %550 : vector<8x1xf32> to vector<8x256xf32>
    %552 = arith.divf %547, %551 : vector<8x256xf32>
    %c0_235 = arith.constant 0 : index
    %c0_236 = arith.constant 0 : index
    %553 = vector.load %arg9[%c0_235, %c0_236] : memref<256x128xf32, #tpu.memory_space<vmem>>, vector<256x128xf32>
    %cst_237 = arith.constant dense<0.000000e+00> : vector<8x128xf32>
    %554 = tpu.matmul %552, %553, %cst_237 {dimension_numbers = #tpu.dot_dimension_numbers<[1], [0], [0], [1], [0, 0, 1, 1], [], []>} : vector<8x256xf32>, vector<256x128xf32>, vector<8x128xf32> -> vector<8x128xf32>
    %c0_238 = arith.constant 0 : index
    %c0_239 = arith.constant 0 : index
    %555 = vector.load %arg10[%c0_238, %c0_239] : memref<1x128xf32, #tpu.memory_space<vmem>>, vector<1x128xf32>
    %556 = vector.broadcast %555 : vector<1x128xf32> to vector<8x128xf32>
    %557 = arith.addf %554, %556 : vector<8x128xf32>
    %cst_240 = arith.constant 0.000000e+00 : f32
    %558 = vector.broadcast %cst_240 : f32 to vector<8x128xf32>
    %559 = arith.cmpf oge, %557, %558 : vector<8x128xf32>
    %cst_241 = arith.constant 0.00999999977 : f32
    %560 = vector.broadcast %cst_241 : f32 to vector<8x128xf32>
    %561 = arith.mulf %560, %557 : vector<8x128xf32>
    %562 = arith.select %559, %557, %561 : vector<8x128xi1>, vector<8x128xf32>
    %c0_242 = arith.constant 0 : index
    %c0_243 = arith.constant 0 : index
    %563 = vector.load %arg11[%c0_242, %c0_243] : memref<128x2xf32, #tpu.memory_space<vmem>>, vector<128x2xf32>
    %cst_244 = arith.constant dense<0.000000e+00> : vector<8x2xf32>
    %564 = tpu.matmul %562, %563, %cst_244 {dimension_numbers = #tpu.dot_dimension_numbers<[1], [0], [0], [1], [0, 0, 1, 1], [], []>} : vector<8x128xf32>, vector<128x2xf32>, vector<8x2xf32> -> vector<8x2xf32>
    %c0_245 = arith.constant 0 : index
    %c0_246 = arith.constant 0 : index
    %565 = vector.load %arg12[%c0_245, %c0_246] : memref<1x2xf32, #tpu.memory_space<vmem>>, vector<1x2xf32>
    %566 = vector.broadcast %565 : vector<1x2xf32> to vector<8x2xf32>
    %567 = arith.addf %564, %566 : vector<8x2xf32>
    %c0_247 = arith.constant 0 : index
    %c0_248 = arith.constant 0 : index
    %568 = vector.load %arg13[%c0_247, %c0_248] : memref<8x2xf32, #tpu.memory_space<vmem>>, vector<8x2xf32>
    tpu.vector_store %arg13[%c0_247, %c0_248], %567 {strides = array<i32>} : memref<8x2xf32, #tpu.memory_space<vmem>>, vector<8x2xf32>,
    return
  }
  func.func @transform_0(%arg0: i32) -> (i32, i32) {
    %c0_i32 = arith.constant 0 : i32
    %c0_i32_0 = arith.constant 0 : i32
    %c0_i32_1 = arith.constant 0 : i32
    return %c0_i32, %c0_i32_0 : i32, i32
  }
  func.func @transform_1(%arg0: i32) -> (i32, i32) {
    %c0_i32 = arith.constant 0 : i32
    %c0_i32_0 = arith.constant 0 : i32
    %c0_i32_1 = arith.constant 0 : i32
    return %c0_i32, %c0_i32_0 : i32, i32
  }
  func.func @transform_2(%arg0: i32) -> (i32, i32) {
    %c0_i32 = arith.constant 0 : i32
    %c0_i32_0 = arith.constant 0 : i32
    %c0_i32_1 = arith.constant 0 : i32
    return %c0_i32, %c0_i32_0 : i32, i32
  }
  func.func @transform_3(%arg0: i32) -> (i32, i32) {
    %c0_i32 = arith.constant 0 : i32
    %c0_i32_0 = arith.constant 0 : i32
    %c0_i32_1 = arith.constant 0 : i32
    return %c0_i32, %c0_i32_0 : i32, i32
  }
  func.func @transform_6(%arg0: i32) -> (i32, i32) {
    %c0_i32 = arith.constant 0 : i32
    %c0_i32_0 = arith.constant 0 : i32
    %c0_i32_1 = arith.constant 0 : i32
    return %c0_i32, %c0_i32_0 : i32, i32
  }
  func.func @transform_7(%arg0: i32) -> (i32, i32) {
    %c0_i32 = arith.constant 0 : i32
    %c0_i32_0 = arith.constant 0 : i32
    %c0_i32_1 = arith.constant 0 : i32
    return %c0_i32, %c0_i32_0 : i32, i32
  }
  func.func @transform_8(%arg0: i32) -> (i32, i32) {
    %c0_i32 = arith.constant 0 : i32
    %c0_i32_0 = arith.constant 0 : i32
    %c0_i32_1 = arith.constant 0 : i32
    return %c0_i32, %c0_i32_0 : i32, i32
  }
  func.func @transform_9(%arg0: i32) -> (i32, i32) {
    %c0_i32 = arith.constant 0 : i32
    %c0_i32_0 = arith.constant 0 : i32
    %c0_i32_1 = arith.constant 0 : i32
    return %c0_i32, %c0_i32_0 : i32, i32
  }
  func.func @transform_10(%arg0: i32) -> (i32, i32) {
    %c0_i32 = arith.constant 0 : i32
    %c0_i32_0 = arith.constant 0 : i32
    %c0_i32_1 = arith.constant 0 : i32
    return %c0_i32, %c0_i32_0 : i32, i32
  }
  func.func @transform_11(%arg0: i32) -> (i32, i32) {
    %c0_i32 = arith.constant 0 : i32
    %c0_i32_0 = arith.constant 0 : i32
    %c0_i32_1 = arith.constant 0 : i32
    return %c0_i32, %c0_i32_0 : i32, i32
  }
  func.func @transform_12(%arg0: i32) -> (i32, i32) {
    %c0_i32 = arith.constant 0 : i32
    %c0_i32_0 = arith.constant 0 : i32
    %c0_i32_1 = arith.constant 0 : i32
    return %c0_i32, %c0_i32_0 : i32, i32
  }
}

</mosaic_0001>

<bundles_post_ra>
// kernel: lstm_model_forward.1
= control target key start
LH: loop header
LB: loop body
LE: loop exit
PB: predicated region body
PF: predicated region fallthrough
CT: control target
= control target key end

     0   :  { %17 = vsyncpa [#allocation9], 0  ;;  %s9318_s0 = inlined_call_operand.vmem [shape: bf16[64,32], index: 0, kind: input, shape index: {}]   ;;  %s9319_s1 = inlined_call_operand.hbm [shape: bf16[32,1024], index: 1, kind: input, shape index: {}]   ;;  %s9320_s2 = inlined_call_operand.vmem [shape: bf16[256,512], index: 2, kind: input, shape index: {}]   ;;  %s9321_s3 = inlined_call_operand.vmem [shape: f32[1,1024], index: 3, kind: input, shape index: {}]   ;;  %s9322_s4 = inlined_call_operand.hbm [shape: bf16[256,1024], index: 4, kind: input, shape index: {}]   ;;  %s9323_s5 = inlined_call_operand.hbm [shape: bf16[256,512], index: 5, kind: input, shape index: {}]   ;;  %s9324_s6 = inlined_call_operand.vmem [shape: f32[1,1024], index: 6, kind: input, shape index: {}]   ;;  %s9325_s7 = inlined_call_operand.vmem [shape: f32[256,1], index: 7, kind: input, shape index: {}]   ;;  %s9326_s8 = inlined_call_operand.hbm [shape: f32[256,128], index: 8, kind: input, shape index: {}]   ;;  %s9327_s9 = inlined_call_operand.vmem [shape: f32[1,128], index: 9, kind: input, shape index: {}]   ;;  %s9328_s10 = inlined_call_operand.vmem [shape: f32[128,2], index: 10, kind: input, shape index: {}]   ;;  %s9329_s11 = inlined_call_operand.vmem [shape: f32[1,2], index: 11, kind: input, shape index: {}]   ;;  %s9330_s12 = inlined_call_operand.vmem [shape: f32[8,2], index: 12, kind: output, shape index: {}]  }
   0x1   :  { %18 = vsyncpa [#allocation11], 0  ;;  %s5835_s21 = smov [#allocation8]   ;;  %s5783_s25 = scalar_lea.hbm %s9319_s1, 2048 }
   0x2   :  { %s26_s22 = sshll.u32 %s5835_s21, 4  ;;  %p5784_p0 = scmp.ne.s32.totalorder %s9319_s1, %s5783_s25  ;;  %s27_s22 = int_to_ptr.vmem [resolvable:$true] %s26_s22 }
   0x3   :  { %p5787_p1 = scmp.lt.u32.totalorder %s5783_s25, %s9319_s1 }
   0x5   :  { %p5789_p2 = pnand %p5787_p1, %p5784_p0 }
   0x7   :  { %5792 = shalt.err (!%p5789_p2)
}
   0x8   :  { %s5793_s30 = scalar_lea.vmem %s27_s22, 2048  ;;  %p5798_p4 = scmp.lt.s32.totalorder %s27_s22, %s27_s22 }
   0x9   :  { %p5794_p3 = scmp.ne.s32.totalorder %s27_s22, %s5793_s30  ;;  %p5799_p5 = scmp.lt.s32.totalorder %s5793_s30, %s5793_s30 }
   0xb   :  { %p5800_p6 = por %p5799_p5, %p5798_p4 }
   0xd   :  { %p5801_p7 = pnand %p5800_p6, %p5794_p3 }
   0xf   :  { %5804 = shalt.err (!%p5801_p7)
}
  0x10   :  { %s5836_s13 = smov 512   ;;  %s5837_s14 = smov 32  }
  0x11   :  { %32 = dma.hbm_to_vmem [thread:$0]  %s9319_s1, 2048, %s27_s22, [#allocation9], %s5836_s13, %s5836_s13, %s5837_s14  }
  0x12   :  { %s5838_s17 = smov [#allocation10]   ;;  %s5805_s21 = scalar_lea.hbm %s9326_s8, 4096 }
  0x13   :  { %s46_s18 = sshll.u32 %s5838_s17, 4  ;;  %p5806_p8 = scmp.ne.s32.totalorder %s9326_s8, %s5805_s21  ;;  %s47_s18 = int_to_ptr.vmem [resolvable:$true] %s46_s18 }
  0x14   :  { %p5809_p9 = scmp.lt.u32.totalorder %s5805_s21, %s9326_s8 }
  0x16   :  { %p5811_p10 = pnand %p5809_p9, %p5806_p8 }
  0x18   :  { %5814 = shalt.err (!%p5811_p10)
}
  0x19   :  { %s5815_s27 = scalar_lea.vmem %s47_s18, 4096  ;;  %p5820_p12 = scmp.lt.s32.totalorder %s47_s18, %s47_s18 }
  0x1a   :  { %p5816_p11 = scmp.ne.s32.totalorder %s47_s18, %s5815_s27  ;;  %p5821_p13 = scmp.lt.s32.totalorder %s5815_s27, %s5815_s27 }
  0x1c   :  { %p5822_p0 = por %p5821_p13, %p5820_p12 }
  0x1e   :  { %p5823_p1 = pnand %p5822_p0, %p5816_p11 }
  0x20   :  { %5826 = shalt.err (!%p5823_p1)
}
  0x21   :  { %s5839_s1 = smov 128   ;;  %s5840_s22 = smov 8  }
  0x22   :  { %52 = dma.hbm_to_vmem [thread:$0]  %s9326_s8, 4096, %s47_s18, [#allocation11], %s5839_s1, %s5839_s1, %s5840_s22  }
  0x23   :  { %5827 = dma.done.wait [#allocation9], 2048  }
  0x24   :  { %5828 = vsyncadd [#allocation9], 4294965248 }
  0x25   :  { %5829 = dma.done.wait [#allocation11], 4096  }
  0x26   :  { %5830 = vsyncadd [#allocation11], 4294963200  ;;  %s70_s30 = sld [smem:[#allocation0]]   ;;  %s5841_s14 = smov 1024   ;;  %v9331_v0 = vmov 0   ;;  %vm369_vm0 = vcmask 261120  }
  0x27   :  { %82 = sst [smem:[#allocation13]] %s5841_s14  ;;  %414 = vmatprep.mubr.bf16.mxu0 %v9331_v0  ;;  %487 = vmatprep.mubr.bf16.mxu1 %v9331_v0  ;;  %s5843_s15 = smov [#allocation5]  }
  0x28   :  { %84 = sst [smem:[#allocation13 + $0x1]] %s5841_s14  ;;  %s78_s16 = sshll.u32 %s5843_s15, 4  ;;  %s79_s16 = int_to_ptr.vmem [resolvable:$true] %s78_s16 }
  0x29   :  { %86 = sst [smem:[#allocation13 + $0x2]] %s5840_s22  ;;  %s5844_s8 = smov 64  }
  0x2a   :  { %90 = sst [smem:[#allocation13 + $0x4]] %s5839_s1  ;;  %s5845_s18 = smov 2  }
  0x2b   :  { %94 = sst [smem:[#allocation13 + $0x6]] %s5836_s13  ;;  %s5846_s20 = smov 4  }
  0x2c   :  { %88 = sst [smem:[#allocation13 + $0x3]] %s5844_s8  ;;  %s4577_s17 = sshll.u32 %s70_s30, 26 }
  0x2d   :  { %92 = sst [smem:[#allocation13 + $0x5]] %s5845_s18  ;;  %s4578_s19 = sadd.s32 134217728, %s4577_s17 }
  0x2e   :  { %96 = sst [smem:[#allocation13 + $0x7]] %s5844_s8  ;;  %s5847_s21 = smov [#allocation7]  }
  0x2f   :  { %98 = sst [smem:[#allocation13 + $0x8]] %s5846_s20  ;;  %s5848_s23 = smov [#allocation12]  }
  0x30   :  { %100 = dma.general %s9322_s4, 16384, %s79_s16, %s5847_s21, %s5848_s23, [#allocation13], %s4578_s19, 0  }
  0x31   :  { %117 = sst [smem:[#allocation15]] %s5836_s13  ;;  %s5849_s26 = smov [#allocation6]  }
  0x32   :  { %119 = sst [smem:[#allocation15 + $0x1]] %s5836_s13  ;;  %s113_s27 = sshll.u32 %s5849_s26, 4  ;;  %s114_s27 = int_to_ptr.vmem [resolvable:$true] %s113_s27 }
  0x33   :  { %121 = sst [smem:[#allocation15 + $0x2]] %s5846_s20  ;;  %s5850_s22 = smov 256  }
  0x34   :  { %123 = sst [smem:[#allocation15 + $0x3]] %s5844_s8  ;;  %s5851_s28 = smov [#allocation7 + $0x1]  }
  0x35   :  { %125 = sst [smem:[#allocation15 + $0x4]] %s5839_s1  ;;  %s5852_s29 = smov [#allocation14]  }
  0x36   :  { %127 = sst [smem:[#allocation15 + $0x5]] %s5845_s18 }
  0x37   :  { %129 = sst [smem:[#allocation15 + $0x6]] %s5850_s22 }
  0x38   :  { %131 = sst [smem:[#allocation15 + $0x7]] %s5844_s8 }
  0x39   :  { %133 = sst [smem:[#allocation15 + $0x8]] %s5846_s20 }
  0x3a   :  { %135 = dma.general %s9323_s5, 8192, %s114_s27, %s5851_s28, %s5852_s29, [#allocation15], %s4578_s19, 0  }
  0x3b   :  { %v147_v1 = vld [vmem:[#allocation8] sm:$0xff]  ;;  %v148_v3 = vld [vmem:[#allocation8 + $0x8] sm:$0xff]  ;;  %v149_v15 = vld [vmem:[#allocation8 + $0x10] sm:$0xff] }
  0x3c   :  { %v151_v2 = vld [vmem:[#allocation8 + $0x20] sm:$0xff]  ;;  %v152_v5 = vld [vmem:[#allocation8 + $0x28] sm:$0xff]  ;;  %v153_v17 = vld [vmem:[#allocation8 + $0x30] sm:$0xff] }
  0x3d   :  { %v4586_v4 = vcombine.high %v147_v1, %v151_v2  ;;  %v4585_v6 = vcombine.low %v147_v1, %v151_v2  ;;  %v155_v7 = vld [vmem:[#allocation8 + $0x40] sm:$0xff]  ;;  %v4588_v9 = vcombine.high %v148_v3, %v152_v5  ;;  %v4587_v10 = vcombine.low %v148_v3, %v152_v5  ;;  %v156_v12 = vld [vmem:[#allocation8 + $0x48] sm:$0xff]  ;;  %v150_v20 = vld [vmem:[#allocation8 + $0x18] sm:$0xff] }
  0x3e   :  { %v159_v8 = vld [vmem:[#allocation8 + $0x60] sm:$0xff]  ;;  %v160_v13 = vld [vmem:[#allocation8 + $0x68] sm:$0xff]  ;;  %v4590_v19 = vcombine.high %v149_v15, %v153_v17  ;;  %v154_v21 = vld [vmem:[#allocation8 + $0x38] sm:$0xff]  ;;  %v4589_v26 = vcombine.low %v149_v15, %v153_v17 }
  0x3f   :  { %v4594_v11 = vcombine.high %v155_v7, %v159_v8  ;;  %382 = vmatprep.subr.bf16.mxu0 %v4586_v4  ;;  %v4596_v14 = vcombine.high %v156_v12, %v160_v13  ;;  %455 = vmatprep.subr.bf16.mxu1 %v4588_v9  ;;  %v4593_v16 = vcombine.low %v155_v7, %v159_v8  ;;  %v5279_v22 = vld [vmem:[%s9318_s0] sm:$0xff]   ;;  %v157_v24 = vld [vmem:[#allocation8 + $0x50] sm:$0xff]  ;;  %v158_v27 = vld [vmem:[#allocation8 + $0x58] sm:$0xff] }
  0x40   :  { %383 = vmatpush1.bf16.msra.mxu0 %v4585_v6  ;;  %456 = vmatpush1.bf16.msra.mxu1 %v4587_v10  ;;  %v4595_v18 = vcombine.low %v156_v12, %v160_v13  ;;  %v4592_v23 = vcombine.high %v150_v20, %v154_v21  ;;  %v161_v25 = vld [vmem:[#allocation8 + $0x70] sm:$0xff]  ;;  %v162_v28 = vld [vmem:[#allocation8 + $0x78] sm:$0xff]  ;;  %v4591_v29 = vcombine.low %v150_v20, %v154_v21  ;;  %v5280_v34 = vld [vmem:[%s9318_s0 + $0x8] sm:$0xff]  }
  0x41   :  { %384 = vmatprep.subr.bf16.mxu0 %v4594_v11  ;;  %457 = vmatprep.subr.bf16.mxu1 %v4596_v14  ;;  %v4598_v30 = vcombine.high %v157_v24, %v161_v25  ;;  %v4600_v31 = vcombine.high %v158_v27, %v162_v28  ;;  %v4597_v32 = vcombine.low %v157_v24, %v161_v25  ;;  %v5972_v33 = vld [vmem:[%s9320_s2 + $0x4] ss:$16 sps:$4 sm:$0xff]   ;;  %v5980_v36 = vld [vmem:[%s9320_s2 + $0xc] ss:$16 sps:$4 sm:$0xff]   ;;  %v6009_v39 = vld [vmem:[%s9320_s2] ss:$16 sps:$4 sm:$0xff]  }
  0x42   :  { %v4599_v35 = vcombine.low %v158_v27, %v162_v28  ;;  %v5281_v37 = vld [vmem:[%s9318_s0 + $0x10] sm:$0xff]   ;;  %v5998_v38 = vld [vmem:[%s9318_s0 + $0x18] sm:$0xff]  }
  0x43   :  { %v6014_v40 = vld [vmem:[%s9320_s2 + $0x8] ss:$16 sps:$4 sm:$0xff]   ;;  %v6019_v41 = vld [vmem:[%s9320_s2 + $0x24] ss:$16 sps:$4 sm:$0xff]   ;;  %v6024_v42 = vld [vmem:[%s9320_s2 + $0x2c] ss:$16 sps:$4 sm:$0xff]  }
  0x44   :  { %385 = vmatpush1.bf16.msra.mxu0 %v4593_v16  ;;  %458 = vmatpush1.bf16.msra.mxu1 %v4595_v18  ;;  %v6030_v43 = vld [vmem:[%s9320_s2 + $0x20] ss:$16 sps:$4 sm:$0xff]   ;;  %v6037_v44 = vld [vmem:[%s9320_s2 + $0x28] ss:$16 sps:$4 sm:$0xff]   ;;  %v6044_v45 = vld [vmem:[%s9320_s2 + $0x44] ss:$16 sps:$4 sm:$0xff]  }
  0x45   :  { %528 = vmatprep.subr.bf16.mxu0 %v4590_v19  ;;  %601 = vmatprep.subr.bf16.mxu1 %v4592_v23  ;;  %9632 = vst [vmem:[#allocation20_spill] sm:$0xff] %v6030_v43  ;;  %9633 = vst [vmem:[#allocation21_spill] sm:$0xff] %v6037_v44  ;;  %v6051_v46 = vld [vmem:[%s9320_s2 + $0x4c] ss:$16 sps:$4 sm:$0xff]   ;;  %v6058_v47 = vld [vmem:[%s9320_s2 + $0x40] ss:$16 sps:$4 sm:$0xff]  }
  0x46   :  { %9634 = vst [vmem:[#allocation22_spill] sm:$0xff] %v6044_v45  ;;  %9635 = vst [vmem:[#allocation23_spill] sm:$0xff] %v6051_v46  ;;  %v6063_v48 = vld [vmem:[%s9320_s2 + $0x48] ss:$16 sps:$4 sm:$0xff]   ;;  %v6070_v49 = vld [vmem:[%s9320_s2 + $0x64] ss:$16 sps:$4 sm:$0xff]  }
  0x47   :  { %4601 = vmatmul.mubr.msk.bf16.vlgmr.msra.gmra.mrb[0].mxu0 %vm369_vm0, %v5279_v22  ;;  %4605 = vmatmul.mubr.msk.bf16.vlgmr.msra.gmra.mrb[0].mxu1 %vm369_vm0, %v5279_v22  ;;  %9636 = vst [vmem:[#allocation24_spill] sm:$0xff] %v6058_v47  ;;  %9637 = vst [vmem:[#allocation25_spill] sm:$0xff] %v6063_v48  ;;  %v6076_v50 = vld [vmem:[%s9320_s2 + $0x6c] ss:$16 sps:$4 sm:$0xff]   ;;  %v6084_v51 = vld [vmem:[%s9320_s2 + $0x60] ss:$16 sps:$4 sm:$0xff]  }
  0x48   :  { %529 = vmatpush1.bf16.msra.mxu0 %v4589_v26  ;;  %424 = vmatprep.mubr.bf16.mxu0 %v9331_v0  ;;  %9638 = vst [vmem:[#allocation26_spill] sm:$0xff] %v6070_v49  ;;  %9639 = vst [vmem:[#allocation27_spill] sm:$0xff] %v6076_v50  ;;  %v6091_v52 = vld [vmem:[%s9320_s2 + $0x68] ss:$16 sps:$4 sm:$0xff]   ;;  %v6096_v53 = vld [vmem:[%s9320_s2 + $0x84] ss:$16 sps:$4 sm:$0xff]  }
  0x49   :  { %497 = vmatprep.mubr.bf16.mxu1 %v9331_v0  ;;  %530 = vmatprep.subr.bf16.mxu0 %v4598_v30  ;;  %9640 = vst [vmem:[#allocation28_spill] sm:$0xff] %v6084_v51  ;;  %9641 = vst [vmem:[#allocation29_spill] sm:$0xff] %v6091_v52  ;;  %v6103_v54 = vld [vmem:[%s9320_s2 + $0x8c] ss:$16 sps:$4 sm:$0xff]   ;;  %v6110_v55 = vld [vmem:[%s9320_s2 + $0x80] ss:$16 sps:$4 sm:$0xff]  }
  0x4a   :  { %602 = vmatpush1.bf16.msra.mxu1 %v4591_v29  ;;  %9642 = vst [vmem:[#allocation30_spill] sm:$0xff] %v6096_v53  ;;  %9643 = vst [vmem:[#allocation31_spill] sm:$0xff] %v6103_v54  ;;  %v6117_v56 = vld [vmem:[%s9320_s2 + $0x88] ss:$16 sps:$4 sm:$0xff]   ;;  %v6122_v57 = vld [vmem:[%s9320_s2 + $0xa4] ss:$16 sps:$4 sm:$0xff]  }
  0x4b   :  { %603 = vmatprep.subr.bf16.mxu1 %v4600_v31  ;;  %9644 = vst [vmem:[#allocation32_spill] sm:$0xff] %v6110_v55  ;;  %9645 = vst [vmem:[#allocation33_spill] sm:$0xff] %v6117_v56  ;;  %v6128_v58 = vld [vmem:[%s9320_s2 + $0xac] ss:$16 sps:$4 sm:$0xff]   ;;  %v6136_v59 = vld [vmem:[%s9320_s2 + $0xa0] ss:$16 sps:$4 sm:$0xff]  }
  0x4c   :  { %531 = vmatpush1.bf16.msra.mxu0 %v4597_v32  ;;  %9646 = vst [vmem:[#allocation34_spill] sm:$0xff] %v6122_v57  ;;  %9647 = vst [vmem:[#allocation35_spill] sm:$0xff] %v6128_v58  ;;  %v6143_v60 = vld [vmem:[%s9320_s2 + $0xa8] ss:$16 sps:$4 sm:$0xff]   ;;  %v6148_v61 = vld [vmem:[%s9320_s2 + $0xc4] ss:$16 sps:$4 sm:$0xff]  }
  0x4d   :  { %1058 = vmatprep.subr.bf16.mxu0 %v5972_v33  ;;  %9648 = vst [vmem:[#allocation36_spill] sm:$0xff] %v6136_v59  ;;  %9649 = vst [vmem:[#allocation37_spill] sm:$0xff] %v6143_v60  ;;  %v6155_v62 = vld [vmem:[%s9320_s2 + $0xcc] ss:$16 sps:$4 sm:$0xff]   ;;  %v6162_v63 = vld [vmem:[%s9320_s2 + $0xc0] ss:$16 sps:$4 sm:$0xff]  }
  0x4e   :  { %604 = vmatpush1.bf16.msra.mxu1 %v4599_v35  ;;  %9650 = vst [vmem:[#allocation38_spill] sm:$0xff] %v6148_v61  ;;  %9651 = vst [vmem:[#allocation39_spill] sm:$0xff] %v6155_v62  ;;  %v6169_v1 = vld [vmem:[%s9320_s2 + $0xc8] ss:$16 sps:$4 sm:$0xff]   ;;  %v6174_v2 = vld [vmem:[%s9320_s2 + $0xe4] ss:$16 sps:$4 sm:$0xff]  }
  0x4f   :  { %4602 = vmatmul.mubr.msk.bf16.gmra.mrb[4].mxu0 %vm369_vm0, %v5280_v34  ;;  %1099 = vmatprep.subr.bf16.mxu1 %v5980_v36  ;;  %9652 = vst [vmem:[#allocation40_spill] sm:$0xff] %v6162_v63  ;;  %9653 = vst [vmem:[#allocation41_spill] sm:$0xff] %v6169_v1  ;;  %v6180_v3 = vld [vmem:[%s9320_s2 + $0xec] ss:$16 sps:$4 sm:$0xff]   ;;  %v6190_v4 = vld [vmem:[%s9320_s2 + $0xe0] ss:$16 sps:$4 sm:$0xff]  }
  0x50   :  { %4606 = vmatmul.mubr.msk.bf16.gmra.mrb[4].mxu1 %vm369_vm0, %v5280_v34  ;;  %434 = vmatprep.mubr.bf16.mxu0 %v9331_v0  ;;  %9654 = vst [vmem:[#allocation42_spill] sm:$0xff] %v6174_v2  ;;  %9655 = vst [vmem:[#allocation43_spill] sm:$0xff] %v6180_v3  ;;  %v6197_v5 = vld [vmem:[%s9320_s2 + $0xe8] ss:$16 sps:$4 sm:$0xff]   ;;  %v6202_v6 = vld [vmem:[%s9320_s2 + $0x104] ss:$16 sps:$4 sm:$0xff]  }
  0x51   :  { %507 = vmatprep.mubr.bf16.mxu1 %v9331_v0  ;;  %9656 = vst [vmem:[#allocation44_spill] sm:$0xff] %v6190_v4  ;;  %9657 = vst [vmem:[#allocation45_spill] sm:$0xff] %v6197_v5  ;;  %v6208_v7 = vld [vmem:[%s9320_s2 + $0x10c] ss:$16 sps:$4 sm:$0xff]   ;;  %v6216_v8 = vld [vmem:[%s9320_s2 + $0x100] ss:$16 sps:$4 sm:$0xff]  }
  0x52   :  { %9658 = vst [vmem:[#allocation46_spill] sm:$0xff] %v6202_v6  ;;  %9659 = vst [vmem:[#allocation47_spill] sm:$0xff] %v6208_v7  ;;  %v6223_v9 = vld [vmem:[%s9320_s2 + $0x108] ss:$16 sps:$4 sm:$0xff]   ;;  %v6228_v10 = vld [vmem:[%s9320_s2 + $0x124] ss:$16 sps:$4 sm:$0xff]  }
  0x53   :  { %9660 = vst [vmem:[#allocation48_spill] sm:$0xff] %v6216_v8  ;;  %9661 = vst [vmem:[#allocation49_spill] sm:$0xff] %v6223_v9  ;;  %v6234_v11 = vld [vmem:[%s9320_s2 + $0x12c] ss:$16 sps:$4 sm:$0xff]   ;;  %v6240_v12 = vld [vmem:[%s9320_s2 + $0x120] ss:$16 sps:$4 sm:$0xff]  }
  0x54   :  { %9662 = vst [vmem:[#allocation50_spill] sm:$0xff] %v6228_v10  ;;  %9663 = vst [vmem:[#allocation51_spill] sm:$0xff] %v6234_v11  ;;  %v6247_v13 = vld [vmem:[%s9320_s2 + $0x128] ss:$16 sps:$4 sm:$0xff]   ;;  %v6252_v14 = vld [vmem:[%s9320_s2 + $0x144] ss:$16 sps:$4 sm:$0xff]  }
  0x55   :  { %9664 = vst [vmem:[#allocation52_spill] sm:$0xff] %v6240_v12  ;;  %9665 = vst [vmem:[#allocation53_spill] sm:$0xff] %v6247_v13  ;;  %v6258_v15 = vld [vmem:[%s9320_s2 + $0x14c] ss:$16 sps:$4 sm:$0xff]   ;;  %v6264_v16 = vld [vmem:[%s9320_s2 + $0x140] ss:$16 sps:$4 sm:$0xff]  }
  0x56   :  { %9666 = vst [vmem:[#allocation54_spill] sm:$0xff] %v6252_v14  ;;  %9667 = vst [vmem:[#allocation55_spill] sm:$0xff] %v6258_v15  ;;  %v6271_v17 = vld [vmem:[%s9320_s2 + $0x148] ss:$16 sps:$4 sm:$0xff]   ;;  %v6276_v18 = vld [vmem:[%s9320_s2 + $0x164] ss:$16 sps:$4 sm:$0xff]  }
  0x57   :  { %4603 = vmatmul.mubr.msk.bf16.gmra.mrb[8].mxu0 %vm369_vm0, %v5281_v37  ;;  %9668 = vst [vmem:[#allocation56_spill] sm:$0xff] %v6264_v16  ;;  %9669 = vst [vmem:[#allocation57_spill] sm:$0xff] %v6271_v17  ;;  %v6282_v19 = vld [vmem:[%s9320_s2 + $0x16c] ss:$16 sps:$4 sm:$0xff]   ;;  %v6288_v20 = vld [vmem:[%s9320_s2 + $0x160] ss:$16 sps:$4 sm:$0xff]  }
  0x58   :  { %4607 = vmatmul.mubr.msk.bf16.gmra.mrb[8].mxu1 %vm369_vm0, %v5281_v37  ;;  %444 = vmatprep.mubr.bf16.mxu0 %v9331_v0  ;;  %9670 = vst [vmem:[#allocation58_spill] sm:$0xff] %v6276_v18  ;;  %9671 = vst [vmem:[#allocation59_spill] sm:$0xff] %v6282_v19  ;;  %v6295_v21 = vld [vmem:[%s9320_s2 + $0x168] ss:$16 sps:$4 sm:$0xff]   ;;  %v6306_v23 = vld [vmem:[%s9320_s2 + $0x18c] ss:$16 sps:$4 sm:$0xff]  }
  0x59   :  { %517 = vmatprep.mubr.bf16.mxu1 %v9331_v0  ;;  %9672 = vst [vmem:[#allocation60_spill] sm:$0xff] %v6288_v20  ;;  %9673 = vst [vmem:[#allocation61_spill] sm:$0xff] %v6295_v21  ;;  %v6312_v24 = vld [vmem:[%s9320_s2 + $0x180] ss:$16 sps:$4 sm:$0xff]   ;;  %v6319_v25 = vld [vmem:[%s9320_s2 + $0x188] ss:$16 sps:$4 sm:$0xff]  }
  0x5a   :  { %9675 = vst [vmem:[#allocation63_spill] sm:$0xff] %v6306_v23  ;;  %9676 = vst [vmem:[#allocation64_spill] sm:$0xff] %v6312_v24  ;;  %v6324_v26 = vld [vmem:[%s9320_s2 + $0x1a4] ss:$16 sps:$4 sm:$0xff]   ;;  %v6330_v27 = vld [vmem:[%s9320_s2 + $0x1ac] ss:$16 sps:$4 sm:$0xff]  }
  0x5b   :  { %9677 = vst [vmem:[#allocation65_spill] sm:$0xff] %v6319_v25  ;;  %9678 = vst [vmem:[#allocation66_spill] sm:$0xff] %v6324_v26  ;;  %v6336_v28 = vld [vmem:[%s9320_s2 + $0x1a0] ss:$16 sps:$4 sm:$0xff]   ;;  %v6343_v29 = vld [vmem:[%s9320_s2 + $0x1a8] ss:$16 sps:$4 sm:$0xff]  }
  0x5c   :  { %9679 = vst [vmem:[#allocation67_spill] sm:$0xff] %v6330_v27  ;;  %9680 = vst [vmem:[#allocation68_spill] sm:$0xff] %v6336_v28  ;;  %v6348_v30 = vld [vmem:[%s9320_s2 + $0x1c4] ss:$16 sps:$4 sm:$0xff]   ;;  %v6354_v31 = vld [vmem:[%s9320_s2 + $0x1cc] ss:$16 sps:$4 sm:$0xff]  }
  0x5d   :  { %9681 = vst [vmem:[#allocation69_spill] sm:$0xff] %v6343_v29  ;;  %9682 = vst [vmem:[#allocation70_spill] sm:$0xff] %v6348_v30  ;;  %v6360_v32 = vld [vmem:[%s9320_s2 + $0x1c0] ss:$16 sps:$4 sm:$0xff]   ;;  %v6372_v35 = vld [vmem:[%s9320_s2 + $0x1e4] ss:$16 sps:$4 sm:$0xff]  }
  0x5e   :  { %9683 = vst [vmem:[#allocation71_spill] sm:$0xff] %v6354_v31  ;;  %9684 = vst [vmem:[#allocation72_spill] sm:$0xff] %v6360_v32 }
  0x5f   :  { %4604 = vmatmul.mubr.msk.bf16.gmra.mrb[12].mxu0 %vm369_vm0, %v5998_v38  ;;  %9686 = vst [vmem:[#allocation74_spill] sm:$0xff] %v6372_v35 }
  0x60   :  { %4608 = vmatmul.mubr.msk.bf16.gmra.mrb[12].mxu1 %vm369_vm0, %v5998_v38  ;;  %560 = vmatprep.mubr.bf16.mxu0 %v9331_v0 }
  0x61   :  { %633 = vmatprep.mubr.bf16.mxu1 %v9331_v0 }
  0x67   :  { %4609 = vmatmul.mubr.msk.bf16.vlgmr.msra.gmra.mrb[16].mxu0 %vm369_vm0, %v5279_v22 }
  0x68   :  { %4613 = vmatmul.mubr.msk.bf16.vlgmr.msra.gmra.mrb[16].mxu1 %vm369_vm0, %v5279_v22  ;;  %1059 = vmatpush1.bf16.msra.mxu0 %v6009_v39  ;;  %v6300_v22 = vld [vmem:[%s9320_s2 + $0x184] ss:$16 sps:$4 sm:$0xff]  }
  0x69   :  { %1100 = vmatpush1.bf16.msra.mxu1 %v6014_v40  ;;  %1060 = vmatprep.subr.bf16.mxu0 %v6019_v41  ;;  %9674 = vst [vmem:[#allocation62_spill] sm:$0xff] %v6300_v22 }
  0x6a   :  { %1101 = vmatprep.subr.bf16.mxu1 %v6024_v42  ;;  %570 = vmatprep.mubr.bf16.mxu0 %v9331_v0 }
  0x6b   :  { %643 = vmatprep.mubr.bf16.mxu1 %v9331_v0 }
  0x6c   :  { %1061 = vmatpush1.bf16.msra.mxu0 %v6030_v43 }
  0x6d   :  { %1102 = vmatpush1.bf16.msra.mxu1 %v6037_v44  ;;  %1062 = vmatprep.subr.bf16.mxu0 %v6044_v45 }
  0x6e   :  { %1103 = vmatprep.subr.bf16.mxu1 %v6051_v46 }
  0x6f   :  { %4610 = vmatmul.mubr.msk.bf16.gmra.mrb[20].mxu0 %vm369_vm0, %v5280_v34 }
  0x70   :  { %4614 = vmatmul.mubr.msk.bf16.gmra.mrb[20].mxu1 %vm369_vm0, %v5280_v34  ;;  %1063 = vmatpush1.bf16.msra.mxu0 %v6058_v47  ;;  %v6367_v34 = vld [vmem:[%s9320_s2 + $0x1c8] ss:$16 sps:$4 sm:$0xff]  }
  0x71   :  { %1104 = vmatpush1.bf16.msra.mxu1 %v6063_v48  ;;  %1064 = vmatprep.subr.bf16.mxu0 %v6070_v49  ;;  %9685 = vst [vmem:[#allocation73_spill] sm:$0xff] %v6367_v34 }
  0x72   :  { %1105 = vmatprep.subr.bf16.mxu1 %v6076_v50  ;;  %580 = vmatprep.mubr.bf16.mxu0 %v9331_v0 }
  0x73   :  { %653 = vmatprep.mubr.bf16.mxu1 %v9331_v0 }
  0x74   :  { %1065 = vmatpush1.bf16.msra.mxu0 %v6084_v51 }
  0x75   :  { %1106 = vmatpush1.bf16.msra.mxu1 %v6091_v52  ;;  %1066 = vmatprep.subr.bf16.mxu0 %v6096_v53 }
  0x76   :  { %1107 = vmatprep.subr.bf16.mxu1 %v6103_v54 }
  0x77   :  { %4611 = vmatmul.mubr.msk.bf16.gmra.mrb[24].mxu0 %vm369_vm0, %v5281_v37 }
  0x78   :  { %4615 = vmatmul.mubr.msk.bf16.gmra.mrb[24].mxu1 %vm369_vm0, %v5281_v37  ;;  %1067 = vmatpush1.bf16.msra.mxu0 %v6110_v55  ;;  %v6378_v37 = vld [vmem:[%s9320_s2 + $0x1ec] ss:$16 sps:$4 sm:$0xff]  }
  0x79   :  { %1108 = vmatpush1.bf16.msra.mxu1 %v6117_v56  ;;  %1068 = vmatprep.subr.bf16.mxu0 %v6122_v57  ;;  %9687 = vst [vmem:[#allocation75_spill] sm:$0xff] %v6378_v37 }
  0x7a   :  { %1109 = vmatprep.subr.bf16.mxu1 %v6128_v58  ;;  %590 = vmatprep.mubr.bf16.mxu0 %v9331_v0 }
  0x7b   :  { %663 = vmatprep.mubr.bf16.mxu1 %v9331_v0 }
  0x7c   :  { %1069 = vmatpush1.bf16.msra.mxu0 %v6136_v59 }
  0x7d   :  { %1110 = vmatpush1.bf16.msra.mxu1 %v6143_v60  ;;  %1070 = vmatprep.subr.bf16.mxu0 %v6148_v61 }
  0x7e   :  { %1111 = vmatprep.subr.bf16.mxu1 %v6155_v62 }
  0x7f   :  { %4612 = vmatmul.mubr.msk.bf16.gmra.mrb[28].mxu0 %vm369_vm0, %v5998_v38 }
  0x80   :  { %4616 = vmatmul.mubr.msk.bf16.gmra.mrb[28].mxu1 %vm369_vm0, %v5998_v38  ;;  %1071 = vmatpush1.bf16.msra.mxu0 %v6162_v63  ;;  %v6384_v38 = vld [vmem:[%s9320_s2 + $0x1e0] ss:$16 sps:$4 sm:$0xff]  }
  0x81   :  { %1112 = vmatpush1.bf16.msra.mxu1 %v6169_v1  ;;  %1072 = vmatprep.subr.bf16.mxu0 %v6174_v2  ;;  %9688 = vst [vmem:[#allocation76_spill] sm:$0xff] %v6384_v38 }
  0x82   :  { %1113 = vmatprep.subr.bf16.mxu1 %v6180_v3  ;;  %1090 = vmatprep.mubr.bf16.mxu0 %v9331_v0 }
  0x83   :  { %1131 = vmatprep.mubr.bf16.mxu1 %v9331_v0  ;;  %v6391_v0 = vld [vmem:[%s9320_s2 + $0x1e8] ss:$16 sps:$4 sm:$0xff]  }
  0x84   :  { %1073 = vmatpush1.bf16.msra.mxu0 %v6190_v4  ;;  %9689 = vst [vmem:[#allocation77_spill] sm:$0xff] %v6391_v0 }
  0x85   :  { %1114 = vmatpush1.bf16.msra.mxu1 %v6197_v5  ;;  %1074 = vmatprep.subr.bf16.mxu0 %v6202_v6 }
  0x86   :  { %1115 = vmatprep.subr.bf16.mxu1 %v6208_v7 }
  0x88   :  { %1075 = vmatpush1.bf16.msra.mxu0 %v6216_v8 }
  0x89   :  { %1116 = vmatpush1.bf16.msra.mxu1 %v6223_v9  ;;  %1076 = vmatprep.subr.bf16.mxu0 %v6228_v10 }
  0x8a   :  { %1117 = vmatprep.subr.bf16.mxu1 %v6234_v11 }
  0x8c   :  { %1077 = vmatpush1.bf16.msra.mxu0 %v6240_v12 }
  0x8d   :  { %1118 = vmatpush1.bf16.msra.mxu1 %v6247_v13  ;;  %1078 = vmatprep.subr.bf16.mxu0 %v6252_v14 }
  0x8e   :  { %1119 = vmatprep.subr.bf16.mxu1 %v6258_v15 }
  0x90   :  { %1079 = vmatpush1.bf16.msra.mxu0 %v6264_v16 }
  0x91   :  { %1120 = vmatpush1.bf16.msra.mxu1 %v6271_v17  ;;  %1080 = vmatprep.subr.bf16.mxu0 %v6276_v18 }
  0x92   :  { %1121 = vmatprep.subr.bf16.mxu1 %v6282_v19 }
  0x94   :  { %1081 = vmatpush1.bf16.msra.mxu0 %v6288_v20 }
  0x95   :  { %1122 = vmatpush1.bf16.msra.mxu1 %v6295_v21  ;;  %1082 = vmatprep.subr.bf16.mxu0 %v6300_v22 }
  0x96   :  { %1123 = vmatprep.subr.bf16.mxu1 %v6306_v23 }
  0x98   :  { %1083 = vmatpush1.bf16.msra.mxu0 %v6312_v24 }
  0x99   :  { %1124 = vmatpush1.bf16.msra.mxu1 %v6319_v25  ;;  %1084 = vmatprep.subr.bf16.mxu0 %v6324_v26 }
  0x9a   :  { %1125 = vmatprep.subr.bf16.mxu1 %v6330_v27 }
  0x9c   :  { %1085 = vmatpush1.bf16.msra.mxu0 %v6336_v28 }
  0x9d   :  { %1126 = vmatpush1.bf16.msra.mxu1 %v6343_v29  ;;  %1086 = vmatprep.subr.bf16.mxu0 %v6348_v30 }
  0x9e   :  { %1127 = vmatprep.subr.bf16.mxu1 %v6354_v31 }
  0xa0   :  { %1087 = vmatpush1.bf16.msra.mxu0 %v6360_v32  ;;  %v9690_v32 = vmov 0  }
  0xa1   :  { %1128 = vmatpush1.bf16.msra.mxu1 %v6367_v34  ;;  %1088 = vmatprep.subr.bf16.mxu0 %v6372_v35 }
  0xa2   :  { %1129 = vmatprep.subr.bf16.mxu1 %v6378_v37 }
  0xa4   :  { %1089 = vmatpush1.bf16.msra.mxu0 %v6384_v38 }
  0xa5   :  { %1130 = vmatpush1.bf16.msra.mxu1 %v6391_v0  ;;  %1191 = vmatprep.subr.bf16.mxu0 %v5972_v33 }
  0xa6   :  { %1232 = vmatprep.subr.bf16.mxu1 %v5980_v36 }
  0xa7   :  { %1091 = vmatmul.mubr.bf16.vlgmr.msra.gmra.mrb[32].mxu0 %v9690_v32 }
  0xa8   :  { %1132 = vmatmul.mubr.bf16.vlgmr.msra.gmra.mrb[32].mxu1 %v9690_v32  ;;  %1192 = vmatpush1.bf16.msra.mxu0 %v6009_v39  ;;  %v9691_v32 = vld [vmem:[#allocation72_spill] sm:$0xff] }
  0xa9   :  { %1233 = vmatpush1.bf16.msra.mxu1 %v6014_v40  ;;  %1193 = vmatprep.subr.bf16.mxu0 %v6019_v41 }
  0xaa   :  { %1234 = vmatprep.subr.bf16.mxu1 %v6024_v42 }
  0xac   :  { %1194 = vmatpush1.bf16.msra.mxu0 %v6030_v43 }
  0xad   :  { %1235 = vmatpush1.bf16.msra.mxu1 %v6037_v44  ;;  %1195 = vmatprep.subr.bf16.mxu0 %v6044_v45 }
  0xae   :  { %1236 = vmatprep.subr.bf16.mxu1 %v6051_v46 }
  0xb0   :  { %1196 = vmatpush1.bf16.msra.mxu0 %v6058_v47 }
  0xb1   :  { %1237 = vmatpush1.bf16.msra.mxu1 %v6063_v48  ;;  %1197 = vmatprep.subr.bf16.mxu0 %v6070_v49 }
  0xb2   :  { %1238 = vmatprep.subr.bf16.mxu1 %v6076_v50 }
  0xb4   :  { %1198 = vmatpush1.bf16.msra.mxu0 %v6084_v51 }
  0xb5   :  { %1239 = vmatpush1.bf16.msra.mxu1 %v6091_v52  ;;  %1199 = vmatprep.subr.bf16.mxu0 %v6096_v53 }
  0xb6   :  { %1240 = vmatprep.subr.bf16.mxu1 %v6103_v54 }
  0xb8   :  { %1200 = vmatpush1.bf16.msra.mxu0 %v6110_v55 }
  0xb9   :  { %1241 = vmatpush1.bf16.msra.mxu1 %v6117_v56  ;;  %1201 = vmatprep.subr.bf16.mxu0 %v6122_v57 }
  0xba   :  { %1242 = vmatprep.subr.bf16.mxu1 %v6128_v58 }
  0xbc   :  { %1202 = vmatpush1.bf16.msra.mxu0 %v6136_v59 }
  0xbd   :  { %1243 = vmatpush1.bf16.msra.mxu1 %v6143_v60  ;;  %1203 = vmatprep.subr.bf16.mxu0 %v6148_v61 }
  0xbe   :  { %1244 = vmatprep.subr.bf16.mxu1 %v6155_v62 }
  0xc0   :  { %1204 = vmatpush1.bf16.msra.mxu0 %v6162_v63 }
  0xc1   :  { %1245 = vmatpush1.bf16.msra.mxu1 %v6169_v1  ;;  %1205 = vmatprep.subr.bf16.mxu0 %v6174_v2 }
  0xc2   :  { %1246 = vmatprep.subr.bf16.mxu1 %v6180_v3 }
  0xc4   :  { %1206 = vmatpush1.bf16.msra.mxu0 %v6190_v4 }
  0xc5   :  { %1247 = vmatpush1.bf16.msra.mxu1 %v6197_v5  ;;  %1207 = vmatprep.subr.bf16.mxu0 %v6202_v6 }
  0xc6   :  { %1248 = vmatprep.subr.bf16.mxu1 %v6208_v7 }
  0xc8   :  { %1208 = vmatpush1.bf16.msra.mxu0 %v6216_v8 }
  0xc9   :  { %1249 = vmatpush1.bf16.msra.mxu1 %v6223_v9  ;;  %1209 = vmatprep.subr.bf16.mxu0 %v6228_v10 }
  0xca   :  { %1250 = vmatprep.subr.bf16.mxu1 %v6234_v11 }
  0xcc   :  { %1210 = vmatpush1.bf16.msra.mxu0 %v6240_v12 }
  0xcd   :  { %1251 = vmatpush1.bf16.msra.mxu1 %v6247_v13  ;;  %1211 = vmatprep.subr.bf16.mxu0 %v6252_v14 }
  0xce   :  { %1252 = vmatprep.subr.bf16.mxu1 %v6258_v15 }
  0xd0   :  { %1212 = vmatpush1.bf16.msra.mxu0 %v6264_v16 }
  0xd1   :  { %1253 = vmatpush1.bf16.msra.mxu1 %v6271_v17  ;;  %1213 = vmatprep.subr.bf16.mxu0 %v6276_v18 }
  0xd2   :  { %1254 = vmatprep.subr.bf16.mxu1 %v6282_v19 }
  0xd4   :  { %1214 = vmatpush1.bf16.msra.mxu0 %v6288_v20 }
  0xd5   :  { %1255 = vmatpush1.bf16.msra.mxu1 %v6295_v21  ;;  %1215 = vmatprep.subr.bf16.mxu0 %v6300_v22 }
  0xd6   :  { %1256 = vmatprep.subr.bf16.mxu1 %v6306_v23 }
  0xd8   :  { %1216 = vmatpush1.bf16.msra.mxu0 %v6312_v24 }
  0xd9   :  { %1257 = vmatpush1.bf16.msra.mxu1 %v6319_v25  ;;  %1217 = vmatprep.subr.bf16.mxu0 %v6324_v26 }
  0xda   :  { %1258 = vmatprep.subr.bf16.mxu1 %v6330_v27 }
  0xdc   :  { %1218 = vmatpush1.bf16.msra.mxu0 %v6336_v28 }
  0xdd   :  { %1259 = vmatpush1.bf16.msra.mxu1 %v6343_v29  ;;  %1219 = vmatprep.subr.bf16.mxu0 %v6348_v30  ;;  %v9348_v29 = vlaneseq }
  0xde   :  { %1260 = vmatprep.subr.bf16.mxu1 %v6354_v31 }
  0xdf   :  { %v6465_v30 = vshrl.u32 %v9348_v29, 7 }
  0xe0   :  { %1220 = vmatpush1.bf16.msra.mxu0 %v9691_v32 }
  0xe1   :  { %1261 = vmatpush1.bf16.msra.mxu1 %v6367_v34  ;;  %1221 = vmatprep.subr.bf16.mxu0 %v6372_v35  ;;  %9692 = vst [vmem:[#allocation78_spill] sm:$0xff] %v6465_v30  ;;  %v9357_v32 = vsub.s32 2, %v6465_v30  ;;  %v9359_v34 = vsub.s32 0, %v6465_v30  ;;  %v9693_v31 = vsub.s32 3, %v6465_v30  ;;  %v9694_v28 = vsub.s32 1, %v6465_v30 }
  0xe2   :  { %1262 = vmatprep.subr.bf16.mxu1 %v6378_v37  ;;  %vm138_vm1 = vcmp.lt.s32.totalorder %v6465_v30, 4 }
  0xe3   :  { %vm4684_vm2 = vmneg %vm138_vm1 }
  0xe4   :  { %1222 = vmatpush1.bf16.msra.mxu0 %v6384_v38  ;;  %v6473_v38 = vld [vmem:[%s9321_s3] sm:$0xff]  ;;  %vm6784_vm3 = vmpackc.low %vm4684_vm2, %vm4684_vm2 }
  0xe5   :  { %1263 = vmatpush1.bf16.msra.mxu1 %v6391_v0  ;;  %1324 = vmatprep.subr.bf16.mxu0 %v5972_v33  ;;  %v6486_v29 = vrot.slane %v6473_v38, %v9359_v34  ;;  %v6495_v0 = vrot.slane %v6473_v38, %v9693_v31  ;;  %v6500_v27 = vrot.slane %v6473_v38, %v9694_v28  ;;  %vm6794_vm4 = vmpackc.low %vm138_vm1, %vm138_vm1 }
  0xe6   :  { %1365 = vmatprep.subr.bf16.mxu1 %v5980_v36  ;;  %v6481_v36 = vrot.slane %v6473_v38, %v9357_v32 }
 0x11a   :  { %v6476_v33 = vpop.f32.mrb[0].mxu0  ;;  %v6490_v37 = vpop.f32.mrb[0].mxu1 }
 0x11b   :  { %v6488_v35 = vpop.f32.mrb[1].mxu0  ;;  %v6502_v26 = vpop.f32.mrb[1].mxu1 }
 0x11c   :  { %v420_v32 = vpop.f32.mrb[2].mxu0  ;;  %v493_v24 = vpop.f32.mrb[2].mxu1 }
 0x11d   :  { %v6505_v34 = vadd.f32 %v420_v32, %v6486_v29  ;;  %v422_v25 = vpop.f32.mrb[3].mxu0  ;;  %v6511_v22 = vadd.f32 %v493_v24, %v6481_v36  ;;  %v495_v31 = vpop.f32.mrb[3].mxu1 }
 0x11e   :  { %v6508_v23 = vadd.f32 %v422_v25, %v6500_v27  ;;  %v6514_v21 = vadd.f32 %v495_v31, %v6495_v0 }
 0x122   :  { %v426_v28 = vpop.f32.mrb[4].mxu0 }
 0x123   :  { %v6517_v20 = vadd.f32 %v426_v28, %v6486_v29  ;;  %v428_v19 = vpop.f32.mrb[5].mxu0  ;;  %v499_v18 = vpop.f32.mrb[4].mxu1 }
 0x124   :  { %v6520_v32 = vadd.f32 %v428_v19, %v6500_v27  ;;  %v430_v17 = vpop.f32.mrb[6].mxu0  ;;  %v6523_v25 = vadd.f32 %v499_v18, %v6481_v36  ;;  %v501_v16 = vpop.f32.mrb[5].mxu1 }
 0x125   :  { %v6526_v24 = vadd.f32 %v430_v17, %v6486_v29  ;;  %v432_v15 = vpop.f32.mrb[7].mxu0  ;;  %v6529_v31 = vadd.f32 %v501_v16, %v6495_v0  ;;  %v503_v14 = vpop.f32.mrb[6].mxu1 }
 0x126   :  { %v6532_v28 = vadd.f32 %v432_v15, %v6500_v27  ;;  %v6535_v13 = vadd.f32 %v503_v14, %v6481_v36  ;;  %v505_v19 = vpop.f32.mrb[7].mxu1 }
 0x127   :  { %v6538_v12 = vadd.f32 %v505_v19, %v6495_v0 }
 0x12a   :  { %v436_v18 = vpop.f32.mrb[8].mxu0 }
 0x12b   :  { %v6541_v11 = vadd.f32 %v436_v18, %v6486_v29  ;;  %v438_v17 = vpop.f32.mrb[9].mxu0  ;;  %v509_v10 = vpop.f32.mrb[8].mxu1 }
 0x12c   :  { %v6544_v16 = vadd.f32 %v438_v17, %v6500_v27  ;;  %v440_v9 = vpop.f32.mrb[10].mxu0  ;;  %v6547_v15 = vadd.f32 %v509_v10, %v6481_v36  ;;  %v511_v8 = vpop.f32.mrb[9].mxu1 }
 0x12d   :  { %v6550_v14 = vadd.f32 %v440_v9, %v6486_v29  ;;  %v442_v7 = vpop.f32.mrb[11].mxu0  ;;  %v6553_v19 = vadd.f32 %v511_v8, %v6495_v0  ;;  %v513_v6 = vpop.f32.mrb[10].mxu1 }
 0x12e   :  { %v6556_v18 = vadd.f32 %v442_v7, %v6500_v27  ;;  %v6559_v5 = vadd.f32 %v513_v6, %v6481_v36  ;;  %v515_v17 = vpop.f32.mrb[11].mxu1  ;;  %v9397_v6 = vsub.s32 5, %v6465_v30 }
 0x12f   :  { %v6562_v4 = vadd.f32 %v515_v17, %v6495_v0 }
 0x132   :  { %v446_v10 = vpop.f32.mrb[12].mxu0 }
 0x133   :  { %v447_v3 = vadd.f32 %v446_v10, %v6486_v29  ;;  %v448_v9 = vpop.f32.mrb[13].mxu0  ;;  %v519_v2 = vpop.f32.mrb[12].mxu1 }
 0x134   :  { %v449_v8 = vadd.f32 %v448_v9, %v6500_v27  ;;  %v450_v63 = vpop.f32.mrb[14].mxu0  ;;  %v520_v7 = vadd.f32 %v519_v2, %v6481_v36  ;;  %v521_v62 = vpop.f32.mrb[13].mxu1  ;;  %v9695_v2 = vsub.s32 4, %v6465_v30 }
 0x135   :  { %v451_v17 = vadd.f32 %v450_v63, %v6486_v29  ;;  %v452_v60 = vpop.f32.mrb[15].mxu0  ;;  %v522_v59 = vadd.f32 %v521_v62, %v6495_v0  ;;  %v523_v10 = vpop.f32.mrb[14].mxu1  ;;  %v6584_v63 = vrot.slane %v6473_v38, %v9397_v6  ;;  %v9696_v62 = vsub.s32 6, %v6465_v30 }
 0x136   :  { %v453_v1 = vadd.f32 %v452_v60, %v6500_v27  ;;  %v524_v9 = vadd.f32 %v523_v10, %v6481_v36  ;;  %v525_v57 = vpop.f32.mrb[15].mxu1  ;;  %v6578_v56 = vrot.slane %v6473_v38, %v9695_v2  ;;  %v9697_v60 = vsub.s32 7, %v6465_v30  ;;  %v7030_v30 = vld [vmem:[%s9320_s2 + $0xa8] ss:$16 sps:$4 sm:$0xff]  }
 0x137   :  { %v526_v61 = vadd.f32 %v525_v57, %v6495_v0  ;;  %v6589_v58 = vrot.slane %v6473_v38, %v9696_v62 }
 0x138   :  { %v6594_v10 = vrot.slane %v6473_v38, %v9697_v60 }
 0x13a   :  { %v562_v55 = vpop.f32.mrb[16].mxu0 }
 0x13b   :  { %v563_v2 = vadd.f32 %v562_v55, %v6578_v56  ;;  %v564_v54 = vpop.f32.mrb[17].mxu0  ;;  %v635_v57 = vpop.f32.mrb[16].mxu1 }
 0x13c   :  { %v565_v53 = vadd.f32 %v564_v54, %v6584_v63  ;;  %v566_v52 = vpop.f32.mrb[18].mxu0  ;;  %v636_v6 = vadd.f32 %v635_v57, %v6589_v58  ;;  %v637_v51 = vpop.f32.mrb[17].mxu1 }
 0x13d   :  { %v2079_v62 = vrot.slane %v563_v2, 4  ;;  %v567_v50 = vadd.f32 %v566_v52, %v6578_v56  ;;  %v568_v49 = vpop.f32.mrb[19].mxu0  ;;  %v638_v38 = vadd.f32 %v637_v51, %v6594_v10  ;;  %v639_v60 = vpop.f32.mrb[18].mxu1 }
 0x13e   :  { %v2080_v48 = vrot.slane %v565_v53, 4  ;;  %v569_v55 = vadd.f32 %v568_v49, %v6584_v63  ;;  %v2081_v47 = vrot.slane %v636_v6, 4  ;;  %v640_v46 = vadd.f32 %v639_v60, %v6589_v58  ;;  %v641_v54 = vpop.f32.mrb[19].mxu1 }
 0x13f   :  { %v1946_v45 = vrot.slane %v567_v50, 4  ;;  %v2082_v44 = vrot.slane %v638_v38, 4  ;;  %v642_v57 = vadd.f32 %v641_v54, %v6594_v10  ;;  %v6607_v2 = vsel %vm138_vm1, %v451_v17, %v2079_v62 }
 0x140   :  { %9698 = vst [vmem:[#allocation79_spill] sm:$0xff] %v6607_v2  ;;  %v1947_v52 = vrot.slane %v569_v55, 4  ;;  %v1948_v43 = vrot.slane %v640_v46, 4  ;;  %v6611_v51 = vsel %vm138_vm1, %v524_v9, %v2081_v47  ;;  %v6615_v49 = vsel %vm138_vm1, %v453_v1, %v2080_v48  ;;  %v7066_v2 = vld [vmem:[%s9320_s2 + $0xec] ss:$16 sps:$4 sm:$0xff]  }
 0x141   :  { %9699 = vst [vmem:[#allocation80_spill] sm:$0xff] %v6611_v51  ;;  %9700 = vst [vmem:[#allocation81_spill] sm:$0xff] %v6615_v49  ;;  %v1949_v53 = vrot.slane %v642_v57, 4  ;;  %v6619_v50 = vsel %vm138_vm1, %v447_v3, %v1946_v45  ;;  %v6623_v6 = vsel %vm138_vm1, %v526_v61, %v2082_v44  ;;  %v7054_v49 = vld [vmem:[%s9320_s2 + $0xc8] ss:$16 sps:$4 sm:$0xff]  }
 0x142   :  { %9701 = vst [vmem:[#allocation82_spill] sm:$0xff] %v6619_v50  ;;  %9702 = vst [vmem:[#allocation83_spill] sm:$0xff] %v6623_v6  ;;  %v572_v17 = vpop.f32.mrb[20].mxu0  ;;  %v6627_v46 = vsel %vm138_vm1, %v520_v7, %v1948_v43  ;;  %v6631_v47 = vsel %vm138_vm1, %v449_v8, %v1947_v52  ;;  %v7048_v6 = vld [vmem:[%s9320_s2 + $0xc0] ss:$16 sps:$4 sm:$0xff]  }
 0x143   :  { %9703 = vst [vmem:[#allocation84_spill] sm:$0xff] %v6627_v46  ;;  %9704 = vst [vmem:[#allocation85_spill] sm:$0xff] %v6631_v47  ;;  %v573_v48 = vadd.f32 %v572_v17, %v6578_v56  ;;  %v645_v1 = vpop.f32.mrb[20].mxu1  ;;  %v574_v9 = vpop.f32.mrb[21].mxu0  ;;  %v6636_v45 = vsel %vm138_vm1, %v522_v59, %v1949_v53  ;;  %v7060_v51 = vld [vmem:[%s9320_s2 + $0xe4] ss:$16 sps:$4 sm:$0xff]  }
 0x144   :  { %9705 = vst [vmem:[#allocation86_spill] sm:$0xff] %v6636_v45  ;;  %v646_v44 = vadd.f32 %v645_v1, %v6589_v58  ;;  %v575_v61 = vadd.f32 %v574_v9, %v6584_v63  ;;  %v647_v3 = vpop.f32.mrb[21].mxu1  ;;  %v576_v62 = vpop.f32.mrb[22].mxu0  ;;  %v7072_v45 = vld [vmem:[%s9320_s2 + $0xe0] ss:$16 sps:$4 sm:$0xff]  }
 0x145   :  { %v1813_v43 = vrot.slane %v573_v48, 4  ;;  %v648_v7 = vadd.f32 %v647_v3, %v6594_v10  ;;  %v577_v8 = vadd.f32 %v576_v62, %v6578_v56  ;;  %v649_v38 = vpop.f32.mrb[22].mxu1  ;;  %v578_v60 = vpop.f32.mrb[23].mxu0  ;;  %v7078_v47 = vld [vmem:[%s9320_s2 + $0xe8] ss:$16 sps:$4 sm:$0xff]  }
 0x146   :  { %v1815_v55 = vrot.slane %v646_v44, 4  ;;  %v1814_v54 = vrot.slane %v575_v61, 4  ;;  %v650_v57 = vadd.f32 %v649_v38, %v6589_v58  ;;  %v579_v59 = vadd.f32 %v578_v60, %v6584_v63  ;;  %v651_v52 = vpop.f32.mrb[23].mxu1  ;;  %v7084_v46 = vld [vmem:[%s9320_s2 + $0x104] ss:$16 sps:$4 sm:$0xff]  }
 0x147   :  { %v1816_v53 = vrot.slane %v648_v7, 4  ;;  %v1680_v17 = vrot.slane %v577_v8, 4  ;;  %v652_v1 = vadd.f32 %v651_v52, %v6594_v10  ;;  %v6648_v48 = vsel %vm138_vm1, %v6550_v14, %v1813_v43  ;;  %v7090_v50 = vld [vmem:[%s9320_s2 + $0x10c] ss:$16 sps:$4 sm:$0xff]  }
 0x148   :  { %9706 = vst [vmem:[#allocation87_spill] sm:$0xff] %v6648_v48  ;;  %v1682_v9 = vrot.slane %v650_v57, 4  ;;  %v1681_v3 = vrot.slane %v579_v59, 4  ;;  %v6653_v44 = vsel %vm138_vm1, %v6559_v5, %v1815_v55  ;;  %v6658_v61 = vsel %vm138_vm1, %v6556_v18, %v1814_v54  ;;  %v7114_v48 = vld [vmem:[%s9320_s2 + $0x12c] ss:$16 sps:$4 sm:$0xff]  }
 0x149   :  { %9707 = vst [vmem:[#allocation88_spill] sm:$0xff] %v6653_v44  ;;  %9708 = vst [vmem:[#allocation89_spill] sm:$0xff] %v6658_v61  ;;  %v1683_v62 = vrot.slane %v652_v1, 4  ;;  %v6663_v7 = vsel %vm138_vm1, %v6541_v11, %v1680_v17  ;;  %v6668_v14 = vsel %vm138_vm1, %v6562_v4, %v1816_v53  ;;  %v7102_v61 = vld [vmem:[%s9320_s2 + $0x108] ss:$16 sps:$4 sm:$0xff]  }
 0x14a   :  { %9709 = vst [vmem:[#allocation90_spill] sm:$0xff] %v6663_v7  ;;  %9710 = vst [vmem:[#allocation91_spill] sm:$0xff] %v6668_v14  ;;  %v582_v43 = vpop.f32.mrb[24].mxu0  ;;  %v6673_v5 = vsel %vm138_vm1, %v6547_v15, %v1682_v9  ;;  %v6678_v18 = vsel %vm138_vm1, %v6544_v16, %v1681_v3  ;;  %v7096_v14 = vld [vmem:[%s9320_s2 + $0x100] ss:$16 sps:$4 sm:$0xff]  }
 0x14b   :  { %9711 = vst [vmem:[#allocation92_spill] sm:$0xff] %v6673_v5  ;;  %9712 = vst [vmem:[#allocation93_spill] sm:$0xff] %v6678_v18  ;;  %v583_v8 = vadd.f32 %v582_v43, %v6578_v56  ;;  %v655_v11 = vpop.f32.mrb[24].mxu1  ;;  %v584_v38 = vpop.f32.mrb[25].mxu0  ;;  %v6684_v4 = vsel %vm138_vm1, %v6553_v19, %v1683_v62  ;;  %v7108_v44 = vld [vmem:[%s9320_s2 + $0x124] ss:$16 sps:$4 sm:$0xff]  }
 0x14c   :  { %9713 = vst [vmem:[#allocation94_spill] sm:$0xff] %v6684_v4  ;;  %v656_v60 = vadd.f32 %v655_v11, %v6589_v58  ;;  %v585_v55 = vadd.f32 %v584_v38, %v6584_v63  ;;  %v657_v15 = vpop.f32.mrb[25].mxu1  ;;  %v586_v54 = vpop.f32.mrb[26].mxu0  ;;  %v7120_v4 = vld [vmem:[%s9320_s2 + $0x120] ss:$16 sps:$4 sm:$0xff]  }
 0x14d   :  { %v1547_v57 = vrot.slane %v583_v8, 4  ;;  %v658_v59 = vadd.f32 %v657_v15, %v6594_v10  ;;  %v587_v16 = vadd.f32 %v586_v54, %v6578_v56  ;;  %v659_v52 = vpop.f32.mrb[26].mxu1  ;;  %v588_v53 = vpop.f32.mrb[27].mxu0  ;;  %v7126_v18 = vld [vmem:[%s9320_s2 + $0x128] ss:$16 sps:$4 sm:$0xff]  }
 0x14e   :  { %v1549_v17 = vrot.slane %v656_v60, 4  ;;  %v1548_v1 = vrot.slane %v585_v55, 4  ;;  %v660_v9 = vadd.f32 %v659_v52, %v6589_v58  ;;  %v589_v19 = vadd.f32 %v588_v53, %v6584_v63  ;;  %v661_v3 = vpop.f32.mrb[27].mxu1  ;;  %v7132_v5 = vld [vmem:[%s9320_s2 + $0x144] ss:$16 sps:$4 sm:$0xff]  }
 0x14f   :  { %v1550_v62 = vrot.slane %v658_v59, 4  ;;  %v1414_v43 = vrot.slane %v587_v16, 4  ;;  %v662_v11 = vadd.f32 %v661_v3, %v6594_v10  ;;  %v6696_v8 = vsel %vm138_vm1, %v6526_v24, %v1547_v57  ;;  %v7138_v7 = vld [vmem:[%s9320_s2 + $0x14c] ss:$16 sps:$4 sm:$0xff]  }
 0x150   :  { %9714 = vst [vmem:[#allocation95_spill] sm:$0xff] %v6696_v8  ;;  %v1416_v38 = vrot.slane %v660_v9, 4  ;;  %v1415_v15 = vrot.slane %v589_v19, 4  ;;  %v6701_v60 = vsel %vm138_vm1, %v6535_v13, %v1549_v17  ;;  %v6706_v55 = vsel %vm138_vm1, %v6532_v28, %v1548_v1  ;;  %v7162_v8 = vld [vmem:[%s9320_s2 + $0x16c] ss:$16 sps:$4 sm:$0xff]  }
 0x151   :  { %9715 = vst [vmem:[#allocation96_spill] sm:$0xff] %v6701_v60  ;;  %9716 = vst [vmem:[#allocation97_spill] sm:$0xff] %v6706_v55  ;;  %v1417_v54 = vrot.slane %v662_v11, 4  ;;  %v6711_v59 = vsel %vm138_vm1, %v6517_v20, %v1414_v43  ;;  %v6716_v24 = vsel %vm138_vm1, %v6538_v12, %v1550_v62  ;;  %v417_v53 = vadd.f32 %v6476_v33, %v6486_v29  ;;  %v7150_v55 = vld [vmem:[%s9320_s2 + $0x148] ss:$16 sps:$4 sm:$0xff]  }
 0x152   :  { %9717 = vst [vmem:[#allocation98_spill] sm:$0xff] %v6716_v24  ;;  %v592_v57 = vpop.f32.mrb[28].mxu0  ;;  %v6721_v13 = vsel %vm138_vm1, %v6523_v25, %v1416_v38  ;;  %v6726_v28 = vsel %vm138_vm1, %v6520_v32, %v1415_v15  ;;  %v419_v25 = vadd.f32 %v6488_v35, %v6500_v27  ;;  %v490_v19 = vadd.f32 %v6490_v37, %v6481_v36  ;;  %v7144_v24 = vld [vmem:[%s9320_s2 + $0x140] ss:$16 sps:$4 sm:$0xff]   ;;  %v7156_v60 = vld [vmem:[%s9320_s2 + $0x164] ss:$16 sps:$4 sm:$0xff]  }
 0x153   :  { %v593_v16 = vadd.f32 %v592_v57, %v6578_v56  ;;  %v665_v20 = vpop.f32.mrb[28].mxu1  ;;  %v594_v52 = vpop.f32.mrb[29].mxu0  ;;  %v6732_v12 = vsel %vm138_vm1, %v6529_v31, %v1417_v54 }
 0x154   :  { %v666_v17 = vadd.f32 %v665_v20, %v6589_v58  ;;  %v595_v32 = vadd.f32 %v594_v52, %v6584_v63  ;;  %v667_v1 = vpop.f32.mrb[29].mxu1  ;;  %v596_v9 = vpop.f32.mrb[30].mxu0 }
 0x155   :  { %v1281_v3 = vrot.slane %v593_v16, 4  ;;  %v668_v62 = vadd.f32 %v667_v1, %v6594_v10  ;;  %v597_v31 = vadd.f32 %v596_v9, %v6578_v56  ;;  %v669_v43 = vpop.f32.mrb[30].mxu1  ;;  %v598_v11 = vpop.f32.mrb[31].mxu0 }
 0x156   :  { %v1283_v29 = vrot.slane %v666_v17, 4  ;;  %v1282_v33 = vrot.slane %v595_v32, 4  ;;  %v670_v27 = vadd.f32 %v669_v43, %v6589_v58  ;;  %v599_v35 = vadd.f32 %v598_v11, %v6584_v63  ;;  %v671_v38 = vpop.f32.mrb[31].mxu1 }
 0x157   :  { %v1284_v15 = vrot.slane %v668_v62, 4  ;;  %v1148_v54 = vrot.slane %v597_v31, 4  ;;  %v672_v57 = vadd.f32 %v671_v38, %v6594_v10  ;;  %v6750_v37 = vsel %vm138_vm1, %v6505_v34, %v1281_v3 }
 0x158   :  { %v1150_v36 = vrot.slane %v670_v27, 4  ;;  %v1149_v56 = vrot.slane %v599_v35, 4  ;;  %v6755_v16 = vsel %vm138_vm1, %v6511_v22, %v1283_v29  ;;  %v6760_v58 = vsel %vm138_vm1, %v6508_v23, %v1282_v33 }
 0x159   :  { %v492_v63 = vadd.f32 %v6502_v26, %v6495_v0  ;;  %v1151_v10 = vrot.slane %v672_v57, 4  ;;  %v1152_v34 = vsel %vm138_vm1, %v417_v53, %v1148_v54  ;;  %v6769_v20 = vsel %vm138_vm1, %v6514_v21, %v1284_v15 }
 0x15a   :  { %v1154_v22 = vsel %vm138_vm1, %v490_v19, %v1150_v36  ;;  %v1153_v52 = vsel %vm138_vm1, %v419_v25, %v1149_v56 }
 0x15b   :  { %v1155_v23 = vsel %vm138_vm1, %v492_v63, %v1151_v10 }
 0x17a   :  { %v1092_v17 = vpop.f32.mrb[32].mxu0 }
 0x17b   :  { %v1156_v0 = vadd.f32 %v1152_v34, %v1092_v17  ;;  %v1133_v26 = vpop.f32.mrb[32].mxu1  ;;  %v1094_v32 = vpop.f32.mrb[33].mxu0  ;;  %v7018_v17 = vld [vmem:[%s9320_s2 + $0xac] ss:$16 sps:$4 sm:$0xff]  }
 0x17c   :  { %v1158_v1 = vadd.f32 %v1154_v22, %v1133_v26  ;;  %v1157_v53 = vadd.f32 %v1153_v52, %v1094_v32  ;;  %v1135_v9 = vpop.f32.mrb[33].mxu1  ;;  %v1096_v3 = vpop.f32.mrb[34].mxu0  ;;  %v9722_v26 = vmov 0  ;;  %v9725_v32 = vld [vmem:[#allocation20_spill] sm:$0xff] }
 0x17d   :  { %v4681_v62 = vmul.f32 -1.442695, %v1156_v0  ;;  %v1159_v21 = vadd.f32 %v1155_v23, %v1135_v9  ;;  %v1097_v31 = vpop.f32.mrb[35].mxu0  ;;  %v1137_v43 = vpop.f32.mrb[34].mxu1  ;;  %v9719_v23 = vmov 0  ;;  %v9723_v26 = vsel %vm6794_vm4, 4294967295, %v9722_v26 }
 0x17e   :  { %v4682_v11 = vmul.f32 -1.442695, %v1157_v53  ;;  %v1138_v19 = vpop.f32.mrb[35].mxu1  ;;  %v4683_v25 = vmul.f32 -1.442695, %v1158_v1  ;;  %v9720_v23 = vsel %vm6784_vm3, 4294967295, %v9719_v23 }
 0x17f   :  { %5379 = vpow2.f32 %v4681_v62  ;;  %9721 = vst [vmem:[#allocation100_spill] sm:$0xff] %v9720_v23  ;;  %9724 = vst [vmem:[#allocation101_spill] sm:$0xff] %v9723_v26  ;;  %v9726_v1 = vld [vmem:[#allocation21_spill] sm:$0xff]  ;;  %v9727_v53 = vld [vmem:[#allocation22_spill] sm:$0xff] }
 0x180   :  { %5381 = vpow2.f32 %v4682_v11  ;;  %v9728_v9 = vld [vmem:[#allocation23_spill] sm:$0xff]  ;;  %v9729_v3 = vld [vmem:[#allocation24_spill] sm:$0xff]  ;;  %v9730_v62 = vld [vmem:[#allocation25_spill] sm:$0xff] }
 0x181   :  { %5383 = vpow2.f32 %v4683_v25  ;;  %v9736_v31 = vld [vmem:[#allocation31_spill] sm:$0xff]  ;;  %v9737_v43 = vld [vmem:[#allocation32_spill] sm:$0xff]  ;;  %v9738_v11 = vld [vmem:[#allocation33_spill] sm:$0xff]  ;;  %9786 = vst [vmem:[#allocation23_spill] sm:$0xff] %v7144_v24 }
 0x182   :  { %5385 = vtanh.f32 %v1159_v21  ;;  %v9731_v21 = vld [vmem:[#allocation26_spill] sm:$0xff]  ;;  %v9740_v25 = vld [vmem:[#allocation35_spill] sm:$0xff]  ;;  %9787 = vst [vmem:[#allocation24_spill] sm:$0xff] %v7150_v55  ;;  %9788 = vst [vmem:[#allocation25_spill] sm:$0xff] %v7156_v60 }
 0x183   :  { %v9739_v19 = vld [vmem:[#allocation34_spill] sm:$0xff]  ;;  %9789 = vst [vmem:[#allocation26_spill] sm:$0xff] %v7162_v8 }
 0x189   :  { %v5380_v29 = vpop.eup %5379 }
 0x18a   :  { %v1169_v33 = vadd.f32 1.0, %v5380_v29  ;;  %v5382_v27 = vpop.eup %5381  ;;  %v9741_v29 = vld [vmem:[#allocation36_spill] sm:$0xff] }
 0x18b   :  { %v1170_v35 = vadd.f32 1.0, %v5382_v27  ;;  %v5384_v38 = vpop.eup %5383  ;;  %v9743_v27 = vld [vmem:[#allocation38_spill] sm:$0xff] }
 0x18c   :  { %5387 = vrcp.f32 %v1169_v33  ;;  %v5386_v15 = vpop.eup %5385  ;;  %v1171_v56 = vadd.f32 1.0, %v5384_v38  ;;  %v9742_v33 = vld [vmem:[#allocation37_spill] sm:$0xff]  ;;  %v9745_v38 = vld [vmem:[#allocation40_spill] sm:$0xff] }
 0x18d   :  { %5389 = vrcp.f32 %v1170_v35  ;;  %v9744_v35 = vld [vmem:[#allocation39_spill] sm:$0xff] }
 0x18e   :  { %5391 = vrcp.f32 %v1171_v56  ;;  %v9750_v56 = vld [vmem:[#allocation45_spill] sm:$0xff] }
 0x196   :  { %v5388_v54 = vpop.eup %5387 }
 0x197   :  { %v1180_v57 = vmul.f32 %v5388_v54, %v5386_v15  ;;  %v5390_v36 = vpop.eup %5389  ;;  %v9746_v15 = vld [vmem:[#allocation41_spill] sm:$0xff]  ;;  %v9747_v54 = vld [vmem:[#allocation42_spill] sm:$0xff] }
 0x198   :  { %v1179_v63 = vmul.f32 0.0, %v5390_v36  ;;  %v5392_v34 = vpop.eup %5391  ;;  %v9749_v36 = vld [vmem:[#allocation44_spill] sm:$0xff] }
 0x19a   :  { %v6777_v10 = vadd.f32 %v1180_v57, %v1179_v63  ;;  %v9748_v57 = vld [vmem:[#allocation43_spill] sm:$0xff]  ;;  %v9751_v63 = vld [vmem:[#allocation46_spill] sm:$0xff] }
 0x19c   :  { %5393 = vtanh.f32 %v6777_v10 }
 0x1a6   :  { %v5394_v22 = vpop.eup %5393 }
 0x1a7   :  { %v6782_v52 = vmul.f32 %v5394_v22, %v5392_v34  ;;  %v9752_v34 = vld [vmem:[#allocation47_spill] sm:$0xff]  ;;  %v9753_v22 = vld [vmem:[#allocation48_spill] sm:$0xff] }
 0x1a9   :  { %9718 = vst [vmem:[#allocation99_spill] sm:$0xff] %v6782_v52  ;;  %v4687_v0 = vpack.c.bf16 %v6782_v52, %v6782_v52  ;;  %v7042_v52 = vld [vmem:[%s9320_s2 + $0xcc] ss:$16 sps:$4 sm:$0xff]  }
 0x1ab   :  { %4688 = vmatprep.mubr.msk.bf16.mxu0 %vm6784_vm3, %v4687_v0  ;;  %4696 = vmatprep.mubr.msk.bf16.mxu1 %vm6784_vm3, %v4687_v0 }
 0x1ac   :  { %4691 = vmatmul.mubr.msk.bf16.vlgmr.msra.gmra.mrb[36].mxu0 %vm6794_vm4, %v4687_v0  ;;  %4699 = vmatmul.mubr.msk.bf16.vlgmr.msra.gmra.mrb[36].mxu1 %vm6794_vm4, %v4687_v0  ;;  %v9754_v0 = vld [vmem:[#allocation49_spill] sm:$0xff] }
 0x1ad   :  { %1325 = vmatpush1.bf16.msra.mxu0 %v6009_v39  ;;  %1366 = vmatpush1.bf16.msra.mxu1 %v6014_v40  ;;  %v9732_v39 = vld [vmem:[#allocation27_spill] sm:$0xff]  ;;  %v9733_v40 = vld [vmem:[#allocation28_spill] sm:$0xff] }
 0x1ae   :  { %1326 = vmatprep.subr.bf16.mxu0 %v6019_v41  ;;  %1367 = vmatprep.subr.bf16.mxu1 %v6024_v42  ;;  %v9734_v41 = vld [vmem:[#allocation29_spill] sm:$0xff]  ;;  %v9735_v42 = vld [vmem:[#allocation30_spill] sm:$0xff] }
 0x1b1   :  { %1327 = vmatpush1.bf16.msra.mxu0 %v9725_v32  ;;  %1368 = vmatpush1.bf16.msra.mxu1 %v9726_v1  ;;  %v9755_v32 = vld [vmem:[#allocation50_spill] sm:$0xff]  ;;  %v9756_v1 = vld [vmem:[#allocation51_spill] sm:$0xff] }
 0x1b2   :  { %1328 = vmatprep.subr.bf16.mxu0 %v9727_v53  ;;  %1369 = vmatprep.subr.bf16.mxu1 %v9728_v9  ;;  %v9757_v53 = vld [vmem:[#allocation52_spill] sm:$0xff]  ;;  %v9758_v9 = vld [vmem:[#allocation53_spill] sm:$0xff] }
 0x1b5   :  { %1329 = vmatpush1.bf16.msra.mxu0 %v9729_v3  ;;  %1370 = vmatpush1.bf16.msra.mxu1 %v9730_v62  ;;  %v9759_v3 = vld [vmem:[#allocation54_spill] sm:$0xff]  ;;  %v9760_v62 = vld [vmem:[#allocation55_spill] sm:$0xff] }
 0x1b6   :  { %1330 = vmatprep.subr.bf16.mxu0 %v9731_v21  ;;  %1371 = vmatprep.subr.bf16.mxu1 %v9732_v39  ;;  %v9761_v21 = vld [vmem:[#allocation56_spill] sm:$0xff]  ;;  %v9762_v39 = vld [vmem:[#allocation57_spill] sm:$0xff] }
 0x1b9   :  { %1331 = vmatpush1.bf16.msra.mxu0 %v9733_v40  ;;  %1372 = vmatpush1.bf16.msra.mxu1 %v9734_v41  ;;  %v9763_v40 = vld [vmem:[#allocation58_spill] sm:$0xff]  ;;  %v9764_v41 = vld [vmem:[#allocation59_spill] sm:$0xff] }
 0x1ba   :  { %1332 = vmatprep.subr.bf16.mxu0 %v9735_v42  ;;  %1373 = vmatprep.subr.bf16.mxu1 %v9736_v31  ;;  %v9765_v42 = vld [vmem:[#allocation60_spill] sm:$0xff]  ;;  %v9766_v31 = vld [vmem:[#allocation61_spill] sm:$0xff] }
 0x1bd   :  { %1333 = vmatpush1.bf16.msra.mxu0 %v9737_v43  ;;  %1374 = vmatpush1.bf16.msra.mxu1 %v9738_v11  ;;  %v9767_v43 = vld [vmem:[#allocation62_spill] sm:$0xff]  ;;  %v9768_v11 = vld [vmem:[#allocation63_spill] sm:$0xff] }
 0x1be   :  { %1334 = vmatprep.subr.bf16.mxu0 %v9739_v19  ;;  %1375 = vmatprep.subr.bf16.mxu1 %v9740_v25  ;;  %v9769_v19 = vld [vmem:[#allocation64_spill] sm:$0xff]  ;;  %v9770_v25 = vld [vmem:[#allocation65_spill] sm:$0xff] }
 0x1c1   :  { %1335 = vmatpush1.bf16.msra.mxu0 %v9741_v29  ;;  %1376 = vmatpush1.bf16.msra.mxu1 %v9742_v33  ;;  %v9771_v29 = vld [vmem:[#allocation66_spill] sm:$0xff]  ;;  %v9772_v33 = vld [vmem:[#allocation67_spill] sm:$0xff] }
 0x1c2   :  { %1336 = vmatprep.subr.bf16.mxu0 %v9743_v27  ;;  %1377 = vmatprep.subr.bf16.mxu1 %v9744_v35  ;;  %v9773_v27 = vld [vmem:[#allocation68_spill] sm:$0xff]  ;;  %v9774_v35 = vld [vmem:[#allocation69_spill] sm:$0xff] }
 0x1c5   :  { %1337 = vmatpush1.bf16.msra.mxu0 %v9745_v38  ;;  %1378 = vmatpush1.bf16.msra.mxu1 %v9746_v15  ;;  %v9775_v38 = vld [vmem:[#allocation70_spill] sm:$0xff]  ;;  %v9776_v15 = vld [vmem:[#allocation71_spill] sm:$0xff] }
 0x1c6   :  { %1338 = vmatprep.subr.bf16.mxu0 %v9747_v54  ;;  %1379 = vmatprep.subr.bf16.mxu1 %v9748_v57  ;;  %v9777_v54 = vld [vmem:[#allocation72_spill] sm:$0xff]  ;;  %v9778_v57 = vld [vmem:[#allocation73_spill] sm:$0xff] }
 0x1c9   :  { %1339 = vmatpush1.bf16.msra.mxu0 %v9749_v36  ;;  %1380 = vmatpush1.bf16.msra.mxu1 %v9750_v56  ;;  %v9779_v36 = vld [vmem:[#allocation74_spill] sm:$0xff]  ;;  %v9780_v56 = vld [vmem:[#allocation75_spill] sm:$0xff] }
 0x1ca   :  { %1340 = vmatprep.subr.bf16.mxu0 %v9751_v63  ;;  %1381 = vmatprep.subr.bf16.mxu1 %v9752_v34  ;;  %v9781_v63 = vld [vmem:[#allocation76_spill] sm:$0xff]  ;;  %v9782_v34 = vld [vmem:[#allocation77_spill] sm:$0xff] }
 0x1cd   :  { %1341 = vmatpush1.bf16.msra.mxu0 %v9753_v22  ;;  %1382 = vmatpush1.bf16.msra.mxu1 %v9754_v0  ;;  %v6871_v22 = vld [vmem:[%s9320_s2 + $0x4] ss:$16 sps:$4 sm:$0xff]   ;;  %v6877_v0 = vld [vmem:[%s9320_s2 + $0xc] ss:$16 sps:$4 sm:$0xff]  }
 0x1ce   :  { %1342 = vmatprep.subr.bf16.mxu0 %v9755_v32  ;;  %1383 = vmatprep.subr.bf16.mxu1 %v9756_v1  ;;  %9783 = vst [vmem:[#allocation20_spill] sm:$0xff] %v6871_v22  ;;  %9784 = vst [vmem:[#allocation21_spill] sm:$0xff] %v6877_v0 }
 0x1d1   :  { %1343 = vmatpush1.bf16.msra.mxu0 %v9757_v53  ;;  %1384 = vmatpush1.bf16.msra.mxu1 %v9758_v9 }
 0x1d2   :  { %1344 = vmatprep.subr.bf16.mxu0 %v9759_v3  ;;  %1385 = vmatprep.subr.bf16.mxu1 %v9760_v62 }
 0x1d5   :  { %1345 = vmatpush1.bf16.msra.mxu0 %v9761_v21  ;;  %1386 = vmatpush1.bf16.msra.mxu1 %v9762_v39 }
 0x1d6   :  { %1346 = vmatprep.subr.bf16.mxu0 %v9763_v40  ;;  %1387 = vmatprep.subr.bf16.mxu1 %v9764_v41 }
 0x1d9   :  { %1347 = vmatpush1.bf16.msra.mxu0 %v9765_v42  ;;  %1388 = vmatpush1.bf16.msra.mxu1 %v9766_v31 }
 0x1da   :  { %1348 = vmatprep.subr.bf16.mxu0 %v9767_v43  ;;  %1389 = vmatprep.subr.bf16.mxu1 %v9768_v11 }
 0x1dd   :  { %1349 = vmatpush1.bf16.msra.mxu0 %v9769_v19  ;;  %1390 = vmatpush1.bf16.msra.mxu1 %v9770_v25 }
 0x1de   :  { %1350 = vmatprep.subr.bf16.mxu0 %v9771_v29  ;;  %1391 = vmatprep.subr.bf16.mxu1 %v9772_v33 }
 0x1e1   :  { %1351 = vmatpush1.bf16.msra.mxu0 %v9773_v27  ;;  %1392 = vmatpush1.bf16.msra.mxu1 %v9774_v35 }
 0x1e2   :  { %1352 = vmatprep.subr.bf16.mxu0 %v9775_v38  ;;  %1393 = vmatprep.subr.bf16.mxu1 %v9776_v15 }
 0x1e5   :  { %1353 = vmatpush1.bf16.msra.mxu0 %v9777_v54  ;;  %1394 = vmatpush1.bf16.msra.mxu1 %v9778_v57 }
 0x1e6   :  { %1354 = vmatprep.subr.bf16.mxu0 %v9779_v36  ;;  %1395 = vmatprep.subr.bf16.mxu1 %v9780_v56 }
 0x1e9   :  { %1355 = vmatpush1.bf16.msra.mxu0 %v9781_v63  ;;  %1396 = vmatpush1.bf16.msra.mxu1 %v9782_v34 }
 0x1ea   :  { %1457 = vmatprep.subr.bf16.mxu0 %v6871_v22  ;;  %1498 = vmatprep.subr.bf16.mxu1 %v6877_v0 }
 0x27f   :  { %v1225_v32 = vpop.f32.mrb[36].mxu0  ;;  %v1266_v1 = vpop.f32.mrb[36].mxu1 }
 0x280   :  { %v1289_v53 = vadd.f32 %v6750_v37, %v1225_v32  ;;  %v1291_v9 = vadd.f32 %v6755_v16, %v1266_v1  ;;  %v1227_v3 = vpop.f32.mrb[37].mxu0  ;;  %v1268_v62 = vpop.f32.mrb[37].mxu1 }
 0x281   :  { %v1290_v21 = vadd.f32 %v6760_v58, %v1227_v3  ;;  %v1292_v39 = vadd.f32 %v6769_v20, %v1268_v62  ;;  %v1229_v40 = vpop.f32.mrb[38].mxu0  ;;  %v1270_v41 = vpop.f32.mrb[38].mxu1 }
 0x282   :  { %v4700_v42 = vmul.f32 -1.442695, %v1289_v53  ;;  %v1230_v31 = vpop.f32.mrb[39].mxu0  ;;  %v1271_v43 = vpop.f32.mrb[39].mxu1  ;;  %v4702_v19 = vmul.f32 -1.442695, %v1291_v9 }
 0x283   :  { %v4701_v11 = vmul.f32 -1.442695, %v1290_v21  ;;  %v6910_v31 = vld [vmem:[%s9320_s2 + $0x8] ss:$16 sps:$4 sm:$0xff]   ;;  %v6916_v43 = vld [vmem:[%s9320_s2 + $0x24] ss:$16 sps:$4 sm:$0xff]  }
 0x284   :  { %5395 = vpow2.f32 %v4700_v42  ;;  %v7024_v41 = vld [vmem:[%s9320_s2 + $0xa0] ss:$16 sps:$4 sm:$0xff]  }
 0x285   :  { %5397 = vpow2.f32 %v4701_v11  ;;  %v6922_v11 = vld [vmem:[%s9320_s2 + $0x2c] ss:$16 sps:$4 sm:$0xff]  }
 0x286   :  { %5399 = vtanh.f32 %v1292_v39 }
 0x287   :  { %5401 = vpow2.f32 %v4702_v19  ;;  %v6928_v19 = vld [vmem:[%s9320_s2 + $0x20] ss:$16 sps:$4 sm:$0xff]  }
 0x28e   :  { %v5396_v25 = vpop.eup %5395 }
 0x28f   :  { %v1302_v29 = vadd.f32 1.0, %v5396_v25  ;;  %v5398_v37 = vpop.eup %5397  ;;  %v6934_v25 = vld [vmem:[%s9320_s2 + $0x28] ss:$16 sps:$4 sm:$0xff]  }
 0x290   :  { %v1303_v16 = vadd.f32 1.0, %v5398_v37  ;;  %v5400_v58 = vpop.eup %5399  ;;  %v6946_v37 = vld [vmem:[%s9320_s2 + $0x4c] ss:$16 sps:$4 sm:$0xff]  }
 0x291   :  { %5403 = vrcp.f32 %v1302_v29  ;;  %v5402_v32 = vpop.eup %5401  ;;  %v6940_v29 = vld [vmem:[%s9320_s2 + $0x44] ss:$16 sps:$4 sm:$0xff]  }
 0x292   :  { %5405 = vrcp.f32 %v1303_v16  ;;  %v1304_v53 = vadd.f32 1.0, %v5402_v32  ;;  %v6952_v16 = vld [vmem:[%s9320_s2 + $0x40] ss:$16 sps:$4 sm:$0xff]   ;;  %v6964_v32 = vld [vmem:[%s9320_s2 + $0x64] ss:$16 sps:$4 sm:$0xff]  }
 0x294   :  { %5407 = vrcp.f32 %v1304_v53  ;;  %v6988_v53 = vld [vmem:[%s9320_s2 + $0x84] ss:$16 sps:$4 sm:$0xff]  }
 0x29b   :  { %v5404_v20 = vpop.eup %5403 }
 0x29c   :  { %v1313_v1 = vmul.f32 %v5404_v20, %v5400_v58  ;;  %v5406_v3 = vpop.eup %5405  ;;  %v6958_v58 = vld [vmem:[%s9320_s2 + $0x48] ss:$16 sps:$4 sm:$0xff]   ;;  %v6970_v20 = vld [vmem:[%s9320_s2 + $0x6c] ss:$16 sps:$4 sm:$0xff]  }
 0x29d   :  { %v1312_v62 = vmul.f32 %v5406_v3, %v6777_v10  ;;  %v6904_v10 = vld [vmem:[%s9320_s2] ss:$16 sps:$4 sm:$0xff]   ;;  %v6982_v3 = vld [vmem:[%s9320_s2 + $0x68] ss:$16 sps:$4 sm:$0xff]  }
 0x29e   :  { %v5408_v9 = vpop.eup %5407 }
 0x29f   :  { %v6885_v21 = vadd.f32 %v1313_v1, %v1312_v62  ;;  %v6976_v1 = vld [vmem:[%s9320_s2 + $0x60] ss:$16 sps:$4 sm:$0xff]   ;;  %v6994_v62 = vld [vmem:[%s9320_s2 + $0x8c] ss:$16 sps:$4 sm:$0xff]  }
 0x2a1   :  { %5409 = vtanh.f32 %v6885_v21 }
 0x2ab   :  { %v5410_v39 = vpop.eup %5409 }
 0x2ac   :  { %v6888_v40 = vmul.f32 %v5410_v39, %v5408_v9  ;;  %v7000_v9 = vld [vmem:[%s9320_s2 + $0x80] ss:$16 sps:$4 sm:$0xff]   ;;  %v7006_v39 = vld [vmem:[%s9320_s2 + $0x88] ss:$16 sps:$4 sm:$0xff]  }
 0x2ae   :  { %9785 = vst [vmem:[#allocation22_spill] sm:$0xff] %v6888_v40  ;;  %v4706_v42 = vpack.c.bf16 %v6888_v40, %v6888_v40  ;;  %v7036_v40 = vld [vmem:[%s9320_s2 + $0xc4] ss:$16 sps:$4 sm:$0xff]  }
 0x2b0   :  { %4707 = vmatprep.mubr.msk.bf16.mxu0 %vm6784_vm3, %v4706_v42  ;;  %4715 = vmatprep.mubr.msk.bf16.mxu1 %vm6784_vm3, %v4706_v42 }
 0x2b1   :  { %4710 = vmatmul.mubr.msk.bf16.vlgmr.msra.gmra.mrb[40].mxu0 %vm6794_vm4, %v4706_v42  ;;  %4718 = vmatmul.mubr.msk.bf16.vlgmr.msra.gmra.mrb[40].mxu1 %vm6794_vm4, %v4706_v42  ;;  %v7012_v42 = vld [vmem:[%s9320_s2 + $0xa4] ss:$16 sps:$4 sm:$0xff]  }
 0x2b2   :  { %1458 = vmatpush1.bf16.msra.mxu0 %v6904_v10  ;;  %1499 = vmatpush1.bf16.msra.mxu1 %v6910_v31 }
 0x2b3   :  { %1459 = vmatprep.subr.bf16.mxu0 %v6916_v43  ;;  %1500 = vmatprep.subr.bf16.mxu1 %v6922_v11 }
 0x2b6   :  { %1460 = vmatpush1.bf16.msra.mxu0 %v6928_v19  ;;  %1501 = vmatpush1.bf16.msra.mxu1 %v6934_v25 }
 0x2b7   :  { %1461 = vmatprep.subr.bf16.mxu0 %v6940_v29  ;;  %1502 = vmatprep.subr.bf16.mxu1 %v6946_v37 }
 0x2ba   :  { %1462 = vmatpush1.bf16.msra.mxu0 %v6952_v16  ;;  %1503 = vmatpush1.bf16.msra.mxu1 %v6958_v58 }
 0x2bb   :  { %1463 = vmatprep.subr.bf16.mxu0 %v6964_v32  ;;  %1504 = vmatprep.subr.bf16.mxu1 %v6970_v20 }
 0x2be   :  { %1464 = vmatpush1.bf16.msra.mxu0 %v6976_v1  ;;  %1505 = vmatpush1.bf16.msra.mxu1 %v6982_v3 }
 0x2bf   :  { %1465 = vmatprep.subr.bf16.mxu0 %v6988_v53  ;;  %1506 = vmatprep.subr.bf16.mxu1 %v6994_v62 }
 0x2c2   :  { %1466 = vmatpush1.bf16.msra.mxu0 %v7000_v9  ;;  %1507 = vmatpush1.bf16.msra.mxu1 %v7006_v39 }
 0x2c3   :  { %1467 = vmatprep.subr.bf16.mxu0 %v7012_v42  ;;  %1508 = vmatprep.subr.bf16.mxu1 %v7018_v17 }
 0x2c6   :  { %1468 = vmatpush1.bf16.msra.mxu0 %v7024_v41  ;;  %1509 = vmatpush1.bf16.msra.mxu1 %v7030_v30 }
 0x2c7   :  { %1469 = vmatprep.subr.bf16.mxu0 %v7036_v40  ;;  %1510 = vmatprep.subr.bf16.mxu1 %v7042_v52 }
 0x2ca   :  { %1470 = vmatpush1.bf16.msra.mxu0 %v7048_v6  ;;  %1511 = vmatpush1.bf16.msra.mxu1 %v7054_v49 }
 0x2cb   :  { %1471 = vmatprep.subr.bf16.mxu0 %v7060_v51  ;;  %1512 = vmatprep.subr.bf16.mxu1 %v7066_v2 }
 0x2ce   :  { %1472 = vmatpush1.bf16.msra.mxu0 %v7072_v45  ;;  %1513 = vmatpush1.bf16.msra.mxu1 %v7078_v47 }
 0x2cf   :  { %1473 = vmatprep.subr.bf16.mxu0 %v7084_v46  ;;  %1514 = vmatprep.subr.bf16.mxu1 %v7090_v50 }
 0x2d2   :  { %1474 = vmatpush1.bf16.msra.mxu0 %v7096_v14  ;;  %1515 = vmatpush1.bf16.msra.mxu1 %v7102_v61 }
 0x2d3   :  { %1475 = vmatprep.subr.bf16.mxu0 %v7108_v44  ;;  %1516 = vmatprep.subr.bf16.mxu1 %v7114_v48 }
 0x2d6   :  { %1476 = vmatpush1.bf16.msra.mxu0 %v7120_v4  ;;  %1517 = vmatpush1.bf16.msra.mxu1 %v7126_v18 }
 0x2d7   :  { %1477 = vmatprep.subr.bf16.mxu0 %v7132_v5  ;;  %1518 = vmatprep.subr.bf16.mxu1 %v7138_v7 }
 0x2da   :  { %1478 = vmatpush1.bf16.msra.mxu0 %v7144_v24  ;;  %1519 = vmatpush1.bf16.msra.mxu1 %v7150_v55  ;;  %v7168_v24 = vld [vmem:[%s9320_s2 + $0x160] ss:$16 sps:$4 sm:$0xff]   ;;  %v7174_v55 = vld [vmem:[%s9320_s2 + $0x168] ss:$16 sps:$4 sm:$0xff]  }
 0x2db   :  { %1479 = vmatprep.subr.bf16.mxu0 %v7156_v60  ;;  %1520 = vmatprep.subr.bf16.mxu1 %v7162_v8  ;;  %9790 = vst [vmem:[#allocation27_spill] sm:$0xff] %v7168_v24  ;;  %9791 = vst [vmem:[#allocation28_spill] sm:$0xff] %v7174_v55  ;;  %v7180_v60 = vld [vmem:[%s9320_s2 + $0x184] ss:$16 sps:$4 sm:$0xff]   ;;  %v7186_v8 = vld [vmem:[%s9320_s2 + $0x18c] ss:$16 sps:$4 sm:$0xff]  }
 0x2dc   :  { %9792 = vst [vmem:[#allocation29_spill] sm:$0xff] %v7180_v60  ;;  %9793 = vst [vmem:[#allocation30_spill] sm:$0xff] %v7186_v8 }
 0x2de   :  { %1480 = vmatpush1.bf16.msra.mxu0 %v7168_v24  ;;  %1521 = vmatpush1.bf16.msra.mxu1 %v7174_v55  ;;  %v7192_v24 = vld [vmem:[%s9320_s2 + $0x180] ss:$16 sps:$4 sm:$0xff]   ;;  %v7198_v55 = vld [vmem:[%s9320_s2 + $0x188] ss:$16 sps:$4 sm:$0xff]  }
 0x2df   :  { %1481 = vmatprep.subr.bf16.mxu0 %v7180_v60  ;;  %1522 = vmatprep.subr.bf16.mxu1 %v7186_v8  ;;  %9794 = vst [vmem:[#allocation31_spill] sm:$0xff] %v7192_v24  ;;  %9795 = vst [vmem:[#allocation32_spill] sm:$0xff] %v7198_v55  ;;  %v7204_v60 = vld [vmem:[%s9320_s2 + $0x1a4] ss:$16 sps:$4 sm:$0xff]  }
 0x2e0   :  { %9796 = vst [vmem:[#allocation33_spill] sm:$0xff] %v7204_v60 }
 0x2e2   :  { %1482 = vmatpush1.bf16.msra.mxu0 %v7192_v24  ;;  %1523 = vmatpush1.bf16.msra.mxu1 %v7198_v55 }
 0x2e3   :  { %1483 = vmatprep.subr.bf16.mxu0 %v7204_v60  ;;  %1524 = vmatprep.subr.bf16.mxu1 %v9772_v33 }
 0x2e6   :  { %1484 = vmatpush1.bf16.msra.mxu0 %v9773_v27  ;;  %1525 = vmatpush1.bf16.msra.mxu1 %v9774_v35 }
 0x2e7   :  { %1485 = vmatprep.subr.bf16.mxu0 %v9775_v38  ;;  %1526 = vmatprep.subr.bf16.mxu1 %v9776_v15 }
 0x2ea   :  { %1486 = vmatpush1.bf16.msra.mxu0 %v9777_v54  ;;  %1527 = vmatpush1.bf16.msra.mxu1 %v9778_v57 }
 0x2eb   :  { %1487 = vmatprep.subr.bf16.mxu0 %v9779_v36  ;;  %1528 = vmatprep.subr.bf16.mxu1 %v9780_v56 }
 0x2ee   :  { %1488 = vmatpush1.bf16.msra.mxu0 %v9781_v63  ;;  %1529 = vmatpush1.bf16.msra.mxu1 %v9782_v34 }
 0x2ef   :  { %1590 = vmatprep.subr.bf16.mxu0 %v6871_v22  ;;  %1631 = vmatprep.subr.bf16.mxu1 %v6877_v0 }
 0x384   :  { %v1358_v33 = vpop.f32.mrb[40].mxu0  ;;  %v1399_v27 = vpop.f32.mrb[40].mxu1 }
 0x385   :  { %v1422_v35 = vadd.f32 %v6711_v59, %v1358_v33  ;;  %v1424_v38 = vadd.f32 %v6721_v13, %v1399_v27  ;;  %v1360_v15 = vpop.f32.mrb[41].mxu0  ;;  %v1401_v54 = vpop.f32.mrb[41].mxu1 }
 0x386   :  { %v1423_v57 = vadd.f32 %v6726_v28, %v1360_v15  ;;  %v1425_v36 = vadd.f32 %v6732_v12, %v1401_v54  ;;  %v1362_v56 = vpop.f32.mrb[42].mxu0  ;;  %v1403_v63 = vpop.f32.mrb[42].mxu1 }
 0x387   :  { %v4719_v60 = vmul.f32 -1.442695, %v1422_v35  ;;  %v1363_v34 = vpop.f32.mrb[43].mxu0  ;;  %v1404_v55 = vpop.f32.mrb[43].mxu1  ;;  %v4721_v0 = vmul.f32 -1.442695, %v1424_v38 }
 0x388   :  { %v4720_v22 = vmul.f32 -1.442695, %v1423_v57  ;;  %v9799_v38 = vld [vmem:[#allocation24_spill] sm:$0xff]  ;;  %v9800_v57 = vld [vmem:[#allocation25_spill] sm:$0xff]  ;;  %v9802_v56 = vld [vmem:[#allocation27_spill] sm:$0xff] }
 0x389   :  { %5411 = vpow2.f32 %v4719_v60  ;;  %v9803_v63 = vld [vmem:[#allocation28_spill] sm:$0xff]  ;;  %v9804_v34 = vld [vmem:[#allocation29_spill] sm:$0xff] }
 0x38a   :  { %5413 = vpow2.f32 %v4720_v22 }
 0x38b   :  { %5415 = vtanh.f32 %v1425_v36  ;;  %v9801_v36 = vld [vmem:[#allocation26_spill] sm:$0xff] }
 0x38c   :  { %5417 = vpow2.f32 %v4721_v0 }
 0x393   :  { %v5412_v24 = vpop.eup %5411 }
 0x394   :  { %v1435_v8 = vadd.f32 1.0, %v5412_v24  ;;  %v5414_v59 = vpop.eup %5413 }
 0x395   :  { %v1436_v13 = vadd.f32 1.0, %v5414_v59  ;;  %v5416_v28 = vpop.eup %5415  ;;  %v9805_v59 = vld [vmem:[#allocation30_spill] sm:$0xff] }
 0x396   :  { %5419 = vrcp.f32 %v1435_v8  ;;  %v5418_v33 = vpop.eup %5417  ;;  %v7343_v8 = vld [vmem:[%s9320_s2 + $0x1ec] ss:$16 sps:$4 sm:$0xff]  }
 0x397   :  { %5421 = vrcp.f32 %v1436_v13  ;;  %v1437_v35 = vadd.f32 1.0, %v5418_v33  ;;  %v9806_v13 = vld [vmem:[#allocation31_spill] sm:$0xff]  ;;  %v9808_v33 = vld [vmem:[#allocation33_spill] sm:$0xff]  ;;  %9817 = vst [vmem:[#allocation43_spill] sm:$0xff] %v7343_v8 }
 0x399   :  { %5423 = vrcp.f32 %v1437_v35  ;;  %v7313_v35 = vld [vmem:[%s9320_s2 + $0x1c4] ss:$16 sps:$4 sm:$0xff]  }
 0x39a   :  { %9812 = vst [vmem:[#allocation38_spill] sm:$0xff] %v7313_v35 }
 0x3a0   :  { %v5420_v12 = vpop.eup %5419 }
 0x3a1   :  { %v1446_v27 = vmul.f32 %v5420_v12, %v5416_v28  ;;  %v5422_v15 = vpop.eup %5421  ;;  %v9807_v28 = vld [vmem:[#allocation32_spill] sm:$0xff]  ;;  %v7295_v12 = vld [vmem:[%s9320_s2 + $0x1ac] ss:$16 sps:$4 sm:$0xff]  }
 0x3a2   :  { %v1445_v55 = vmul.f32 %v5422_v15, %v6885_v21  ;;  %v9798_v21 = vld [vmem:[#allocation23_spill] sm:$0xff]  ;;  %9809 = vst [vmem:[#allocation35_spill] sm:$0xff] %v7295_v12 }
 0x3a3   :  { %v5424_v60 = vpop.eup %5423  ;;  %v7307_v15 = vld [vmem:[%s9320_s2 + $0x1a8] ss:$16 sps:$4 sm:$0xff]  }
 0x3a4   :  { %v7225_v54 = vadd.f32 %v1446_v27, %v1445_v55  ;;  %v7301_v27 = vld [vmem:[%s9320_s2 + $0x1a0] ss:$16 sps:$4 sm:$0xff]   ;;  %9811 = vst [vmem:[#allocation37_spill] sm:$0xff] %v7307_v15  ;;  %v7319_v55 = vld [vmem:[%s9320_s2 + $0x1cc] ss:$16 sps:$4 sm:$0xff]  }
 0x3a5   :  { %9810 = vst [vmem:[#allocation36_spill] sm:$0xff] %v7301_v27  ;;  %9813 = vst [vmem:[#allocation39_spill] sm:$0xff] %v7319_v55 }
 0x3a6   :  { %5425 = vtanh.f32 %v7225_v54 }
 0x3b0   :  { %v5426_v24 = vpop.eup %5425 }
 0x3b1   :  { %v7228_v22 = vmul.f32 %v5426_v24, %v5424_v60  ;;  %v7325_v60 = vld [vmem:[%s9320_s2 + $0x1c0] ss:$16 sps:$4 sm:$0xff]   ;;  %v7331_v24 = vld [vmem:[%s9320_s2 + $0x1c8] ss:$16 sps:$4 sm:$0xff]  }
 0x3b2   :  { %9814 = vst [vmem:[#allocation40_spill] sm:$0xff] %v7325_v60  ;;  %9815 = vst [vmem:[#allocation41_spill] sm:$0xff] %v7331_v24 }
 0x3b3   :  { %9797 = vst [vmem:[#allocation34_spill] sm:$0xff] %v7228_v22  ;;  %v4725_v0 = vpack.c.bf16 %v7228_v22, %v7228_v22  ;;  %v7349_v22 = vld [vmem:[%s9320_s2 + $0x1e0] ss:$16 sps:$4 sm:$0xff]  }
 0x3b4   :  { %9818 = vst [vmem:[#allocation44_spill] sm:$0xff] %v7349_v22 }
 0x3b5   :  { %4726 = vmatprep.mubr.msk.bf16.mxu0 %vm6784_vm3, %v4725_v0  ;;  %4734 = vmatprep.mubr.msk.bf16.mxu1 %vm6784_vm3, %v4725_v0 }
 0x3b6   :  { %4729 = vmatmul.mubr.msk.bf16.vlgmr.msra.gmra.mrb[44].mxu0 %vm6794_vm4, %v4725_v0  ;;  %4737 = vmatmul.mubr.msk.bf16.vlgmr.msra.gmra.mrb[44].mxu1 %vm6794_vm4, %v4725_v0  ;;  %v7337_v0 = vld [vmem:[%s9320_s2 + $0x1e4] ss:$16 sps:$4 sm:$0xff]  }
 0x3b7   :  { %1591 = vmatpush1.bf16.msra.mxu0 %v6904_v10  ;;  %1632 = vmatpush1.bf16.msra.mxu1 %v6910_v31  ;;  %9816 = vst [vmem:[#allocation42_spill] sm:$0xff] %v7337_v0 }
 0x3b8   :  { %1592 = vmatprep.subr.bf16.mxu0 %v6916_v43  ;;  %1633 = vmatprep.subr.bf16.mxu1 %v6922_v11 }
 0x3bb   :  { %1593 = vmatpush1.bf16.msra.mxu0 %v6928_v19  ;;  %1634 = vmatpush1.bf16.msra.mxu1 %v6934_v25 }
 0x3bc   :  { %1594 = vmatprep.subr.bf16.mxu0 %v6940_v29  ;;  %1635 = vmatprep.subr.bf16.mxu1 %v6946_v37 }
 0x3bf   :  { %1595 = vmatpush1.bf16.msra.mxu0 %v6952_v16  ;;  %1636 = vmatpush1.bf16.msra.mxu1 %v6958_v58 }
 0x3c0   :  { %1596 = vmatprep.subr.bf16.mxu0 %v6964_v32  ;;  %1637 = vmatprep.subr.bf16.mxu1 %v6970_v20 }
 0x3c3   :  { %1597 = vmatpush1.bf16.msra.mxu0 %v6976_v1  ;;  %1638 = vmatpush1.bf16.msra.mxu1 %v6982_v3 }
 0x3c4   :  { %1598 = vmatprep.subr.bf16.mxu0 %v6988_v53  ;;  %1639 = vmatprep.subr.bf16.mxu1 %v6994_v62 }
 0x3c7   :  { %1599 = vmatpush1.bf16.msra.mxu0 %v7000_v9  ;;  %1640 = vmatpush1.bf16.msra.mxu1 %v7006_v39 }
 0x3c8   :  { %1600 = vmatprep.subr.bf16.mxu0 %v7012_v42  ;;  %1641 = vmatprep.subr.bf16.mxu1 %v7018_v17 }
 0x3cb   :  { %1601 = vmatpush1.bf16.msra.mxu0 %v7024_v41  ;;  %1642 = vmatpush1.bf16.msra.mxu1 %v7030_v30 }
 0x3cc   :  { %1602 = vmatprep.subr.bf16.mxu0 %v7036_v40  ;;  %1643 = vmatprep.subr.bf16.mxu1 %v7042_v52 }
 0x3cf   :  { %1603 = vmatpush1.bf16.msra.mxu0 %v7048_v6  ;;  %1644 = vmatpush1.bf16.msra.mxu1 %v7054_v49 }
 0x3d0   :  { %1604 = vmatprep.subr.bf16.mxu0 %v7060_v51  ;;  %1645 = vmatprep.subr.bf16.mxu1 %v7066_v2 }
 0x3d3   :  { %1605 = vmatpush1.bf16.msra.mxu0 %v7072_v45  ;;  %1646 = vmatpush1.bf16.msra.mxu1 %v7078_v47 }
 0x3d4   :  { %1606 = vmatprep.subr.bf16.mxu0 %v7084_v46  ;;  %1647 = vmatprep.subr.bf16.mxu1 %v7090_v50 }
 0x3d7   :  { %1607 = vmatpush1.bf16.msra.mxu0 %v7096_v14  ;;  %1648 = vmatpush1.bf16.msra.mxu1 %v7102_v61 }
 0x3d8   :  { %1608 = vmatprep.subr.bf16.mxu0 %v7108_v44  ;;  %1649 = vmatprep.subr.bf16.mxu1 %v7114_v48 }
 0x3db   :  { %1609 = vmatpush1.bf16.msra.mxu0 %v7120_v4  ;;  %1650 = vmatpush1.bf16.msra.mxu1 %v7126_v18 }
 0x3dc   :  { %1610 = vmatprep.subr.bf16.mxu0 %v7132_v5  ;;  %1651 = vmatprep.subr.bf16.mxu1 %v7138_v7 }
 0x3df   :  { %1611 = vmatpush1.bf16.msra.mxu0 %v9798_v21  ;;  %1652 = vmatpush1.bf16.msra.mxu1 %v9799_v38 }
 0x3e0   :  { %1612 = vmatprep.subr.bf16.mxu0 %v9800_v57  ;;  %1653 = vmatprep.subr.bf16.mxu1 %v9801_v36 }
 0x3e3   :  { %1613 = vmatpush1.bf16.msra.mxu0 %v9802_v56  ;;  %1654 = vmatpush1.bf16.msra.mxu1 %v9803_v63 }
 0x3e4   :  { %1614 = vmatprep.subr.bf16.mxu0 %v9804_v34  ;;  %1655 = vmatprep.subr.bf16.mxu1 %v9805_v59  ;;  %v9825_v59 = vld [vmem:[#allocation98_spill] sm:$0xff] }
 0x3e7   :  { %1615 = vmatpush1.bf16.msra.mxu0 %v9806_v13  ;;  %1656 = vmatpush1.bf16.msra.mxu1 %v9807_v28 }
 0x3e8   :  { %1616 = vmatprep.subr.bf16.mxu0 %v9808_v33  ;;  %1657 = vmatprep.subr.bf16.mxu1 %v7295_v12 }
 0x3eb   :  { %1617 = vmatpush1.bf16.msra.mxu0 %v7301_v27  ;;  %1658 = vmatpush1.bf16.msra.mxu1 %v7307_v15  ;;  %v9823_v27 = vld [vmem:[#allocation96_spill] sm:$0xff] }
 0x3ec   :  { %1618 = vmatprep.subr.bf16.mxu0 %v7313_v35  ;;  %1659 = vmatprep.subr.bf16.mxu1 %v7319_v55  ;;  %v9822_v35 = vld [vmem:[#allocation95_spill] sm:$0xff] }
 0x3ef   :  { %1619 = vmatpush1.bf16.msra.mxu0 %v7325_v60  ;;  %1660 = vmatpush1.bf16.msra.mxu1 %v7331_v24  ;;  %v7355_v24 = vld [vmem:[%s9320_s2 + $0x1e8] ss:$16 sps:$4 sm:$0xff]  }
 0x3f0   :  { %1620 = vmatprep.subr.bf16.mxu0 %v7337_v0  ;;  %1661 = vmatprep.subr.bf16.mxu1 %v7343_v8  ;;  %9819 = vst [vmem:[#allocation45_spill] sm:$0xff] %v7355_v24  ;;  %v9820_v0 = vld [vmem:[#allocation20_spill] sm:$0xff]  ;;  %v9821_v60 = vld [vmem:[#allocation21_spill] sm:$0xff] }
 0x3f3   :  { %1621 = vmatpush1.bf16.msra.mxu0 %v7349_v22  ;;  %1662 = vmatpush1.bf16.msra.mxu1 %v7355_v24  ;;  %v9824_v22 = vld [vmem:[#allocation97_spill] sm:$0xff] }
 0x3f4   :  { %1723 = vmatprep.subr.bf16.mxu0 %v9820_v0  ;;  %1764 = vmatprep.subr.bf16.mxu1 %v9821_v60 }
 0x489   :  { %v1491_v55 = vpop.f32.mrb[44].mxu0  ;;  %v1532_v8 = vpop.f32.mrb[44].mxu1 }
 0x48a   :  { %v1555_v15 = vadd.f32 %v9822_v35, %v1491_v55  ;;  %v1557_v12 = vadd.f32 %v9823_v27, %v1532_v8  ;;  %v1493_v33 = vpop.f32.mrb[45].mxu0  ;;  %v1534_v28 = vpop.f32.mrb[45].mxu1  ;;  %v9828_v27 = vld [vmem:[#allocation24_spill] sm:$0xff]  ;;  %v9830_v55 = vld [vmem:[#allocation26_spill] sm:$0xff] }
 0x48b   :  { %v1556_v13 = vadd.f32 %v9824_v22, %v1493_v33  ;;  %v1558_v34 = vadd.f32 %v9825_v59, %v1534_v28  ;;  %v1495_v63 = vpop.f32.mrb[46].mxu0  ;;  %v1536_v56 = vpop.f32.mrb[46].mxu1 }
 0x48c   :  { %v4738_v36 = vmul.f32 -1.442695, %v1555_v15  ;;  %v1496_v24 = vpop.f32.mrb[47].mxu0  ;;  %v1537_v57 = vpop.f32.mrb[47].mxu1  ;;  %v4740_v60 = vmul.f32 -1.442695, %v1557_v12 }
 0x48d   :  { %v4739_v0 = vmul.f32 -1.442695, %v1556_v13  ;;  %v9829_v15 = vld [vmem:[#allocation25_spill] sm:$0xff]  ;;  %v9832_v24 = vld [vmem:[#allocation28_spill] sm:$0xff] }
 0x48e   :  { %5427 = vpow2.f32 %v4738_v36 }
 0x48f   :  { %5429 = vpow2.f32 %v4739_v0  ;;  %v9833_v0 = vld [vmem:[#allocation29_spill] sm:$0xff] }
 0x490   :  { %5431 = vtanh.f32 %v1558_v34 }
 0x491   :  { %5433 = vpow2.f32 %v4740_v60  ;;  %v9831_v60 = vld [vmem:[#allocation27_spill] sm:$0xff] }
 0x498   :  { %v5428_v38 = vpop.eup %5427 }
 0x499   :  { %v1568_v21 = vadd.f32 1.0, %v5428_v38  ;;  %v5430_v35 = vpop.eup %5429 }
 0x49a   :  { %v1569_v8 = vadd.f32 1.0, %v5430_v35  ;;  %v5432_v22 = vpop.eup %5431  ;;  %v9834_v35 = vld [vmem:[#allocation30_spill] sm:$0xff] }
 0x49b   :  { %5435 = vrcp.f32 %v1568_v21  ;;  %v5434_v33 = vpop.eup %5433  ;;  %v9846_v21 = vld [vmem:[#allocation43_spill] sm:$0xff] }
 0x49c   :  { %5437 = vrcp.f32 %v1569_v8  ;;  %v1570_v28 = vadd.f32 1.0, %v5434_v33  ;;  %v9835_v8 = vld [vmem:[#allocation31_spill] sm:$0xff]  ;;  %v9837_v33 = vld [vmem:[#allocation33_spill] sm:$0xff] }
 0x49e   :  { %5439 = vrcp.f32 %v1570_v28  ;;  %v9841_v28 = vld [vmem:[#allocation38_spill] sm:$0xff] }
 0x4a5   :  { %v5436_v59 = vpop.eup %5435 }
 0x4a6   :  { %v1579_v63 = vmul.f32 %v5436_v59, %v5432_v22  ;;  %v5438_v56 = vpop.eup %5437  ;;  %v9836_v22 = vld [vmem:[#allocation32_spill] sm:$0xff]  ;;  %v9838_v59 = vld [vmem:[#allocation35_spill] sm:$0xff] }
 0x4a7   :  { %v1578_v57 = vmul.f32 %v5438_v56, %v7225_v54  ;;  %v9827_v54 = vld [vmem:[#allocation23_spill] sm:$0xff]  ;;  %v9840_v56 = vld [vmem:[#allocation37_spill] sm:$0xff] }
 0x4a8   :  { %v5440_v38 = vpop.eup %5439 }
 0x4a9   :  { %v7365_v13 = vadd.f32 %v1579_v63, %v1578_v57  ;;  %v9839_v63 = vld [vmem:[#allocation36_spill] sm:$0xff]  ;;  %v9842_v57 = vld [vmem:[#allocation39_spill] sm:$0xff] }
 0x4ab   :  { %5441 = vtanh.f32 %v7365_v13 }
 0x4b5   :  { %v5442_v36 = vpop.eup %5441 }
 0x4b6   :  { %v7368_v34 = vmul.f32 %v5442_v36, %v5440_v38  ;;  %v9843_v38 = vld [vmem:[#allocation40_spill] sm:$0xff]  ;;  %v9844_v36 = vld [vmem:[#allocation41_spill] sm:$0xff] }
 0x4b8   :  { %9826 = vst [vmem:[#allocation46_spill] sm:$0xff] %v7368_v34  ;;  %v4744_v12 = vpack.c.bf16 %v7368_v34, %v7368_v34  ;;  %v9847_v34 = vld [vmem:[#allocation44_spill] sm:$0xff] }
 0x4ba   :  { %4745 = vmatprep.mubr.msk.bf16.mxu0 %vm6784_vm3, %v4744_v12  ;;  %4753 = vmatprep.mubr.msk.bf16.mxu1 %vm6784_vm3, %v4744_v12 }
 0x4bb   :  { %4748 = vmatmul.mubr.msk.bf16.vlgmr.msra.gmra.mrb[48].mxu0 %vm6794_vm4, %v4744_v12  ;;  %4756 = vmatmul.mubr.msk.bf16.vlgmr.msra.gmra.mrb[48].mxu1 %vm6794_vm4, %v4744_v12  ;;  %v9845_v12 = vld [vmem:[#allocation42_spill] sm:$0xff] }
 0x4bc   :  { %1724 = vmatpush1.bf16.msra.mxu0 %v6904_v10  ;;  %1765 = vmatpush1.bf16.msra.mxu1 %v6910_v31 }
 0x4bd   :  { %1725 = vmatprep.subr.bf16.mxu0 %v6916_v43  ;;  %1766 = vmatprep.subr.bf16.mxu1 %v6922_v11 }
 0x4c0   :  { %1726 = vmatpush1.bf16.msra.mxu0 %v6928_v19  ;;  %1767 = vmatpush1.bf16.msra.mxu1 %v6934_v25 }
 0x4c1   :  { %1727 = vmatprep.subr.bf16.mxu0 %v6940_v29  ;;  %1768 = vmatprep.subr.bf16.mxu1 %v6946_v37 }
 0x4c4   :  { %1728 = vmatpush1.bf16.msra.mxu0 %v6952_v16  ;;  %1769 = vmatpush1.bf16.msra.mxu1 %v6958_v58 }
 0x4c5   :  { %1729 = vmatprep.subr.bf16.mxu0 %v6964_v32  ;;  %1770 = vmatprep.subr.bf16.mxu1 %v6970_v20 }
 0x4c8   :  { %1730 = vmatpush1.bf16.msra.mxu0 %v6976_v1  ;;  %1771 = vmatpush1.bf16.msra.mxu1 %v6982_v3 }
 0x4c9   :  { %1731 = vmatprep.subr.bf16.mxu0 %v6988_v53  ;;  %1772 = vmatprep.subr.bf16.mxu1 %v6994_v62 }
 0x4cc   :  { %1732 = vmatpush1.bf16.msra.mxu0 %v7000_v9  ;;  %1773 = vmatpush1.bf16.msra.mxu1 %v7006_v39 }
 0x4cd   :  { %1733 = vmatprep.subr.bf16.mxu0 %v7012_v42  ;;  %1774 = vmatprep.subr.bf16.mxu1 %v7018_v17 }
 0x4d0   :  { %1734 = vmatpush1.bf16.msra.mxu0 %v7024_v41  ;;  %1775 = vmatpush1.bf16.msra.mxu1 %v7030_v30 }
 0x4d1   :  { %1735 = vmatprep.subr.bf16.mxu0 %v7036_v40  ;;  %1776 = vmatprep.subr.bf16.mxu1 %v7042_v52 }
 0x4d4   :  { %1736 = vmatpush1.bf16.msra.mxu0 %v7048_v6  ;;  %1777 = vmatpush1.bf16.msra.mxu1 %v7054_v49 }
 0x4d5   :  { %1737 = vmatprep.subr.bf16.mxu0 %v7060_v51  ;;  %1778 = vmatprep.subr.bf16.mxu1 %v7066_v2 }
 0x4d8   :  { %1738 = vmatpush1.bf16.msra.mxu0 %v7072_v45  ;;  %1779 = vmatpush1.bf16.msra.mxu1 %v7078_v47 }
 0x4d9   :  { %1739 = vmatprep.subr.bf16.mxu0 %v7084_v46  ;;  %1780 = vmatprep.subr.bf16.mxu1 %v7090_v50 }
 0x4dc   :  { %1740 = vmatpush1.bf16.msra.mxu0 %v7096_v14  ;;  %1781 = vmatpush1.bf16.msra.mxu1 %v7102_v61 }
 0x4dd   :  { %1741 = vmatprep.subr.bf16.mxu0 %v7108_v44  ;;  %1782 = vmatprep.subr.bf16.mxu1 %v7114_v48 }
 0x4e0   :  { %1742 = vmatpush1.bf16.msra.mxu0 %v7120_v4  ;;  %1783 = vmatpush1.bf16.msra.mxu1 %v7126_v18 }
 0x4e1   :  { %1743 = vmatprep.subr.bf16.mxu0 %v7132_v5  ;;  %1784 = vmatprep.subr.bf16.mxu1 %v7138_v7 }
 0x4e4   :  { %1744 = vmatpush1.bf16.msra.mxu0 %v9827_v54  ;;  %1785 = vmatpush1.bf16.msra.mxu1 %v9828_v27 }
 0x4e5   :  { %1745 = vmatprep.subr.bf16.mxu0 %v9829_v15  ;;  %1786 = vmatprep.subr.bf16.mxu1 %v9830_v55 }
 0x4e8   :  { %1746 = vmatpush1.bf16.msra.mxu0 %v9831_v60  ;;  %1787 = vmatpush1.bf16.msra.mxu1 %v9832_v24  ;;  %v9854_v24 = vld [vmem:[#allocation94_spill] sm:$0xff] }
 0x4e9   :  { %1747 = vmatprep.subr.bf16.mxu0 %v9833_v0  ;;  %1788 = vmatprep.subr.bf16.mxu1 %v9834_v35  ;;  %v9853_v0 = vld [vmem:[#allocation93_spill] sm:$0xff] }
 0x4ec   :  { %1748 = vmatpush1.bf16.msra.mxu0 %v9835_v8  ;;  %1789 = vmatpush1.bf16.msra.mxu1 %v9836_v22  ;;  %v9851_v22 = vld [vmem:[#allocation90_spill] sm:$0xff]  ;;  %v9852_v8 = vld [vmem:[#allocation92_spill] sm:$0xff] }
 0x4ed   :  { %1749 = vmatprep.subr.bf16.mxu0 %v9837_v33  ;;  %1790 = vmatprep.subr.bf16.mxu1 %v9838_v59  ;;  %v9848_v33 = vld [vmem:[#allocation45_spill] sm:$0xff]  ;;  %v9849_v59 = vld [vmem:[#allocation20_spill] sm:$0xff] }
 0x4f0   :  { %1750 = vmatpush1.bf16.msra.mxu0 %v9839_v63  ;;  %1791 = vmatpush1.bf16.msra.mxu1 %v9840_v56  ;;  %v9850_v63 = vld [vmem:[#allocation21_spill] sm:$0xff] }
 0x4f1   :  { %1751 = vmatprep.subr.bf16.mxu0 %v9841_v28  ;;  %1792 = vmatprep.subr.bf16.mxu1 %v9842_v57 }
 0x4f4   :  { %1752 = vmatpush1.bf16.msra.mxu0 %v9843_v38  ;;  %1793 = vmatpush1.bf16.msra.mxu1 %v9844_v36 }
 0x4f5   :  { %1753 = vmatprep.subr.bf16.mxu0 %v9845_v12  ;;  %1794 = vmatprep.subr.bf16.mxu1 %v9846_v21 }
 0x4f8   :  { %1754 = vmatpush1.bf16.msra.mxu0 %v9847_v34  ;;  %1795 = vmatpush1.bf16.msra.mxu1 %v9848_v33 }
 0x4f9   :  { %1856 = vmatprep.subr.bf16.mxu0 %v9849_v59  ;;  %1897 = vmatprep.subr.bf16.mxu1 %v9850_v63 }
 0x58e   :  { %v1624_v56 = vpop.f32.mrb[48].mxu0  ;;  %v1665_v28 = vpop.f32.mrb[48].mxu1 }
 0x58f   :  { %v1688_v57 = vadd.f32 %v9851_v22, %v1624_v56  ;;  %v1690_v38 = vadd.f32 %v9852_v8, %v1665_v28  ;;  %v1626_v35 = vpop.f32.mrb[49].mxu0  ;;  %v1667_v36 = vpop.f32.mrb[49].mxu1  ;;  %v9858_v28 = vld [vmem:[#allocation25_spill] sm:$0xff] }
 0x590   :  { %v1689_v12 = vadd.f32 %v9853_v0, %v1626_v35  ;;  %v1691_v21 = vadd.f32 %v9854_v24, %v1667_v36  ;;  %v1628_v60 = vpop.f32.mrb[50].mxu0  ;;  %v1669_v34 = vpop.f32.mrb[50].mxu1  ;;  %v9861_v36 = vld [vmem:[#allocation28_spill] sm:$0xff] }
 0x591   :  { %v4757_v55 = vmul.f32 -1.442695, %v1688_v57  ;;  %v1629_v33 = vpop.f32.mrb[51].mxu0  ;;  %v1670_v15 = vpop.f32.mrb[51].mxu1  ;;  %v4759_v63 = vmul.f32 -1.442695, %v1690_v38 }
 0x592   :  { %v4758_v59 = vmul.f32 -1.442695, %v1689_v12  ;;  %v9859_v57 = vld [vmem:[#allocation26_spill] sm:$0xff]  ;;  %v9860_v38 = vld [vmem:[#allocation27_spill] sm:$0xff]  ;;  %v9862_v12 = vld [vmem:[#allocation29_spill] sm:$0xff] }
 0x593   :  { %5443 = vpow2.f32 %v4757_v55 }
 0x594   :  { %5445 = vpow2.f32 %v4758_v59 }
 0x595   :  { %5447 = vtanh.f32 %v1691_v21 }
 0x596   :  { %5449 = vpow2.f32 %v4759_v63  ;;  %v9857_v63 = vld [vmem:[#allocation24_spill] sm:$0xff] }
 0x59d   :  { %v5444_v27 = vpop.eup %5443 }
 0x59e   :  { %v1701_v54 = vadd.f32 1.0, %v5444_v27  ;;  %v5446_v22 = vpop.eup %5445 }
 0x59f   :  { %v1702_v8 = vadd.f32 1.0, %v5446_v22  ;;  %v5448_v0 = vpop.eup %5447  ;;  %v9863_v22 = vld [vmem:[#allocation30_spill] sm:$0xff] }
 0x5a0   :  { %5451 = vrcp.f32 %v1701_v54  ;;  %v5450_v35 = vpop.eup %5449  ;;  %v9875_v54 = vld [vmem:[#allocation43_spill] sm:$0xff] }
 0x5a1   :  { %5453 = vrcp.f32 %v1702_v8  ;;  %v1703_v56 = vadd.f32 1.0, %v5450_v35  ;;  %v9864_v8 = vld [vmem:[#allocation31_spill] sm:$0xff]  ;;  %v9866_v35 = vld [vmem:[#allocation33_spill] sm:$0xff] }
 0x5a3   :  { %5455 = vrcp.f32 %v1703_v56  ;;  %v9870_v56 = vld [vmem:[#allocation38_spill] sm:$0xff] }
 0x5aa   :  { %v5452_v24 = vpop.eup %5451 }
 0x5ab   :  { %v1712_v60 = vmul.f32 %v5452_v24, %v5448_v0  ;;  %v5454_v34 = vpop.eup %5453  ;;  %v9865_v0 = vld [vmem:[#allocation32_spill] sm:$0xff]  ;;  %v9867_v24 = vld [vmem:[#allocation35_spill] sm:$0xff] }
 0x5ac   :  { %v1711_v15 = vmul.f32 %v5454_v34, %v7365_v13  ;;  %v9856_v13 = vld [vmem:[#allocation23_spill] sm:$0xff]  ;;  %v9869_v34 = vld [vmem:[#allocation37_spill] sm:$0xff] }
 0x5ad   :  { %v5456_v27 = vpop.eup %5455 }
 0x5ae   :  { %v7450_v33 = vadd.f32 %v1712_v60, %v1711_v15  ;;  %v9868_v60 = vld [vmem:[#allocation36_spill] sm:$0xff]  ;;  %v9871_v15 = vld [vmem:[#allocation39_spill] sm:$0xff] }
 0x5b0   :  { %5457 = vtanh.f32 %v7450_v33 }
 0x5ba   :  { %v5458_v21 = vpop.eup %5457 }
 0x5bb   :  { %v7453_v55 = vmul.f32 %v5458_v21, %v5456_v27  ;;  %v9872_v27 = vld [vmem:[#allocation40_spill] sm:$0xff]  ;;  %v9873_v21 = vld [vmem:[#allocation41_spill] sm:$0xff] }
 0x5bd   :  { %9855 = vst [vmem:[#allocation47_spill] sm:$0xff] %v7453_v55  ;;  %v4763_v59 = vpack.c.bf16 %v7453_v55, %v7453_v55  ;;  %v9876_v55 = vld [vmem:[#allocation44_spill] sm:$0xff] }
 0x5bf   :  { %4764 = vmatprep.mubr.msk.bf16.mxu0 %vm6784_vm3, %v4763_v59  ;;  %4772 = vmatprep.mubr.msk.bf16.mxu1 %vm6784_vm3, %v4763_v59 }
 0x5c0   :  { %4767 = vmatmul.mubr.msk.bf16.vlgmr.msra.gmra.mrb[52].mxu0 %vm6794_vm4, %v4763_v59  ;;  %4775 = vmatmul.mubr.msk.bf16.vlgmr.msra.gmra.mrb[52].mxu1 %vm6794_vm4, %v4763_v59  ;;  %v9874_v59 = vld [vmem:[#allocation42_spill] sm:$0xff] }
 0x5c1   :  { %1857 = vmatpush1.bf16.msra.mxu0 %v6904_v10  ;;  %1898 = vmatpush1.bf16.msra.mxu1 %v6910_v31 }
 0x5c2   :  { %1858 = vmatprep.subr.bf16.mxu0 %v6916_v43  ;;  %1899 = vmatprep.subr.bf16.mxu1 %v6922_v11 }
 0x5c5   :  { %1859 = vmatpush1.bf16.msra.mxu0 %v6928_v19  ;;  %1900 = vmatpush1.bf16.msra.mxu1 %v6934_v25 }
 0x5c6   :  { %1860 = vmatprep.subr.bf16.mxu0 %v6940_v29  ;;  %1901 = vmatprep.subr.bf16.mxu1 %v6946_v37 }
 0x5c9   :  { %1861 = vmatpush1.bf16.msra.mxu0 %v6952_v16  ;;  %1902 = vmatpush1.bf16.msra.mxu1 %v6958_v58 }
 0x5ca   :  { %1862 = vmatprep.subr.bf16.mxu0 %v6964_v32  ;;  %1903 = vmatprep.subr.bf16.mxu1 %v6970_v20 }
 0x5cd   :  { %1863 = vmatpush1.bf16.msra.mxu0 %v6976_v1  ;;  %1904 = vmatpush1.bf16.msra.mxu1 %v6982_v3 }
 0x5ce   :  { %1864 = vmatprep.subr.bf16.mxu0 %v6988_v53  ;;  %1905 = vmatprep.subr.bf16.mxu1 %v6994_v62 }
 0x5d1   :  { %1865 = vmatpush1.bf16.msra.mxu0 %v7000_v9  ;;  %1906 = vmatpush1.bf16.msra.mxu1 %v7006_v39 }
 0x5d2   :  { %1866 = vmatprep.subr.bf16.mxu0 %v7012_v42  ;;  %1907 = vmatprep.subr.bf16.mxu1 %v7018_v17 }
 0x5d5   :  { %1867 = vmatpush1.bf16.msra.mxu0 %v7024_v41  ;;  %1908 = vmatpush1.bf16.msra.mxu1 %v7030_v30 }
 0x5d6   :  { %1868 = vmatprep.subr.bf16.mxu0 %v7036_v40  ;;  %1909 = vmatprep.subr.bf16.mxu1 %v7042_v52 }
 0x5d9   :  { %1869 = vmatpush1.bf16.msra.mxu0 %v7048_v6  ;;  %1910 = vmatpush1.bf16.msra.mxu1 %v7054_v49 }
 0x5da   :  { %1870 = vmatprep.subr.bf16.mxu0 %v7060_v51  ;;  %1911 = vmatprep.subr.bf16.mxu1 %v7066_v2 }
 0x5dd   :  { %1871 = vmatpush1.bf16.msra.mxu0 %v7072_v45  ;;  %1912 = vmatpush1.bf16.msra.mxu1 %v7078_v47 }
 0x5de   :  { %1872 = vmatprep.subr.bf16.mxu0 %v7084_v46  ;;  %1913 = vmatprep.subr.bf16.mxu1 %v7090_v50 }
 0x5e1   :  { %1873 = vmatpush1.bf16.msra.mxu0 %v7096_v14  ;;  %1914 = vmatpush1.bf16.msra.mxu1 %v7102_v61 }
 0x5e2   :  { %1874 = vmatprep.subr.bf16.mxu0 %v7108_v44  ;;  %1915 = vmatprep.subr.bf16.mxu1 %v7114_v48 }
 0x5e5   :  { %1875 = vmatpush1.bf16.msra.mxu0 %v7120_v4  ;;  %1916 = vmatpush1.bf16.msra.mxu1 %v7126_v18 }
 0x5e6   :  { %1876 = vmatprep.subr.bf16.mxu0 %v7132_v5  ;;  %1917 = vmatprep.subr.bf16.mxu1 %v7138_v7 }
 0x5e9   :  { %1877 = vmatpush1.bf16.msra.mxu0 %v9856_v13  ;;  %1918 = vmatpush1.bf16.msra.mxu1 %v9857_v63 }
 0x5ea   :  { %1878 = vmatprep.subr.bf16.mxu0 %v9858_v28  ;;  %1919 = vmatprep.subr.bf16.mxu1 %v9859_v57 }
 0x5ed   :  { %1879 = vmatpush1.bf16.msra.mxu0 %v9860_v38  ;;  %1920 = vmatpush1.bf16.msra.mxu1 %v9861_v36  ;;  %v9883_v36 = vld [vmem:[#allocation91_spill] sm:$0xff] }
 0x5ee   :  { %1880 = vmatprep.subr.bf16.mxu0 %v9862_v12  ;;  %1921 = vmatprep.subr.bf16.mxu1 %v9863_v22  ;;  %v9882_v12 = vld [vmem:[#allocation89_spill] sm:$0xff] }
 0x5f1   :  { %1881 = vmatpush1.bf16.msra.mxu0 %v9864_v8  ;;  %1922 = vmatpush1.bf16.msra.mxu1 %v9865_v0  ;;  %v9880_v0 = vld [vmem:[#allocation87_spill] sm:$0xff]  ;;  %v9881_v8 = vld [vmem:[#allocation88_spill] sm:$0xff] }
 0x5f2   :  { %1882 = vmatprep.subr.bf16.mxu0 %v9866_v35  ;;  %1923 = vmatprep.subr.bf16.mxu1 %v9867_v24  ;;  %v9877_v35 = vld [vmem:[#allocation45_spill] sm:$0xff]  ;;  %v9878_v24 = vld [vmem:[#allocation20_spill] sm:$0xff] }
 0x5f5   :  { %1883 = vmatpush1.bf16.msra.mxu0 %v9868_v60  ;;  %1924 = vmatpush1.bf16.msra.mxu1 %v9869_v34  ;;  %v9879_v60 = vld [vmem:[#allocation21_spill] sm:$0xff] }
 0x5f6   :  { %1884 = vmatprep.subr.bf16.mxu0 %v9870_v56  ;;  %1925 = vmatprep.subr.bf16.mxu1 %v9871_v15 }
 0x5f9   :  { %1885 = vmatpush1.bf16.msra.mxu0 %v9872_v27  ;;  %1926 = vmatpush1.bf16.msra.mxu1 %v9873_v21 }
 0x5fa   :  { %1886 = vmatprep.subr.bf16.mxu0 %v9874_v59  ;;  %1927 = vmatprep.subr.bf16.mxu1 %v9875_v54 }
 0x5fd   :  { %1887 = vmatpush1.bf16.msra.mxu0 %v9876_v55  ;;  %1928 = vmatpush1.bf16.msra.mxu1 %v9877_v35 }
 0x5fe   :  { %1989 = vmatprep.subr.bf16.mxu0 %v9878_v24  ;;  %2030 = vmatprep.subr.bf16.mxu1 %v9879_v60 }
 0x693   :  { %v1757_v34 = vpop.f32.mrb[52].mxu0  ;;  %v1798_v56 = vpop.f32.mrb[52].mxu1 }
 0x694   :  { %v1821_v15 = vadd.f32 %v9880_v0, %v1757_v34  ;;  %v1823_v27 = vadd.f32 %v9881_v8, %v1798_v56  ;;  %v1759_v22 = vpop.f32.mrb[53].mxu0  ;;  %v1800_v21 = vpop.f32.mrb[53].mxu1 }
 0x695   :  { %v1822_v59 = vadd.f32 %v9882_v12, %v1759_v22  ;;  %v1824_v54 = vadd.f32 %v9883_v36, %v1800_v21  ;;  %v1761_v38 = vpop.f32.mrb[54].mxu0  ;;  %v1802_v55 = vpop.f32.mrb[54].mxu1 }
 0x696   :  { %v4776_v57 = vmul.f32 -1.442695, %v1821_v15  ;;  %v1762_v35 = vpop.f32.mrb[55].mxu0  ;;  %v1803_v28 = vpop.f32.mrb[55].mxu1  ;;  %v4778_v60 = vmul.f32 -1.442695, %v1823_v27 }
 0x697   :  { %v4777_v24 = vmul.f32 -1.442695, %v1822_v59 }
 0x698   :  { %5459 = vpow2.f32 %v4776_v57 }
 0x699   :  { %5461 = vpow2.f32 %v4777_v24 }
 0x69a   :  { %5463 = vtanh.f32 %v1824_v54 }
 0x69b   :  { %5465 = vpow2.f32 %v4778_v60 }
 0x6a2   :  { %v5460_v63 = vpop.eup %5459 }
 0x6a3   :  { %v1834_v13 = vadd.f32 1.0, %v5460_v63  ;;  %v5462_v0 = vpop.eup %5461 }
 0x6a4   :  { %v1835_v8 = vadd.f32 1.0, %v5462_v0  ;;  %v5464_v12 = vpop.eup %5463 }
 0x6a5   :  { %5467 = vrcp.f32 %v1834_v13  ;;  %v5466_v22 = vpop.eup %5465 }
 0x6a6   :  { %5469 = vrcp.f32 %v1835_v8  ;;  %v1836_v34 = vadd.f32 1.0, %v5466_v22 }
 0x6a8   :  { %5471 = vrcp.f32 %v1836_v34 }
 0x6af   :  { %v5468_v36 = vpop.eup %5467 }
 0x6b0   :  { %v1845_v38 = vmul.f32 %v5468_v36, %v5464_v12  ;;  %v5470_v55 = vpop.eup %5469 }
 0x6b1   :  { %v1844_v28 = vmul.f32 %v5470_v55, %v7450_v33 }
 0x6b2   :  { %v5472_v63 = vpop.eup %5471 }
 0x6b3   :  { %v7535_v35 = vadd.f32 %v1845_v38, %v1844_v28 }
 0x6b5   :  { %5473 = vtanh.f32 %v7535_v35 }
 0x6bf   :  { %v5474_v54 = vpop.eup %5473 }
 0x6c0   :  { %v7538_v57 = vmul.f32 %v5474_v54, %v5472_v63 }
 0x6c2   :  { %v1850_v13 = vrot.slane %v7538_v57, 4  ;;  %v4782_v56 = vpack.c.bf16 %v7538_v57, %v7538_v57 }
 0x6c4   :  { %4783 = vmatprep.mubr.msk.bf16.mxu0 %vm6784_vm3, %v4782_v56  ;;  %4791 = vmatprep.mubr.msk.bf16.mxu1 %vm6784_vm3, %v4782_v56 }
 0x6c5   :  { %4786 = vmatmul.mubr.msk.bf16.vlgmr.msra.gmra.mrb[56].mxu0 %vm6794_vm4, %v4782_v56  ;;  %4794 = vmatmul.mubr.msk.bf16.vlgmr.msra.gmra.mrb[56].mxu1 %vm6794_vm4, %v4782_v56 }
 0x6c6   :  { %1990 = vmatpush1.bf16.msra.mxu0 %v6904_v10  ;;  %2031 = vmatpush1.bf16.msra.mxu1 %v6910_v31  ;;  %v9905_v10 = vld [vmem:[#allocation45_spill] sm:$0xff] }
 0x6c7   :  { %1991 = vmatprep.subr.bf16.mxu0 %v6916_v43  ;;  %2032 = vmatprep.subr.bf16.mxu1 %v6922_v11  ;;  %v9906_v11 = vld [vmem:[#allocation82_spill] sm:$0xff] }
 0x6ca   :  { %1992 = vmatpush1.bf16.msra.mxu0 %v6928_v19  ;;  %2033 = vmatpush1.bf16.msra.mxu1 %v6934_v25  ;;  %v9907_v25 = vld [vmem:[#allocation84_spill] sm:$0xff] }
 0x6cb   :  { %1993 = vmatprep.subr.bf16.mxu0 %v6940_v29  ;;  %2034 = vmatprep.subr.bf16.mxu1 %v6946_v37 }
 0x6ce   :  { %1994 = vmatpush1.bf16.msra.mxu0 %v6952_v16  ;;  %2035 = vmatpush1.bf16.msra.mxu1 %v6958_v58  ;;  %v9908_v58 = vld [vmem:[#allocation85_spill] sm:$0xff] }
 0x6cf   :  { %1995 = vmatprep.subr.bf16.mxu0 %v6964_v32  ;;  %2036 = vmatprep.subr.bf16.mxu1 %v6970_v20  ;;  %v9909_v20 = vld [vmem:[#allocation86_spill] sm:$0xff] }
 0x6d2   :  { %1996 = vmatpush1.bf16.msra.mxu0 %v6976_v1  ;;  %2037 = vmatpush1.bf16.msra.mxu1 %v6982_v3 }
 0x6d3   :  { %1997 = vmatprep.subr.bf16.mxu0 %v6988_v53  ;;  %2038 = vmatprep.subr.bf16.mxu1 %v6994_v62 }
 0x6d6   :  { %1998 = vmatpush1.bf16.msra.mxu0 %v7000_v9  ;;  %2039 = vmatpush1.bf16.msra.mxu1 %v7006_v39 }
 0x6d7   :  { %1999 = vmatprep.subr.bf16.mxu0 %v7012_v42  ;;  %2040 = vmatprep.subr.bf16.mxu1 %v7018_v17  ;;  %v9902_v17 = vld [vmem:[#allocation42_spill] sm:$0xff] }
 0x6da   :  { %2000 = vmatpush1.bf16.msra.mxu0 %v7024_v41  ;;  %2041 = vmatpush1.bf16.msra.mxu1 %v7030_v30  ;;  %v9884_v30 = vld [vmem:[#allocation23_spill] sm:$0xff]  ;;  %v9904_v41 = vld [vmem:[#allocation44_spill] sm:$0xff] }
 0x6db   :  { %2001 = vmatprep.subr.bf16.mxu0 %v7036_v40  ;;  %2042 = vmatprep.subr.bf16.mxu1 %v7042_v52  ;;  %v9901_v52 = vld [vmem:[#allocation41_spill] sm:$0xff]  ;;  %v9903_v40 = vld [vmem:[#allocation43_spill] sm:$0xff] }
 0x6de   :  { %2002 = vmatpush1.bf16.msra.mxu0 %v7048_v6  ;;  %2043 = vmatpush1.bf16.msra.mxu1 %v7054_v49  ;;  %v9887_v49 = vld [vmem:[#allocation26_spill] sm:$0xff]  ;;  %v9889_v6 = vld [vmem:[#allocation28_spill] sm:$0xff] }
 0x6df   :  { %2003 = vmatprep.subr.bf16.mxu0 %v7060_v51  ;;  %2044 = vmatprep.subr.bf16.mxu1 %v7066_v2  ;;  %v9885_v2 = vld [vmem:[#allocation24_spill] sm:$0xff]  ;;  %v9886_v51 = vld [vmem:[#allocation25_spill] sm:$0xff] }
 0x6e2   :  { %2004 = vmatpush1.bf16.msra.mxu0 %v7072_v45  ;;  %2045 = vmatpush1.bf16.msra.mxu1 %v7078_v47  ;;  %v9891_v47 = vld [vmem:[#allocation30_spill] sm:$0xff]  ;;  %v9892_v45 = vld [vmem:[#allocation31_spill] sm:$0xff] }
 0x6e3   :  { %2005 = vmatprep.subr.bf16.mxu0 %v7084_v46  ;;  %2046 = vmatprep.subr.bf16.mxu1 %v7090_v50  ;;  %v9888_v50 = vld [vmem:[#allocation27_spill] sm:$0xff]  ;;  %v9890_v46 = vld [vmem:[#allocation29_spill] sm:$0xff] }
 0x6e6   :  { %2006 = vmatpush1.bf16.msra.mxu0 %v7096_v14  ;;  %2047 = vmatpush1.bf16.msra.mxu1 %v7102_v61  ;;  %v9895_v61 = vld [vmem:[#allocation35_spill] sm:$0xff]  ;;  %v9897_v14 = vld [vmem:[#allocation37_spill] sm:$0xff] }
 0x6e7   :  { %2007 = vmatprep.subr.bf16.mxu0 %v7108_v44  ;;  %2048 = vmatprep.subr.bf16.mxu1 %v7114_v48  ;;  %v9893_v48 = vld [vmem:[#allocation32_spill] sm:$0xff]  ;;  %v9894_v44 = vld [vmem:[#allocation33_spill] sm:$0xff] }
 0x6ea   :  { %2008 = vmatpush1.bf16.msra.mxu0 %v7120_v4  ;;  %2049 = vmatpush1.bf16.msra.mxu1 %v7126_v18  ;;  %v9899_v18 = vld [vmem:[#allocation39_spill] sm:$0xff]  ;;  %v9900_v4 = vld [vmem:[#allocation40_spill] sm:$0xff] }
 0x6eb   :  { %2009 = vmatprep.subr.bf16.mxu0 %v7132_v5  ;;  %2050 = vmatprep.subr.bf16.mxu1 %v7138_v7  ;;  %v9896_v7 = vld [vmem:[#allocation36_spill] sm:$0xff]  ;;  %v9898_v5 = vld [vmem:[#allocation38_spill] sm:$0xff] }
 0x6ee   :  { %2010 = vmatpush1.bf16.msra.mxu0 %v9884_v30  ;;  %2051 = vmatpush1.bf16.msra.mxu1 %v9885_v2  ;;  %v9910_v30 = vld [vmem:[#allocation79_spill] sm:$0xff] }
 0x6ef   :  { %2011 = vmatprep.subr.bf16.mxu0 %v9886_v51  ;;  %2052 = vmatprep.subr.bf16.mxu1 %v9887_v49  ;;  %v9911_v51 = vld [vmem:[#allocation80_spill] sm:$0xff] }
 0x6f2   :  { %2012 = vmatpush1.bf16.msra.mxu0 %v9888_v50  ;;  %2053 = vmatpush1.bf16.msra.mxu1 %v9889_v6 }
 0x6f3   :  { %2013 = vmatprep.subr.bf16.mxu0 %v9890_v46  ;;  %2054 = vmatprep.subr.bf16.mxu1 %v9891_v47  ;;  %v9912_v46 = vld [vmem:[#allocation81_spill] sm:$0xff] }
 0x6f6   :  { %2014 = vmatpush1.bf16.msra.mxu0 %v9892_v45  ;;  %2055 = vmatpush1.bf16.msra.mxu1 %v9893_v48  ;;  %v9913_v45 = vld [vmem:[#allocation83_spill] sm:$0xff] }
 0x6f7   :  { %2015 = vmatprep.subr.bf16.mxu0 %v9894_v44  ;;  %2056 = vmatprep.subr.bf16.mxu1 %v9895_v61 }
 0x6fa   :  { %2016 = vmatpush1.bf16.msra.mxu0 %v9896_v7  ;;  %2057 = vmatpush1.bf16.msra.mxu1 %v9897_v14 }
 0x6fb   :  { %2017 = vmatprep.subr.bf16.mxu0 %v9898_v5  ;;  %2058 = vmatprep.subr.bf16.mxu1 %v9899_v18 }
 0x6fe   :  { %2018 = vmatpush1.bf16.msra.mxu0 %v9900_v4  ;;  %2059 = vmatpush1.bf16.msra.mxu1 %v9901_v52 }
 0x6ff   :  { %2019 = vmatprep.subr.bf16.mxu0 %v9902_v17  ;;  %2060 = vmatprep.subr.bf16.mxu1 %v9903_v40 }
 0x702   :  { %2020 = vmatpush1.bf16.msra.mxu0 %v9904_v41  ;;  %2061 = vmatpush1.bf16.msra.mxu1 %v9905_v10 }
 0x798   :  { %v1890_v31 = vpop.f32.mrb[56].mxu0  ;;  %v1931_v43 = vpop.f32.mrb[56].mxu1 }
 0x799   :  { %v1954_v19 = vadd.f32 %v9906_v11, %v1890_v31  ;;  %v1956_v29 = vadd.f32 %v9907_v25, %v1931_v43  ;;  %v1892_v37 = vpop.f32.mrb[57].mxu0  ;;  %v1933_v16 = vpop.f32.mrb[57].mxu1 }
 0x79a   :  { %v1955_v32 = vadd.f32 %v9908_v58, %v1892_v37  ;;  %v1957_v1 = vadd.f32 %v9909_v20, %v1933_v16  ;;  %v1894_v3 = vpop.f32.mrb[58].mxu0  ;;  %v1935_v53 = vpop.f32.mrb[58].mxu1 }
 0x79b   :  { %v4795_v62 = vmul.f32 -1.442695, %v1954_v19  ;;  %v1895_v9 = vpop.f32.mrb[59].mxu0  ;;  %v1936_v39 = vpop.f32.mrb[59].mxu1  ;;  %v4797_v33 = vmul.f32 -1.442695, %v1956_v29 }
 0x79c   :  { %v4796_v42 = vmul.f32 -1.442695, %v1955_v32 }
 0x79d   :  { %5475 = vpow2.f32 %v4795_v62 }
 0x79e   :  { %5477 = vpow2.f32 %v4796_v42 }
 0x79f   :  { %5479 = vtanh.f32 %v1957_v1 }
 0x7a0   :  { %5481 = vpow2.f32 %v4797_v33 }
 0x7a7   :  { %v5476_v15 = vpop.eup %5475 }
 0x7a8   :  { %v1967_v27 = vadd.f32 1.0, %v5476_v15  ;;  %v5478_v21 = vpop.eup %5477 }
 0x7a9   :  { %v1968_v59 = vadd.f32 1.0, %v5478_v21  ;;  %v5480_v24 = vpop.eup %5479 }
 0x7aa   :  { %5483 = vrcp.f32 %v1967_v27  ;;  %v5482_v60 = vpop.eup %5481 }
 0x7ab   :  { %5485 = vrcp.f32 %v1968_v59  ;;  %v1969_v22 = vadd.f32 1.0, %v5482_v60 }
 0x7ad   :  { %5487 = vrcp.f32 %v1969_v22 }
 0x7b4   :  { %v5484_v0 = vpop.eup %5483 }
 0x7b5   :  { %v1978_v8 = vmul.f32 %v5484_v0, %v5480_v24  ;;  %v5486_v12 = vpop.eup %5485 }
 0x7b6   :  { %v1977_v36 = vmul.f32 %v5486_v12, %v7535_v35 }
 0x7b7   :  { %v5488_v55 = vpop.eup %5487 }
 0x7b8   :  { %v1979_v38 = vadd.f32 %v1978_v8, %v1977_v36 }
 0x7ba   :  { %5489 = vtanh.f32 %v1979_v38 }
 0x7c4   :  { %v5490_v34 = vpop.eup %5489 }
 0x7c5   :  { %v7618_v28 = vmul.f32 %v5490_v34, %v5488_v55 }
 0x7c7   :  { %v1983_v63 = vrot.slane %v7618_v28, 4  ;;  %v4801_v54 = vpack.c.bf16 %v7618_v28, %v7618_v28 }
 0x7c9   :  { %4802 = vmatprep.mubr.msk.bf16.mxu0 %vm6784_vm3, %v4801_v54  ;;  %4810 = vmatprep.mubr.msk.bf16.mxu1 %vm6784_vm3, %v4801_v54 }
 0x7ca   :  { %4805 = vmatmul.mubr.msk.bf16.vlgmr.msra.gmra.mrb[60].mxu0 %vm6794_vm4, %v4801_v54  ;;  %4813 = vmatmul.mubr.msk.bf16.vlgmr.msra.gmra.mrb[60].mxu1 %vm6794_vm4, %v4801_v54 }
 0x89d   :  { %v2023_v35 = vpop.f32.mrb[60].mxu0  ;;  %v2064_v56 = vpop.f32.mrb[60].mxu1 }
 0x89e   :  { %v2087_v2 = vadd.f32 %v9910_v30, %v2023_v35  ;;  %v2089_v49 = vadd.f32 %v9911_v51, %v2064_v56  ;;  %v2025_v50 = vpop.f32.mrb[61].mxu0  ;;  %v2066_v6 = vpop.f32.mrb[61].mxu1 }
 0x89f   :  { %v2088_v47 = vadd.f32 %v9912_v46, %v2025_v50  ;;  %v2090_v48 = vadd.f32 %v9913_v45, %v2066_v6  ;;  %v2027_v44 = vpop.f32.mrb[62].mxu0  ;;  %v2068_v61 = vpop.f32.mrb[62].mxu1 }
 0x8a0   :  { %v4814_v7 = vmul.f32 -1.442695, %v2087_v2  ;;  %v2028_v14 = vpop.f32.mrb[63].mxu0  ;;  %v2069_v5 = vpop.f32.mrb[63].mxu1  ;;  %v4816_v4 = vmul.f32 -1.442695, %v2089_v49 }
 0x8a1   :  { %v4815_v18 = vmul.f32 -1.442695, %v2088_v47 }
 0x8a2   :  { %5491 = vpow2.f32 %v4814_v7 }
 0x8a3   :  { %5493 = vpow2.f32 %v4815_v18 }
 0x8a4   :  { %5495 = vtanh.f32 %v2090_v48 }
 0x8a5   :  { %5497 = vpow2.f32 %v4816_v4 }
 0x8ac   :  { %v5492_v52 = vpop.eup %5491 }
 0x8ad   :  { %v2100_v17 = vadd.f32 1.0, %v5492_v52  ;;  %v5494_v40 = vpop.eup %5493 }
 0x8ae   :  { %v2101_v41 = vadd.f32 1.0, %v5494_v40  ;;  %v5496_v10 = vpop.eup %5495 }
 0x8af   :  { %5499 = vrcp.f32 %v2100_v17  ;;  %v5498_v31 = vpop.eup %5497 }
 0x8b0   :  { %5501 = vrcp.f32 %v2101_v41  ;;  %v2102_v25 = vadd.f32 1.0, %v5498_v31 }
 0x8b2   :  { %5503 = vrcp.f32 %v2102_v25 }
 0x8b9   :  { %v5500_v43 = vpop.eup %5499 }
 0x8ba   :  { %v2111_v11 = vmul.f32 %v5500_v43, %v5496_v10  ;;  %v5502_v19 = vpop.eup %5501 }
 0x8bb   :  { %v2110_v29 = vmul.f32 %v5502_v19, %v1979_v38 }
 0x8bc   :  { %v5504_v16 = vpop.eup %5503 }
 0x8bd   :  { %v2112_v37 = vadd.f32 %v2111_v11, %v2110_v29 }
 0x8bf   :  { %5505 = vtanh.f32 %v2112_v37 }
 0x8c9   :  { %v5506_v58 = vpop.eup %5505 }
 0x8ca   :  { %v7635_v32 = vmul.f32 %v5506_v58, %v5504_v16 }
 0x8cc   :  { %v2116_v20 = vrot.slane %v7635_v32, 4 }
 0x8cd   :  { %5831 = dma.done.wait [#allocation7], 16384 }
 0x8ce   :  { %5832 = vsyncadd [#allocation7], 4294950912 }
 0x8cf   :  { %5833 = dma.done.wait [#allocation7 + $0x1], 8192 }
 0x8d0   :  { %5834 = vsyncadd [#allocation7 + $0x1], 4294959104  ;;  %v7638_v1 = vpack.c.bf16 %v1983_v63, %v2116_v20  ;;  %v9914_v3 = vmov 0   ;;  %v2150_v53 = vld [vmem:[#allocation5 + $0x8] sm:$0xff]  ;;  %v2152_v62 = vld [vmem:[#allocation5 + $0x18] sm:$0xff]  ;;  %vm4071_vm7 = vcmask 7168  }
 0x8d1   :  { %5572 = vset.pattern.permute.xlu1 %v9914_v3  ;;  %5571 = vset.pattern.permute.xlu0 %v9914_v3  ;;  %v2149_v9 = vld [vmem:[#allocation5] sm:$0xff]  ;;  %v2151_v39 = vld [vmem:[#allocation5 + $0x10] sm:$0xff]  ;;  %v2158_v42 = vld [vmem:[#allocation5 + $0x48] sm:$0xff]  ;;  %vm4197_vm15 = vcmask 523264  }
 0x8d2   :  { %2415 = vmatprep.mubr.bf16.mxu0 %v7638_v1  ;;  %2488 = vmatprep.mubr.bf16.mxu1 %v7638_v1  ;;  %v2160_v33 = vld [vmem:[#allocation5 + $0x58] sm:$0xff]  ;;  %v2157_v15 = vld [vmem:[#allocation5 + $0x40] sm:$0xff]  ;;  %v2159_v27 = vld [vmem:[#allocation5 + $0x50] sm:$0xff] }
 0x8d3   :  { %2383 = vmatprep.subr.bf16.mxu0 %v2150_v53  ;;  %2456 = vmatprep.subr.bf16.mxu1 %v2152_v62  ;;  %v2166_v21 = vld [vmem:[#allocation5 + $0x88] sm:$0xff]  ;;  %v2168_v59 = vld [vmem:[#allocation5 + $0x98] sm:$0xff]  ;;  %v2165_v24 = vld [vmem:[#allocation5 + $0x80] sm:$0xff] }
 0x8d4   :  { %2384 = vmatpush1.bf16.msra.mxu0 %v2149_v9  ;;  %2457 = vmatpush1.bf16.msra.mxu1 %v2151_v39  ;;  %v2167_v60 = vld [vmem:[#allocation5 + $0x90] sm:$0xff]  ;;  %v2174_v0 = vld [vmem:[#allocation5 + $0xc8] sm:$0xff]  ;;  %v2176_v8 = vld [vmem:[#allocation5 + $0xd8] sm:$0xff] }
 0x8d5   :  { %2385 = vmatprep.subr.bf16.mxu0 %v2158_v42  ;;  %2458 = vmatprep.subr.bf16.mxu1 %v2160_v33  ;;  %v2173_v12 = vld [vmem:[#allocation5 + $0xc0] sm:$0xff]  ;;  %v2175_v22 = vld [vmem:[#allocation5 + $0xd0] sm:$0xff]  ;;  %v2182_v36 = vld [vmem:[#allocation5 + $0x108] sm:$0xff] }
 0x8d6   :  { %v2184_v38 = vld [vmem:[#allocation5 + $0x118] sm:$0xff]  ;;  %v2181_v55 = vld [vmem:[#allocation5 + $0x100] sm:$0xff]  ;;  %v2183_v34 = vld [vmem:[#allocation5 + $0x110] sm:$0xff] }
 0x8d7   :  { %v2190_v63 = vld [vmem:[#allocation5 + $0x148] sm:$0xff]  ;;  %v2192_v54 = vld [vmem:[#allocation5 + $0x158] sm:$0xff]  ;;  %v2189_v35 = vld [vmem:[#allocation5 + $0x140] sm:$0xff] }
 0x8d8   :  { %2386 = vmatpush1.bf16.msra.mxu0 %v2157_v15  ;;  %2459 = vmatpush1.bf16.msra.mxu1 %v2159_v27  ;;  %v2191_v56 = vld [vmem:[#allocation5 + $0x150] sm:$0xff]  ;;  %v2198_v30 = vld [vmem:[#allocation5 + $0x188] sm:$0xff]  ;;  %v2200_v2 = vld [vmem:[#allocation5 + $0x198] sm:$0xff] }
 0x8d9   :  { %2387 = vmatprep.subr.bf16.mxu0 %v2166_v21  ;;  %2460 = vmatprep.subr.bf16.mxu1 %v2168_v59  ;;  %v2197_v51 = vld [vmem:[#allocation5 + $0x180] sm:$0xff]  ;;  %v2199_v49 = vld [vmem:[#allocation5 + $0x190] sm:$0xff]  ;;  %v2206_v50 = vld [vmem:[#allocation5 + $0x1c8] sm:$0xff] }
 0x8da   :  { %v2208_v6 = vld [vmem:[#allocation5 + $0x1d8] sm:$0xff]  ;;  %v2205_v46 = vld [vmem:[#allocation5 + $0x1c0] sm:$0xff]  ;;  %v2207_v47 = vld [vmem:[#allocation5 + $0x1d0] sm:$0xff] }
 0x8db   :  { %v2214_v45 = vld [vmem:[#allocation5 + $0x208] sm:$0xff]  ;;  %v2216_v48 = vld [vmem:[#allocation5 + $0x218] sm:$0xff]  ;;  %v2213_v44 = vld [vmem:[#allocation5 + $0x200] sm:$0xff] }
 0x8dc   :  { %2388 = vmatpush1.bf16.msra.mxu0 %v2165_v24  ;;  %2461 = vmatpush1.bf16.msra.mxu1 %v2167_v60  ;;  %v2215_v61 = vld [vmem:[#allocation5 + $0x210] sm:$0xff]  ;;  %v2222_v7 = vld [vmem:[#allocation5 + $0x248] sm:$0xff]  ;;  %v2224_v14 = vld [vmem:[#allocation5 + $0x258] sm:$0xff] }
 0x8dd   :  { %2389 = vmatprep.subr.bf16.mxu0 %v2174_v0  ;;  %2462 = vmatprep.subr.bf16.mxu1 %v2176_v8  ;;  %v2221_v5 = vld [vmem:[#allocation5 + $0x240] sm:$0xff]  ;;  %v2223_v18 = vld [vmem:[#allocation5 + $0x250] sm:$0xff]  ;;  %v2230_v4 = vld [vmem:[#allocation5 + $0x288] sm:$0xff] }
 0x8de   :  { %v2232_v52 = vld [vmem:[#allocation5 + $0x298] sm:$0xff]  ;;  %v2229_v17 = vld [vmem:[#allocation5 + $0x280] sm:$0xff]  ;;  %v2231_v40 = vld [vmem:[#allocation5 + $0x290] sm:$0xff] }
 0x8df   :  { %v2238_v41 = vld [vmem:[#allocation5 + $0x2c8] sm:$0xff]  ;;  %v2240_v10 = vld [vmem:[#allocation5 + $0x2d8] sm:$0xff]  ;;  %v2237_v31 = vld [vmem:[#allocation5 + $0x2c0] sm:$0xff] }
 0x8e0   :  { %2390 = vmatpush1.bf16.msra.mxu0 %v2173_v12  ;;  %2463 = vmatpush1.bf16.msra.mxu1 %v2175_v22  ;;  %v2239_v43 = vld [vmem:[#allocation5 + $0x2d0] sm:$0xff]  ;;  %v2246_v11 = vld [vmem:[#allocation5 + $0x308] sm:$0xff]  ;;  %v2248_v19 = vld [vmem:[#allocation5 + $0x318] sm:$0xff] }
 0x8e1   :  { %2391 = vmatprep.subr.bf16.mxu0 %v2182_v36  ;;  %2464 = vmatprep.subr.bf16.mxu1 %v2184_v38  ;;  %v2245_v25 = vld [vmem:[#allocation5 + $0x300] sm:$0xff]  ;;  %v2247_v29 = vld [vmem:[#allocation5 + $0x310] sm:$0xff]  ;;  %v2254_v37 = vld [vmem:[#allocation5 + $0x348] sm:$0xff] }
 0x8e2   :  { %v2256_v16 = vld [vmem:[#allocation5 + $0x358] sm:$0xff]  ;;  %v2253_v58 = vld [vmem:[#allocation5 + $0x340] sm:$0xff]  ;;  %v2255_v20 = vld [vmem:[#allocation5 + $0x350] sm:$0xff] }
 0x8e3   :  { %v2262_v53 = vld [vmem:[#allocation5 + $0x388] sm:$0xff]  ;;  %v2264_v62 = vld [vmem:[#allocation5 + $0x398] sm:$0xff]  ;;  %v2261_v9 = vld [vmem:[#allocation5 + $0x380] sm:$0xff] }
 0x8e4   :  { %2392 = vmatpush1.bf16.msra.mxu0 %v2181_v55  ;;  %2465 = vmatpush1.bf16.msra.mxu1 %v2183_v34  ;;  %v2263_v39 = vld [vmem:[#allocation5 + $0x390] sm:$0xff]  ;;  %v2270_v42 = vld [vmem:[#allocation5 + $0x3c8] sm:$0xff]  ;;  %v2272_v33 = vld [vmem:[#allocation5 + $0x3d8] sm:$0xff] }
 0x8e5   :  { %2393 = vmatprep.subr.bf16.mxu0 %v2190_v63  ;;  %2466 = vmatprep.subr.bf16.mxu1 %v2192_v54  ;;  %v2269_v15 = vld [vmem:[#allocation5 + $0x3c0] sm:$0xff]  ;;  %v2271_v27 = vld [vmem:[#allocation5 + $0x3d0] sm:$0xff]  ;;  %v2154_v21 = vld [vmem:[#allocation5 + $0x28] sm:$0xff] }
 0x8e6   :  { %v2156_v59 = vld [vmem:[#allocation5 + $0x38] sm:$0xff]  ;;  %v9916_v60 = vld [vmem:[#allocation22_spill] sm:$0xff]  ;;  %v2153_v8 = vld [vmem:[#allocation5 + $0x20] sm:$0xff] }
 0x8e7   :  { %v9915_v24 = vld [vmem:[#allocation99_spill] sm:$0xff]  ;;  %v2155_v12 = vld [vmem:[#allocation5 + $0x30] sm:$0xff]  ;;  %v2162_v22 = vld [vmem:[#allocation5 + $0x68] sm:$0xff] }
 0x8e8   :  { %2394 = vmatpush1.bf16.msra.mxu0 %v2189_v35  ;;  %2467 = vmatpush1.bf16.msra.mxu1 %v2191_v56  ;;  %v7646_v0 = vpack.c.bf16 %v9916_v60, %v9915_v24  ;;  %v2164_v36 = vld [vmem:[#allocation5 + $0x78] sm:$0xff]  ;;  %v2161_v63 = vld [vmem:[#allocation5 + $0x60] sm:$0xff]  ;;  %v2163_v54 = vld [vmem:[#allocation5 + $0x70] sm:$0xff] }
 0x8e9   :  { %2395 = vmatprep.subr.bf16.mxu0 %v2198_v30  ;;  %2468 = vmatprep.subr.bf16.mxu1 %v2200_v2  ;;  %v9917_v38 = vld [vmem:[#allocation47_spill] sm:$0xff]  ;;  %v2170_v35 = vld [vmem:[#allocation5 + $0xa8] sm:$0xff]  ;;  %v9919_v30 = vld [vmem:[#allocation34_spill] sm:$0xff] }
 0x8ea   :  { %v9918_v55 = vrot.slane %v9917_v38, 4  ;;  %v2172_v56 = vld [vmem:[#allocation5 + $0xb8] sm:$0xff]  ;;  %v9920_v2 = vld [vmem:[#allocation46_spill] sm:$0xff]  ;;  %v7896_v23 = vld [vmem:[#allocation6 + $0x1e0] sm:$0xff] }
 0x8eb   :  { %v7890_v26 = vld [vmem:[#allocation6 + $0x1f8] sm:$0xff]  ;;  %9981 = vst [vmem:[#allocation36_spill] sm:$0xff] %v7896_v23 }
 0x8ec   :  { %2396 = vmatpush1.bf16.msra.mxu0 %v2197_v51  ;;  %2469 = vmatpush1.bf16.msra.mxu1 %v2199_v49  ;;  %v7652_v34 = vpack.c.bf16 %v9918_v55, %v1850_v13  ;;  %v7660_v13 = vpack.c.bf16 %v9920_v2, %v9919_v30  ;;  %v2169_v51 = vld [vmem:[#allocation5 + $0xa0] sm:$0xff]  ;;  %v2171_v49 = vld [vmem:[#allocation5 + $0xb0] sm:$0xff]  ;;  %v2260_v55 = vld [vmem:[#allocation5 + $0x378] sm:$0xff]  ;;  %9980 = vst [vmem:[#allocation35_spill] sm:$0xff] %v7890_v26 }
 0x8ed   :  { %2397 = vmatprep.subr.bf16.mxu0 %v2206_v50  ;;  %2470 = vmatprep.subr.bf16.mxu1 %v2208_v6  ;;  %v2178_v50 = vld [vmem:[#allocation5 + $0xe8] sm:$0xff]  ;;  %v2180_v6 = vld [vmem:[#allocation5 + $0xf8] sm:$0xff] }
 0x8f0   :  { %2398 = vmatpush1.bf16.msra.mxu0 %v2205_v46  ;;  %2471 = vmatpush1.bf16.msra.mxu1 %v2207_v47  ;;  %v9921_v46 = vrot.slane %v9920_v2, 4  ;;  %v9922_v47 = vrot.slane %v9919_v30, 4  ;;  %v2265_v30 = vld [vmem:[#allocation5 + $0x3a0] sm:$0xff]  ;;  %v2267_v2 = vld [vmem:[#allocation5 + $0x3b0] sm:$0xff] }
 0x8f1   :  { %2399 = vmatprep.subr.bf16.mxu0 %v2214_v45  ;;  %2472 = vmatprep.subr.bf16.mxu1 %v2216_v48  ;;  %v2177_v48 = vld [vmem:[#allocation5 + $0xe0] sm:$0xff] }
 0x8f2   :  { %v7666_v45 = vpack.c.bf16 %v9922_v47, %v9921_v46  ;;  %v7694_v46 = vld [vmem:[#allocation6 + $0x8] sm:$0xff]  ;;  %v7696_v47 = vld [vmem:[#allocation6 + $0x18] sm:$0xff] }
 0x8f4   :  { %2400 = vmatpush1.bf16.msra.mxu0 %v2213_v44  ;;  %2473 = vmatpush1.bf16.msra.mxu1 %v2215_v61  ;;  %v2179_v44 = vld [vmem:[#allocation5 + $0xf0] sm:$0xff]  ;;  %v2186_v61 = vld [vmem:[#allocation5 + $0x128] sm:$0xff] }
 0x8f5   :  { %2401 = vmatprep.subr.bf16.mxu0 %v2222_v7  ;;  %2474 = vmatprep.subr.bf16.mxu1 %v2224_v14  ;;  %v2188_v7 = vld [vmem:[#allocation5 + $0x138] sm:$0xff]  ;;  %v7674_v14 = vpack.c.bf16 %v7538_v57, %v9917_v38  ;;  %v2193_v57 = vld [vmem:[#allocation5 + $0x160] sm:$0xff]  ;;  %v2258_v38 = vld [vmem:[#allocation5 + $0x368] sm:$0xff] }
 0x8f8   :  { %2402 = vmatpush1.bf16.msra.mxu0 %v2221_v5  ;;  %2475 = vmatpush1.bf16.msra.mxu1 %v2223_v18  ;;  %v2185_v5 = vld [vmem:[#allocation5 + $0x120] sm:$0xff]  ;;  %v2187_v18 = vld [vmem:[#allocation5 + $0x130] sm:$0xff] }
 0x8f9   :  { %2403 = vmatprep.subr.bf16.mxu0 %v2230_v4  ;;  %2476 = vmatprep.subr.bf16.mxu1 %v2232_v52  ;;  %v2194_v4 = vld [vmem:[#allocation5 + $0x168] sm:$0xff]  ;;  %v2196_v52 = vld [vmem:[#allocation5 + $0x178] sm:$0xff] }
 0x8fc   :  { %2404 = vmatpush1.bf16.msra.mxu0 %v2229_v17  ;;  %2477 = vmatpush1.bf16.msra.mxu1 %v2231_v40  ;;  %v9923_v17 = vrot.slane %v9916_v60, 4  ;;  %v9924_v40 = vrot.slane %v9915_v24, 4  ;;  %v2241_v24 = vld [vmem:[#allocation5 + $0x2e0] sm:$0xff]  ;;  %v2243_v60 = vld [vmem:[#allocation5 + $0x2f0] sm:$0xff] }
 0x8fd   :  { %2405 = vmatprep.subr.bf16.mxu0 %v2238_v41  ;;  %2478 = vmatprep.subr.bf16.mxu1 %v2240_v10  ;;  %v2195_v10 = vld [vmem:[#allocation5 + $0x170] sm:$0xff] }
 0x8fe   :  { %v7680_v41 = vpack.c.bf16 %v9924_v40, %v9923_v17  ;;  %v7730_v17 = vld [vmem:[#allocation6 + $0x50] sm:$0xff]  ;;  %v7732_v40 = vld [vmem:[#allocation6 + $0x68] sm:$0xff] }
 0x8ff   :  { %9930 = vst [vmem:[#allocation53_spill] sm:$0xff] %v7730_v17  ;;  %9931 = vst [vmem:[#allocation54_spill] sm:$0xff] %v7732_v40 }
 0x900   :  { %2406 = vmatpush1.bf16.msra.mxu0 %v2237_v31  ;;  %2479 = vmatpush1.bf16.msra.mxu1 %v2239_v43  ;;  %v2202_v31 = vld [vmem:[#allocation5 + $0x1a8] sm:$0xff]  ;;  %v2204_v43 = vld [vmem:[#allocation5 + $0x1b8] sm:$0xff] }
 0x901   :  { %2407 = vmatprep.subr.bf16.mxu0 %v2246_v11  ;;  %2480 = vmatprep.subr.bf16.mxu1 %v2248_v19  ;;  %v7688_v11 = vpack.c.bf16 %v7635_v32, %v7618_v28  ;;  %v2201_v19 = vld [vmem:[#allocation5 + $0x1a0] sm:$0xff]  ;;  %v2218_v28 = vld [vmem:[#allocation5 + $0x228] sm:$0xff]  ;;  %v2220_v32 = vld [vmem:[#allocation5 + $0x238] sm:$0xff] }
 0x904   :  { %2408 = vmatpush1.bf16.msra.mxu0 %v2245_v25  ;;  %2481 = vmatpush1.bf16.msra.mxu1 %v2247_v29  ;;  %v2203_v25 = vld [vmem:[#allocation5 + $0x1b0] sm:$0xff]  ;;  %v2210_v29 = vld [vmem:[#allocation5 + $0x1e8] sm:$0xff] }
 0x905   :  { %2409 = vmatprep.subr.bf16.mxu0 %v2254_v37  ;;  %2482 = vmatprep.subr.bf16.mxu1 %v2256_v16  ;;  %v2212_v37 = vld [vmem:[#allocation5 + $0x1f8] sm:$0xff]  ;;  %v2209_v16 = vld [vmem:[#allocation5 + $0x1e0] sm:$0xff] }
 0x908   :  { %2410 = vmatpush1.bf16.msra.mxu0 %v2253_v58  ;;  %2483 = vmatpush1.bf16.msra.mxu1 %v2255_v20  ;;  %v2211_v58 = vld [vmem:[#allocation5 + $0x1f0] sm:$0xff]  ;;  %v2217_v20 = vld [vmem:[#allocation5 + $0x220] sm:$0xff] }
 0x909   :  { %2411 = vmatprep.subr.bf16.mxu0 %v2262_v53  ;;  %2484 = vmatprep.subr.bf16.mxu1 %v2264_v62  ;;  %v2219_v53 = vld [vmem:[#allocation5 + $0x230] sm:$0xff]  ;;  %v2226_v62 = vld [vmem:[#allocation5 + $0x268] sm:$0xff] }
 0x90c   :  { %2412 = vmatpush1.bf16.msra.mxu0 %v2261_v9  ;;  %2485 = vmatpush1.bf16.msra.mxu1 %v2263_v39  ;;  %v2228_v9 = vld [vmem:[#allocation5 + $0x278] sm:$0xff]  ;;  %v2225_v39 = vld [vmem:[#allocation5 + $0x260] sm:$0xff] }
 0x90d   :  { %2413 = vmatprep.subr.bf16.mxu0 %v2270_v42  ;;  %2486 = vmatprep.subr.bf16.mxu1 %v2272_v33  ;;  %v2227_v42 = vld [vmem:[#allocation5 + $0x270] sm:$0xff]  ;;  %v2234_v33 = vld [vmem:[#allocation5 + $0x2a8] sm:$0xff] }
 0x910   :  { %2414 = vmatpush1.bf16.msra.mxu0 %v2269_v15  ;;  %2487 = vmatpush1.bf16.msra.mxu1 %v2271_v27  ;;  %v2236_v15 = vld [vmem:[#allocation5 + $0x2b8] sm:$0xff]  ;;  %v2235_v27 = vld [vmem:[#allocation5 + $0x2b0] sm:$0xff] }
 0x911   :  { %2529 = vmatprep.subr.bf16.mxu0 %v2154_v21  ;;  %2602 = vmatprep.subr.bf16.mxu1 %v2156_v59  ;;  %v2242_v21 = vld [vmem:[#allocation5 + $0x2e8] sm:$0xff]  ;;  %v2244_v59 = vld [vmem:[#allocation5 + $0x2f8] sm:$0xff] }
 0x913   :  { %2416 = vmatmul.mubr.bf16.vlgmr.msra.gmra.mrb[64].mxu0 %v7646_v0  ;;  %2489 = vmatmul.mubr.bf16.vlgmr.msra.gmra.mrb[64].mxu1 %v7646_v0 }
 0x914   :  { %2530 = vmatpush1.bf16.msra.mxu0 %v2153_v8  ;;  %2603 = vmatpush1.bf16.msra.mxu1 %v2155_v12  ;;  %v2250_v8 = vld [vmem:[#allocation5 + $0x328] sm:$0xff]  ;;  %v2252_v12 = vld [vmem:[#allocation5 + $0x338] sm:$0xff] }
 0x915   :  { %2531 = vmatprep.subr.bf16.mxu0 %v2162_v22  ;;  %2604 = vmatprep.subr.bf16.mxu1 %v2164_v36  ;;  %v2249_v22 = vld [vmem:[#allocation5 + $0x320] sm:$0xff]  ;;  %v2251_v36 = vld [vmem:[#allocation5 + $0x330] sm:$0xff] }
 0x916   :  { %2425 = vmatprep.mubr.bf16.mxu0 %v7652_v34  ;;  %2498 = vmatprep.mubr.bf16.mxu1 %v7652_v34 }
 0x918   :  { %2532 = vmatpush1.bf16.msra.mxu0 %v2161_v63  ;;  %2605 = vmatpush1.bf16.msra.mxu1 %v2163_v54  ;;  %v2257_v63 = vld [vmem:[#allocation5 + $0x360] sm:$0xff]  ;;  %v2259_v54 = vld [vmem:[#allocation5 + $0x370] sm:$0xff] }
 0x919   :  { %2533 = vmatprep.subr.bf16.mxu0 %v2170_v35  ;;  %2606 = vmatprep.subr.bf16.mxu1 %v2172_v56  ;;  %v2266_v35 = vld [vmem:[#allocation5 + $0x3a8] sm:$0xff]  ;;  %v2268_v56 = vld [vmem:[#allocation5 + $0x3b8] sm:$0xff] }
 0x91b   :  { %2426 = vmatmul.mubr.bf16.gmra.mrb[68].mxu0 %v7660_v13  ;;  %2499 = vmatmul.mubr.bf16.gmra.mrb[68].mxu1 %v7660_v13 }
 0x91c   :  { %2534 = vmatpush1.bf16.msra.mxu0 %v2169_v51  ;;  %2607 = vmatpush1.bf16.msra.mxu1 %v2171_v49  ;;  %v2274_v51 = vld [vmem:[#allocation5 + $0x3e8] sm:$0xff]  ;;  %v2276_v49 = vld [vmem:[#allocation5 + $0x3f8] sm:$0xff] }
 0x91d   :  { %2535 = vmatprep.subr.bf16.mxu0 %v2178_v50  ;;  %2608 = vmatprep.subr.bf16.mxu1 %v2180_v6  ;;  %v2273_v50 = vld [vmem:[#allocation5 + $0x3e0] sm:$0xff]  ;;  %v2275_v6 = vld [vmem:[#allocation5 + $0x3f0] sm:$0xff] }
 0x91e   :  { %2435 = vmatprep.mubr.bf16.mxu0 %v7666_v45  ;;  %2508 = vmatprep.mubr.bf16.mxu1 %v7666_v45 }
 0x920   :  { %2536 = vmatpush1.bf16.msra.mxu0 %v2177_v48  ;;  %2609 = vmatpush1.bf16.msra.mxu1 %v2179_v44  ;;  %v7700_v48 = vld [vmem:[#allocation6] sm:$0xff]  ;;  %v7702_v44 = vld [vmem:[#allocation6 + $0x10] sm:$0xff] }
 0x921   :  { %2537 = vmatprep.subr.bf16.mxu0 %v2186_v61  ;;  %2610 = vmatprep.subr.bf16.mxu1 %v2188_v7  ;;  %v7704_v61 = vld [vmem:[#allocation6 + $0x28] sm:$0xff]  ;;  %v7706_v7 = vld [vmem:[#allocation6 + $0x38] sm:$0xff] }
 0x923   :  { %2436 = vmatmul.mubr.bf16.gmra.mrb[72].mxu0 %v7674_v14  ;;  %2509 = vmatmul.mubr.bf16.gmra.mrb[72].mxu1 %v7674_v14 }
 0x924   :  { %2538 = vmatpush1.bf16.msra.mxu0 %v2185_v5  ;;  %2611 = vmatpush1.bf16.msra.mxu1 %v2187_v18  ;;  %v7714_v5 = vld [vmem:[#allocation6 + $0x20] sm:$0xff]  ;;  %v7716_v18 = vld [vmem:[#allocation6 + $0x30] sm:$0xff] }
 0x925   :  { %2539 = vmatprep.subr.bf16.mxu0 %v2194_v4  ;;  %2612 = vmatprep.subr.bf16.mxu1 %v2196_v52  ;;  %9925 = vst [vmem:[#allocation48_spill] sm:$0xff] %v7714_v5  ;;  %9926 = vst [vmem:[#allocation49_spill] sm:$0xff] %v7716_v18  ;;  %v7720_v4 = vld [vmem:[#allocation6 + $0x48] sm:$0xff]  ;;  %v7722_v52 = vld [vmem:[#allocation6 + $0x58] sm:$0xff] }
 0x926   :  { %2445 = vmatprep.mubr.bf16.mxu0 %v7680_v41  ;;  %2518 = vmatprep.mubr.bf16.mxu1 %v7680_v41  ;;  %9927 = vst [vmem:[#allocation50_spill] sm:$0xff] %v7720_v4  ;;  %9928 = vst [vmem:[#allocation51_spill] sm:$0xff] %v7722_v52 }
 0x928   :  { %2540 = vmatpush1.bf16.msra.mxu0 %v2193_v57  ;;  %2613 = vmatpush1.bf16.msra.mxu1 %v2195_v10  ;;  %v7734_v57 = vld [vmem:[#allocation6 + $0x78] sm:$0xff]  ;;  %v7744_v10 = vld [vmem:[#allocation6 + $0x70] sm:$0xff] }
 0x929   :  { %2541 = vmatprep.subr.bf16.mxu0 %v2202_v31  ;;  %2614 = vmatprep.subr.bf16.mxu1 %v2204_v43  ;;  %9932 = vst [vmem:[#allocation55_spill] sm:$0xff] %v7734_v57  ;;  %9934 = vst [vmem:[#allocation57_spill] sm:$0xff] %v7744_v10  ;;  %v7748_v31 = vld [vmem:[#allocation6 + $0x88] sm:$0xff]  ;;  %v7750_v43 = vld [vmem:[#allocation6 + $0x98] sm:$0xff] }
 0x92a   :  { %9935 = vst [vmem:[#allocation58_spill] sm:$0xff] %v7748_v31  ;;  %9936 = vst [vmem:[#allocation59_spill] sm:$0xff] %v7750_v43 }
 0x92b   :  { %2446 = vmatmul.mubr.bf16.gmra.mrb[76].mxu0 %v7688_v11  ;;  %2519 = vmatmul.mubr.bf16.gmra.mrb[76].mxu1 %v7688_v11 }
 0x92c   :  { %2542 = vmatpush1.bf16.msra.mxu0 %v2201_v19  ;;  %2615 = vmatpush1.bf16.msra.mxu1 %v2203_v25  ;;  %v7758_v19 = vld [vmem:[#allocation6 + $0x90] sm:$0xff]  ;;  %v7760_v25 = vld [vmem:[#allocation6 + $0xa8] sm:$0xff] }
 0x92d   :  { %2543 = vmatprep.subr.bf16.mxu0 %v2210_v29  ;;  %2616 = vmatprep.subr.bf16.mxu1 %v2212_v37  ;;  %9938 = vst [vmem:[#allocation61_spill] sm:$0xff] %v7758_v19  ;;  %9939 = vst [vmem:[#allocation62_spill] sm:$0xff] %v7760_v25  ;;  %v7762_v29 = vld [vmem:[#allocation6 + $0xb8] sm:$0xff]  ;;  %v7772_v37 = vld [vmem:[#allocation6 + $0xb0] sm:$0xff] }
 0x92e   :  { %2561 = vmatprep.mubr.bf16.mxu0 %v7638_v1  ;;  %2634 = vmatprep.mubr.bf16.mxu1 %v7638_v1  ;;  %v2233_v1 = vld [vmem:[#allocation5 + $0x2a0] sm:$0xff]  ;;  %9940 = vst [vmem:[#allocation63_spill] sm:$0xff] %v7762_v29  ;;  %9942 = vst [vmem:[#allocation65_spill] sm:$0xff] %v7772_v37 }
 0x930   :  { %2544 = vmatpush1.bf16.msra.mxu0 %v2209_v16  ;;  %2617 = vmatpush1.bf16.msra.mxu1 %v2211_v58  ;;  %v7776_v16 = vld [vmem:[#allocation6 + $0xc8] sm:$0xff]  ;;  %v7778_v58 = vld [vmem:[#allocation6 + $0xd8] sm:$0xff] }
 0x931   :  { %2545 = vmatprep.subr.bf16.mxu0 %v2218_v28  ;;  %2618 = vmatprep.subr.bf16.mxu1 %v2220_v32  ;;  %9943 = vst [vmem:[#allocation66_spill] sm:$0xff] %v7776_v16  ;;  %9944 = vst [vmem:[#allocation67_spill] sm:$0xff] %v7778_v58  ;;  %v7786_v28 = vld [vmem:[#allocation6 + $0xd0] sm:$0xff]  ;;  %v7788_v32 = vld [vmem:[#allocation6 + $0xe8] sm:$0xff] }
 0x932   :  { %9946 = vst [vmem:[#allocation69_spill] sm:$0xff] %v7786_v28  ;;  %9947 = vst [vmem:[#allocation70_spill] sm:$0xff] %v7788_v32 }
 0x934   :  { %2546 = vmatpush1.bf16.msra.mxu0 %v2217_v20  ;;  %2619 = vmatpush1.bf16.msra.mxu1 %v2219_v53  ;;  %v7790_v20 = vld [vmem:[#allocation6 + $0xf8] sm:$0xff]  ;;  %v7800_v53 = vld [vmem:[#allocation6 + $0xf0] sm:$0xff] }
 0x935   :  { %2547 = vmatprep.subr.bf16.mxu0 %v2226_v62  ;;  %2620 = vmatprep.subr.bf16.mxu1 %v2228_v9  ;;  %9948 = vst [vmem:[#allocation71_spill] sm:$0xff] %v7790_v20  ;;  %9950 = vst [vmem:[#allocation73_spill] sm:$0xff] %v7800_v53  ;;  %v7802_v62 = vld [vmem:[#allocation6 + $0x108] sm:$0xff]  ;;  %v7804_v9 = vld [vmem:[#allocation6 + $0x118] sm:$0xff] }
 0x936   :  { %9951 = vst [vmem:[#allocation74_spill] sm:$0xff] %v7802_v62  ;;  %9952 = vst [vmem:[#allocation75_spill] sm:$0xff] %v7804_v9 }
 0x938   :  { %2548 = vmatpush1.bf16.msra.mxu0 %v2225_v39  ;;  %2621 = vmatpush1.bf16.msra.mxu1 %v2227_v42  ;;  %v7814_v39 = vld [vmem:[#allocation6 + $0x110] sm:$0xff]  ;;  %v7816_v42 = vld [vmem:[#allocation6 + $0x128] sm:$0xff] }
 0x939   :  { %2549 = vmatprep.subr.bf16.mxu0 %v2234_v33  ;;  %2622 = vmatprep.subr.bf16.mxu1 %v2236_v15  ;;  %9954 = vst [vmem:[#allocation77_spill] sm:$0xff] %v7814_v39  ;;  %9955 = vst [vmem:[#allocation95_spill] sm:$0xff] %v7816_v42  ;;  %v7818_v33 = vld [vmem:[#allocation6 + $0x138] sm:$0xff]  ;;  %v7824_v15 = vld [vmem:[#allocation6 + $0x120] sm:$0xff] }
 0x93a   :  { %9956 = vst [vmem:[#allocation96_spill] sm:$0xff] %v7818_v33  ;;  %9957 = vst [vmem:[#allocation97_spill] sm:$0xff] %v7824_v15 }
 0x93c   :  { %2550 = vmatpush1.bf16.msra.mxu0 %v2233_v1  ;;  %2623 = vmatpush1.bf16.msra.mxu1 %v2235_v27  ;;  %v7826_v1 = vld [vmem:[#allocation6 + $0x130] sm:$0xff]  ;;  %v7828_v27 = vld [vmem:[#allocation6 + $0x148] sm:$0xff] }
 0x93d   :  { %2551 = vmatprep.subr.bf16.mxu0 %v2242_v21  ;;  %2624 = vmatprep.subr.bf16.mxu1 %v2244_v59  ;;  %9958 = vst [vmem:[#allocation98_spill] sm:$0xff] %v7826_v1  ;;  %9959 = vst [vmem:[#allocation90_spill] sm:$0xff] %v7828_v27  ;;  %v7830_v21 = vld [vmem:[#allocation6 + $0x158] sm:$0xff]  ;;  %v7836_v59 = vld [vmem:[#allocation6 + $0x140] sm:$0xff] }
 0x93e   :  { %9960 = vst [vmem:[#allocation92_spill] sm:$0xff] %v7830_v21  ;;  %9961 = vst [vmem:[#allocation93_spill] sm:$0xff] %v7836_v59 }
 0x940   :  { %2552 = vmatpush1.bf16.msra.mxu0 %v2241_v24  ;;  %2625 = vmatpush1.bf16.msra.mxu1 %v2243_v60  ;;  %v7838_v24 = vld [vmem:[#allocation6 + $0x150] sm:$0xff]  ;;  %v7840_v60 = vld [vmem:[#allocation6 + $0x168] sm:$0xff] }
 0x941   :  { %2553 = vmatprep.subr.bf16.mxu0 %v2250_v8  ;;  %2626 = vmatprep.subr.bf16.mxu1 %v2252_v12  ;;  %9962 = vst [vmem:[#allocation94_spill] sm:$0xff] %v7838_v24  ;;  %9963 = vst [vmem:[#allocation20_spill] sm:$0xff] %v7840_v60  ;;  %v7842_v8 = vld [vmem:[#allocation6 + $0x178] sm:$0xff]  ;;  %v7848_v12 = vld [vmem:[#allocation6 + $0x160] sm:$0xff] }
 0x942   :  { %9964 = vst [vmem:[#allocation21_spill] sm:$0xff] %v7842_v8  ;;  %9965 = vst [vmem:[#allocation87_spill] sm:$0xff] %v7848_v12 }
 0x944   :  { %2554 = vmatpush1.bf16.msra.mxu0 %v2249_v22  ;;  %2627 = vmatpush1.bf16.msra.mxu1 %v2251_v36  ;;  %v7850_v22 = vld [vmem:[#allocation6 + $0x170] sm:$0xff]  ;;  %v7852_v36 = vld [vmem:[#allocation6 + $0x188] sm:$0xff] }
 0x945   :  { %2555 = vmatprep.subr.bf16.mxu0 %v2258_v38  ;;  %2628 = vmatprep.subr.bf16.mxu1 %v2260_v55  ;;  %9966 = vst [vmem:[#allocation88_spill] sm:$0xff] %v7850_v22  ;;  %9967 = vst [vmem:[#allocation89_spill] sm:$0xff] %v7852_v36  ;;  %v7854_v38 = vld [vmem:[#allocation6 + $0x198] sm:$0xff]  ;;  %v7860_v55 = vld [vmem:[#allocation6 + $0x180] sm:$0xff] }
 0x946   :  { %9968 = vst [vmem:[#allocation91_spill] sm:$0xff] %v7854_v38  ;;  %9969 = vst [vmem:[#allocation23_spill] sm:$0xff] %v7860_v55 }
 0x948   :  { %2556 = vmatpush1.bf16.msra.mxu0 %v2257_v63  ;;  %2629 = vmatpush1.bf16.msra.mxu1 %v2259_v54  ;;  %v7862_v63 = vld [vmem:[#allocation6 + $0x190] sm:$0xff]  ;;  %v7864_v54 = vld [vmem:[#allocation6 + $0x1a8] sm:$0xff] }
 0x949   :  { %2557 = vmatprep.subr.bf16.mxu0 %v2266_v35  ;;  %2630 = vmatprep.subr.bf16.mxu1 %v2268_v56  ;;  %9970 = vst [vmem:[#allocation24_spill] sm:$0xff] %v7862_v63  ;;  %9971 = vst [vmem:[#allocation25_spill] sm:$0xff] %v7864_v54  ;;  %v7866_v35 = vld [vmem:[#allocation6 + $0x1b8] sm:$0xff]  ;;  %v7872_v56 = vld [vmem:[#allocation6 + $0x1a0] sm:$0xff] }
 0x94a   :  { %9972 = vst [vmem:[#allocation26_spill] sm:$0xff] %v7866_v35  ;;  %9973 = vst [vmem:[#allocation27_spill] sm:$0xff] %v7872_v56 }
 0x94c   :  { %2558 = vmatpush1.bf16.msra.mxu0 %v2265_v30  ;;  %2631 = vmatpush1.bf16.msra.mxu1 %v2267_v2  ;;  %v7874_v30 = vld [vmem:[#allocation6 + $0x1b0] sm:$0xff]  ;;  %v7876_v2 = vld [vmem:[#allocation6 + $0x1c8] sm:$0xff] }
 0x94d   :  { %2559 = vmatprep.subr.bf16.mxu0 %v2274_v51  ;;  %2632 = vmatprep.subr.bf16.mxu1 %v2276_v49  ;;  %9974 = vst [vmem:[#allocation28_spill] sm:$0xff] %v7874_v30  ;;  %9975 = vst [vmem:[#allocation29_spill] sm:$0xff] %v7876_v2  ;;  %v7878_v51 = vld [vmem:[#allocation6 + $0x1d8] sm:$0xff]  ;;  %v7884_v49 = vld [vmem:[#allocation6 + $0x1c0] sm:$0xff] }
 0x94e   :  { %9976 = vst [vmem:[#allocation30_spill] sm:$0xff] %v7878_v51  ;;  %9977 = vst [vmem:[#allocation31_spill] sm:$0xff] %v7884_v49 }
 0x950   :  { %2560 = vmatpush1.bf16.msra.mxu0 %v2273_v50  ;;  %2633 = vmatpush1.bf16.msra.mxu1 %v2275_v6  ;;  %v7886_v50 = vld [vmem:[#allocation6 + $0x1d0] sm:$0xff]  ;;  %v7888_v6 = vld [vmem:[#allocation6 + $0x1e8] sm:$0xff] }
 0x951   :  { %2739 = vmatprep.subr.bf16.mxu0 %v7694_v46  ;;  %2780 = vmatprep.subr.bf16.mxu1 %v7696_v47  ;;  %9978 = vst [vmem:[#allocation32_spill] sm:$0xff] %v7886_v50  ;;  %9979 = vst [vmem:[#allocation33_spill] sm:$0xff] %v7888_v6 }
 0x953   :  { %2562 = vmatmul.mubr.bf16.vlgmr.msra.gmra.mrb[80].mxu0 %v7646_v0  ;;  %2635 = vmatmul.mubr.bf16.vlgmr.msra.gmra.mrb[80].mxu1 %v7646_v0  ;;  %v7728_v0 = vld [vmem:[#allocation6 + $0x40] sm:$0xff] }
 0x954   :  { %2740 = vmatpush1.bf16.msra.mxu0 %v7700_v48  ;;  %2781 = vmatpush1.bf16.msra.mxu1 %v7702_v44  ;;  %9929 = vst [vmem:[#allocation52_spill] sm:$0xff] %v7728_v0 }
 0x955   :  { %2741 = vmatprep.subr.bf16.mxu0 %v7704_v61  ;;  %2782 = vmatprep.subr.bf16.mxu1 %v7706_v7 }
 0x956   :  { %2571 = vmatprep.mubr.bf16.mxu0 %v7652_v34  ;;  %2644 = vmatprep.mubr.bf16.mxu1 %v7652_v34  ;;  %v7742_v34 = vld [vmem:[#allocation6 + $0x60] sm:$0xff] }
 0x957   :  { %9933 = vst [vmem:[#allocation56_spill] sm:$0xff] %v7742_v34 }
 0x958   :  { %2742 = vmatpush1.bf16.msra.mxu0 %v7714_v5  ;;  %2783 = vmatpush1.bf16.msra.mxu1 %v7716_v18 }
 0x959   :  { %2743 = vmatprep.subr.bf16.mxu0 %v7720_v4  ;;  %2784 = vmatprep.subr.bf16.mxu1 %v7722_v52 }
 0x95b   :  { %2572 = vmatmul.mubr.bf16.gmra.mrb[84].mxu0 %v7660_v13  ;;  %2645 = vmatmul.mubr.bf16.gmra.mrb[84].mxu1 %v7660_v13  ;;  %v7756_v13 = vld [vmem:[#allocation6 + $0x80] sm:$0xff] }
 0x95c   :  { %2744 = vmatpush1.bf16.msra.mxu0 %v7728_v0  ;;  %2785 = vmatpush1.bf16.msra.mxu1 %v7730_v17  ;;  %9937 = vst [vmem:[#allocation60_spill] sm:$0xff] %v7756_v13 }
 0x95d   :  { %2745 = vmatprep.subr.bf16.mxu0 %v7732_v40  ;;  %2786 = vmatprep.subr.bf16.mxu1 %v7734_v57 }
 0x95e   :  { %2581 = vmatprep.mubr.bf16.mxu0 %v7666_v45  ;;  %2654 = vmatprep.mubr.bf16.mxu1 %v7666_v45  ;;  %v7770_v45 = vld [vmem:[#allocation6 + $0xa0] sm:$0xff] }
 0x95f   :  { %9941 = vst [vmem:[#allocation64_spill] sm:$0xff] %v7770_v45 }
 0x960   :  { %2746 = vmatpush1.bf16.msra.mxu0 %v7742_v34  ;;  %2787 = vmatpush1.bf16.msra.mxu1 %v7744_v10 }
 0x961   :  { %2747 = vmatprep.subr.bf16.mxu0 %v7748_v31  ;;  %2788 = vmatprep.subr.bf16.mxu1 %v7750_v43 }
 0x963   :  { %2582 = vmatmul.mubr.bf16.gmra.mrb[88].mxu0 %v7674_v14  ;;  %2655 = vmatmul.mubr.bf16.gmra.mrb[88].mxu1 %v7674_v14  ;;  %v7784_v14 = vld [vmem:[#allocation6 + $0xc0] sm:$0xff] }
 0x964   :  { %2748 = vmatpush1.bf16.msra.mxu0 %v7756_v13  ;;  %2789 = vmatpush1.bf16.msra.mxu1 %v7758_v19  ;;  %9945 = vst [vmem:[#allocation68_spill] sm:$0xff] %v7784_v14 }
 0x965   :  { %2749 = vmatprep.subr.bf16.mxu0 %v7760_v25  ;;  %2790 = vmatprep.subr.bf16.mxu1 %v7762_v29 }
 0x966   :  { %2591 = vmatprep.mubr.bf16.mxu0 %v7680_v41  ;;  %2664 = vmatprep.mubr.bf16.mxu1 %v7680_v41  ;;  %v7798_v41 = vld [vmem:[#allocation6 + $0xe0] sm:$0xff] }
 0x967   :  { %9949 = vst [vmem:[#allocation72_spill] sm:$0xff] %v7798_v41 }
 0x968   :  { %2750 = vmatpush1.bf16.msra.mxu0 %v7770_v45  ;;  %2791 = vmatpush1.bf16.msra.mxu1 %v7772_v37 }
 0x969   :  { %2751 = vmatprep.subr.bf16.mxu0 %v7776_v16  ;;  %2792 = vmatprep.subr.bf16.mxu1 %v7778_v58 }
 0x96b   :  { %2592 = vmatmul.mubr.bf16.gmra.mrb[92].mxu0 %v7688_v11  ;;  %2665 = vmatmul.mubr.bf16.gmra.mrb[92].mxu1 %v7688_v11  ;;  %v7812_v11 = vld [vmem:[#allocation6 + $0x100] sm:$0xff] }
 0x96c   :  { %2752 = vmatpush1.bf16.msra.mxu0 %v7784_v14  ;;  %2793 = vmatpush1.bf16.msra.mxu1 %v7786_v28  ;;  %9953 = vst [vmem:[#allocation76_spill] sm:$0xff] %v7812_v11 }
 0x96d   :  { %2753 = vmatprep.subr.bf16.mxu0 %v7788_v32  ;;  %2794 = vmatprep.subr.bf16.mxu1 %v7790_v20 }
 0x96e   :  { %2771 = vmatprep.mubr.bf16.mxu0 %v9914_v3  ;;  %2812 = vmatprep.mubr.bf16.mxu1 %v9914_v3 }
 0x970   :  { %2754 = vmatpush1.bf16.msra.mxu0 %v7798_v41  ;;  %2795 = vmatpush1.bf16.msra.mxu1 %v7800_v53 }
 0x971   :  { %2755 = vmatprep.subr.bf16.mxu0 %v7802_v62  ;;  %2796 = vmatprep.subr.bf16.mxu1 %v7804_v9 }
 0x974   :  { %2756 = vmatpush1.bf16.msra.mxu0 %v7812_v11  ;;  %2797 = vmatpush1.bf16.msra.mxu1 %v7814_v39 }
 0x975   :  { %2757 = vmatprep.subr.bf16.mxu0 %v7816_v42  ;;  %2798 = vmatprep.subr.bf16.mxu1 %v7818_v33 }
 0x978   :  { %2758 = vmatpush1.bf16.msra.mxu0 %v7824_v15  ;;  %2799 = vmatpush1.bf16.msra.mxu1 %v7826_v1 }
 0x979   :  { %2759 = vmatprep.subr.bf16.mxu0 %v7828_v27  ;;  %2800 = vmatprep.subr.bf16.mxu1 %v7830_v21 }
 0x97c   :  { %2760 = vmatpush1.bf16.msra.mxu0 %v7836_v59  ;;  %2801 = vmatpush1.bf16.msra.mxu1 %v7838_v24 }
 0x97d   :  { %2761 = vmatprep.subr.bf16.mxu0 %v7840_v60  ;;  %2802 = vmatprep.subr.bf16.mxu1 %v7842_v8 }
 0x980   :  { %2762 = vmatpush1.bf16.msra.mxu0 %v7848_v12  ;;  %2803 = vmatpush1.bf16.msra.mxu1 %v7850_v22 }
 0x981   :  { %2763 = vmatprep.subr.bf16.mxu0 %v7852_v36  ;;  %2804 = vmatprep.subr.bf16.mxu1 %v7854_v38 }
 0x984   :  { %2764 = vmatpush1.bf16.msra.mxu0 %v7860_v55  ;;  %2805 = vmatpush1.bf16.msra.mxu1 %v7862_v63 }
 0x985   :  { %2765 = vmatprep.subr.bf16.mxu0 %v7864_v54  ;;  %2806 = vmatprep.subr.bf16.mxu1 %v7866_v35 }
 0x988   :  { %2766 = vmatpush1.bf16.msra.mxu0 %v7872_v56  ;;  %2807 = vmatpush1.bf16.msra.mxu1 %v7874_v30 }
 0x989   :  { %2767 = vmatprep.subr.bf16.mxu0 %v7876_v2  ;;  %2808 = vmatprep.subr.bf16.mxu1 %v7878_v51  ;;  %v7898_v2 = vld [vmem:[#allocation6 + $0x1f0] sm:$0xff] }
 0x98a   :  { %9982 = vst [vmem:[#allocation37_spill] sm:$0xff] %v7898_v2 }
 0x98c   :  { %2768 = vmatpush1.bf16.msra.mxu0 %v7884_v49  ;;  %2809 = vmatpush1.bf16.msra.mxu1 %v7886_v50 }
 0x98d   :  { %2769 = vmatprep.subr.bf16.mxu0 %v7888_v6  ;;  %2810 = vmatprep.subr.bf16.mxu1 %v7890_v26 }
 0x990   :  { %2770 = vmatpush1.bf16.msra.mxu0 %v7896_v23  ;;  %2811 = vmatpush1.bf16.msra.mxu1 %v7898_v2 }
 0x991   :  { %2872 = vmatprep.subr.bf16.mxu0 %v7694_v46  ;;  %2913 = vmatprep.subr.bf16.mxu1 %v7696_v47 }
 0x993   :  { %2772 = vmatmul.mubr.bf16.vlgmr.msra.gmra.mrb[96].mxu0 %v9914_v3  ;;  %2813 = vmatmul.mubr.bf16.vlgmr.msra.gmra.mrb[96].mxu1 %v9914_v3  ;;  %v9983_v3 = vld [vmem:[#allocation29_spill] sm:$0xff] }
 0x994   :  { %2873 = vmatpush1.bf16.msra.mxu0 %v7700_v48  ;;  %2914 = vmatpush1.bf16.msra.mxu1 %v7702_v44 }
 0x995   :  { %2874 = vmatprep.subr.bf16.mxu0 %v7704_v61  ;;  %2915 = vmatprep.subr.bf16.mxu1 %v7706_v7 }
 0x998   :  { %2875 = vmatpush1.bf16.msra.mxu0 %v7714_v5  ;;  %2916 = vmatpush1.bf16.msra.mxu1 %v7716_v18 }
 0x999   :  { %2876 = vmatprep.subr.bf16.mxu0 %v7720_v4  ;;  %2917 = vmatprep.subr.bf16.mxu1 %v7722_v52 }
 0x99c   :  { %2877 = vmatpush1.bf16.msra.mxu0 %v7728_v0  ;;  %2918 = vmatpush1.bf16.msra.mxu1 %v7730_v17 }
 0x99d   :  { %2878 = vmatprep.subr.bf16.mxu0 %v7732_v40  ;;  %2919 = vmatprep.subr.bf16.mxu1 %v7734_v57 }
 0x9a0   :  { %2879 = vmatpush1.bf16.msra.mxu0 %v7742_v34  ;;  %2920 = vmatpush1.bf16.msra.mxu1 %v7744_v10 }
 0x9a1   :  { %2880 = vmatprep.subr.bf16.mxu0 %v7748_v31  ;;  %2921 = vmatprep.subr.bf16.mxu1 %v7750_v43 }
 0x9a4   :  { %2881 = vmatpush1.bf16.msra.mxu0 %v7756_v13  ;;  %2922 = vmatpush1.bf16.msra.mxu1 %v7758_v19 }
 0x9a5   :  { %2882 = vmatprep.subr.bf16.mxu0 %v7760_v25  ;;  %2923 = vmatprep.subr.bf16.mxu1 %v7762_v29 }
 0x9a8   :  { %2883 = vmatpush1.bf16.msra.mxu0 %v7770_v45  ;;  %2924 = vmatpush1.bf16.msra.mxu1 %v7772_v37 }
 0x9a9   :  { %2884 = vmatprep.subr.bf16.mxu0 %v7776_v16  ;;  %2925 = vmatprep.subr.bf16.mxu1 %v7778_v58 }
 0x9ac   :  { %2885 = vmatpush1.bf16.msra.mxu0 %v7784_v14  ;;  %2926 = vmatpush1.bf16.msra.mxu1 %v7786_v28 }
 0x9ad   :  { %2886 = vmatprep.subr.bf16.mxu0 %v7788_v32  ;;  %2927 = vmatprep.subr.bf16.mxu1 %v7790_v20 }
 0x9b0   :  { %2887 = vmatpush1.bf16.msra.mxu0 %v7798_v41  ;;  %2928 = vmatpush1.bf16.msra.mxu1 %v7800_v53 }
 0x9b1   :  { %2888 = vmatprep.subr.bf16.mxu0 %v7802_v62  ;;  %2929 = vmatprep.subr.bf16.mxu1 %v7804_v9 }
 0x9b4   :  { %2889 = vmatpush1.bf16.msra.mxu0 %v7812_v11  ;;  %2930 = vmatpush1.bf16.msra.mxu1 %v7814_v39 }
 0x9b5   :  { %2890 = vmatprep.subr.bf16.mxu0 %v7816_v42  ;;  %2931 = vmatprep.subr.bf16.mxu1 %v7818_v33 }
 0x9b8   :  { %2891 = vmatpush1.bf16.msra.mxu0 %v7824_v15  ;;  %2932 = vmatpush1.bf16.msra.mxu1 %v7826_v1 }
 0x9b9   :  { %2892 = vmatprep.subr.bf16.mxu0 %v7828_v27  ;;  %2933 = vmatprep.subr.bf16.mxu1 %v7830_v21 }
 0x9bc   :  { %2893 = vmatpush1.bf16.msra.mxu0 %v7836_v59  ;;  %2934 = vmatpush1.bf16.msra.mxu1 %v7838_v24 }
 0x9bd   :  { %2894 = vmatprep.subr.bf16.mxu0 %v7840_v60  ;;  %2935 = vmatprep.subr.bf16.mxu1 %v7842_v8 }
 0x9c0   :  { %2895 = vmatpush1.bf16.msra.mxu0 %v7848_v12  ;;  %2936 = vmatpush1.bf16.msra.mxu1 %v7850_v22 }
 0x9c1   :  { %2896 = vmatprep.subr.bf16.mxu0 %v7852_v36  ;;  %2937 = vmatprep.subr.bf16.mxu1 %v7854_v38 }
 0x9c4   :  { %2897 = vmatpush1.bf16.msra.mxu0 %v7860_v55  ;;  %2938 = vmatpush1.bf16.msra.mxu1 %v7862_v63 }
 0x9c5   :  { %2898 = vmatprep.subr.bf16.mxu0 %v7864_v54  ;;  %2939 = vmatprep.subr.bf16.mxu1 %v7866_v35 }
 0x9c8   :  { %2899 = vmatpush1.bf16.msra.mxu0 %v7872_v56  ;;  %2940 = vmatpush1.bf16.msra.mxu1 %v7874_v30 }
 0x9c9   :  { %2900 = vmatprep.subr.bf16.mxu0 %v9983_v3  ;;  %2941 = vmatprep.subr.bf16.mxu1 %v7878_v51  ;;  %v7973_v51 = vld [vmem:[%s9324_s6] sm:$0xff] }
 0x9cc   :  { %2901 = vmatpush1.bf16.msra.mxu0 %v7884_v49  ;;  %2942 = vmatpush1.bf16.msra.mxu1 %v7886_v50  ;;  %v9984_v49 = vld [vmem:[#allocation78_spill] sm:$0xff] }
 0x9cd   :  { %2902 = vmatprep.subr.bf16.mxu0 %v7888_v6  ;;  %2943 = vmatprep.subr.bf16.mxu1 %v7890_v26  ;;  %v9985_v3 = vsub.s32 0, %v9984_v49  ;;  %v9986_v26 = vsub.s32 2, %v9984_v49  ;;  %v9989_v25 = vsub.s32 4, %v9984_v49 }
 0x9cf   :  { %v7978_v50 = vrot.slane %v7973_v51, %v9985_v3  ;;  %v9988_v3 = vsub.s32 1, %v9984_v49 }
 0x9d0   :  { %2903 = vmatpush1.bf16.msra.mxu0 %v7896_v23  ;;  %2944 = vmatpush1.bf16.msra.mxu1 %v7898_v2  ;;  %v7983_v23 = vrot.slane %v7973_v51, %v9986_v26 }
 0x9d1   :  { %3005 = vmatprep.subr.bf16.mxu0 %v7694_v46  ;;  %3046 = vmatprep.subr.bf16.mxu1 %v7696_v47  ;;  %v9987_v47 = vsub.s32 3, %v9984_v49  ;;  %v8001_v35 = vrot.slane %v7973_v51, %v9988_v3 }
 0x9d3   :  { %v7992_v6 = vrot.slane %v7973_v51, %v9987_v47 }
 0x9e6   :  { %v7985_v2 = vpop.f32.mrb[64].mxu0  ;;  %v7987_v46 = vpop.f32.mrb[64].mxu1 }
 0x9e7   :  { %v7994_v30 = vpop.f32.mrb[65].mxu0  ;;  %v7996_v56 = vpop.f32.mrb[65].mxu1 }
 0x9e8   :  { %v2421_v26 = vpop.f32.mrb[66].mxu0  ;;  %v2494_v54 = vpop.f32.mrb[66].mxu1 }
 0x9e9   :  { %v8004_v63 = vadd.f32 %v2421_v26, %v7978_v50  ;;  %v2423_v55 = vpop.f32.mrb[67].mxu0  ;;  %v8007_v38 = vadd.f32 %v2494_v54, %v7983_v23  ;;  %v2496_v47 = vpop.f32.mrb[67].mxu1 }
 0x9ea   :  { %v8010_v36 = vadd.f32 %v2423_v55, %v8001_v35  ;;  %v8013_v22 = vadd.f32 %v2496_v47, %v7992_v6 }
 0x9ee   :  { %v2427_v12 = vpop.f32.mrb[68].mxu0  ;;  %v2500_v8 = vpop.f32.mrb[68].mxu1 }
 0x9ef   :  { %v8016_v3 = vadd.f32 %v2427_v12, %v7978_v50  ;;  %v2429_v60 = vpop.f32.mrb[69].mxu0  ;;  %v8019_v26 = vadd.f32 %v2500_v8, %v7983_v23  ;;  %v2502_v24 = vpop.f32.mrb[69].mxu1 }
 0x9f0   :  { %v8022_v54 = vadd.f32 %v2429_v60, %v8001_v35  ;;  %v2431_v59 = vpop.f32.mrb[70].mxu0  ;;  %v8025_v55 = vadd.f32 %v2502_v24, %v7992_v6  ;;  %v2504_v21 = vpop.f32.mrb[70].mxu1 }
 0x9f1   :  { %v8028_v47 = vadd.f32 %v2431_v59, %v7978_v50  ;;  %v2433_v27 = vpop.f32.mrb[71].mxu0  ;;  %v8031_v12 = vadd.f32 %v2504_v21, %v7983_v23  ;;  %v2506_v1 = vpop.f32.mrb[71].mxu1 }
 0x9f2   :  { %v8034_v8 = vadd.f32 %v2433_v27, %v8001_v35  ;;  %v8037_v15 = vadd.f32 %v2506_v1, %v7992_v6 }
 0x9f6   :  { %v2437_v60 = vpop.f32.mrb[72].mxu0  ;;  %v2510_v33 = vpop.f32.mrb[72].mxu1 }
 0x9f7   :  { %v8040_v24 = vadd.f32 %v2437_v60, %v7978_v50  ;;  %v2439_v42 = vpop.f32.mrb[73].mxu0  ;;  %v8043_v59 = vadd.f32 %v2510_v33, %v7983_v23  ;;  %v2512_v39 = vpop.f32.mrb[73].mxu1 }
 0x9f8   :  { %v8046_v21 = vadd.f32 %v2439_v42, %v8001_v35  ;;  %v2441_v11 = vpop.f32.mrb[74].mxu0  ;;  %v8049_v27 = vadd.f32 %v2512_v39, %v7992_v6  ;;  %v2514_v9 = vpop.f32.mrb[74].mxu1 }
 0x9f9   :  { %v8052_v1 = vadd.f32 %v2441_v11, %v7978_v50  ;;  %v2443_v62 = vpop.f32.mrb[75].mxu0  ;;  %v8055_v60 = vadd.f32 %v2514_v9, %v7983_v23  ;;  %v2516_v53 = vpop.f32.mrb[75].mxu1 }
 0x9fa   :  { %v8058_v33 = vadd.f32 %v2443_v62, %v8001_v35  ;;  %v8061_v41 = vadd.f32 %v2516_v53, %v7992_v6 }
 0x9fe   :  { %v2447_v42 = vpop.f32.mrb[76].mxu0  ;;  %v2520_v20 = vpop.f32.mrb[76].mxu1 }
 0x9ff   :  { %v2448_v39 = vadd.f32 %v2447_v42, %v7978_v50  ;;  %v2449_v32 = vpop.f32.mrb[77].mxu0  ;;  %v2521_v28 = vadd.f32 %v2520_v20, %v7983_v23  ;;  %v2522_v11 = vpop.f32.mrb[77].mxu1  ;;  %v8074_v20 = vrot.slane %v7973_v51, %v9989_v25 }
 0xa00   :  { %v2450_v14 = vadd.f32 %v2449_v32, %v8001_v35  ;;  %v2451_v58 = vpop.f32.mrb[78].mxu0  ;;  %v2523_v9 = vadd.f32 %v2522_v11, %v7992_v6  ;;  %v2524_v16 = vpop.f32.mrb[78].mxu1  ;;  %v9990_v32 = vsub.s32 6, %v9984_v49 }
 0xa01   :  { %v2452_v62 = vadd.f32 %v2451_v58, %v7978_v50  ;;  %v2453_v37 = vpop.f32.mrb[79].mxu0  ;;  %v2525_v53 = vadd.f32 %v2524_v16, %v7983_v23  ;;  %v2526_v45 = vpop.f32.mrb[79].mxu1  ;;  %v9991_v58 = vsub.s32 5, %v9984_v49  ;;  %v9992_v16 = vsub.s32 7, %v9984_v49  ;;  %v8351_v49 = vld [vmem:[#allocation6 + $0x18] sm:$0xff] }
 0xa02   :  { %v2454_v29 = vadd.f32 %v2453_v37, %v8001_v35  ;;  %v2527_v42 = vadd.f32 %v2526_v45, %v7992_v6  ;;  %v8079_v11 = vrot.slane %v7973_v51, %v9990_v32  ;;  %10075 = vst [vmem:[#allocation101_spill] sm:$0xff] %v8351_v49 }
 0xa03   :  { %v8084_v19 = vrot.slane %v7973_v51, %v9991_v58  ;;  %v8089_v37 = vrot.slane %v7973_v51, %v9992_v16 }
 0xa26   :  { %v2563_v45 = vpop.f32.mrb[80].mxu0  ;;  %v2636_v13 = vpop.f32.mrb[80].mxu1 }
 0xa27   :  { %v2564_v25 = vadd.f32 %v2563_v45, %v8074_v20  ;;  %v2565_v43 = vpop.f32.mrb[81].mxu0  ;;  %v2637_v31 = vadd.f32 %v2636_v13, %v8079_v11  ;;  %v2638_v10 = vpop.f32.mrb[81].mxu1 }
 0xa28   :  { %v2566_v32 = vadd.f32 %v2565_v43, %v8084_v19  ;;  %v2567_v34 = vpop.f32.mrb[82].mxu0  ;;  %v2639_v57 = vadd.f32 %v2638_v10, %v8089_v37  ;;  %v2640_v58 = vpop.f32.mrb[82].mxu1 }
 0xa29   :  { %v3760_v40 = vrot.slane %v2564_v25, 4  ;;  %v2568_v17 = vadd.f32 %v2567_v34, %v8074_v20  ;;  %v2569_v0 = vpop.f32.mrb[83].mxu0  ;;  %v3762_v51 = vrot.slane %v2637_v31, 4  ;;  %v2641_v16 = vadd.f32 %v2640_v58, %v8079_v11  ;;  %v2642_v52 = vpop.f32.mrb[83].mxu1 }
 0xa2a   :  { %v3761_v4 = vrot.slane %v2566_v32, 4  ;;  %v2570_v45 = vadd.f32 %v2569_v0, %v8084_v19  ;;  %v3763_v18 = vrot.slane %v2639_v57, 4  ;;  %v2643_v13 = vadd.f32 %v2642_v52, %v8089_v37 }
 0xa2b   :  { %v3627_v5 = vrot.slane %v2568_v17, 4  ;;  %v3629_v43 = vrot.slane %v2641_v16, 4  ;;  %v8101_v10 = vsel %vm138_vm1, %v2452_v62, %v3760_v40  ;;  %v8105_v34 = vsel %vm138_vm1, %v2525_v53, %v3762_v51 }
 0xa2c   :  { %9993 = vst [vmem:[#allocation38_spill] sm:$0xff] %v8101_v10  ;;  %9994 = vst [vmem:[#allocation39_spill] sm:$0xff] %v8105_v34  ;;  %v3628_v31 = vrot.slane %v2570_v45, 4  ;;  %v3630_v25 = vrot.slane %v2643_v13, 4  ;;  %v8109_v32 = vsel %vm138_vm1, %v2454_v29, %v3761_v4  ;;  %v8113_v0 = vsel %vm138_vm1, %v2527_v42, %v3763_v18 }
 0xa2d   :  { %9995 = vst [vmem:[#allocation40_spill] sm:$0xff] %v8109_v32  ;;  %9996 = vst [vmem:[#allocation41_spill] sm:$0xff] %v8113_v0  ;;  %v8117_v52 = vsel %vm138_vm1, %v2448_v39, %v3627_v5  ;;  %v8121_v17 = vsel %vm138_vm1, %v2521_v28, %v3629_v43 }
 0xa2e   :  { %9997 = vst [vmem:[#allocation42_spill] sm:$0xff] %v8117_v52  ;;  %9998 = vst [vmem:[#allocation43_spill] sm:$0xff] %v8121_v17  ;;  %v2573_v40 = vpop.f32.mrb[84].mxu0  ;;  %v2646_v57 = vpop.f32.mrb[84].mxu1  ;;  %v8125_v62 = vsel %vm138_vm1, %v2450_v14, %v3628_v31  ;;  %v8129_v4 = vsel %vm138_vm1, %v2523_v9, %v3630_v25 }
 0xa2f   :  { %9999 = vst [vmem:[#allocation44_spill] sm:$0xff] %v8125_v62  ;;  %10000 = vst [vmem:[#allocation45_spill] sm:$0xff] %v8129_v4  ;;  %v2574_v18 = vadd.f32 %v2573_v40, %v8074_v20  ;;  %v2647_v29 = vadd.f32 %v2646_v57, %v8079_v11  ;;  %v2575_v5 = vpop.f32.mrb[85].mxu0  ;;  %v2648_v39 = vpop.f32.mrb[85].mxu1 }
 0xa30   :  { %v2576_v53 = vadd.f32 %v2575_v5, %v8084_v19  ;;  %v2649_v28 = vadd.f32 %v2648_v39, %v8089_v37  ;;  %v2577_v42 = vpop.f32.mrb[86].mxu0  ;;  %v2650_v58 = vpop.f32.mrb[86].mxu1 }
 0xa31   :  { %v3494_v51 = vrot.slane %v2574_v18, 4  ;;  %v3496_v16 = vrot.slane %v2647_v29, 4  ;;  %v2578_v14 = vadd.f32 %v2577_v42, %v8074_v20  ;;  %v2651_v45 = vadd.f32 %v2650_v58, %v8079_v11  ;;  %v2579_v9 = vpop.f32.mrb[87].mxu0  ;;  %v2652_v13 = vpop.f32.mrb[87].mxu1 }
 0xa32   :  { %v3495_v43 = vrot.slane %v2576_v53, 4  ;;  %v3497_v31 = vrot.slane %v2649_v28, 4  ;;  %v2580_v25 = vadd.f32 %v2579_v9, %v8084_v19  ;;  %v2653_v40 = vadd.f32 %v2652_v13, %v8089_v37 }
 0xa33   :  { %v3361_v57 = vrot.slane %v2578_v14, 4  ;;  %v3363_v5 = vrot.slane %v2651_v45, 4  ;;  %v8142_v39 = vsel %vm138_vm1, %v8052_v1, %v3494_v51  ;;  %v8147_v18 = vsel %vm138_vm1, %v8055_v60, %v3496_v16 }
 0xa34   :  { %10001 = vst [vmem:[#allocation82_spill] sm:$0xff] %v8142_v39  ;;  %10002 = vst [vmem:[#allocation84_spill] sm:$0xff] %v8147_v18  ;;  %v3362_v29 = vrot.slane %v2580_v25, 4  ;;  %v3364_v42 = vrot.slane %v2653_v40, 4  ;;  %v8152_v53 = vsel %vm138_vm1, %v8058_v33, %v3495_v43  ;;  %v8157_v28 = vsel %vm138_vm1, %v8061_v41, %v3497_v31 }
 0xa35   :  { %10003 = vst [vmem:[#allocation85_spill] sm:$0xff] %v8152_v53  ;;  %10004 = vst [vmem:[#allocation86_spill] sm:$0xff] %v8157_v28  ;;  %v8162_v1 = vsel %vm138_vm1, %v8040_v24, %v3361_v57  ;;  %v8167_v60 = vsel %vm138_vm1, %v8043_v59, %v3363_v5 }
 0xa36   :  { %10005 = vst [vmem:[#allocation79_spill] sm:$0xff] %v8162_v1  ;;  %10006 = vst [vmem:[#allocation80_spill] sm:$0xff] %v8167_v60  ;;  %v2583_v58 = vpop.f32.mrb[88].mxu0  ;;  %v2656_v51 = vpop.f32.mrb[88].mxu1  ;;  %v8172_v33 = vsel %vm138_vm1, %v8046_v21, %v3362_v29  ;;  %v8177_v41 = vsel %vm138_vm1, %v8049_v27, %v3364_v42 }
 0xa37   :  { %10007 = vst [vmem:[#allocation81_spill] sm:$0xff] %v8172_v33  ;;  %10008 = vst [vmem:[#allocation83_spill] sm:$0xff] %v8177_v41  ;;  %v2584_v24 = vadd.f32 %v2583_v58, %v8074_v20  ;;  %v2657_v16 = vadd.f32 %v2656_v51, %v8079_v11  ;;  %v2585_v14 = vpop.f32.mrb[89].mxu0  ;;  %v2658_v45 = vpop.f32.mrb[89].mxu1 }
 0xa38   :  { %v2586_v59 = vadd.f32 %v2585_v14, %v8084_v19  ;;  %v2659_v9 = vadd.f32 %v2658_v45, %v8089_v37  ;;  %v2587_v13 = vpop.f32.mrb[90].mxu0  ;;  %v2660_v43 = vpop.f32.mrb[90].mxu1 }
 0xa39   :  { %v3228_v31 = vrot.slane %v2584_v24, 4  ;;  %v3230_v21 = vrot.slane %v2657_v16, 4  ;;  %v2588_v25 = vadd.f32 %v2587_v13, %v8074_v20  ;;  %v2661_v40 = vadd.f32 %v2660_v43, %v8079_v11  ;;  %v2589_v27 = vpop.f32.mrb[91].mxu0  ;;  %v2662_v57 = vpop.f32.mrb[91].mxu1 }
 0xa3a   :  { %v3229_v5 = vrot.slane %v2586_v59, 4  ;;  %v3231_v29 = vrot.slane %v2659_v9, 4  ;;  %v2590_v42 = vadd.f32 %v2589_v27, %v8084_v19  ;;  %v2663_v58 = vadd.f32 %v2662_v57, %v8089_v37 }
 0xa3b   :  { %v3095_v51 = vrot.slane %v2588_v25, 4  ;;  %v3097_v14 = vrot.slane %v2661_v40, 4  ;;  %v8190_v45 = vsel %vm138_vm1, %v8028_v47, %v3228_v31  ;;  %v8195_v24 = vsel %vm138_vm1, %v8031_v12, %v3230_v21 }
 0xa3c   :  { %10009 = vst [vmem:[#allocation99_spill] sm:$0xff] %v8190_v45  ;;  %10010 = vst [vmem:[#allocation22_spill] sm:$0xff] %v8195_v24  ;;  %v3096_v16 = vrot.slane %v2590_v42, 4  ;;  %v3098_v13 = vrot.slane %v2663_v58, 4  ;;  %v8200_v59 = vsel %vm138_vm1, %v8034_v8, %v3229_v5  ;;  %v8205_v9 = vsel %vm138_vm1, %v8037_v15, %v3231_v29  ;;  %v8443_v24 = vld [vmem:[#allocation6 + $0xd8] sm:$0xff]  ;;  %v8446_v45 = vld [vmem:[#allocation6 + $0xc0] sm:$0xff] }
 0xa3d   :  { %10011 = vst [vmem:[#allocation47_spill] sm:$0xff] %v8200_v59  ;;  %10012 = vst [vmem:[#allocation34_spill] sm:$0xff] %v8205_v9  ;;  %v8210_v47 = vsel %vm138_vm1, %v8016_v3, %v3095_v51  ;;  %v8215_v12 = vsel %vm138_vm1, %v8019_v26, %v3097_v14  ;;  %v2418_v3 = vadd.f32 %v7985_v2, %v7978_v50  ;;  %v8437_v9 = vld [vmem:[#allocation6 + $0xb0] sm:$0xff]  ;;  %v8440_v59 = vld [vmem:[#allocation6 + $0xc8] sm:$0xff] }
 0xa3e   :  { %v2593_v43 = vpop.f32.mrb[92].mxu0  ;;  %v2666_v31 = vpop.f32.mrb[92].mxu1  ;;  %v8220_v8 = vsel %vm138_vm1, %v8022_v54, %v3096_v16  ;;  %v8225_v15 = vsel %vm138_vm1, %v8025_v55, %v3098_v13  ;;  %v2491_v21 = vadd.f32 %v7987_v46, %v7983_v23  ;;  %v2420_v54 = vadd.f32 %v7994_v30, %v8001_v35 }
 0xa3f   :  { %v2594_v26 = vadd.f32 %v2593_v43, %v8074_v20  ;;  %v2667_v25 = vadd.f32 %v2666_v31, %v8079_v11  ;;  %v2595_v40 = vpop.f32.mrb[93].mxu0  ;;  %v2668_v27 = vpop.f32.mrb[93].mxu1  ;;  %v2493_v57 = vadd.f32 %v7996_v56, %v7992_v6 }
 0xa40   :  { %v2596_v55 = vadd.f32 %v2595_v40, %v8084_v19  ;;  %v2669_v5 = vadd.f32 %v2668_v27, %v8089_v37  ;;  %v2597_v2 = vpop.f32.mrb[94].mxu0  ;;  %v2670_v50 = vpop.f32.mrb[94].mxu1 }
 0xa41   :  { %v2962_v29 = vrot.slane %v2594_v26, 4  ;;  %v2964_v23 = vrot.slane %v2667_v25, 4  ;;  %v2598_v46 = vadd.f32 %v2597_v2, %v8074_v20  ;;  %v2671_v42 = vadd.f32 %v2670_v50, %v8079_v11  ;;  %v2599_v58 = vpop.f32.mrb[95].mxu0  ;;  %v2672_v51 = vpop.f32.mrb[95].mxu1 }
 0xa42   :  { %v2963_v14 = vrot.slane %v2596_v55, 4  ;;  %v2965_v16 = vrot.slane %v2669_v5, 4  ;;  %v2600_v35 = vadd.f32 %v2599_v58, %v8084_v19  ;;  %v2673_v56 = vadd.f32 %v2672_v51, %v8089_v37 }
 0xa43   :  { %v2829_v30 = vrot.slane %v2598_v46, 4  ;;  %v2831_v6 = vrot.slane %v2671_v42, 4  ;;  %v8246_v13 = vsel %vm138_vm1, %v8004_v63, %v2962_v29  ;;  %v8251_v20 = vsel %vm138_vm1, %v8007_v38, %v2964_v23 }
 0xa44   :  { %v2830_v11 = vrot.slane %v2600_v35, 4  ;;  %v2832_v43 = vrot.slane %v2673_v56, 4  ;;  %v8256_v19 = vsel %vm138_vm1, %v8010_v36, %v2963_v14  ;;  %v8261_v37 = vsel %vm138_vm1, %v8013_v22, %v2965_v16 }
 0xa45   :  { %v2833_v63 = vsel %vm138_vm1, %v2418_v3, %v2829_v30  ;;  %v2835_v31 = vsel %vm138_vm1, %v2491_v21, %v2831_v6 }
 0xa46   :  { %v2834_v38 = vsel %vm138_vm1, %v2420_v54, %v2830_v11  ;;  %v2836_v26 = vsel %vm138_vm1, %v2493_v57, %v2832_v43  ;;  %vm5855_vm1 = vmmov 0  }
 0xa66   :  { %v2773_v25 = vpop.f32.mrb[96].mxu0  ;;  %v2814_v36 = vpop.f32.mrb[96].mxu1 }
 0xa67   :  { %v2837_v40 = vadd.f32 %v2833_v63, %v2773_v25  ;;  %v2839_v27 = vadd.f32 %v2835_v31, %v2814_v36  ;;  %v2775_v55 = vpop.f32.mrb[97].mxu0  ;;  %v2816_v5 = vpop.f32.mrb[97].mxu1  ;;  %v3815_v25 = vld [vmem:[%s9325_s7] sm:$0xff]  ;;  %v3833_v36 = vld [vmem:[%s9325_s7 + $0x90] sm:$0xff] }
 0xa68   :  { %v2838_v22 = vadd.f32 %v2834_v38, %v2775_v55  ;;  %v2840_v2 = vadd.f32 %v2836_v26, %v2816_v5  ;;  %v2777_v50 = vpop.f32.mrb[98].mxu0  ;;  %v2818_v29 = vpop.f32.mrb[98].mxu1  ;;  %v10018_v55 = vld [vmem:[#allocation50_spill] sm:$0xff]  ;;  %v10019_v5 = vld [vmem:[#allocation51_spill] sm:$0xff] }
 0xa69   :  { %v4817_v3 = vmul.f32 -1.442695, %v2837_v40  ;;  %v2778_v23 = vpop.f32.mrb[99].mxu0  ;;  %v2819_v46 = vpop.f32.mrb[99].mxu1  ;;  %v4819_v54 = vmul.f32 -1.442695, %v2839_v27 }
 0xa6a   :  { %v4818_v21 = vmul.f32 -1.442695, %v2838_v22  ;;  %v10016_v40 = vld [vmem:[#allocation48_spill] sm:$0xff]  ;;  %v10017_v27 = vld [vmem:[#allocation49_spill] sm:$0xff]  ;;  %v10022_v50 = vld [vmem:[#allocation54_spill] sm:$0xff]  ;;  %10079 = vst [vmem:[#allocation51_spill] sm:$0xff] %v8437_v9 }
 0xa6b   :  { %5573 = vpow2.f32 %v4817_v3  ;;  %v10020_v22 = vld [vmem:[#allocation52_spill] sm:$0xff]  ;;  %v10027_v29 = vld [vmem:[#allocation59_spill] sm:$0xff]  ;;  %v10029_v23 = vld [vmem:[#allocation61_spill] sm:$0xff]  ;;  %10082 = vst [vmem:[#allocation54_spill] sm:$0xff] %v8446_v45 }
 0xa6c   :  { %5575 = vpow2.f32 %v4818_v21  ;;  %v10028_v3 = vld [vmem:[#allocation60_spill] sm:$0xff]  ;;  %v10030_v46 = vld [vmem:[#allocation62_spill] sm:$0xff]  ;;  %v10031_v21 = vld [vmem:[#allocation63_spill] sm:$0xff]  ;;  %10080 = vst [vmem:[#allocation52_spill] sm:$0xff] %v8440_v59 }
 0xa6d   :  { %5577 = vtanh.f32 %v2840_v2  ;;  %v10021_v2 = vld [vmem:[#allocation53_spill] sm:$0xff] }
 0xa6e   :  { %5579 = vpow2.f32 %v4819_v54  ;;  %v10032_v54 = vld [vmem:[#allocation64_spill] sm:$0xff]  ;;  %10081 = vst [vmem:[#allocation53_spill] sm:$0xff] %v8443_v24 }
 0xa75   :  { %v5574_v42 = vpop.eup %5573 }
 0xa76   :  { %v2850_v58 = vadd.f32 1.0, %v5574_v42  ;;  %v5576_v57 = vpop.eup %5575  ;;  %v10033_v42 = vld [vmem:[#allocation65_spill] sm:$0xff] }
 0xa77   :  { %v2851_v51 = vadd.f32 1.0, %v5576_v57  ;;  %v5578_v14 = vpop.eup %5577  ;;  %v10035_v57 = vld [vmem:[#allocation67_spill] sm:$0xff] }
 0xa78   :  { %5581 = vrcp.f32 %v2850_v58  ;;  %v5580_v16 = vpop.eup %5579  ;;  %v10034_v58 = vld [vmem:[#allocation66_spill] sm:$0xff] }
 0xa79   :  { %5583 = vrcp.f32 %v2851_v51  ;;  %v2852_v6 = vadd.f32 1.0, %v5580_v16  ;;  %v10036_v51 = vld [vmem:[#allocation68_spill] sm:$0xff]  ;;  %v10038_v16 = vld [vmem:[#allocation70_spill] sm:$0xff] }
 0xa7b   :  { %5585 = vrcp.f32 %v2852_v6  ;;  %v10042_v6 = vld [vmem:[#allocation74_spill] sm:$0xff] }
 0xa82   :  { %v5582_v35 = vpop.eup %5581 }
 0xa83   :  { %v2861_v56 = vmul.f32 %v5582_v35, %v5578_v14  ;;  %v5584_v30 = vpop.eup %5583  ;;  %v10037_v14 = vld [vmem:[#allocation69_spill] sm:$0xff]  ;;  %v10039_v35 = vld [vmem:[#allocation71_spill] sm:$0xff] }
 0xa84   :  { %v2860_v11 = vmul.f32 0.0, %v5584_v30  ;;  %v10041_v30 = vld [vmem:[#allocation73_spill] sm:$0xff] }
 0xa85   :  { %v5586_v63 = vpop.eup %5585 }
 0xa86   :  { %v8271_v43 = vadd.f32 %v2861_v56, %v2860_v11  ;;  %v10040_v56 = vld [vmem:[#allocation72_spill] sm:$0xff]  ;;  %v10043_v11 = vld [vmem:[#allocation75_spill] sm:$0xff] }
 0xa88   :  { %5587 = vtanh.f32 %v8271_v43 }
 0xa92   :  { %v5588_v31 = vpop.eup %5587 }
 0xa93   :  { %v8274_v38 = vmul.f32 %v5588_v31, %v5586_v63  ;;  %v10044_v63 = vld [vmem:[#allocation76_spill] sm:$0xff]  ;;  %v10045_v31 = vld [vmem:[#allocation77_spill] sm:$0xff] }
 0xa95   :  { %10013 = vst [vmem:[#allocation46_spill] sm:$0xff] %v8274_v38  ;;  %v4823_v26 = vpack.c.bf16 %v8274_v38, %v8274_v38 }
 0xa97   :  { %4824 = vmatprep.mubr.msk.bf16.mxu0 %vm6784_vm3, %v4823_v26  ;;  %4832 = vmatprep.mubr.msk.bf16.mxu1 %vm6784_vm3, %v4823_v26 }
 0xa98   :  { %4827 = vmatmul.mubr.msk.bf16.vlgmr.msra.gmra.mrb[100].mxu0 %vm6794_vm4, %v4823_v26  ;;  %4835 = vmatmul.mubr.msk.bf16.vlgmr.msra.gmra.mrb[100].mxu1 %vm6794_vm4, %v4823_v26  ;;  %v10046_v26 = vld [vmem:[#allocation95_spill] sm:$0xff] }
 0xa99   :  { %3006 = vmatpush1.bf16.msra.mxu0 %v7700_v48  ;;  %3047 = vmatpush1.bf16.msra.mxu1 %v7702_v44  ;;  %v10023_v48 = vld [vmem:[#allocation55_spill] sm:$0xff]  ;;  %v10024_v44 = vld [vmem:[#allocation56_spill] sm:$0xff] }
 0xa9a   :  { %3007 = vmatprep.subr.bf16.mxu0 %v7704_v61  ;;  %3048 = vmatprep.subr.bf16.mxu1 %v7706_v7  ;;  %v10025_v61 = vld [vmem:[#allocation57_spill] sm:$0xff]  ;;  %v10026_v7 = vld [vmem:[#allocation58_spill] sm:$0xff] }
 0xa9d   :  { %3008 = vmatpush1.bf16.msra.mxu0 %v10016_v40  ;;  %3049 = vmatpush1.bf16.msra.mxu1 %v10017_v27  ;;  %v10047_v40 = vld [vmem:[#allocation96_spill] sm:$0xff]  ;;  %v10048_v27 = vld [vmem:[#allocation97_spill] sm:$0xff] }
 0xa9e   :  { %3009 = vmatprep.subr.bf16.mxu0 %v10018_v55  ;;  %3050 = vmatprep.subr.bf16.mxu1 %v10019_v5  ;;  %v10049_v55 = vld [vmem:[#allocation98_spill] sm:$0xff] }
 0xa9f   :  { %v10050_v5 = vld [vmem:[#allocation90_spill] sm:$0xff] }
 0xaa1   :  { %3010 = vmatpush1.bf16.msra.mxu0 %v10020_v22  ;;  %3051 = vmatpush1.bf16.msra.mxu1 %v10021_v2  ;;  %v10051_v22 = vld [vmem:[#allocation92_spill] sm:$0xff]  ;;  %v10052_v2 = vld [vmem:[#allocation93_spill] sm:$0xff] }
 0xaa2   :  { %3011 = vmatprep.subr.bf16.mxu0 %v10022_v50  ;;  %3052 = vmatprep.subr.bf16.mxu1 %v10023_v48  ;;  %v10053_v50 = vld [vmem:[#allocation94_spill] sm:$0xff]  ;;  %v10054_v48 = vld [vmem:[#allocation20_spill] sm:$0xff] }
 0xaa5   :  { %3012 = vmatpush1.bf16.msra.mxu0 %v10024_v44  ;;  %3053 = vmatpush1.bf16.msra.mxu1 %v10025_v61  ;;  %v10055_v44 = vld [vmem:[#allocation21_spill] sm:$0xff]  ;;  %v10056_v61 = vld [vmem:[#allocation87_spill] sm:$0xff] }
 0xaa6   :  { %3013 = vmatprep.subr.bf16.mxu0 %v10026_v7  ;;  %3054 = vmatprep.subr.bf16.mxu1 %v10027_v29  ;;  %v10057_v7 = vld [vmem:[#allocation88_spill] sm:$0xff]  ;;  %v10058_v29 = vld [vmem:[#allocation89_spill] sm:$0xff] }
 0xaa9   :  { %3014 = vmatpush1.bf16.msra.mxu0 %v10028_v3  ;;  %3055 = vmatpush1.bf16.msra.mxu1 %v10029_v23  ;;  %v10059_v3 = vld [vmem:[#allocation91_spill] sm:$0xff] }
 0xaaa   :  { %3015 = vmatprep.subr.bf16.mxu0 %v10030_v46  ;;  %3056 = vmatprep.subr.bf16.mxu1 %v10031_v21  ;;  %v10060_v23 = vld [vmem:[#allocation23_spill] sm:$0xff]  ;;  %v10061_v46 = vld [vmem:[#allocation24_spill] sm:$0xff]  ;;  %v10062_v21 = vld [vmem:[#allocation25_spill] sm:$0xff] }
 0xaad   :  { %3016 = vmatpush1.bf16.msra.mxu0 %v10032_v54  ;;  %3057 = vmatpush1.bf16.msra.mxu1 %v10033_v42  ;;  %v10063_v54 = vld [vmem:[#allocation26_spill] sm:$0xff]  ;;  %v10064_v42 = vld [vmem:[#allocation27_spill] sm:$0xff] }
 0xaae   :  { %3017 = vmatprep.subr.bf16.mxu0 %v10034_v58  ;;  %3058 = vmatprep.subr.bf16.mxu1 %v10035_v57  ;;  %v10065_v58 = vld [vmem:[#allocation28_spill] sm:$0xff]  ;;  %v10066_v57 = vld [vmem:[#allocation29_spill] sm:$0xff] }
 0xab1   :  { %3018 = vmatpush1.bf16.msra.mxu0 %v10036_v51  ;;  %3059 = vmatpush1.bf16.msra.mxu1 %v10037_v14  ;;  %v10067_v51 = vld [vmem:[#allocation30_spill] sm:$0xff]  ;;  %v10068_v14 = vld [vmem:[#allocation31_spill] sm:$0xff] }
 0xab2   :  { %3019 = vmatprep.subr.bf16.mxu0 %v10038_v16  ;;  %3060 = vmatprep.subr.bf16.mxu1 %v10039_v35  ;;  %v10069_v16 = vld [vmem:[#allocation32_spill] sm:$0xff]  ;;  %v10070_v35 = vld [vmem:[#allocation33_spill] sm:$0xff] }
 0xab5   :  { %3020 = vmatpush1.bf16.msra.mxu0 %v10040_v56  ;;  %3061 = vmatpush1.bf16.msra.mxu1 %v10041_v30  ;;  %v10071_v56 = vld [vmem:[#allocation35_spill] sm:$0xff]  ;;  %v10072_v30 = vld [vmem:[#allocation36_spill] sm:$0xff] }
 0xab6   :  { %3021 = vmatprep.subr.bf16.mxu0 %v10042_v6  ;;  %3062 = vmatprep.subr.bf16.mxu1 %v10043_v11  ;;  %v10073_v6 = vld [vmem:[#allocation37_spill] sm:$0xff] }
 0xab7   :  { %v8348_v11 = vld [vmem:[#allocation6 + $0x8] sm:$0xff] }
 0xab8   :  { %10074 = vst [vmem:[#allocation100_spill] sm:$0xff] %v8348_v11 }
 0xab9   :  { %3022 = vmatpush1.bf16.msra.mxu0 %v10044_v63  ;;  %3063 = vmatpush1.bf16.msra.mxu1 %v10045_v31 }
 0xaba   :  { %3023 = vmatprep.subr.bf16.mxu0 %v10046_v26  ;;  %3064 = vmatprep.subr.bf16.mxu1 %v10047_v40 }
 0xabd   :  { %3024 = vmatpush1.bf16.msra.mxu0 %v10048_v27  ;;  %3065 = vmatpush1.bf16.msra.mxu1 %v10049_v55 }
 0xabe   :  { %3025 = vmatprep.subr.bf16.mxu0 %v10050_v5  ;;  %3066 = vmatprep.subr.bf16.mxu1 %v10051_v22 }
 0xac1   :  { %3026 = vmatpush1.bf16.msra.mxu0 %v10052_v2  ;;  %3067 = vmatpush1.bf16.msra.mxu1 %v10053_v50 }
 0xac2   :  { %3027 = vmatprep.subr.bf16.mxu0 %v10054_v48  ;;  %3068 = vmatprep.subr.bf16.mxu1 %v10055_v44 }
 0xac5   :  { %3028 = vmatpush1.bf16.msra.mxu0 %v10056_v61  ;;  %3069 = vmatpush1.bf16.msra.mxu1 %v10057_v7 }
 0xac6   :  { %3029 = vmatprep.subr.bf16.mxu0 %v10058_v29  ;;  %3070 = vmatprep.subr.bf16.mxu1 %v10059_v3 }
 0xac9   :  { %3030 = vmatpush1.bf16.msra.mxu0 %v10060_v23  ;;  %3071 = vmatpush1.bf16.msra.mxu1 %v10061_v46 }
 0xaca   :  { %3031 = vmatprep.subr.bf16.mxu0 %v10062_v21  ;;  %3072 = vmatprep.subr.bf16.mxu1 %v10063_v54 }
 0xacd   :  { %3032 = vmatpush1.bf16.msra.mxu0 %v10064_v42  ;;  %3073 = vmatpush1.bf16.msra.mxu1 %v10065_v58 }
 0xace   :  { %3033 = vmatprep.subr.bf16.mxu0 %v10066_v57  ;;  %3074 = vmatprep.subr.bf16.mxu1 %v10067_v51 }
 0xad1   :  { %3034 = vmatpush1.bf16.msra.mxu0 %v10068_v14  ;;  %3075 = vmatpush1.bf16.msra.mxu1 %v10069_v16 }
 0xad2   :  { %3035 = vmatprep.subr.bf16.mxu0 %v10070_v35  ;;  %3076 = vmatprep.subr.bf16.mxu1 %v10071_v56 }
 0xad5   :  { %3036 = vmatpush1.bf16.msra.mxu0 %v10072_v30  ;;  %3077 = vmatpush1.bf16.msra.mxu1 %v10073_v6 }
 0xad6   :  { %3138 = vmatprep.subr.bf16.mxu0 %v8348_v11  ;;  %3179 = vmatprep.subr.bf16.mxu1 %v8351_v49 }
 0xb6b   :  { %v2906_v38 = vpop.f32.mrb[100].mxu0  ;;  %v2947_v0 = vpop.f32.mrb[100].mxu1 }
 0xb6c   :  { %v2970_v32 = vadd.f32 %v8246_v13, %v2906_v38  ;;  %v2972_v34 = vadd.f32 %v8251_v20, %v2947_v0  ;;  %v2908_v10 = vpop.f32.mrb[101].mxu0  ;;  %v2949_v4 = vpop.f32.mrb[101].mxu1  ;;  %v8395_v38 = vld [vmem:[#allocation6 + $0x58] sm:$0xff] }
 0xb6d   :  { %v2971_v62 = vadd.f32 %v8256_v19, %v2908_v10  ;;  %v2973_v17 = vadd.f32 %v8261_v37, %v2949_v4  ;;  %v2910_v52 = vpop.f32.mrb[102].mxu0  ;;  %v2951_v28 = vpop.f32.mrb[102].mxu1  ;;  %v8386_v19 = vld [vmem:[#allocation6 + $0x20] sm:$0xff]  ;;  %v8389_v37 = vld [vmem:[#allocation6 + $0x30] sm:$0xff] }
 0xb6e   :  { %v4836_v53 = vmul.f32 -1.442695, %v2970_v32  ;;  %v2911_v18 = vpop.f32.mrb[103].mxu0  ;;  %v2952_v39 = vpop.f32.mrb[103].mxu1  ;;  %v4838_v33 = vmul.f32 -1.442695, %v2972_v34 }
 0xb6f   :  { %v4837_v41 = vmul.f32 -1.442695, %v2971_v62 }
 0xb70   :  { %5589 = vpow2.f32 %v4836_v53 }
 0xb71   :  { %5591 = vpow2.f32 %v4837_v41  ;;  %v8383_v41 = vld [vmem:[#allocation6 + $0x38] sm:$0xff] }
 0xb72   :  { %5593 = vtanh.f32 %v2973_v17 }
 0xb73   :  { %5595 = vpow2.f32 %v4838_v33  ;;  %v8380_v33 = vld [vmem:[#allocation6 + $0x28] sm:$0xff] }
 0xb7a   :  { %v5590_v60 = vpop.eup %5589 }
 0xb7b   :  { %v2983_v1 = vadd.f32 1.0, %v5590_v60  ;;  %v5592_v13 = vpop.eup %5591  ;;  %v8377_v60 = vld [vmem:[#allocation6 + $0x10] sm:$0xff] }
 0xb7c   :  { %v2984_v0 = vadd.f32 1.0, %v5592_v13  ;;  %v5594_v10 = vpop.eup %5593  ;;  %v8398_v13 = vld [vmem:[#allocation6 + $0x40] sm:$0xff] }
 0xb7d   :  { %5597 = vrcp.f32 %v2983_v1  ;;  %v5596_v20 = vpop.eup %5595  ;;  %v8374_v1 = vld [vmem:[#allocation6] sm:$0xff] }
 0xb7e   :  { %5599 = vrcp.f32 %v2984_v0  ;;  %v2985_v32 = vadd.f32 1.0, %v5596_v20  ;;  %v8401_v0 = vld [vmem:[#allocation6 + $0x50] sm:$0xff]  ;;  %v8407_v20 = vld [vmem:[#allocation6 + $0x78] sm:$0xff] }
 0xb80   :  { %5601 = vrcp.f32 %v2985_v32  ;;  %v8419_v32 = vld [vmem:[#allocation6 + $0x98] sm:$0xff] }
 0xb87   :  { %v5598_v4 = vpop.eup %5597 }
 0xb88   :  { %v2994_v52 = vmul.f32 %v5598_v4, %v5594_v10  ;;  %v5600_v28 = vpop.eup %5599  ;;  %v8404_v10 = vld [vmem:[#allocation6 + $0x68] sm:$0xff]  ;;  %v8410_v4 = vld [vmem:[#allocation6 + $0x60] sm:$0xff] }
 0xb89   :  { %v2993_v39 = vmul.f32 %v5600_v28, %v8271_v43  ;;  %v8392_v43 = vld [vmem:[#allocation6 + $0x48] sm:$0xff] }
 0xb8a   :  { %v5602_v34 = vpop.eup %5601  ;;  %v8416_v28 = vld [vmem:[#allocation6 + $0x88] sm:$0xff] }
 0xb8b   :  { %v8359_v62 = vadd.f32 %v2994_v52, %v2993_v39  ;;  %v8413_v52 = vld [vmem:[#allocation6 + $0x70] sm:$0xff]  ;;  %v8422_v39 = vld [vmem:[#allocation6 + $0x80] sm:$0xff] }
 0xb8d   :  { %5603 = vtanh.f32 %v8359_v62 }
 0xb97   :  { %v5604_v17 = vpop.eup %5603 }
 0xb98   :  { %v8362_v18 = vmul.f32 %v5604_v17, %v5602_v34  ;;  %v8425_v34 = vld [vmem:[#allocation6 + $0x90] sm:$0xff]  ;;  %v8428_v17 = vld [vmem:[#allocation6 + $0xa8] sm:$0xff] }
 0xb9a   :  { %10076 = vst [vmem:[#allocation48_spill] sm:$0xff] %v8362_v18  ;;  %v4842_v53 = vpack.c.bf16 %v8362_v18, %v8362_v18  ;;  %v8434_v18 = vld [vmem:[#allocation6 + $0xa0] sm:$0xff] }
 0xb9b   :  { %10078 = vst [vmem:[#allocation50_spill] sm:$0xff] %v8434_v18 }
 0xb9c   :  { %4843 = vmatprep.mubr.msk.bf16.mxu0 %vm6784_vm3, %v4842_v53  ;;  %4851 = vmatprep.mubr.msk.bf16.mxu1 %vm6784_vm3, %v4842_v53 }
 0xb9d   :  { %4846 = vmatmul.mubr.msk.bf16.vlgmr.msra.gmra.mrb[104].mxu0 %vm6794_vm4, %v4842_v53  ;;  %4854 = vmatmul.mubr.msk.bf16.vlgmr.msra.gmra.mrb[104].mxu1 %vm6794_vm4, %v4842_v53  ;;  %v8431_v53 = vld [vmem:[#allocation6 + $0xb8] sm:$0xff] }
 0xb9e   :  { %3139 = vmatpush1.bf16.msra.mxu0 %v8374_v1  ;;  %3180 = vmatpush1.bf16.msra.mxu1 %v8377_v60  ;;  %10077 = vst [vmem:[#allocation49_spill] sm:$0xff] %v8431_v53 }
 0xb9f   :  { %3140 = vmatprep.subr.bf16.mxu0 %v8380_v33  ;;  %3181 = vmatprep.subr.bf16.mxu1 %v8383_v41 }
 0xba2   :  { %3141 = vmatpush1.bf16.msra.mxu0 %v8386_v19  ;;  %3182 = vmatpush1.bf16.msra.mxu1 %v8389_v37 }
 0xba3   :  { %3142 = vmatprep.subr.bf16.mxu0 %v8392_v43  ;;  %3183 = vmatprep.subr.bf16.mxu1 %v8395_v38 }
 0xba6   :  { %3143 = vmatpush1.bf16.msra.mxu0 %v8398_v13  ;;  %3184 = vmatpush1.bf16.msra.mxu1 %v8401_v0 }
 0xba7   :  { %3144 = vmatprep.subr.bf16.mxu0 %v8404_v10  ;;  %3185 = vmatprep.subr.bf16.mxu1 %v8407_v20 }
 0xbaa   :  { %3145 = vmatpush1.bf16.msra.mxu0 %v8410_v4  ;;  %3186 = vmatpush1.bf16.msra.mxu1 %v8413_v52 }
 0xbab   :  { %3146 = vmatprep.subr.bf16.mxu0 %v8416_v28  ;;  %3187 = vmatprep.subr.bf16.mxu1 %v8419_v32 }
 0xbae   :  { %3147 = vmatpush1.bf16.msra.mxu0 %v8422_v39  ;;  %3188 = vmatpush1.bf16.msra.mxu1 %v8425_v34 }
 0xbaf   :  { %3148 = vmatprep.subr.bf16.mxu0 %v8428_v17  ;;  %3189 = vmatprep.subr.bf16.mxu1 %v8431_v53  ;;  %v8449_v53 = vld [vmem:[#allocation6 + $0xd0] sm:$0xff] }
 0xbb0   :  { %10083 = vst [vmem:[#allocation55_spill] sm:$0xff] %v8449_v53 }
 0xbb2   :  { %3149 = vmatpush1.bf16.msra.mxu0 %v8434_v18  ;;  %3190 = vmatpush1.bf16.msra.mxu1 %v8437_v9  ;;  %v8452_v18 = vld [vmem:[#allocation6 + $0xe8] sm:$0xff]  ;;  %v8455_v9 = vld [vmem:[#allocation6 + $0xf8] sm:$0xff] }
 0xbb3   :  { %3150 = vmatprep.subr.bf16.mxu0 %v8440_v59  ;;  %3191 = vmatprep.subr.bf16.mxu1 %v8443_v24  ;;  %v8458_v59 = vld [vmem:[#allocation6 + $0xe0] sm:$0xff]  ;;  %v8461_v24 = vld [vmem:[#allocation6 + $0xf0] sm:$0xff] }
 0xbb6   :  { %3151 = vmatpush1.bf16.msra.mxu0 %v8446_v45  ;;  %3192 = vmatpush1.bf16.msra.mxu1 %v8449_v53  ;;  %v8464_v45 = vld [vmem:[#allocation6 + $0x108] sm:$0xff]  ;;  %v8467_v53 = vld [vmem:[#allocation6 + $0x118] sm:$0xff] }
 0xbb7   :  { %3152 = vmatprep.subr.bf16.mxu0 %v8452_v18  ;;  %3193 = vmatprep.subr.bf16.mxu1 %v8455_v9 }
 0xbba   :  { %3153 = vmatpush1.bf16.msra.mxu0 %v8458_v59  ;;  %3194 = vmatpush1.bf16.msra.mxu1 %v8461_v24 }
 0xbbb   :  { %3154 = vmatprep.subr.bf16.mxu0 %v8464_v45  ;;  %3195 = vmatprep.subr.bf16.mxu1 %v8467_v53 }
 0xbbe   :  { %3155 = vmatpush1.bf16.msra.mxu0 %v10044_v63  ;;  %3196 = vmatpush1.bf16.msra.mxu1 %v10045_v31 }
 0xbbf   :  { %3156 = vmatprep.subr.bf16.mxu0 %v10046_v26  ;;  %3197 = vmatprep.subr.bf16.mxu1 %v10047_v40 }
 0xbc2   :  { %3157 = vmatpush1.bf16.msra.mxu0 %v10048_v27  ;;  %3198 = vmatpush1.bf16.msra.mxu1 %v10049_v55 }
 0xbc3   :  { %3158 = vmatprep.subr.bf16.mxu0 %v10050_v5  ;;  %3199 = vmatprep.subr.bf16.mxu1 %v10051_v22 }
 0xbc6   :  { %3159 = vmatpush1.bf16.msra.mxu0 %v10052_v2  ;;  %3200 = vmatpush1.bf16.msra.mxu1 %v10053_v50 }
 0xbc7   :  { %3160 = vmatprep.subr.bf16.mxu0 %v10054_v48  ;;  %3201 = vmatprep.subr.bf16.mxu1 %v10055_v44 }
 0xbca   :  { %3161 = vmatpush1.bf16.msra.mxu0 %v10056_v61  ;;  %3202 = vmatpush1.bf16.msra.mxu1 %v10057_v7 }
 0xbcb   :  { %3162 = vmatprep.subr.bf16.mxu0 %v10058_v29  ;;  %3203 = vmatprep.subr.bf16.mxu1 %v10059_v3 }
 0xbce   :  { %3163 = vmatpush1.bf16.msra.mxu0 %v10060_v23  ;;  %3204 = vmatpush1.bf16.msra.mxu1 %v10061_v46 }
 0xbcf   :  { %3164 = vmatprep.subr.bf16.mxu0 %v10062_v21  ;;  %3205 = vmatprep.subr.bf16.mxu1 %v10063_v54 }
 0xbd2   :  { %3165 = vmatpush1.bf16.msra.mxu0 %v10064_v42  ;;  %3206 = vmatpush1.bf16.msra.mxu1 %v10065_v58 }
 0xbd3   :  { %3166 = vmatprep.subr.bf16.mxu0 %v10066_v57  ;;  %3207 = vmatprep.subr.bf16.mxu1 %v10067_v51 }
 0xbd6   :  { %3167 = vmatpush1.bf16.msra.mxu0 %v10068_v14  ;;  %3208 = vmatpush1.bf16.msra.mxu1 %v10069_v16 }
 0xbd7   :  { %3168 = vmatprep.subr.bf16.mxu0 %v10070_v35  ;;  %3209 = vmatprep.subr.bf16.mxu1 %v10071_v56  ;;  %v10085_v56 = vld [vmem:[#allocation49_spill] sm:$0xff] }
 0xbda   :  { %3169 = vmatpush1.bf16.msra.mxu0 %v10072_v30  ;;  %3210 = vmatpush1.bf16.msra.mxu1 %v10073_v6  ;;  %v10086_v30 = vld [vmem:[#allocation50_spill] sm:$0xff]  ;;  %v10087_v6 = vld [vmem:[#allocation51_spill] sm:$0xff] }
 0xbdb   :  { %3271 = vmatprep.subr.bf16.mxu0 %v8348_v11  ;;  %3312 = vmatprep.subr.bf16.mxu1 %v8351_v49 }
 0xc70   :  { %v3039_v63 = vpop.f32.mrb[104].mxu0  ;;  %v3080_v31 = vpop.f32.mrb[104].mxu1 }
 0xc71   :  { %v3103_v26 = vadd.f32 %v8210_v47, %v3039_v63  ;;  %v3105_v40 = vadd.f32 %v8215_v12, %v3080_v31  ;;  %v3041_v27 = vpop.f32.mrb[105].mxu0  ;;  %v3082_v55 = vpop.f32.mrb[105].mxu1  ;;  %v10089_v63 = vld [vmem:[#allocation53_spill] sm:$0xff]  ;;  %v10090_v31 = vld [vmem:[#allocation54_spill] sm:$0xff] }
 0xc72   :  { %v3104_v5 = vadd.f32 %v8220_v8, %v3041_v27  ;;  %v3106_v22 = vadd.f32 %v8225_v15, %v3082_v55  ;;  %v3043_v2 = vpop.f32.mrb[106].mxu0  ;;  %v3084_v50 = vpop.f32.mrb[106].mxu1  ;;  %v8557_v27 = vld [vmem:[#allocation6 + $0x110] sm:$0xff]  ;;  %v8560_v55 = vld [vmem:[#allocation6 + $0x128] sm:$0xff] }
 0xc73   :  { %v4855_v48 = vmul.f32 -1.442695, %v3103_v26  ;;  %v3044_v44 = vpop.f32.mrb[107].mxu0  ;;  %v3085_v61 = vpop.f32.mrb[107].mxu1  ;;  %v4857_v29 = vmul.f32 -1.442695, %v3105_v40 }
 0xc74   :  { %v4856_v7 = vmul.f32 -1.442695, %v3104_v5  ;;  %v10091_v26 = vld [vmem:[#allocation55_spill] sm:$0xff]  ;;  %v8554_v40 = vld [vmem:[#allocation6 + $0x100] sm:$0xff]  ;;  %v8569_v2 = vld [vmem:[#allocation6 + $0x130] sm:$0xff] }
 0xc75   :  { %5605 = vpow2.f32 %v4855_v48  ;;  %v8563_v5 = vld [vmem:[#allocation6 + $0x138] sm:$0xff]  ;;  %v8572_v50 = vld [vmem:[#allocation6 + $0x148] sm:$0xff]  ;;  %v8578_v44 = vld [vmem:[#allocation6 + $0x140] sm:$0xff] }
 0xc76   :  { %5607 = vpow2.f32 %v4856_v7  ;;  %v8575_v48 = vld [vmem:[#allocation6 + $0x158] sm:$0xff]  ;;  %10092 = vst [vmem:[#allocation57_spill] sm:$0xff] %v8578_v44  ;;  %v8581_v61 = vld [vmem:[#allocation6 + $0x150] sm:$0xff]  ;;  %v8584_v7 = vld [vmem:[#allocation6 + $0x168] sm:$0xff] }
 0xc77   :  { %5609 = vtanh.f32 %v3106_v22  ;;  %v8566_v22 = vld [vmem:[#allocation6 + $0x120] sm:$0xff]  ;;  %10093 = vst [vmem:[#allocation58_spill] sm:$0xff] %v8581_v61  ;;  %10094 = vst [vmem:[#allocation59_spill] sm:$0xff] %v8584_v7 }
 0xc78   :  { %5611 = vpow2.f32 %v4857_v29  ;;  %v8587_v29 = vld [vmem:[#allocation6 + $0x178] sm:$0xff] }
 0xc79   :  { %10095 = vst [vmem:[#allocation60_spill] sm:$0xff] %v8587_v29 }
 0xc7f   :  { %v5606_v3 = vpop.eup %5605 }
 0xc80   :  { %v3116_v23 = vadd.f32 1.0, %v5606_v3  ;;  %v5608_v47 = vpop.eup %5607  ;;  %v8590_v3 = vld [vmem:[#allocation6 + $0x160] sm:$0xff] }
 0xc81   :  { %v3117_v12 = vadd.f32 1.0, %v5608_v47  ;;  %v5610_v8 = vpop.eup %5609  ;;  %10096 = vst [vmem:[#allocation61_spill] sm:$0xff] %v8590_v3  ;;  %v8596_v47 = vld [vmem:[#allocation6 + $0x188] sm:$0xff] }
 0xc82   :  { %5613 = vrcp.f32 %v3116_v23  ;;  %v5612_v46 = vpop.eup %5611  ;;  %v8593_v23 = vld [vmem:[#allocation6 + $0x170] sm:$0xff]  ;;  %10098 = vst [vmem:[#allocation63_spill] sm:$0xff] %v8596_v47 }
 0xc83   :  { %5615 = vrcp.f32 %v3117_v12  ;;  %v3118_v42 = vadd.f32 1.0, %v5612_v46  ;;  %10097 = vst [vmem:[#allocation62_spill] sm:$0xff] %v8593_v23  ;;  %v8599_v12 = vld [vmem:[#allocation6 + $0x198] sm:$0xff]  ;;  %v8605_v46 = vld [vmem:[#allocation6 + $0x190] sm:$0xff] }
 0xc84   :  { %10099 = vst [vmem:[#allocation64_spill] sm:$0xff] %v8599_v12  ;;  %10101 = vst [vmem:[#allocation66_spill] sm:$0xff] %v8605_v46 }
 0xc85   :  { %5617 = vrcp.f32 %v3118_v42  ;;  %v8617_v42 = vld [vmem:[#allocation6 + $0x1b0] sm:$0xff] }
 0xc86   :  { %10105 = vst [vmem:[#allocation70_spill] sm:$0xff] %v8617_v42 }
 0xc8c   :  { %v5614_v15 = vpop.eup %5613 }
 0xc8d   :  { %v3127_v21 = vmul.f32 %v5614_v15, %v5610_v8  ;;  %v5616_v54 = vpop.eup %5615  ;;  %v8602_v8 = vld [vmem:[#allocation6 + $0x180] sm:$0xff]  ;;  %v8608_v15 = vld [vmem:[#allocation6 + $0x1a8] sm:$0xff] }
 0xc8e   :  { %v3126_v58 = vmul.f32 %v5616_v54, %v8359_v62  ;;  %v10088_v62 = vld [vmem:[#allocation52_spill] sm:$0xff]  ;;  %10100 = vst [vmem:[#allocation65_spill] sm:$0xff] %v8602_v8  ;;  %10102 = vst [vmem:[#allocation67_spill] sm:$0xff] %v8608_v15 }
 0xc8f   :  { %v5618_v51 = vpop.eup %5617  ;;  %v8614_v54 = vld [vmem:[#allocation6 + $0x1a0] sm:$0xff] }
 0xc90   :  { %v8507_v57 = vadd.f32 %v3127_v21, %v3126_v58  ;;  %v8611_v21 = vld [vmem:[#allocation6 + $0x1b8] sm:$0xff]  ;;  %10104 = vst [vmem:[#allocation69_spill] sm:$0xff] %v8614_v54  ;;  %v8620_v58 = vld [vmem:[#allocation6 + $0x1c8] sm:$0xff] }
 0xc91   :  { %10103 = vst [vmem:[#allocation68_spill] sm:$0xff] %v8611_v21  ;;  %10106 = vst [vmem:[#allocation71_spill] sm:$0xff] %v8620_v58 }
 0xc92   :  { %5619 = vtanh.f32 %v8507_v57 }
 0xc9c   :  { %v5620_v14 = vpop.eup %5619 }
 0xc9d   :  { %v8510_v16 = vmul.f32 %v5620_v14, %v5618_v51  ;;  %v8623_v51 = vld [vmem:[#allocation6 + $0x1d8] sm:$0xff]  ;;  %v8626_v14 = vld [vmem:[#allocation6 + $0x1c0] sm:$0xff] }
 0xc9e   :  { %10107 = vst [vmem:[#allocation72_spill] sm:$0xff] %v8623_v51  ;;  %10108 = vst [vmem:[#allocation73_spill] sm:$0xff] %v8626_v14 }
 0xc9f   :  { %10084 = vst [vmem:[#allocation56_spill] sm:$0xff] %v8510_v16  ;;  %v4861_v35 = vpack.c.bf16 %v8510_v16, %v8510_v16  ;;  %v8632_v16 = vld [vmem:[#allocation6 + $0x1e8] sm:$0xff] }
 0xca0   :  { %10110 = vst [vmem:[#allocation75_spill] sm:$0xff] %v8632_v16 }
 0xca1   :  { %4862 = vmatprep.mubr.msk.bf16.mxu0 %vm6784_vm3, %v4861_v35  ;;  %4870 = vmatprep.mubr.msk.bf16.mxu1 %vm6784_vm3, %v4861_v35 }
 0xca2   :  { %4865 = vmatmul.mubr.msk.bf16.vlgmr.msra.gmra.mrb[108].mxu0 %vm6794_vm4, %v4861_v35  ;;  %4873 = vmatmul.mubr.msk.bf16.vlgmr.msra.gmra.mrb[108].mxu1 %vm6794_vm4, %v4861_v35  ;;  %v8629_v35 = vld [vmem:[#allocation6 + $0x1d0] sm:$0xff] }
 0xca3   :  { %3272 = vmatpush1.bf16.msra.mxu0 %v8374_v1  ;;  %3313 = vmatpush1.bf16.msra.mxu1 %v8377_v60  ;;  %10109 = vst [vmem:[#allocation74_spill] sm:$0xff] %v8629_v35 }
 0xca4   :  { %3273 = vmatprep.subr.bf16.mxu0 %v8380_v33  ;;  %3314 = vmatprep.subr.bf16.mxu1 %v8383_v41 }
 0xca7   :  { %3274 = vmatpush1.bf16.msra.mxu0 %v8386_v19  ;;  %3315 = vmatpush1.bf16.msra.mxu1 %v8389_v37 }
 0xca8   :  { %3275 = vmatprep.subr.bf16.mxu0 %v8392_v43  ;;  %3316 = vmatprep.subr.bf16.mxu1 %v8395_v38 }
 0xcab   :  { %3276 = vmatpush1.bf16.msra.mxu0 %v8398_v13  ;;  %3317 = vmatpush1.bf16.msra.mxu1 %v8401_v0 }
 0xcac   :  { %3277 = vmatprep.subr.bf16.mxu0 %v8404_v10  ;;  %3318 = vmatprep.subr.bf16.mxu1 %v8407_v20 }
 0xcaf   :  { %3278 = vmatpush1.bf16.msra.mxu0 %v8410_v4  ;;  %3319 = vmatpush1.bf16.msra.mxu1 %v8413_v52 }
 0xcb0   :  { %3279 = vmatprep.subr.bf16.mxu0 %v8416_v28  ;;  %3320 = vmatprep.subr.bf16.mxu1 %v8419_v32 }
 0xcb3   :  { %3280 = vmatpush1.bf16.msra.mxu0 %v8422_v39  ;;  %3321 = vmatpush1.bf16.msra.mxu1 %v8425_v34 }
 0xcb4   :  { %3281 = vmatprep.subr.bf16.mxu0 %v8428_v17  ;;  %3322 = vmatprep.subr.bf16.mxu1 %v10085_v56 }
 0xcb7   :  { %3282 = vmatpush1.bf16.msra.mxu0 %v10086_v30  ;;  %3323 = vmatpush1.bf16.msra.mxu1 %v10087_v6 }
 0xcb8   :  { %3283 = vmatprep.subr.bf16.mxu0 %v10088_v62  ;;  %3324 = vmatprep.subr.bf16.mxu1 %v10089_v63 }
 0xcbb   :  { %3284 = vmatpush1.bf16.msra.mxu0 %v10090_v31  ;;  %3325 = vmatpush1.bf16.msra.mxu1 %v10091_v26 }
 0xcbc   :  { %3285 = vmatprep.subr.bf16.mxu0 %v8452_v18  ;;  %3326 = vmatprep.subr.bf16.mxu1 %v8455_v9 }
 0xcbf   :  { %3286 = vmatpush1.bf16.msra.mxu0 %v8458_v59  ;;  %3327 = vmatpush1.bf16.msra.mxu1 %v8461_v24 }
 0xcc0   :  { %3287 = vmatprep.subr.bf16.mxu0 %v8464_v45  ;;  %3328 = vmatprep.subr.bf16.mxu1 %v8467_v53 }
 0xcc3   :  { %3288 = vmatpush1.bf16.msra.mxu0 %v8554_v40  ;;  %3329 = vmatpush1.bf16.msra.mxu1 %v8557_v27 }
 0xcc4   :  { %3289 = vmatprep.subr.bf16.mxu0 %v8560_v55  ;;  %3330 = vmatprep.subr.bf16.mxu1 %v8563_v5 }
 0xcc7   :  { %3290 = vmatpush1.bf16.msra.mxu0 %v8566_v22  ;;  %3331 = vmatpush1.bf16.msra.mxu1 %v8569_v2 }
 0xcc8   :  { %3291 = vmatprep.subr.bf16.mxu0 %v8572_v50  ;;  %3332 = vmatprep.subr.bf16.mxu1 %v8575_v48 }
 0xccb   :  { %3292 = vmatpush1.bf16.msra.mxu0 %v8578_v44  ;;  %3333 = vmatpush1.bf16.msra.mxu1 %v8581_v61 }
 0xccc   :  { %3293 = vmatprep.subr.bf16.mxu0 %v8584_v7  ;;  %3334 = vmatprep.subr.bf16.mxu1 %v8587_v29 }
 0xccf   :  { %3294 = vmatpush1.bf16.msra.mxu0 %v8590_v3  ;;  %3335 = vmatpush1.bf16.msra.mxu1 %v8593_v23 }
 0xcd0   :  { %3295 = vmatprep.subr.bf16.mxu0 %v8596_v47  ;;  %3336 = vmatprep.subr.bf16.mxu1 %v8599_v12  ;;  %v10117_v47 = vld [vmem:[#allocation34_spill] sm:$0xff] }
 0xcd3   :  { %3296 = vmatpush1.bf16.msra.mxu0 %v8602_v8  ;;  %3337 = vmatpush1.bf16.msra.mxu1 %v8605_v46  ;;  %v10116_v8 = vld [vmem:[#allocation47_spill] sm:$0xff] }
 0xcd4   :  { %3297 = vmatprep.subr.bf16.mxu0 %v8608_v15  ;;  %3338 = vmatprep.subr.bf16.mxu1 %v8611_v21  ;;  %v10115_v21 = vld [vmem:[#allocation22_spill] sm:$0xff] }
 0xcd7   :  { %3298 = vmatpush1.bf16.msra.mxu0 %v8614_v54  ;;  %3339 = vmatpush1.bf16.msra.mxu1 %v8617_v42  ;;  %v8635_v42 = vld [vmem:[#allocation6 + $0x1f8] sm:$0xff] }
 0xcd8   :  { %3299 = vmatprep.subr.bf16.mxu0 %v8620_v58  ;;  %3340 = vmatprep.subr.bf16.mxu1 %v8623_v51  ;;  %10111 = vst [vmem:[#allocation76_spill] sm:$0xff] %v8635_v42  ;;  %v8638_v58 = vld [vmem:[#allocation6 + $0x1e0] sm:$0xff]  ;;  %v8641_v51 = vld [vmem:[#allocation6 + $0x1f0] sm:$0xff]  ;;  %v10114_v54 = vld [vmem:[#allocation99_spill] sm:$0xff] }
 0xcd9   :  { %10112 = vst [vmem:[#allocation77_spill] sm:$0xff] %v8638_v58  ;;  %10113 = vst [vmem:[#allocation95_spill] sm:$0xff] %v8641_v51 }
 0xcdb   :  { %3300 = vmatpush1.bf16.msra.mxu0 %v8626_v14  ;;  %3341 = vmatpush1.bf16.msra.mxu1 %v8629_v35 }
 0xcdc   :  { %3301 = vmatprep.subr.bf16.mxu0 %v8632_v16  ;;  %3342 = vmatprep.subr.bf16.mxu1 %v8635_v42 }
 0xcdf   :  { %3302 = vmatpush1.bf16.msra.mxu0 %v8638_v58  ;;  %3343 = vmatpush1.bf16.msra.mxu1 %v8641_v51 }
 0xce0   :  { %3404 = vmatprep.subr.bf16.mxu0 %v8348_v11  ;;  %3445 = vmatprep.subr.bf16.mxu1 %v8351_v49 }
 0xd75   :  { %v3172_v35 = vpop.f32.mrb[108].mxu0  ;;  %v3213_v14 = vpop.f32.mrb[108].mxu1 }
 0xd76   :  { %v3236_v16 = vadd.f32 %v10114_v54, %v3172_v35  ;;  %v3238_v15 = vadd.f32 %v10115_v21, %v3213_v14  ;;  %v3174_v46 = vpop.f32.mrb[109].mxu0  ;;  %v3215_v42 = vpop.f32.mrb[109].mxu1  ;;  %v10125_v14 = vld [vmem:[#allocation63_spill] sm:$0xff]  ;;  %v10126_v35 = vld [vmem:[#allocation64_spill] sm:$0xff] }
 0xd77   :  { %v3237_v12 = vadd.f32 %v10116_v8, %v3174_v46  ;;  %v3239_v58 = vadd.f32 %v10117_v47, %v3215_v42  ;;  %v3176_v23 = vpop.f32.mrb[110].mxu0  ;;  %v3217_v3 = vpop.f32.mrb[110].mxu1  ;;  %v10122_v42 = vld [vmem:[#allocation60_spill] sm:$0xff] }
 0xd78   :  { %v4874_v29 = vmul.f32 -1.442695, %v3236_v16  ;;  %v3177_v51 = vpop.f32.mrb[111].mxu0  ;;  %v3218_v7 = vpop.f32.mrb[111].mxu1  ;;  %v4876_v49 = vmul.f32 -1.442695, %v3238_v15 }
 0xd79   :  { %v4875_v11 = vmul.f32 -1.442695, %v3237_v12  ;;  %v10121_v15 = vld [vmem:[#allocation59_spill] sm:$0xff]  ;;  %v10124_v51 = vld [vmem:[#allocation62_spill] sm:$0xff] }
 0xd7a   :  { %5621 = vpow2.f32 %v4874_v29 }
 0xd7b   :  { %5623 = vpow2.f32 %v4875_v11 }
 0xd7c   :  { %5625 = vtanh.f32 %v3239_v58  ;;  %v10123_v58 = vld [vmem:[#allocation61_spill] sm:$0xff] }
 0xd7d   :  { %5627 = vpow2.f32 %v4876_v49 }
 0xd84   :  { %v5622_v61 = vpop.eup %5621 }
 0xd85   :  { %v3249_v44 = vadd.f32 1.0, %v5622_v61  ;;  %v5624_v54 = vpop.eup %5623 }
 0xd86   :  { %v3250_v21 = vadd.f32 1.0, %v5624_v54  ;;  %v5626_v8 = vpop.eup %5625  ;;  %v10127_v54 = vld [vmem:[#allocation65_spill] sm:$0xff] }
 0xd87   :  { %5629 = vrcp.f32 %v3249_v44  ;;  %v5628_v46 = vpop.eup %5627  ;;  %v10120_v44 = vld [vmem:[#allocation58_spill] sm:$0xff] }
 0xd88   :  { %5631 = vrcp.f32 %v3250_v21  ;;  %v3251_v16 = vadd.f32 1.0, %v5628_v46  ;;  %v10128_v21 = vld [vmem:[#allocation66_spill] sm:$0xff]  ;;  %v10130_v46 = vld [vmem:[#allocation68_spill] sm:$0xff] }
 0xd8a   :  { %5633 = vrcp.f32 %v3251_v16  ;;  %v10134_v16 = vld [vmem:[#allocation72_spill] sm:$0xff] }
 0xd91   :  { %v5630_v47 = vpop.eup %5629 }
 0xd92   :  { %v3260_v23 = vmul.f32 %v5630_v47, %v5626_v8  ;;  %v5632_v3 = vpop.eup %5631  ;;  %v10129_v8 = vld [vmem:[#allocation67_spill] sm:$0xff]  ;;  %v10131_v47 = vld [vmem:[#allocation69_spill] sm:$0xff] }
 0xd93   :  { %v3259_v7 = vmul.f32 %v5632_v3, %v8507_v57  ;;  %v10119_v57 = vld [vmem:[#allocation57_spill] sm:$0xff]  ;;  %v10133_v3 = vld [vmem:[#allocation71_spill] sm:$0xff] }
 0xd94   :  { %v5634_v11 = vpop.eup %5633 }
 0xd95   :  { %v8651_v12 = vadd.f32 %v3260_v23, %v3259_v7  ;;  %v10132_v23 = vld [vmem:[#allocation70_spill] sm:$0xff]  ;;  %v10135_v7 = vld [vmem:[#allocation73_spill] sm:$0xff] }
 0xd97   :  { %5635 = vtanh.f32 %v8651_v12 }
 0xda1   :  { %v5636_v61 = vpop.eup %5635 }
 0xda2   :  { %v8654_v29 = vmul.f32 %v5636_v61, %v5634_v11  ;;  %v10136_v11 = vld [vmem:[#allocation74_spill] sm:$0xff]  ;;  %v10137_v61 = vld [vmem:[#allocation75_spill] sm:$0xff] }
 0xda4   :  { %10118 = vst [vmem:[#allocation96_spill] sm:$0xff] %v8654_v29  ;;  %v4880_v49 = vpack.c.bf16 %v8654_v29, %v8654_v29  ;;  %v10139_v29 = vld [vmem:[#allocation77_spill] sm:$0xff] }
 0xda6   :  { %4881 = vmatprep.mubr.msk.bf16.mxu0 %vm6784_vm3, %v4880_v49  ;;  %4889 = vmatprep.mubr.msk.bf16.mxu1 %vm6784_vm3, %v4880_v49 }
 0xda7   :  { %4884 = vmatmul.mubr.msk.bf16.vlgmr.msra.gmra.mrb[112].mxu0 %vm6794_vm4, %v4880_v49  ;;  %4892 = vmatmul.mubr.msk.bf16.vlgmr.msra.gmra.mrb[112].mxu1 %vm6794_vm4, %v4880_v49  ;;  %v10138_v49 = vld [vmem:[#allocation76_spill] sm:$0xff] }
 0xda8   :  { %3405 = vmatpush1.bf16.msra.mxu0 %v8374_v1  ;;  %3446 = vmatpush1.bf16.msra.mxu1 %v8377_v60 }
 0xda9   :  { %3406 = vmatprep.subr.bf16.mxu0 %v8380_v33  ;;  %3447 = vmatprep.subr.bf16.mxu1 %v8383_v41 }
 0xdac   :  { %3407 = vmatpush1.bf16.msra.mxu0 %v8386_v19  ;;  %3448 = vmatpush1.bf16.msra.mxu1 %v8389_v37 }
 0xdad   :  { %3408 = vmatprep.subr.bf16.mxu0 %v8392_v43  ;;  %3449 = vmatprep.subr.bf16.mxu1 %v8395_v38 }
 0xdb0   :  { %3409 = vmatpush1.bf16.msra.mxu0 %v8398_v13  ;;  %3450 = vmatpush1.bf16.msra.mxu1 %v8401_v0 }
 0xdb1   :  { %3410 = vmatprep.subr.bf16.mxu0 %v8404_v10  ;;  %3451 = vmatprep.subr.bf16.mxu1 %v8407_v20 }
 0xdb4   :  { %3411 = vmatpush1.bf16.msra.mxu0 %v8410_v4  ;;  %3452 = vmatpush1.bf16.msra.mxu1 %v8413_v52 }
 0xdb5   :  { %3412 = vmatprep.subr.bf16.mxu0 %v8416_v28  ;;  %3453 = vmatprep.subr.bf16.mxu1 %v8419_v32 }
 0xdb8   :  { %3413 = vmatpush1.bf16.msra.mxu0 %v8422_v39  ;;  %3454 = vmatpush1.bf16.msra.mxu1 %v8425_v34 }
 0xdb9   :  { %3414 = vmatprep.subr.bf16.mxu0 %v8428_v17  ;;  %3455 = vmatprep.subr.bf16.mxu1 %v10085_v56 }
 0xdbc   :  { %3415 = vmatpush1.bf16.msra.mxu0 %v10086_v30  ;;  %3456 = vmatpush1.bf16.msra.mxu1 %v10087_v6 }
 0xdbd   :  { %3416 = vmatprep.subr.bf16.mxu0 %v10088_v62  ;;  %3457 = vmatprep.subr.bf16.mxu1 %v10089_v63 }
 0xdc0   :  { %3417 = vmatpush1.bf16.msra.mxu0 %v10090_v31  ;;  %3458 = vmatpush1.bf16.msra.mxu1 %v10091_v26 }
 0xdc1   :  { %3418 = vmatprep.subr.bf16.mxu0 %v8452_v18  ;;  %3459 = vmatprep.subr.bf16.mxu1 %v8455_v9 }
 0xdc4   :  { %3419 = vmatpush1.bf16.msra.mxu0 %v8458_v59  ;;  %3460 = vmatpush1.bf16.msra.mxu1 %v8461_v24 }
 0xdc5   :  { %3420 = vmatprep.subr.bf16.mxu0 %v8464_v45  ;;  %3461 = vmatprep.subr.bf16.mxu1 %v8467_v53 }
 0xdc8   :  { %3421 = vmatpush1.bf16.msra.mxu0 %v8554_v40  ;;  %3462 = vmatpush1.bf16.msra.mxu1 %v8557_v27 }
 0xdc9   :  { %3422 = vmatprep.subr.bf16.mxu0 %v8560_v55  ;;  %3463 = vmatprep.subr.bf16.mxu1 %v8563_v5 }
 0xdcc   :  { %3423 = vmatpush1.bf16.msra.mxu0 %v8566_v22  ;;  %3464 = vmatpush1.bf16.msra.mxu1 %v8569_v2 }
 0xdcd   :  { %3424 = vmatprep.subr.bf16.mxu0 %v8572_v50  ;;  %3465 = vmatprep.subr.bf16.mxu1 %v8575_v48 }
 0xdd0   :  { %3425 = vmatpush1.bf16.msra.mxu0 %v10119_v57  ;;  %3466 = vmatpush1.bf16.msra.mxu1 %v10120_v44 }
 0xdd1   :  { %3426 = vmatprep.subr.bf16.mxu0 %v10121_v15  ;;  %3467 = vmatprep.subr.bf16.mxu1 %v10122_v42 }
 0xdd4   :  { %3427 = vmatpush1.bf16.msra.mxu0 %v10123_v58  ;;  %3468 = vmatpush1.bf16.msra.mxu1 %v10124_v51  ;;  %v10146_v51 = vld [vmem:[#allocation83_spill] sm:$0xff] }
 0xdd5   :  { %3428 = vmatprep.subr.bf16.mxu0 %v10125_v14  ;;  %3469 = vmatprep.subr.bf16.mxu1 %v10126_v35  ;;  %v10145_v14 = vld [vmem:[#allocation81_spill] sm:$0xff] }
 0xdd8   :  { %3429 = vmatpush1.bf16.msra.mxu0 %v10127_v54  ;;  %3470 = vmatpush1.bf16.msra.mxu1 %v10128_v21  ;;  %v10143_v21 = vld [vmem:[#allocation79_spill] sm:$0xff]  ;;  %v10144_v54 = vld [vmem:[#allocation80_spill] sm:$0xff] }
 0xdd9   :  { %3430 = vmatprep.subr.bf16.mxu0 %v10129_v8  ;;  %3471 = vmatprep.subr.bf16.mxu1 %v10130_v46  ;;  %v10140_v8 = vld [vmem:[#allocation95_spill] sm:$0xff]  ;;  %v10141_v46 = vld [vmem:[#allocation100_spill] sm:$0xff] }
 0xddc   :  { %3431 = vmatpush1.bf16.msra.mxu0 %v10131_v47  ;;  %3472 = vmatpush1.bf16.msra.mxu1 %v10132_v23  ;;  %v10142_v47 = vld [vmem:[#allocation101_spill] sm:$0xff] }
 0xddd   :  { %3432 = vmatprep.subr.bf16.mxu0 %v10133_v3  ;;  %3473 = vmatprep.subr.bf16.mxu1 %v10134_v16 }
 0xde0   :  { %3433 = vmatpush1.bf16.msra.mxu0 %v10135_v7  ;;  %3474 = vmatpush1.bf16.msra.mxu1 %v10136_v11 }
 0xde1   :  { %3434 = vmatprep.subr.bf16.mxu0 %v10137_v61  ;;  %3475 = vmatprep.subr.bf16.mxu1 %v10138_v49 }
 0xde4   :  { %3435 = vmatpush1.bf16.msra.mxu0 %v10139_v29  ;;  %3476 = vmatpush1.bf16.msra.mxu1 %v10140_v8 }
 0xde5   :  { %3537 = vmatprep.subr.bf16.mxu0 %v10141_v46  ;;  %3578 = vmatprep.subr.bf16.mxu1 %v10142_v47 }
 0xe7a   :  { %v3305_v23 = vpop.f32.mrb[112].mxu0  ;;  %v3346_v3 = vpop.f32.mrb[112].mxu1 }
 0xe7b   :  { %v3369_v16 = vadd.f32 %v10143_v21, %v3305_v23  ;;  %v3371_v7 = vadd.f32 %v10144_v54, %v3346_v3  ;;  %v3307_v35 = vpop.f32.mrb[113].mxu0  ;;  %v3348_v11 = vpop.f32.mrb[113].mxu1  ;;  %v10150_v3 = vld [vmem:[#allocation59_spill] sm:$0xff] }
 0xe7c   :  { %v3370_v61 = vadd.f32 %v10145_v14, %v3307_v35  ;;  %v3372_v49 = vadd.f32 %v10146_v51, %v3348_v11  ;;  %v3309_v58 = vpop.f32.mrb[114].mxu0  ;;  %v3350_v29 = vpop.f32.mrb[114].mxu1  ;;  %v10153_v11 = vld [vmem:[#allocation62_spill] sm:$0xff] }
 0xe7d   :  { %v4893_v42 = vmul.f32 -1.442695, %v3369_v16  ;;  %v3310_v8 = vpop.f32.mrb[115].mxu0  ;;  %v3351_v15 = vpop.f32.mrb[115].mxu1  ;;  %v4895_v47 = vmul.f32 -1.442695, %v3371_v7 }
 0xe7e   :  { %v4894_v46 = vmul.f32 -1.442695, %v3370_v61  ;;  %v10151_v16 = vld [vmem:[#allocation60_spill] sm:$0xff]  ;;  %v10152_v7 = vld [vmem:[#allocation61_spill] sm:$0xff]  ;;  %v10154_v61 = vld [vmem:[#allocation63_spill] sm:$0xff] }
 0xe7f   :  { %5637 = vpow2.f32 %v4893_v42 }
 0xe80   :  { %5639 = vpow2.f32 %v4894_v46 }
 0xe81   :  { %5641 = vtanh.f32 %v3372_v49  ;;  %v10155_v49 = vld [vmem:[#allocation64_spill] sm:$0xff] }
 0xe82   :  { %5643 = vpow2.f32 %v4895_v47  ;;  %v10149_v47 = vld [vmem:[#allocation58_spill] sm:$0xff] }
 0xe89   :  { %v5638_v44 = vpop.eup %5637 }
 0xe8a   :  { %v3382_v57 = vadd.f32 1.0, %v5638_v44  ;;  %v5640_v21 = vpop.eup %5639 }
 0xe8b   :  { %v3383_v54 = vadd.f32 1.0, %v5640_v21  ;;  %v5642_v14 = vpop.eup %5641  ;;  %v10156_v21 = vld [vmem:[#allocation65_spill] sm:$0xff] }
 0xe8c   :  { %5645 = vrcp.f32 %v3382_v57  ;;  %v5644_v35 = vpop.eup %5643 }
 0xe8d   :  { %5647 = vrcp.f32 %v3383_v54  ;;  %v3384_v23 = vadd.f32 1.0, %v5644_v35  ;;  %v10157_v54 = vld [vmem:[#allocation66_spill] sm:$0xff]  ;;  %v10159_v35 = vld [vmem:[#allocation68_spill] sm:$0xff] }
 0xe8f   :  { %5649 = vrcp.f32 %v3384_v23  ;;  %v10163_v23 = vld [vmem:[#allocation72_spill] sm:$0xff] }
 0xe96   :  { %v5646_v51 = vpop.eup %5645 }
 0xe97   :  { %v3393_v58 = vmul.f32 %v5646_v51, %v5642_v14  ;;  %v5648_v29 = vpop.eup %5647  ;;  %v10158_v14 = vld [vmem:[#allocation67_spill] sm:$0xff]  ;;  %v10160_v51 = vld [vmem:[#allocation69_spill] sm:$0xff] }
 0xe98   :  { %v3392_v15 = vmul.f32 %v5648_v29, %v8651_v12  ;;  %v10148_v12 = vld [vmem:[#allocation57_spill] sm:$0xff]  ;;  %v10162_v29 = vld [vmem:[#allocation71_spill] sm:$0xff] }
 0xe99   :  { %v5650_v44 = vpop.eup %5649 }
 0xe9a   :  { %v8735_v8 = vadd.f32 %v3393_v58, %v3392_v15  ;;  %v10161_v58 = vld [vmem:[#allocation70_spill] sm:$0xff]  ;;  %v10164_v15 = vld [vmem:[#allocation73_spill] sm:$0xff] }
 0xe9c   :  { %5651 = vtanh.f32 %v8735_v8 }
 0xea6   :  { %v5652_v42 = vpop.eup %5651 }
 0xea7   :  { %v8738_v46 = vmul.f32 %v5652_v42, %v5650_v44  ;;  %v10165_v44 = vld [vmem:[#allocation74_spill] sm:$0xff]  ;;  %v10166_v42 = vld [vmem:[#allocation75_spill] sm:$0xff] }
 0xea9   :  { %10147 = vst [vmem:[#allocation97_spill] sm:$0xff] %v8738_v46  ;;  %v4899_v57 = vpack.c.bf16 %v8738_v46, %v8738_v46  ;;  %v10168_v46 = vld [vmem:[#allocation77_spill] sm:$0xff] }
 0xeab   :  { %4900 = vmatprep.mubr.msk.bf16.mxu0 %vm6784_vm3, %v4899_v57  ;;  %4908 = vmatprep.mubr.msk.bf16.mxu1 %vm6784_vm3, %v4899_v57 }
 0xeac   :  { %4903 = vmatmul.mubr.msk.bf16.vlgmr.msra.gmra.mrb[116].mxu0 %vm6794_vm4, %v4899_v57  ;;  %4911 = vmatmul.mubr.msk.bf16.vlgmr.msra.gmra.mrb[116].mxu1 %vm6794_vm4, %v4899_v57  ;;  %v10167_v57 = vld [vmem:[#allocation76_spill] sm:$0xff] }
 0xead   :  { %3538 = vmatpush1.bf16.msra.mxu0 %v8374_v1  ;;  %3579 = vmatpush1.bf16.msra.mxu1 %v8377_v60 }
 0xeae   :  { %3539 = vmatprep.subr.bf16.mxu0 %v8380_v33  ;;  %3580 = vmatprep.subr.bf16.mxu1 %v8383_v41 }
 0xeb1   :  { %3540 = vmatpush1.bf16.msra.mxu0 %v8386_v19  ;;  %3581 = vmatpush1.bf16.msra.mxu1 %v8389_v37 }
 0xeb2   :  { %3541 = vmatprep.subr.bf16.mxu0 %v8392_v43  ;;  %3582 = vmatprep.subr.bf16.mxu1 %v8395_v38 }
 0xeb5   :  { %3542 = vmatpush1.bf16.msra.mxu0 %v8398_v13  ;;  %3583 = vmatpush1.bf16.msra.mxu1 %v8401_v0 }
 0xeb6   :  { %3543 = vmatprep.subr.bf16.mxu0 %v8404_v10  ;;  %3584 = vmatprep.subr.bf16.mxu1 %v8407_v20 }
 0xeb9   :  { %3544 = vmatpush1.bf16.msra.mxu0 %v8410_v4  ;;  %3585 = vmatpush1.bf16.msra.mxu1 %v8413_v52 }
 0xeba   :  { %3545 = vmatprep.subr.bf16.mxu0 %v8416_v28  ;;  %3586 = vmatprep.subr.bf16.mxu1 %v8419_v32 }
 0xebd   :  { %3546 = vmatpush1.bf16.msra.mxu0 %v8422_v39  ;;  %3587 = vmatpush1.bf16.msra.mxu1 %v8425_v34 }
 0xebe   :  { %3547 = vmatprep.subr.bf16.mxu0 %v8428_v17  ;;  %3588 = vmatprep.subr.bf16.mxu1 %v10085_v56 }
 0xec1   :  { %3548 = vmatpush1.bf16.msra.mxu0 %v10086_v30  ;;  %3589 = vmatpush1.bf16.msra.mxu1 %v10087_v6 }
 0xec2   :  { %3549 = vmatprep.subr.bf16.mxu0 %v10088_v62  ;;  %3590 = vmatprep.subr.bf16.mxu1 %v10089_v63 }
 0xec5   :  { %3550 = vmatpush1.bf16.msra.mxu0 %v10090_v31  ;;  %3591 = vmatpush1.bf16.msra.mxu1 %v10091_v26 }
 0xec6   :  { %3551 = vmatprep.subr.bf16.mxu0 %v8452_v18  ;;  %3592 = vmatprep.subr.bf16.mxu1 %v8455_v9 }
 0xec9   :  { %3552 = vmatpush1.bf16.msra.mxu0 %v8458_v59  ;;  %3593 = vmatpush1.bf16.msra.mxu1 %v8461_v24 }
 0xeca   :  { %3553 = vmatprep.subr.bf16.mxu0 %v8464_v45  ;;  %3594 = vmatprep.subr.bf16.mxu1 %v8467_v53 }
 0xecd   :  { %3554 = vmatpush1.bf16.msra.mxu0 %v8554_v40  ;;  %3595 = vmatpush1.bf16.msra.mxu1 %v8557_v27 }
 0xece   :  { %3555 = vmatprep.subr.bf16.mxu0 %v8560_v55  ;;  %3596 = vmatprep.subr.bf16.mxu1 %v8563_v5 }
 0xed1   :  { %3556 = vmatpush1.bf16.msra.mxu0 %v8566_v22  ;;  %3597 = vmatpush1.bf16.msra.mxu1 %v8569_v2 }
 0xed2   :  { %3557 = vmatprep.subr.bf16.mxu0 %v8572_v50  ;;  %3598 = vmatprep.subr.bf16.mxu1 %v8575_v48 }
 0xed5   :  { %3558 = vmatpush1.bf16.msra.mxu0 %v10148_v12  ;;  %3599 = vmatpush1.bf16.msra.mxu1 %v10149_v47 }
 0xed6   :  { %3559 = vmatprep.subr.bf16.mxu0 %v10150_v3  ;;  %3600 = vmatprep.subr.bf16.mxu1 %v10151_v16 }
 0xed9   :  { %3560 = vmatpush1.bf16.msra.mxu0 %v10152_v7  ;;  %3601 = vmatpush1.bf16.msra.mxu1 %v10153_v11  ;;  %v10175_v11 = vld [vmem:[#allocation86_spill] sm:$0xff] }
 0xeda   :  { %3561 = vmatprep.subr.bf16.mxu0 %v10154_v61  ;;  %3602 = vmatprep.subr.bf16.mxu1 %v10155_v49  ;;  %v10174_v61 = vld [vmem:[#allocation85_spill] sm:$0xff] }
 0xedd   :  { %3562 = vmatpush1.bf16.msra.mxu0 %v10156_v21  ;;  %3603 = vmatpush1.bf16.msra.mxu1 %v10157_v54  ;;  %v10172_v54 = vld [vmem:[#allocation82_spill] sm:$0xff]  ;;  %v10173_v21 = vld [vmem:[#allocation84_spill] sm:$0xff] }
 0xede   :  { %3563 = vmatprep.subr.bf16.mxu0 %v10158_v14  ;;  %3604 = vmatprep.subr.bf16.mxu1 %v10159_v35  ;;  %v10169_v14 = vld [vmem:[#allocation95_spill] sm:$0xff]  ;;  %v10170_v35 = vld [vmem:[#allocation100_spill] sm:$0xff] }
 0xee1   :  { %3564 = vmatpush1.bf16.msra.mxu0 %v10160_v51  ;;  %3605 = vmatpush1.bf16.msra.mxu1 %v10161_v58  ;;  %v10171_v51 = vld [vmem:[#allocation101_spill] sm:$0xff] }
 0xee2   :  { %3565 = vmatprep.subr.bf16.mxu0 %v10162_v29  ;;  %3606 = vmatprep.subr.bf16.mxu1 %v10163_v23 }
 0xee5   :  { %3566 = vmatpush1.bf16.msra.mxu0 %v10164_v15  ;;  %3607 = vmatpush1.bf16.msra.mxu1 %v10165_v44 }
 0xee6   :  { %3567 = vmatprep.subr.bf16.mxu0 %v10166_v42  ;;  %3608 = vmatprep.subr.bf16.mxu1 %v10167_v57 }
 0xee9   :  { %3568 = vmatpush1.bf16.msra.mxu0 %v10168_v46  ;;  %3609 = vmatpush1.bf16.msra.mxu1 %v10169_v14 }
 0xeea   :  { %3670 = vmatprep.subr.bf16.mxu0 %v10170_v35  ;;  %3711 = vmatprep.subr.bf16.mxu1 %v10171_v51 }
 0xf7f   :  { %v3438_v58 = vpop.f32.mrb[116].mxu0  ;;  %v3479_v29 = vpop.f32.mrb[116].mxu1 }
 0xf80   :  { %v3502_v23 = vadd.f32 %v10172_v54, %v3438_v58  ;;  %v3504_v15 = vadd.f32 %v10173_v21, %v3479_v29  ;;  %v3440_v49 = vpop.f32.mrb[117].mxu0  ;;  %v3481_v44 = vpop.f32.mrb[117].mxu1 }
 0xf81   :  { %v3503_v42 = vadd.f32 %v10174_v61, %v3440_v49  ;;  %v3505_v57 = vadd.f32 %v10175_v11, %v3481_v44  ;;  %v3442_v7 = vpop.f32.mrb[118].mxu0  ;;  %v3483_v46 = vpop.f32.mrb[118].mxu1 }
 0xf82   :  { %v4912_v16 = vmul.f32 -1.442695, %v3502_v23  ;;  %v3443_v14 = vpop.f32.mrb[119].mxu0  ;;  %v3484_v3 = vpop.f32.mrb[119].mxu1  ;;  %v4914_v51 = vmul.f32 -1.442695, %v3504_v15 }
 0xf83   :  { %v4913_v35 = vmul.f32 -1.442695, %v3503_v42 }
 0xf84   :  { %5653 = vpow2.f32 %v4912_v16 }
 0xf85   :  { %5655 = vpow2.f32 %v4913_v35 }
 0xf86   :  { %5657 = vtanh.f32 %v3505_v57 }
 0xf87   :  { %5659 = vpow2.f32 %v4914_v51 }
 0xf8e   :  { %v5654_v47 = vpop.eup %5653 }
 0xf8f   :  { %v3515_v12 = vadd.f32 1.0, %v5654_v47  ;;  %v5656_v54 = vpop.eup %5655 }
 0xf90   :  { %v3516_v21 = vadd.f32 1.0, %v5656_v54  ;;  %v5658_v61 = vpop.eup %5657 }
 0xf91   :  { %5661 = vrcp.f32 %v3515_v12  ;;  %v5660_v49 = vpop.eup %5659 }
 0xf92   :  { %5663 = vrcp.f32 %v3516_v21  ;;  %v3517_v58 = vadd.f32 1.0, %v5660_v49 }
 0xf94   :  { %5665 = vrcp.f32 %v3517_v58 }
 0xf9b   :  { %v5662_v11 = vpop.eup %5661 }
 0xf9c   :  { %v3526_v7 = vmul.f32 %v5662_v11, %v5658_v61  ;;  %v5664_v46 = vpop.eup %5663 }
 0xf9d   :  { %v3525_v3 = vmul.f32 %v5664_v46, %v8735_v8 }
 0xf9e   :  { %v5666_v47 = vpop.eup %5665 }
 0xf9f   :  { %v8819_v14 = vadd.f32 %v3526_v7, %v3525_v3 }
 0xfa1   :  { %5667 = vtanh.f32 %v8819_v14 }
 0xfab   :  { %v5668_v16 = vpop.eup %5667 }
 0xfac   :  { %v8822_v29 = vmul.f32 %v5668_v16, %v5666_v47  ;;  %v3832_v47 = vld [vmem:[%s9325_s7 + $0x88] sm:$0xff] }
 0xfae   :  { %v4918_v12 = vpack.c.bf16 %v8822_v29, %v8822_v29 }
 0xfb0   :  { %4919 = vmatprep.mubr.msk.bf16.mxu0 %vm6784_vm3, %v4918_v12  ;;  %4927 = vmatprep.mubr.msk.bf16.mxu1 %vm6784_vm3, %v4918_v12 }
 0xfb1   :  { %4922 = vmatmul.mubr.msk.bf16.vlgmr.msra.gmra.mrb[120].mxu0 %vm6794_vm4, %v4918_v12  ;;  %4930 = vmatmul.mubr.msk.bf16.vlgmr.msra.gmra.mrb[120].mxu1 %vm6794_vm4, %v4918_v12  ;;  %v3816_v12 = vld [vmem:[%s9325_s7 + $0x8] sm:$0xff] }
 0xfb2   :  { %3671 = vmatpush1.bf16.msra.mxu0 %v8374_v1  ;;  %3712 = vmatpush1.bf16.msra.mxu1 %v8377_v60  ;;  %v10181_v1 = vld [vmem:[#allocation62_spill] sm:$0xff]  ;;  %v10182_v60 = vld [vmem:[#allocation63_spill] sm:$0xff] }
 0xfb3   :  { %3672 = vmatprep.subr.bf16.mxu0 %v8380_v33  ;;  %3713 = vmatprep.subr.bf16.mxu1 %v8383_v41  ;;  %v10183_v33 = vld [vmem:[#allocation64_spill] sm:$0xff]  ;;  %v10184_v41 = vld [vmem:[#allocation65_spill] sm:$0xff] }
 0xfb6   :  { %3673 = vmatpush1.bf16.msra.mxu0 %v8386_v19  ;;  %3714 = vmatpush1.bf16.msra.mxu1 %v8389_v37  ;;  %v10185_v19 = vld [vmem:[#allocation66_spill] sm:$0xff]  ;;  %v10186_v37 = vld [vmem:[#allocation67_spill] sm:$0xff] }
 0xfb7   :  { %3674 = vmatprep.subr.bf16.mxu0 %v8392_v43  ;;  %3715 = vmatprep.subr.bf16.mxu1 %v8395_v38  ;;  %v10187_v43 = vld [vmem:[#allocation68_spill] sm:$0xff]  ;;  %v10188_v38 = vld [vmem:[#allocation69_spill] sm:$0xff] }
 0xfba   :  { %3675 = vmatpush1.bf16.msra.mxu0 %v8398_v13  ;;  %3716 = vmatpush1.bf16.msra.mxu1 %v8401_v0  ;;  %v10189_v13 = vld [vmem:[#allocation70_spill] sm:$0xff]  ;;  %v10190_v0 = vld [vmem:[#allocation71_spill] sm:$0xff] }
 0xfbb   :  { %3676 = vmatprep.subr.bf16.mxu0 %v8404_v10  ;;  %3717 = vmatprep.subr.bf16.mxu1 %v8407_v20  ;;  %v10191_v10 = vld [vmem:[#allocation72_spill] sm:$0xff]  ;;  %v10192_v20 = vld [vmem:[#allocation73_spill] sm:$0xff] }
 0xfbe   :  { %3677 = vmatpush1.bf16.msra.mxu0 %v8410_v4  ;;  %3718 = vmatpush1.bf16.msra.mxu1 %v8413_v52  ;;  %v10193_v4 = vld [vmem:[#allocation74_spill] sm:$0xff]  ;;  %v10194_v52 = vld [vmem:[#allocation75_spill] sm:$0xff] }
 0xfbf   :  { %3678 = vmatprep.subr.bf16.mxu0 %v8416_v28  ;;  %3719 = vmatprep.subr.bf16.mxu1 %v8419_v32  ;;  %v10195_v28 = vld [vmem:[#allocation76_spill] sm:$0xff]  ;;  %v10196_v32 = vld [vmem:[#allocation77_spill] sm:$0xff] }
 0xfc2   :  { %3679 = vmatpush1.bf16.msra.mxu0 %v8422_v39  ;;  %3720 = vmatpush1.bf16.msra.mxu1 %v8425_v34  ;;  %v10197_v39 = vld [vmem:[#allocation95_spill] sm:$0xff] }
 0xfc3   :  { %3680 = vmatprep.subr.bf16.mxu0 %v8428_v17  ;;  %3721 = vmatprep.subr.bf16.mxu1 %v10085_v56 }
 0xfc6   :  { %3681 = vmatpush1.bf16.msra.mxu0 %v10086_v30  ;;  %3722 = vmatpush1.bf16.msra.mxu1 %v10087_v6  ;;  %v10199_v30 = vld [vmem:[#allocation43_spill] sm:$0xff] }
 0xfc7   :  { %3682 = vmatprep.subr.bf16.mxu0 %v10088_v62  ;;  %3723 = vmatprep.subr.bf16.mxu1 %v10089_v63 }
 0xfca   :  { %3683 = vmatpush1.bf16.msra.mxu0 %v10090_v31  ;;  %3724 = vmatpush1.bf16.msra.mxu1 %v10091_v26  ;;  %v10200_v31 = vld [vmem:[#allocation44_spill] sm:$0xff] }
 0xfcb   :  { %3684 = vmatprep.subr.bf16.mxu0 %v8452_v18  ;;  %3725 = vmatprep.subr.bf16.mxu1 %v8455_v9  ;;  %v10179_v9 = vld [vmem:[#allocation60_spill] sm:$0xff]  ;;  %v10180_v18 = vld [vmem:[#allocation61_spill] sm:$0xff] }
 0xfce   :  { %3685 = vmatpush1.bf16.msra.mxu0 %v8458_v59  ;;  %3726 = vmatpush1.bf16.msra.mxu1 %v8461_v24  ;;  %v10176_v24 = vld [vmem:[#allocation57_spill] sm:$0xff]  ;;  %v10178_v59 = vld [vmem:[#allocation59_spill] sm:$0xff] }
 0xfcf   :  { %3686 = vmatprep.subr.bf16.mxu0 %v8464_v45  ;;  %3727 = vmatprep.subr.bf16.mxu1 %v8467_v53  ;;  %v10177_v45 = vld [vmem:[#allocation58_spill] sm:$0xff] }
 0xfd0   :  { %v10198_v53 = vld [vmem:[#allocation42_spill] sm:$0xff] }
 0xfd2   :  { %3687 = vmatpush1.bf16.msra.mxu0 %v8554_v40  ;;  %3728 = vmatpush1.bf16.msra.mxu1 %v8557_v27  ;;  %v10201_v40 = vld [vmem:[#allocation45_spill] sm:$0xff] }
 0xfd3   :  { %3688 = vmatprep.subr.bf16.mxu0 %v8560_v55  ;;  %3729 = vmatprep.subr.bf16.mxu1 %v8563_v5 }
 0xfd6   :  { %3689 = vmatpush1.bf16.msra.mxu0 %v8566_v22  ;;  %3730 = vmatpush1.bf16.msra.mxu1 %v8569_v2 }
 0xfd7   :  { %3690 = vmatprep.subr.bf16.mxu0 %v8572_v50  ;;  %3731 = vmatprep.subr.bf16.mxu1 %v8575_v48 }
 0xfda   :  { %3691 = vmatpush1.bf16.msra.mxu0 %v10176_v24  ;;  %3732 = vmatpush1.bf16.msra.mxu1 %v10177_v45  ;;  %v5140_v24 = vpack.c.bf16 %v3816_v12, %v3815_v25  ;;  %v3834_v45 = vld [vmem:[%s9325_s7 + $0x98] sm:$0xff] }
 0xfdb   :  { %3692 = vmatprep.subr.bf16.mxu0 %v10178_v59  ;;  %3733 = vmatprep.subr.bf16.mxu1 %v10179_v9  ;;  %v5142_v59 = vpack.c.bf16 %v3834_v45, %v3833_v36  ;;  %v3817_v9 = vld [vmem:[%s9325_s7 + $0x10] sm:$0xff] }
 0xfde   :  { %3693 = vmatpush1.bf16.msra.mxu0 %v10180_v18  ;;  %3734 = vmatpush1.bf16.msra.mxu1 %v10181_v1  ;;  %v3818_v18 = vld [vmem:[%s9325_s7 + $0x18] sm:$0xff] }
 0xfdf   :  { %3694 = vmatprep.subr.bf16.mxu0 %v10182_v60  ;;  %3735 = vmatprep.subr.bf16.mxu1 %v10183_v33  ;;  %v5144_v1 = vpack.c.bf16 %v3818_v18, %v3817_v9  ;;  %v3835_v60 = vld [vmem:[%s9325_s7 + $0xa0] sm:$0xff]  ;;  %v3836_v33 = vld [vmem:[%s9325_s7 + $0xa8] sm:$0xff] }
 0xfe2   :  { %3695 = vmatpush1.bf16.msra.mxu0 %v10184_v41  ;;  %3736 = vmatpush1.bf16.msra.mxu1 %v10185_v19  ;;  %v5146_v41 = vpack.c.bf16 %v3836_v33, %v3835_v60  ;;  %v3819_v19 = vld [vmem:[%s9325_s7 + $0x20] sm:$0xff] }
 0xfe3   :  { %3696 = vmatprep.subr.bf16.mxu0 %v10186_v37  ;;  %3737 = vmatprep.subr.bf16.mxu1 %v10187_v43  ;;  %v3820_v37 = vld [vmem:[%s9325_s7 + $0x28] sm:$0xff] }
 0xfe4   :  { %v5148_v43 = vpack.c.bf16 %v3820_v37, %v3819_v19 }
 0xfe6   :  { %3697 = vmatpush1.bf16.msra.mxu0 %v10188_v38  ;;  %3738 = vmatpush1.bf16.msra.mxu1 %v10189_v13  ;;  %v3837_v38 = vld [vmem:[%s9325_s7 + $0xb0] sm:$0xff]  ;;  %v3838_v13 = vld [vmem:[%s9325_s7 + $0xb8] sm:$0xff] }
 0xfe7   :  { %3698 = vmatprep.subr.bf16.mxu0 %v10190_v0  ;;  %3739 = vmatprep.subr.bf16.mxu1 %v10191_v10  ;;  %v5150_v0 = vpack.c.bf16 %v3838_v13, %v3837_v38  ;;  %v3821_v10 = vld [vmem:[%s9325_s7 + $0x30] sm:$0xff] }
 0xfea   :  { %3699 = vmatpush1.bf16.msra.mxu0 %v10192_v20  ;;  %3740 = vmatpush1.bf16.msra.mxu1 %v10193_v4  ;;  %v3822_v20 = vld [vmem:[%s9325_s7 + $0x38] sm:$0xff] }
 0xfeb   :  { %3700 = vmatprep.subr.bf16.mxu0 %v10194_v52  ;;  %3741 = vmatprep.subr.bf16.mxu1 %v10195_v28  ;;  %v5152_v4 = vpack.c.bf16 %v3822_v20, %v3821_v10  ;;  %v3839_v52 = vld [vmem:[%s9325_s7 + $0xc0] sm:$0xff]  ;;  %v3840_v28 = vld [vmem:[%s9325_s7 + $0xc8] sm:$0xff] }
 0xfee   :  { %3701 = vmatpush1.bf16.msra.mxu0 %v10196_v32  ;;  %3742 = vmatpush1.bf16.msra.mxu1 %v10197_v39  ;;  %v5154_v32 = vpack.c.bf16 %v3840_v28, %v3839_v52  ;;  %v3823_v39 = vld [vmem:[%s9325_s7 + $0x40] sm:$0xff]  ;;  %v10208_v28 = vld [vmem:[#allocation97_spill] sm:$0xff] }
 0xfef   :  { %v10207_v52 = vld [vmem:[#allocation48_spill] sm:$0xff] }
0x1084   :  { %v3571_v34 = vpop.f32.mrb[120].mxu0  ;;  %v3612_v17 = vpop.f32.mrb[120].mxu1 }
0x1085   :  { %v3635_v56 = vadd.f32 %v10198_v53, %v3571_v34  ;;  %v3637_v6 = vadd.f32 %v10199_v30, %v3612_v17  ;;  %v3573_v62 = vpop.f32.mrb[121].mxu0  ;;  %v3614_v63 = vpop.f32.mrb[121].mxu1  ;;  %v3824_v34 = vld [vmem:[%s9325_s7 + $0x48] sm:$0xff]  ;;  %v3841_v53 = vld [vmem:[%s9325_s7 + $0xd0] sm:$0xff] }
0x1086   :  { %v3636_v26 = vadd.f32 %v10200_v31, %v3573_v62  ;;  %v3638_v27 = vadd.f32 %v10201_v40, %v3614_v63  ;;  %v3575_v55 = vpop.f32.mrb[122].mxu0  ;;  %v3616_v5 = vpop.f32.mrb[122].mxu1  ;;  %v5156_v17 = vpack.c.bf16 %v3824_v34, %v3823_v39  ;;  %v3825_v30 = vld [vmem:[%s9325_s7 + $0x50] sm:$0xff]  ;;  %v3826_v62 = vld [vmem:[%s9325_s7 + $0x58] sm:$0xff]  ;;  %v3843_v63 = vld [vmem:[%s9325_s7 + $0xe0] sm:$0xff] }
0x1087   :  { %v4931_v22 = vmul.f32 -1.442695, %v3635_v56  ;;  %v3576_v2 = vpop.f32.mrb[123].mxu0  ;;  %v3617_v50 = vpop.f32.mrb[123].mxu1  ;;  %v4933_v8 = vmul.f32 -1.442695, %v3637_v6 }
0x1088   :  { %v4932_v48 = vmul.f32 -1.442695, %v3636_v26  ;;  %v3842_v56 = vld [vmem:[%s9325_s7 + $0xd8] sm:$0xff]  ;;  %v3844_v31 = vld [vmem:[%s9325_s7 + $0xe8] sm:$0xff]  ;;  %v5160_v26 = vpack.c.bf16 %v3826_v62, %v3825_v30  ;;  %v3845_v5 = vld [vmem:[%s9325_s7 + $0xf0] sm:$0xff] }
0x1089   :  { %5669 = vpow2.f32 %v4931_v22  ;;  %v5158_v6 = vpack.c.bf16 %v3842_v56, %v3841_v53  ;;  %v5162_v40 = vpack.c.bf16 %v3844_v31, %v3843_v63  ;;  %v3828_v55 = vld [vmem:[%s9325_s7 + $0x68] sm:$0xff]  ;;  %v3846_v22 = vld [vmem:[%s9325_s7 + $0xf8] sm:$0xff]  ;;  %v10209_v39 = vld [vmem:[#allocation56_spill] sm:$0xff]  ;;  %v2999_v56 = vrot.slane %v10207_v52, 4 }
0x108a   :  { %5671 = vpow2.f32 %v4932_v48  ;;  %v5166_v50 = vpack.c.bf16 %v3846_v22, %v3845_v5  ;;  %v3829_v48 = vld [vmem:[%s9325_s7 + $0x70] sm:$0xff]  ;;  %v10210_v34 = vld [vmem:[#allocation96_spill] sm:$0xff]  ;;  %v3132_v53 = vrot.slane %v10209_v39, 4 }
0x108b   :  { %5673 = vtanh.f32 %v3638_v27  ;;  %v3827_v27 = vld [vmem:[%s9325_s7 + $0x60] sm:$0xff]  ;;  %v10211_v5 = vld [vmem:[#allocation78_spill] sm:$0xff] }
0x108c   :  { %5675 = vpow2.f32 %v4933_v8  ;;  %v5164_v2 = vpack.c.bf16 %v3828_v55, %v3827_v27  ;;  %v3830_v8 = vld [vmem:[%s9325_s7 + $0x78] sm:$0xff]  ;;  %v3955_v22 = vadd.s32 32, %v10211_v5 }
0x1093   :  { %v5670_v23 = vpop.eup %5669 }
0x1094   :  { %v3648_v15 = vadd.f32 1.0, %v5670_v23  ;;  %v5672_v44 = vpop.eup %5671  ;;  %v5168_v23 = vpack.c.bf16 %v3830_v8, %v3829_v48  ;;  %v3952_v48 = vadd.s32 8, %v10211_v5 }
0x1095   :  { %v3649_v42 = vadd.f32 1.0, %v5672_v44  ;;  %v5674_v57 = vpop.eup %5673 }
0x1096   :  { %5677 = vrcp.f32 %v3648_v15  ;;  %v5676_v35 = vpop.eup %5675 }
0x1097   :  { %5679 = vrcp.f32 %v3649_v42  ;;  %v3650_v61 = vadd.f32 1.0, %v5676_v35  ;;  %v10202_v42 = vld [vmem:[#allocation38_spill] sm:$0xff]  ;;  %v10203_v35 = vld [vmem:[#allocation39_spill] sm:$0xff] }
0x1099   :  { %5681 = vrcp.f32 %v3650_v61  ;;  %v10204_v61 = vld [vmem:[#allocation40_spill] sm:$0xff] }
0x10a0   :  { %v5678_v51 = vpop.eup %5677 }
0x10a1   :  { %v3659_v54 = vmul.f32 %v5678_v51, %v5674_v57  ;;  %v5680_v21 = vpop.eup %5679 }
0x10a2   :  { %v3658_v49 = vmul.f32 %v5680_v21, %v8819_v14  ;;  %v3831_v14 = vld [vmem:[%s9325_s7 + $0x80] sm:$0xff] }
0x10a3   :  { %v5682_v7 = vpop.eup %5681  ;;  %v5138_v16 = vpack.c.bf16 %v3832_v47, %v3831_v14 }
0x10a4   :  { %v8901_v11 = vadd.f32 %v3659_v54, %v3658_v49 }
0x10a5   :  { %5139 = vmatprep.subr.bf16.mxu0 %v5138_v16 }
0x10a6   :  { %5683 = vtanh.f32 %v8901_v11 }
0x10b0   :  { %v5684_v46 = vpop.eup %5683 }
0x10b1   :  { %v8904_v58 = vmul.f32 %v5684_v46, %v5682_v7  ;;  %v10205_v7 = vld [vmem:[#allocation41_spill] sm:$0xff] }
0x10b3   :  { %v4937_v3 = vpack.c.bf16 %v8904_v58, %v8904_v58  ;;  %v3664_v20 = vrot.slane %v8904_v58, 4 }
0x10b5   :  { %4938 = vmatprep.mubr.msk.bf16.mxu0 %vm6784_vm3, %v4937_v3  ;;  %4946 = vmatprep.mubr.msk.bf16.mxu1 %vm6784_vm3, %v4937_v3 }
0x10b6   :  { %4941 = vmatmul.mubr.msk.bf16.vlgmr.msra.gmra.mrb[124].mxu0 %vm6794_vm4, %v4937_v3  ;;  %4949 = vmatmul.mubr.msk.bf16.vlgmr.msra.gmra.mrb[124].mxu1 %vm6794_vm4, %v4937_v3 }
0x10b7   :  { %5141 = vmatpush3.bf16.msra.mxu0 %v5140_v24 }
0x10b8   :  { %5143 = vmatprep.subr.bf16.mxu0 %v5142_v59 }
0x10bb   :  { %5145 = vmatpush3.bf16.msra.mxu0 %v5144_v1 }
0x10bc   :  { %5147 = vmatprep.subr.bf16.mxu0 %v5146_v41 }
0x10bf   :  { %5149 = vmatpush3.bf16.msra.mxu0 %v5148_v43 }
0x10c0   :  { %5151 = vmatprep.subr.bf16.mxu0 %v5150_v0 }
0x10c3   :  { %5153 = vmatpush3.bf16.msra.mxu0 %v5152_v4  ;;  %v10206_v4 = vld [vmem:[#allocation46_spill] sm:$0xff] }
0x10c4   :  { %5155 = vmatprep.subr.bf16.mxu0 %v5154_v32  ;;  %v3398_v32 = vrot.slane %v10208_v28, 4  ;;  %v2866_v30 = vrot.slane %v10206_v4, 4 }
0x10c7   :  { %5157 = vmatpush3.bf16.msra.mxu0 %v5156_v17  ;;  %v3265_v17 = vrot.slane %v10210_v34, 4 }
0x10c8   :  { %5159 = vmatprep.subr.bf16.mxu0 %v5158_v6 }
0x10cb   :  { %5161 = vmatpush3.bf16.msra.mxu0 %v5160_v26 }
0x10cc   :  { %5163 = vmatprep.subr.bf16.mxu0 %v5162_v40 }
0x10cf   :  { %5165 = vmatpush3.bf16.msra.mxu0 %v5164_v2 }
0x10d0   :  { %5167 = vmatprep.subr.bf16.mxu0 %v5166_v50  ;;  %v3963_v50 = vand.u32 7, %v10211_v5 }
0x10d2   :  { %vm9063_vm5 = vcmp.lt.s32.totalorder %v3963_v50, 2 }
0x10d3   :  { %5169 = vmatpush3.bf16.msra.mxu0 %v5168_v23  ;;  %v3956_v23 = vadd.s32 40, %v10211_v5 }
0x1189   :  { %v3704_v15 = vpop.f32.mrb[124].mxu0  ;;  %v3745_v44 = vpop.f32.mrb[124].mxu1 }
0x118a   :  { %v3768_v57 = vadd.f32 %v10202_v42, %v3704_v15  ;;  %v3770_v51 = vadd.f32 %v10203_v35, %v3745_v44  ;;  %v3706_v54 = vpop.f32.mrb[125].mxu0  ;;  %v3747_v21 = vpop.f32.mrb[125].mxu1  ;;  %v3991_v44 = vand.u32 7, %v3955_v22  ;;  %v3970_v35 = vand.u32 7, %v3952_v48  ;;  %v4372_v22 = vld [vmem:[#allocation10 + $0xa8] sm:$0xff] }
0x118b   :  { %v3769_v49 = vadd.f32 %v10204_v61, %v3706_v54  ;;  %v3771_v46 = vadd.f32 %v10205_v7, %v3747_v21  ;;  %v3708_v3 = vpop.f32.mrb[126].mxu0  ;;  %v3749_v14 = vpop.f32.mrb[126].mxu1  ;;  %v3998_v21 = vand.u32 7, %v3956_v23  ;;  %v3957_v7 = vadd.s32 48, %v10211_v5 }
0x118c   :  { %v4950_v47 = vmul.f32 -1.442695, %v3768_v57  ;;  %v3709_v16 = vpop.f32.mrb[127].mxu0  ;;  %v3750_v25 = vpop.f32.mrb[127].mxu1  ;;  %v4952_v24 = vmul.f32 -1.442695, %v3770_v51 }
0x118d   :  { %v4951_v12 = vmul.f32 -1.442695, %v3769_v49  ;;  %v3953_v51 = vadd.s32 16, %v10211_v5  ;;  %vm9068_vm6 = vcmp.lt.s32.totalorder %v3991_v44, 2  ;;  %vm9078_vm8 = vcmp.lt.s32.totalorder %v3970_v35, 2  ;;  %v4370_v57 = vld [vmem:[#allocation10 + $0x98] sm:$0xff] }
0x118e   :  { %5685 = vpow2.f32 %v4950_v47  ;;  %v3954_v16 = vadd.s32 24, %v10211_v5  ;;  %vm9086_vm9 = vcmp.lt.s32.totalorder %v3998_v21, 2  ;;  %vm5188_vm0 = vmpackc.low %vm9078_vm8, %vm9063_vm5 }
0x118f   :  { %5687 = vpow2.f32 %v4951_v12  ;;  %v3977_v47 = vand.u32 7, %v3953_v51  ;;  %vm5196_vm3 = vmpackc.low %vm9086_vm9, %vm9068_vm6 }
0x1190   :  { %5689 = vtanh.f32 %v3771_v46 }
0x1191   :  { %5691 = vpow2.f32 %v4952_v24  ;;  %vm9096_vm10 = vcmp.lt.s32.totalorder %v3977_v47, 2  ;;  %v4353_v24 = vld [vmem:[#allocation10 + $0x10] sm:$0xff] }
0x1198   :  { %v5686_v36 = vpop.eup %5685 }
0x1199   :  { %v3781_v45 = vadd.f32 1.0, %v5686_v36  ;;  %v5688_v59 = vpop.eup %5687 }
0x119a   :  { %v3782_v9 = vadd.f32 1.0, %v5688_v59  ;;  %v5690_v18 = vpop.eup %5689 }
0x119b   :  { %5693 = vrcp.f32 %v3781_v45  ;;  %v5692_v1 = vpop.eup %5691 }
0x119c   :  { %5695 = vrcp.f32 %v3782_v9  ;;  %v3783_v19 = vadd.f32 1.0, %v5692_v1  ;;  %v4005_v9 = vand.u32 7, %v3957_v7 }
0x119e   :  { %5697 = vrcp.f32 %v3783_v19  ;;  %v3984_v19 = vand.u32 7, %v3954_v16  ;;  %vm9104_vm11 = vcmp.lt.s32.totalorder %v4005_v9, 2 }
0x11a0   :  { %vm9111_vm12 = vcmp.lt.s32.totalorder %v3984_v19, 2 }
0x11a1   :  { %vm5192_vm2 = vmpackc.low %vm9111_vm12, %vm9096_vm10 }
0x11a5   :  { %v5694_v60 = vpop.eup %5693 }
0x11a6   :  { %v3792_v33 = vmul.f32 %v5694_v60, %v5690_v18  ;;  %v5696_v41 = vpop.eup %5695  ;;  %v3958_v18 = vadd.s32 56, %v10211_v5 }
0x11a7   :  { %v3791_v37 = vmul.f32 %v5696_v41, %v8901_v11  ;;  %v3531_v11 = vrot.slane %v8822_v29, 4  ;;  %v4354_v41 = vld [vmem:[#allocation10 + $0x18] sm:$0xff] }
0x11a8   :  { %v5698_v38 = vpop.eup %5697  ;;  %v5208_v35 = vpack.c.bf16 %v4354_v41, %v4353_v24 }
0x11a9   :  { %v3793_v43 = vadd.f32 %v3792_v33, %v3791_v37 }
0x11ab   :  { %5699 = vtanh.f32 %v3793_v43 }
0x11b5   :  { %v5700_v13 = vpop.eup %5699 }
0x11b6   :  { %v9017_v0 = vmul.f32 %v5700_v13, %v5698_v38 }
0x11b8   :  { %v3797_v10 = vrot.slane %v9017_v0, 4 }
0x11ba   :  { %3911 = vmatprep.mubr.f32.mxu0 %v3797_v10 }
0x11bb   :  { %3912 = vmatmul.mubr.f32.vlgmr.msra.gmra.mrb[128].mxu0 %v10206_v4 }
0x11bc   :  { %3916 = vmatprep.mubr.f32.mxu0 %v3664_v20 }
0x11bf   :  { %3917 = vmatmul.mubr.f32.gmra.mrb[130].mxu0 %v10207_v52 }
0x11c0   :  { %3921 = vmatprep.mubr.f32.mxu0 %v3531_v11 }
0x11c3   :  { %3922 = vmatmul.mubr.f32.gmra.mrb[132].mxu0 %v10209_v39 }
0x11c4   :  { %3926 = vmatprep.mubr.f32.mxu0 %v3398_v32 }
0x11c7   :  { %3927 = vmatmul.mubr.f32.gmra.mrb[134].mxu0 %v10210_v34 }
0x11c8   :  { %3931 = vmatprep.mubr.f32.mxu0 %v3265_v17 }
0x11cb   :  { %3932 = vmatmul.mubr.f32.gmra.mrb[136].mxu0 %v10208_v28 }
0x11cc   :  { %3936 = vmatprep.mubr.f32.mxu0 %v3132_v53 }
0x11cf   :  { %3937 = vmatmul.mubr.f32.gmra.mrb[138].mxu0 %v8822_v29 }
0x11d0   :  { %3941 = vmatprep.mubr.f32.mxu0 %v2999_v56 }
0x11d3   :  { %3942 = vmatmul.mubr.f32.gmra.mrb[140].mxu0 %v8904_v58 }
0x11d4   :  { %3946 = vmatprep.mubr.f32.mxu0 %v2866_v30 }
0x11d7   :  { %3947 = vmatmul.mubr.f32.gmra.mrb[142].mxu0 %v9017_v0 }
0x128e   :  { %v4999_v6 = vpop.f32.mrb[128].mxu0 }
0x128f   :  { %v5000_v62 = vpop.f32.mrb[129].mxu0 }
0x1290   :  { %v9051_v63 = vadd.f32 %v5000_v62, %v4999_v6  ;;  %v4371_v62 = vld [vmem:[#allocation10 + $0xa0] sm:$0xff] }
0x1292   :  { %v5002_v31 = vpop.f32.mrb[130].mxu0  ;;  %v4063_v46 = vsel %vm9063_vm5, %v9051_v63, -1e+30 }
0x1293   :  { %v5003_v26 = vpop.f32.mrb[131].mxu0  ;;  %v4072_v36 = vsel %vm4071_vm7, %v4063_v46, -inf }
0x1294   :  { %v9053_v40 = vadd.f32 %v5003_v26, %v5002_v31  ;;  %v4012_v31 = vand.u32 7, %v3958_v18 }
0x1296   :  { %v5005_v27 = vpop.f32.mrb[132].mxu0  ;;  %v4064_v1 = vsel %vm9078_vm8, %v9053_v40, -1e+30  ;;  %vm9119_vm13 = vcmp.lt.s32.totalorder %v4012_v31, 2 }
0x1297   :  { %v5006_v55 = vpop.f32.mrb[133].mxu0  ;;  %v4073_v38 = vsel %vm4071_vm7, %v4064_v1, -inf  ;;  %vm5200_vm4 = vmpackc.low %vm9119_vm13, %vm9104_vm11 }
0x1298   :  { %v9056_v2 = vadd.f32 %v5006_v55, %v5005_v27 }
0x129a   :  { %v5008_v8 = vpop.f32.mrb[134].mxu0  ;;  %v4065_v26 = vsel %vm9096_vm10, %v9056_v2, -1e+30 }
0x129b   :  { %v5009_v15 = vpop.f32.mrb[135].mxu0  ;;  %v4074_v23 = vsel %vm4071_vm7, %v4065_v26, -inf }
0x129c   :  { %v9061_v42 = vadd.f32 %v5009_v15, %v5008_v8 }
0x129e   :  { %v5011_v54 = vpop.f32.mrb[136].mxu0  ;;  %v4066_v51 = vsel %vm9111_vm12, %v9061_v42, -1e+30 }
0x129f   :  { %v5012_v61 = vpop.f32.mrb[137].mxu0  ;;  %v4075_v7 = vsel %vm4071_vm7, %v4066_v51, -inf }
0x12a0   :  { %v9076_v3 = vadd.f32 %v5012_v61, %v5011_v54 }
0x12a2   :  { %v4067_v25 = vsel %vm9068_vm6, %v9076_v3, -1e+30  ;;  %v5014_v12 = vpop.f32.mrb[138].mxu0 }
0x12a3   :  { %v4076_v45 = vsel %vm4071_vm7, %v4067_v25, -inf  ;;  %v5015_v59 = vpop.f32.mrb[139].mxu0 }
0x12a4   :  { %v4077_v60 = vmax.f32 %v4072_v36, %v4076_v45  ;;  %v5016_v33 = vadd.f32 %v5015_v59, %v5014_v12 }
0x12a6   :  { %v4068_v37 = vsel %vm9086_vm9, %v5016_v33, -1e+30  ;;  %v5017_v43 = vpop.f32.mrb[140].mxu0 }
0x12a7   :  { %v4078_v13 = vsel %vm4071_vm7, %v4068_v37, -inf  ;;  %v5018_v6 = vpop.f32.mrb[141].mxu0 }
0x12a8   :  { %v4079_v27 = vmax.f32 %v4073_v38, %v4078_v13  ;;  %v5019_v55 = vadd.f32 %v5018_v6, %v5017_v43 }
0x12aa   :  { %v4084_v50 = vmax.f32 %v4077_v60, %v4079_v27  ;;  %v4069_v48 = vsel %vm9104_vm11, %v5019_v55, -1e+30  ;;  %v5020_v8 = vpop.f32.mrb[142].mxu0 }
0x12ab   :  { %v4080_v15 = vsel %vm4071_vm7, %v4069_v48, -inf  ;;  %v5021_v44 = vpop.f32.mrb[143].mxu0 }
0x12ac   :  { %v4081_v54 = vmax.f32 %v4074_v23, %v4080_v15  ;;  %v5022_v21 = vadd.f32 %v5021_v44, %v5020_v8 }
0x12ae   :  { %v4070_v61 = vsel %vm9119_vm13, %v5022_v21, -1e+30 }
0x12af   :  { %v4082_v46 = vsel %vm4071_vm7, %v4070_v61, -inf }
0x12b0   :  { %v4083_v47 = vmax.f32 %v4075_v7, %v4082_v46 }
0x12b2   :  { %v4085_v16 = vmax.f32 %v4081_v54, %v4083_v47 }
0x12b4   :  { %v4086_v25 = vmax.f32 %v4084_v50, %v4085_v16 }
0x12b6   :  { %v4087_v12 = vrot.slane %v4086_v25, 4 }
0x12b8   :  { %v4088_v36 = vmax.f32 %v4086_v25, %v4087_v12 }
0x12ba   :  { %v4089_v45 = vrot.slane %v4088_v36, 2 }
0x12bc   :  { %v4090_v59 = vmax.f32 %v4088_v36, %v4089_v45 }
0x12be   :  { %v4091_v9 = vrot.slane %v4090_v59, 1 }
0x12c0   :  { %v4092_v18 = vmax.f32 %v4090_v59, %v4091_v9  ;;  %v5853_v59 = vmov 0.0  }
0x12c1   :  { %4265 = vmatprep.mubr.f32.mxu1 %v5853_v59 }
0x12c2   :  { %v4100_v1 = vsub.f32 %v5022_v21, %v4092_v18  ;;  %v4095_v60 = vsub.f32 %v9056_v2, %v4092_v18  ;;  %v4093_v19 = vsub.f32 %v9051_v63, %v4092_v18  ;;  %v4096_v37 = vsub.f32 %v9061_v42, %v4092_v18 }
0x12c3   :  { %v4094_v43 = vsub.f32 %v9053_v40, %v4092_v18  ;;  %v4098_v38 = vsub.f32 %v5016_v33, %v4092_v18  ;;  %v4097_v13 = vsub.f32 %v9076_v3, %v4092_v18  ;;  %v4099_v6 = vsub.f32 %v5019_v55, %v4092_v18 }
0x12c4   :  { %v4115_v31 = vmul.f32 1.442695, %v4100_v1  ;;  %v4105_v26 = vmul.f32 1.442695, %v4095_v60  ;;  %v4101_v27 = vmul.f32 1.442695, %v4093_v19 }
0x12c5   :  { %v4107_v50 = vmul.f32 1.442695, %v4096_v37  ;;  %v4103_v48 = vmul.f32 1.442695, %v4094_v43  ;;  %v4111_v8 = vmul.f32 1.442695, %v4098_v38 }
0x12c6   :  { %5701 = vpow2.f32 %v4115_v31  ;;  %v4109_v2 = vmul.f32 1.442695, %v4097_v13  ;;  %v4113_v63 = vmul.f32 1.442695, %v4099_v6 }
0x12c7   :  { %5703 = vpow2.f32 %v4105_v26 }
0x12c8   :  { %5705 = vpow2.f32 %v4101_v27 }
0x12c9   :  { %5707 = vpow2.f32 %v4107_v50 }
0x12ca   :  { %5709 = vpow2.f32 %v4103_v48 }
0x12cb   :  { %5711 = vpow2.f32 %v4111_v8 }
0x12cc   :  { %5713 = vpow2.f32 %v4109_v2 }
0x12cd   :  { %5715 = vpow2.f32 %v4113_v63 }
0x12d0   :  { %v9135_v40 = vpop.eup %5701 }
0x12d1   :  { %v9137_v42 = vpop.eup %5703  ;;  %v4124_v36 = vsel %vm9119_vm13, %v9135_v40, 0.0 }
0x12d2   :  { %v9139_v3 = vpop.eup %5705  ;;  %v4119_v33 = vsel %vm9096_vm10, %v9137_v42, 0.0 }
0x12d3   :  { %v9144_v55 = vpop.eup %5707  ;;  %4153 = vperm.xlu1 %5572, %v4119_v33   ;;  %v4117_v23 = vsel %vm9063_vm5, %v9139_v3, 0.0 }
0x12d4   :  { %v9149_v15 = vpop.eup %5709  ;;  %4143 = vperm.xlu0 %5571, %v4117_v23   ;;  %v5191_v44 = vpack.c.bf16 %v9144_v55, %v9137_v42  ;;  %v4120_v61 = vsel %vm9111_vm12, %v9144_v55, 0.0  ;;  %v4355_v42 = vld [vmem:[#allocation10 + $0x20] sm:$0xff]  ;;  %v4373_v55 = vld [vmem:[#allocation10 + $0xb0] sm:$0xff] }
0x12d5   :  { %v9153_v51 = vpop.eup %5711  ;;  %v5187_v54 = vpack.c.bf16 %v9149_v15, %v9139_v3  ;;  %v4118_v46 = vsel %vm9078_vm8, %v9149_v15, 0.0  ;;  %v4356_v3 = vld [vmem:[#allocation10 + $0x28] sm:$0xff]  ;;  %v4374_v15 = vld [vmem:[#allocation10 + $0xb8] sm:$0xff] }
0x12d6   :  { %v9157_v21 = vpop.eup %5713  ;;  %v4122_v25 = vsel %vm9086_vm9, %v9153_v51, 0.0 }
0x12d7   :  { %v9162_v7 = vpop.eup %5715  ;;  %4158 = vperm.xlu1 %5572, %v4120_v61   ;;  %v5195_v47 = vpack.c.bf16 %v9153_v51, %v9157_v21  ;;  %v4121_v12 = vsel %vm9068_vm6, %v9157_v21, 0.0  ;;  %v5214_v51 = vpack.c.bf16 %v4374_v15, %v4373_v55  ;;  %v4358_v21 = vld [vmem:[#allocation10 + $0x38] sm:$0xff]  ;;  %vm4556_vm6 = vcmask 15360  }
0x12d8   :  { %4148 = vperm.xlu0 %5571, %v4118_v46   ;;  %v5199_v16 = vpack.c.bf16 %v9135_v40, %v9162_v7  ;;  %v4123_v45 = vsel %vm9104_vm11, %v9162_v7, 0.0  ;;  %v5210_v40 = vpack.c.bf16 %v4372_v22, %v4371_v62  ;;  %v4375_v7 = vld [vmem:[#allocation10 + $0xc0] sm:$0xff] }
0x12d9   :  { %v4475_v22 = vld [vmem:[%s9328_s10 + $0x60] sm:$0xff] }
0x12db   :  { %4168 = vperm.xlu1 %5572, %v4122_v25  }
0x12dc   :  { %4163 = vperm.xlu0 %5571, %v4121_v12  }
0x12df   :  { %4178 = vperm.xlu1 %5572, %v4124_v36  }
0x12e0   :  { %4173 = vperm.xlu0 %5571, %v4123_v45  }
0x1352   :  { %v4154_v9 = vpop.permute.xlu1 %4153 }
0x1353   :  { %v4144_v18 = vpop.permute.xlu0 %4143  ;;  %v4186_v6 = vmul.f32 %v4154_v9, %v3531_v11  ;;  %v4185_v2 = vmul.f32 %v4154_v9, %v10209_v39  ;;  %v10228_v11 = vlaneseq  ;;  %v4359_v9 = vld [vmem:[#allocation10 + $0x40] sm:$0xff] }
0x1354   :  { %v4181_v60 = vmul.f32 %v4144_v18, %v10206_v4  ;;  %v4182_v37 = vmul.f32 %v4144_v18, %v3797_v10  ;;  %v4360_v18 = vld [vmem:[#allocation10 + $0x48] sm:$0xff] }
0x1355   :  { %v4126_v63 = vand.u32 127, %v10228_v11  ;;  %v4381_v11 = vld [vmem:[#allocation10 + $0xf0] sm:$0xff] }
0x1356   :  { %v4159_v1 = vpop.permute.xlu1 %4158 }
0x1357   :  { %v4149_v19 = vpop.permute.xlu0 %4148  ;;  %v4188_v43 = vmul.f32 %v4159_v1, %v3398_v32  ;;  %v4187_v50 = vmul.f32 %v4159_v1, %v10210_v34  ;;  %v4131_v39 = vand.u32 7, %v4126_v63  ;;  %v5220_v1 = vpack.c.bf16 %v4360_v18, %v4359_v9  ;;  %v4382_v63 = vld [vmem:[#allocation10 + $0xf8] sm:$0xff] }
0x1358   :  { %v4183_v38 = vmul.f32 %v4149_v19, %v10207_v52  ;;  %v4184_v13 = vmul.f32 %v4149_v19, %v3664_v20  ;;  %v5854_v52 = vmov 0.0|0.0  }
0x1359   :  { %v5174_v8 = vpack.c.bf16 %v4188_v43, %v4186_v6  ;;  %v5176_v33 = vpack.c.bf16 %v4187_v50, %v4185_v2  ;;  %vm4139_vm14 = vcmp.eq.s32.totalorder %v4131_v39, %v10211_v5  ;;  %v4369_v5 = vld [vmem:[#allocation10 + $0x90] sm:$0xff]  ;;  %v4378_v6 = vld [vmem:[#allocation10 + $0xd8] sm:$0xff]  ;;  %v4364_v2 = vld [vmem:[#allocation10 + $0x68] sm:$0xff] }
0x135a   :  { %v5170_v31 = vpack.c.bf16 %v4184_v13, %v4182_v37  ;;  %v5172_v26 = vpack.c.bf16 %v4183_v38, %v4181_v60  ;;  %v4169_v27 = vpop.permute.xlu1 %4168  ;;  %v4140_v4 = vsel %vm4139_vm14, 1.0, %v5853_v59  ;;  %v5206_v14 = vpack.c.bf16 %v4370_v57, %v4369_v5  ;;  %v4377_v13 = vld [vmem:[#allocation10 + $0xd0] sm:$0xff]  ;;  %v4474_v57 = vld [vmem:[%s9328_s10 + $0x58] sm:$0xff] }
0x135b   :  { %v4164_v48 = vpop.permute.xlu0 %4163  ;;  %v4192_v10 = vmul.f32 %v4169_v27, %v3132_v53  ;;  %v4191_v23 = vmul.f32 %v4169_v27, %v8822_v29  ;;  %v4362_v27 = vld [vmem:[#allocation10 + $0x58] sm:$0xff]  ;;  %v4473_v5 = vld [vmem:[%s9328_s10 + $0x50] sm:$0xff] }
0x135c   :  { %v4190_v32 = vmul.f32 %v4164_v48, %v3265_v17  ;;  %5171 = vmatprep.subr.bf16.mxu1 %v5170_v31  ;;  %v4189_v61 = vmul.f32 %v4164_v48, %v10208_v28  ;;  %v4351_v28 = vld [vmem:[#allocation10] sm:$0xff]  ;;  %v5222_v31 = vpack.c.bf16 %v4378_v6, %v4377_v13 }
0x135d   :  { %5173 = vmatpush1.bf16.msra.mxu1 %v5172_v26  ;;  %v4361_v26 = vld [vmem:[#allocation10 + $0x50] sm:$0xff]  ;;  %v4379_v48 = vld [vmem:[#allocation10 + $0xe0] sm:$0xff] }
0x135e   :  { %5175 = vmatprep.subr.bf16.mxu1 %v5174_v8  ;;  %v4179_v20 = vpop.permute.xlu1 %4178  ;;  %v5178_v25 = vpack.c.bf16 %v4192_v10, %v4190_v32  ;;  %v5180_v17 = vpack.c.bf16 %v4191_v23, %v4189_v61  ;;  %v5224_v50 = vpack.c.bf16 %v4362_v27, %v4361_v26  ;;  %v4380_v8 = vld [vmem:[#allocation10 + $0xe8] sm:$0xff]  ;;  %v4363_v32 = vld [vmem:[#allocation10 + $0x60] sm:$0xff]  ;;  %v5230_v23 = vpack.c.bf16 %v4382_v63, %v4381_v11  ;;  %v4366_v61 = vld [vmem:[#allocation10 + $0x78] sm:$0xff] }
0x135f   :  { %v4174_v46 = vpop.permute.xlu0 %4173  ;;  %v4196_v53 = vmul.f32 %v4179_v20, %v2866_v30  ;;  %v4195_v12 = vmul.f32 %v4179_v20, %v9017_v0  ;;  %v4368_v0 = vld [vmem:[#allocation10 + $0x88] sm:$0xff]  ;;  %v5226_v10 = vpack.c.bf16 %v4380_v8, %v4379_v48  ;;  %v5228_v20 = vpack.c.bf16 %v4364_v2, %v4363_v32 }
0x1360   :  { %v4194_v34 = vmul.f32 %v4174_v46, %v2999_v56  ;;  %v4193_v36 = vmul.f32 %v4174_v46, %v8904_v58  ;;  %v4367_v58 = vld [vmem:[#allocation10 + $0x80] sm:$0xff]  ;;  %v4352_v30 = vld [vmem:[#allocation10 + $0x8] sm:$0xff] }
0x1361   :  { %5177 = vmatpush1.bf16.msra.mxu1 %v5176_v33  ;;  %v5202_v56 = vpack.c.bf16 %v4368_v0, %v4367_v58  ;;  %v5204_v49 = vpack.c.bf16 %v4352_v30, %v4351_v28  ;;  %v4365_v33 = vld [vmem:[#allocation10 + $0x70] sm:$0xff]  ;;  %v4470_v58 = vld [vmem:[%s9328_s10 + $0x38] sm:$0xff]  ;;  %v4471_v28 = vld [vmem:[%s9328_s10 + $0x40] sm:$0xff] }
0x1362   :  { %5179 = vmatprep.subr.bf16.mxu1 %v5178_v25  ;;  %v5182_v45 = vpack.c.bf16 %v4196_v53, %v4194_v34  ;;  %v5184_v29 = vpack.c.bf16 %v4195_v12, %v4193_v36  ;;  %v5232_v46 = vpack.c.bf16 %v4366_v61, %v4365_v33  ;;  %v4463_v25 = vld [vmem:[%s9328_s10] sm:$0xff]  ;;  %v4464_v53 = vld [vmem:[%s9328_s10 + $0x8] sm:$0xff]  ;;  %v4465_v34 = vld [vmem:[%s9328_s10 + $0x10] sm:$0xff] }
0x1363   :  { %5203 = vmatprep.subr.bf16.mxu0 %v5202_v56  ;;  %v5235_v39 = vpack.c.bf16 %v4464_v53, %v4463_v25  ;;  %v4467_v36 = vld [vmem:[%s9328_s10 + $0x20] sm:$0xff]  ;;  %v4472_v56 = vld [vmem:[%s9328_s10 + $0x48] sm:$0xff] }
0x1364   :  { %5205 = vmatpush3.bf16.msra.mxu0 %v5204_v49  ;;  %v5247_v30 = vpack.c.bf16 %v4472_v56, %v4471_v28  ;;  %v5250_v49 = vpack.c.bf16 %v4474_v57, %v4473_v5 }
0x1365   :  { %5181 = vmatpush1.bf16.msra.mxu1 %v5180_v17  ;;  %5207 = vmatprep.subr.bf16.mxu0 %v5206_v14  ;;  %v4466_v17 = vld [vmem:[%s9328_s10 + $0x18] sm:$0xff] }
0x1366   :  { %5183 = vmatprep.subr.bf16.mxu1 %v5182_v45  ;;  %v5238_v12 = vpack.c.bf16 %v4466_v17, %v4465_v34  ;;  %v4468_v45 = vld [vmem:[%s9328_s10 + $0x28] sm:$0xff] }
0x1368   :  { %5209 = vmatpush3.bf16.msra.mxu0 %v5208_v35  ;;  %v4476_v35 = vld [vmem:[%s9328_s10 + $0x68] sm:$0xff] }
0x1369   :  { %5185 = vmatpush1.bf16.msra.mxu1 %v5184_v29  ;;  %5211 = vmatprep.subr.bf16.mxu0 %v5210_v40  ;;  %v5241_v29 = vpack.c.bf16 %v4468_v45, %v4467_v36  ;;  %v5253_v40 = vpack.c.bf16 %v4476_v35, %v4475_v22 }
0x136a   :  { %5186 = vmatprep.subr.bf16.mxu1 %v5854_v52 }
0x136c   :  { %4953 = vmatmul.mubr.msk.f32.vlgmr.msra.gmra.mrb[128].mxu1 %vm4197_vm15, %v4140_v4 }
0x136d   :  { %5189 = vmatpush3.bf16.msk.msra.mxu1 %vm5188_vm0, %v5187_v54  ;;  %5100 = vmatprep.mubr.msk.f32.mxu1 %vm5855_vm1, %v5853_v59  ;;  %v4357_v54 = vld [vmem:[#allocation10 + $0x30] sm:$0xff] }
0x136e   :  { %5190 = vmatprep.subr.bf16.mxu1 %v5854_v52 }
0x1371   :  { %5193 = vmatpush3.bf16.msk.msra.mxu1 %vm5192_vm2, %v5191_v44  ;;  %v5212_v44 = vpack.c.bf16 %v4356_v3, %v4355_v42  ;;  %v4477_v42 = vld [vmem:[%s9328_s10 + $0x70] sm:$0xff]  ;;  %v4478_v3 = vld [vmem:[%s9328_s10 + $0x78] sm:$0xff] }
0x1372   :  { %5194 = vmatprep.subr.bf16.mxu1 %v5854_v52  ;;  %v5256_v55 = vpack.c.bf16 %v4478_v3, %v4477_v42 }
0x1373   :  { %5213 = vmatpush3.bf16.msra.mxu0 %v5212_v44  ;;  %v4963_v44 = vld [vmem:[%s9327_s9] ss:$0 sm:$0xff] }
0x1374   :  { %5215 = vmatprep.subr.bf16.mxu0 %v5214_v51 }
0x1375   :  { %5197 = vmatpush3.bf16.msk.msra.mxu1 %vm5196_vm3, %v5195_v47  ;;  %v4376_v47 = vld [vmem:[#allocation10 + $0xc8] sm:$0xff] }
0x1376   :  { %5198 = vmatprep.subr.bf16.mxu1 %v5854_v52 }
0x1379   :  { %5201 = vmatpush3.bf16.msk.msra.mxu1 %vm5200_vm4, %v5199_v16  ;;  %v5216_v16 = vpack.c.bf16 %v4358_v21, %v4357_v54 }
0x137a   :  { %5234 = vmatprep.subr.bf16.mxu1 %v5854_v52 }
0x137b   :  { %5217 = vmatpush3.bf16.msra.mxu0 %v5216_v16  ;;  %v4964_v16 = vld [vmem:[%s9329_s11] ss:$0 sm:$0xff] }
0x137c   :  { %5101 = vmatmul.mubr.msk.f32.vlgmr.msra.gmra.mrb[130].mxu1 %vm4197_vm15, %v4140_v4  ;;  %v4469_v4 = vld [vmem:[%s9328_s10 + $0x30] sm:$0xff] }
0x137d   :  { %5135 = vmatprep.mubr.msk.f32.mxu1 %vm5855_vm1, %v5853_v59  ;;  %v5218_v59 = vpack.c.bf16 %v4376_v47, %v4375_v7  ;;  %5236 = vmatpush3.bf16.msra.mxu1 %v5235_v39  ;;  %v5244_v0 = vpack.c.bf16 %v4470_v58, %v4469_v4 }
0x137e   :  { %5237 = vmatprep.subr.bf16.mxu1 %v5854_v52 }
0x137f   :  { %5219 = vmatprep.subr.bf16.mxu0 %v5218_v59 }
0x1380   :  { %5221 = vmatpush3.bf16.msra.mxu0 %v5220_v1 }
0x1381   :  { %5223 = vmatprep.subr.bf16.mxu0 %v5222_v31  ;;  %5239 = vmatpush3.bf16.msra.mxu1 %v5238_v12 }
0x1382   :  { %5240 = vmatprep.subr.bf16.mxu1 %v5854_v52 }
0x1384   :  { %5225 = vmatpush3.bf16.msra.mxu0 %v5224_v50 }
0x1385   :  { %5227 = vmatprep.subr.bf16.mxu0 %v5226_v10  ;;  %5242 = vmatpush3.bf16.msra.mxu1 %v5241_v29 }
0x1386   :  { %5243 = vmatprep.subr.bf16.mxu1 %v5854_v52 }
0x1388   :  { %5229 = vmatpush3.bf16.msra.mxu0 %v5228_v20 }
0x1389   :  { %5231 = vmatprep.subr.bf16.mxu0 %v5230_v23  ;;  %5245 = vmatpush3.bf16.msra.mxu1 %v5244_v0 }
0x138a   :  { %5246 = vmatprep.subr.bf16.mxu1 %v5854_v52 }
0x138c   :  { %5233 = vmatpush3.bf16.msra.mxu0 %v5232_v46 }
0x138d   :  { %5248 = vmatpush3.bf16.msra.mxu1 %v5247_v30 }
0x138e   :  { %5249 = vmatprep.subr.bf16.mxu1 %v5854_v52 }
0x1391   :  { %5251 = vmatpush3.bf16.msra.mxu1 %v5250_v49 }
0x1392   :  { %5252 = vmatprep.subr.bf16.mxu1 %v5854_v52 }
0x1395   :  { %5254 = vmatpush3.bf16.msra.mxu1 %v5253_v40 }
0x1396   :  { %5255 = vmatprep.subr.bf16.mxu1 %v5854_v52 }
0x1399   :  { %5257 = vmatpush3.bf16.msra.mxu1 %v5256_v55 }
0x143f   :  { %v9248_v60 = vpop.f32.mrb[128].mxu1 }
0x1440   :  { %v9250_v19 = vpop.f32.mrb[129].mxu1 }
0x144f   :  { %v4338_v37 = vpop.f32.mrb[130].mxu1 }
0x1450   :  { %v4342_v43 = vmax.f32 %v4338_v37, 1e-30  ;;  %v5102_v38 = vpop.f32.mrb[131].mxu1 }
0x1452   :  { %4345 = vperm.xlu0 %5571, %v4342_v43  }
0x14d1   :  { %v4346_v14 = vpop.permute.xlu0 %4345 }
0x14d2   :  { %5717 = vrcp.f32 %v4346_v14 }
0x14dc   :  { %v5718_v24 = vpop.eup %5717 }
0x14dd   :  { %v4349_v41 = vmul.f32 %v5718_v24, %v9248_v60  ;;  %v4350_v62 = vmul.f32 %v5718_v24, %v9250_v19 }
0x14df   :  { %4454 = vmatprep.mubr.f32.mxu0 %v4350_v62 }
0x14e0   :  { %4455 = vmatmul.mubr.f32.vlgmr.msra.gmra.mrb[144].mxu0 %v4349_v41 }
0x15b3   :  { %v5064_v15 = vpop.f32.mrb[144].mxu0 }
0x15b4   :  { %v5065_v51 = vpop.f32.mrb[145].mxu0 }
0x15b5   :  { %v5066_v54 = vadd.f32 %v5065_v51, %v5064_v15 }
0x15b7   :  { %v4457_v21 = vadd.f32 %v5066_v54, %v4963_v44 }
0x15b9   :  { %v4461_v7 = vmul.f32 0.01, %v4457_v21  ;;  %vm4460_vm5 = vcmp.ge.f32.partialorder %v4457_v21, 0.0 }
0x15bb   :  { %v4462_v47 = vsel %vm4460_vm5, %v4457_v21, %v4461_v7 }
0x15bc   :  { %5136 = vmatmul.mubr.f32.vlgmr.msra.gmra.mrb[132].mxu1 %v4462_v47 }
0x168f   :  { %v4552_v59 = vpop.f32.mrb[132].mxu1 }
0x1690   :  { %v4553_v52 = vadd.f32 %v4964_v16, %v4552_v59  ;;  %v5137_v9 = vpop.f32.mrb[133].mxu1 }
0x1692   :  { %4557 = vst.msk [vmem:[%s9330_s12] sm:$0xff] %vm4556_vm6, %v4553_v52 }
0x1693   :  { %4562 = vsyncpa [#allocation9], 1 }
0x1694   :  { %4563 = vsyncpa [#allocation11], 1 }
0x1695   :  { %4564 = vsyncmov [#allocation7] }
0x1698   :  { %s4565_s9 = vpop.sfrf %4564 }
0x1699   :  { %p4965_p2 = scmp.ne.s32.totalorder %s4565_s9, 0 }
0x169b   :  { %4569 = shalt.err (%p4965_p2)  }
0x169c   :  { %4571 = vsyncmov [#allocation7 + $0x1] }
0x169f   :  { %s4572_s15 = vpop.sfrf %4571 }
0x16a0   :  { %p4966_p3 = scmp.ne.s32.totalorder %s4572_s15, 0 }
0x16a2   :  { %4576 = shalt.err (%p4966_p3)  }

</bundles_post_ra>
